<compile_context>
chip_gen: v6e
topology: v6e:2x2x1
jax: 0.10.0
libtpu: 0.0.40
codegen_flags: <defaults>
</compile_context>

<pallas_src>
import functools

import jax
import jax.numpy as jnp
from jax.experimental import pallas as pl
from jax.experimental.pallas import tpu as pltpu


# ----------------------------------------------------------------------------
# helpers
# ----------------------------------------------------------------------------
_INV_SQRT2 = 0.7071067811865476


def _gelu(x):
    # exact (erf) GELU, matching torch.nn.GELU() default
    return 0.5 * x * (1.0 + jax.lax.erf(x * _INV_SQRT2))


def _round_up(n, m):
    return ((n + m - 1) // m) * m


def _pick_row_tile(n, row_bytes, cap=1024, budget=8 << 20):
    """Largest row tile (multiple of 8, <= cap) whose double-buffered
    footprint stays under `budget` bytes (safe on v5e/v6e 128 MiB and
    v7x 64 MiB VMEM with the default scoped limit)."""
    t = min(cap, _round_up(max(n, 8), 8))
    while t > 8 and 2 * t * row_bytes > budget:
        t -= 8
    return max(t, 8)


def _pad_rows(arrs, n, n_padded):
    if n_padded == n:
        return arrs
    return [jnp.pad(a, ((0, n_padded - n), (0, 0))) for a in arrs]


# ----------------------------------------------------------------------------
# Pallas kernels
# ----------------------------------------------------------------------------
def _linear_kernel(x_ref, w_ref, b_ref, o_ref, *, act):
    # o = act(x @ w + b)
    y = jnp.dot(x_ref[...], w_ref[...], preferred_element_type=jnp.float32)
    y = y + b_ref[...]
    if act:
        y = _gelu(y)
    o_ref[...] = y.astype(o_ref.dtype)


def linear_pallas(x, w, b, act=False):
    """x: (N, Cin), w: (Cin, Cout), b: (1, Cout) -> (N, Cout)."""
    N, Cin = x.shape
    Cout = w.shape[1]
    row_bytes = 4 * (Cin + Cout)
    tn = _pick_row_tile(N, row_bytes)
    Np = _round_up(N, tn)
    (xp,) = _pad_rows([x], N, Np)
    out = pl.pallas_call(
        functools.partial(_linear_kernel, act=act),
        out_shape=jax.ShapeDtypeStruct((Np, Cout), jnp.float32),
        grid=(Np // tn,),
        in_specs=[
            pl.BlockSpec((tn, Cin), lambda i: (i, 0)),
            pl.BlockSpec((Cin, Cout), lambda i: (0, 0)),
            pl.BlockSpec((1, Cout), lambda i: (0, 0)),
        ],
        out_specs=pl.BlockSpec((tn, Cout), lambda i: (i, 0)),
        compiler_params=pltpu.CompilerParams(dimension_semantics=("parallel",)),
    )(xp, w, b)
    return out[:N] if Np != N else out


def _fourier_combine_kernel(x_ref, x1_ref, w_ref, b_ref, o_ref, *, act):
    # o = act(x1 + (x @ w + b))   (x1 = spectral-conv branch, w/b = 1x1 conv)
    y = jnp.dot(x_ref[...], w_ref[...], preferred_element_type=jnp.float32)
    y = y + b_ref[...] + x1_ref[...]
    if act:
        y = _gelu(y)
    o_ref[...] = y.astype(o_ref.dtype)


def fourier_combine_pallas(x, x1, w, b, act):
    """x, x1: (N, C), w: (C, C), b: (1, C) -> (N, C)."""
    N, C = x.shape
    row_bytes = 4 * 3 * C
    tn = _pick_row_tile(N, row_bytes)
    Np = _round_up(N, tn)
    xp, x1p = _pad_rows([x, x1], N, Np)
    out = pl.pallas_call(
        functools.partial(_fourier_combine_kernel, act=act),
        out_shape=jax.ShapeDtypeStruct((Np, C), jnp.float32),
        grid=(Np // tn,),
        in_specs=[
            pl.BlockSpec((tn, C), lambda i: (i, 0)),
            pl.BlockSpec((tn, C), lambda i: (i, 0)),
            pl.BlockSpec((C, C), lambda i: (0, 0)),
            pl.BlockSpec((1, C), lambda i: (0, 0)),
        ],
        out_specs=pl.BlockSpec((tn, C), lambda i: (i, 0)),
        compiler_params=pltpu.CompilerParams(dimension_semantics=("parallel",)),
    )(xp, x1p, w, b)
    return out[:N] if Np != N else out


def _head_kernel(x_ref, w1_ref, b1_ref, w2_ref, b2_ref, o_ref):
    # fused projection head: o = (gelu(x @ w1 + b1)) @ w2 + b2
    h = jnp.dot(x_ref[...], w1_ref[...], preferred_element_type=jnp.float32)
    h = _gelu(h + b1_ref[...])
    y = jnp.dot(h, w2_ref[...], preferred_element_type=jnp.float32) + b2_ref[...]
    o_ref[...] = y.astype(o_ref.dtype)


def head_pallas(x, w1, b1, w2, b2):
    """x: (N, Cin) -> (N, Cout); the (N, hidden) activation never hits HBM."""
    N, Cin = x.shape
    hidden = w1.shape[1]
    Cout = w2.shape[1]
    row_bytes = 4 * (Cin + hidden + Cout)
    tn = _pick_row_tile(N, row_bytes)
    Np = _round_up(N, tn)
    (xp,) = _pad_rows([x], N, Np)
    out = pl.pallas_call(
        _head_kernel,
        out_shape=jax.ShapeDtypeStruct((Np, Cout), jnp.float32),
        grid=(Np // tn,),
        in_specs=[
            pl.BlockSpec((tn, Cin), lambda i: (i, 0)),
            pl.BlockSpec((Cin, hidden), lambda i: (0, 0)),
            pl.BlockSpec((1, hidden), lambda i: (0, 0)),
            pl.BlockSpec((hidden, Cout), lambda i: (0, 0)),
            pl.BlockSpec((1, Cout), lambda i: (0, 0)),
        ],
        out_specs=pl.BlockSpec((tn, Cout), lambda i: (i, 0)),
        compiler_params=pltpu.CompilerParams(dimension_semantics=("parallel",)),
    )(xp, w1, b1, w2, b2)
    return out[:N] if Np != N else out


def _spectral_block_kernel(x_ref, w_ref, o_ref):
    # x: (Kb, B, 2*Cin), w: (Kb, 2*Cin, 2*Cout) -> o: (Kb, B, 2*Cout)
    # Packed-complex real batched matmul over a block of retained modes.
    o_ref[...] = jnp.einsum(
        "kbi,kio->kbo", x_ref[...], w_ref[...],
        preferred_element_type=jnp.float32,
    ).astype(o_ref.dtype)


def _pick_mode_block(K, per_mode_bytes, budget=4 << 20):
    """Largest divisor of K whose double-buffered block fits the budget."""
    kb = K
    while kb > 1 and 2 * kb * per_mode_bytes > budget:
        kb -= 1
        while kb > 1 and K % kb != 0:
            kb -= 1
    return kb


def spectral_mul_pallas(xp, wp):
    """xp: (K, B, 2*Cin) packed [real|imag]; wp: (K, 2*Cin, 2*Cout) packed
    [[wr, wi], [-wi, wr]] -> (K, B, 2*Cout) packed [real|imag]."""
    K, B, C2i = xp.shape
    C2o = wp.shape[-1]
    per_mode = 4 * (C2i * C2o + B * (C2i + C2o))
    kb = _pick_mode_block(K, per_mode)
    return pl.pallas_call(
        _spectral_block_kernel,
        out_shape=jax.ShapeDtypeStruct((K, B, C2o), jnp.float32),
        grid=(K // kb,),
        in_specs=[
            pl.BlockSpec((kb, B, C2i), lambda k: (k, 0, 0)),
            pl.BlockSpec((kb, C2i, C2o), lambda k: (k, 0, 0)),
        ],
        out_specs=pl.BlockSpec((kb, B, C2o), lambda k: (k, 0, 0)),
        compiler_params=pltpu.CompilerParams(dimension_semantics=("parallel",)),
    )(xp, wp)


# ----------------------------------------------------------------------------
# SpectralConv2d (FFT in XLA, packed-complex mode mixing in Pallas)
# ----------------------------------------------------------------------------
def spectral_conv2d(h, wp, m1, m2):
    """h: (B, H, W, Cin) real; wp: (2*m1*m2, 2*Cin, 2*Cout) packed real."""
    B, H, W, Cin = h.shape
    Cout = wp.shape[-1] // 2
    Wf = W // 2 + 1
    K = 2 * m1 * m2

    x_ft = jnp.fft.rfft2(h, axes=(1, 2))                       # (B, H, Wf, Cin) c64
    # retained modes: low positive then low negative H-frequencies
    x_sl = jnp.concatenate(
        [x_ft[:, :m1, :m2, :], x_ft[:, H - m1:, :m2, :]], axis=1
    ).reshape(B, K, Cin)                                        # (B, K, Cin)
    xp = jnp.concatenate(
        [jnp.real(x_sl), jnp.imag(x_sl)], axis=-1
    ).astype(jnp.float32)                                       # (B, K, 2Cin)
    xp = jnp.transpose(xp, (1, 0, 2))                           # (K, B, 2Cin)

    op = spectral_mul_pallas(xp, wp)                            # (K, B, 2Cout)
    op = jnp.transpose(op, (1, 0, 2))                           # (B, K, 2Cout)
    out = jax.lax.complex(op[..., :Cout], op[..., Cout:])       # (B, K, Cout)
    out = out.reshape(B, 2 * m1, m2, Cout)

    # assemble the truncated spectrum with one concat + one pad (no DUS)
    mid = jnp.zeros((B, H - 2 * m1, m2, Cout), out.dtype)
    out_ft = jnp.concatenate([out[:, :m1], mid, out[:, m1:]], axis=1)  # (B,H,m2,C)
    out_ft = jnp.pad(out_ft, ((0, 0), (0, 0), (0, Wf - m2), (0, 0)))   # (B,H,Wf,C)
    return jnp.fft.irfft2(out_ft, s=(H, W), axes=(1, 2))        # (B, H, W, Cout)


# ----------------------------------------------------------------------------
# FNO2d forward
# ----------------------------------------------------------------------------
def fno2d_forward(x, params, modes1, modes2, padding=2):
    """x: (B, S, S, in_channels) -> (B, S, S, out_channels)."""
    B, H0, W0, Cin = x.shape
    Cin_pad, width = params["fc0_w"].shape

    # fc0 : lift to `width` channels (input channels zero-padded to 8)
    if Cin_pad != Cin:
        x = jnp.pad(x, ((0, 0), (0, 0), (0, 0), (0, Cin_pad - Cin)))
    h = linear_pallas(x.reshape(-1, Cin_pad), params["fc0_w"], params["fc0_b"],
                      act=False)
    h = h.reshape(B, H0, W0, width)

    # F.pad(x, [0, p, 0, p]) on NCHW == pad H and W on the right (NHWC here)
    h = jnp.pad(h, ((0, 0), (0, padding), (0, padding), (0, 0)))
    Hp, Wp = H0 + padding, W0 + padding

    # 4 Fourier layers:  x = act(conv_l(x) + w_l(x))   (no act on the last one)
    for l in range(4):
        x1 = spectral_conv2d(h, params[f"conv{l}_wp"], modes1, modes2)
        hf = fourier_combine_pallas(h.reshape(-1, width), x1.reshape(-1, width),
                                    params[f"w{l}_w"], params[f"w{l}_b"],
                                    act=(l < 3))
        h = hf.reshape(B, Hp, Wp, width)

    # crop padding, fused projection head (fc1 + gelu + fc2)
    h = h[:, :H0, :W0, :]
    out = head_pallas(h.reshape(-1, width), params["fc1_w"], params["fc1_b"],
                      params["fc2_w"], params["fc2_b"])
    return out.reshape(B, H0, W0, -1)


# ----------------------------------------------------------------------------
# deterministic parameter init (synthetic; torch-layout weights pre-packed /
# pre-transposed ONCE here, outside the jitted forward)
# ----------------------------------------------------------------------------
def init_params(key, in_ch, out_ch, width, m1, m2, hidden=128):
    keys = jax.random.split(key, 24)
    p = {}
    ki = 0

    def nrm(k, shape, scale):
        return (scale * jax.random.normal(k, shape, jnp.float32)).astype(jnp.float32)

    # fc0: torch Linear weight (out, in) -> transposed + channel-padded to 8
    in_ch_pad = _round_up(in_ch, 8)
    fc0_w = nrm(keys[ki], (width, in_ch), 1.0 / jnp.sqrt(in_ch)); ki += 1
    p["fc0_w"] = jnp.pad(fc0_w.T, ((0, in_ch_pad - in_ch), (0, 0)))
    p["fc0_b"] = nrm(keys[ki], (width,), 0.1)[None, :]; ki += 1

    K = 2 * m1 * m2
    sc = 1.0 / (width * width)
    for l in range(4):
        # SpectralConv2d weights (complex) stored mode-major (K, Cin, Cout),
        # mode order = [positive modes, negative modes] flattened row-major
        # (must match spectral_conv2d's slicing order when loading real
        # PyTorch weights).  Packed once into the real block
        # [[wr, wi], [-wi, wr]] of shape (K, 2Cin, 2Cout).
        wr = sc * jax.random.uniform(keys[ki], (K, width, width), jnp.float32); ki += 1
        wi = sc * jax.random.uniform(keys[ki], (K, width, width), jnp.float32); ki += 1
        top = jnp.concatenate([wr, wi], axis=-1)
        bot = jnp.concatenate([-wi, wr], axis=-1)
        p[f"conv{l}_wp"] = jnp.concatenate([top, bot], axis=-2)

        # nn.Conv2d(width, width, 1) weight (Cout, Cin, 1, 1) -> (Cin, Cout)
        wl = nrm(keys[ki], (width, width), 1.0 / jnp.sqrt(width)); ki += 1
        p[f"w{l}_w"] = wl.T
        p[f"w{l}_b"] = nrm(keys[ki], (width,), 0.1)[None, :]; ki += 1

    fc1_w = nrm(keys[ki], (hidden, width), 1.0 / jnp.sqrt(width)); ki += 1
    p["fc1_w"] = fc1_w.T
    p["fc1_b"] = nrm(keys[ki], (hidden,), 0.1)[None, :]; ki += 1
    fc2_w = nrm(keys[ki], (out_ch, hidden), 1.0 / jnp.sqrt(hidden)); ki += 1
    p["fc2_w"] = fc2_w.T
    p["fc2_b"] = nrm(keys[ki], (out_ch,), 0.1)[None, :]; ki += 1
    return p


# ----------------------------------------------------------------------------
# main
# ----------------------------------------------------------------------------
if __name__ == "__main__":
    B, S = 2, 16
    in_channels, out_channels, width = 3, 1, 32
    modes1 = modes2 = 4

    key = jax.random.PRNGKey(0)
    kp, kx = jax.random.split(key)
    params = init_params(kp, in_channels, out_channels, width, modes1, modes2)
    x = jax.random.normal(kx, (B, S, S, in_channels), jnp.float32)

    fwd = jax.jit(functools.partial(fno2d_forward, modes1=modes1, modes2=modes2))
    y = fwd(x, params)
    jax.block_until_ready(y)

    assert y.shape == (B, S, S, out_channels), y.shape
    assert y.dtype == jnp.float32
    assert bool(jnp.all(jnp.isfinite(y)))
    print("KERNEL_OK")
</pallas_src>

<mosaic_0001>
module attributes {stable_mosaic.version = 11 : i64} {
  func.func @_linear_kernel(%arg0: i32, %arg1: memref<512x8xf32, #tpu.memory_space<vmem>>, %arg2: memref<8x32xf32, #tpu.memory_space<vmem>>, %arg3: memref<1x32xf32, #tpu.memory_space<vmem>>, %arg4: memref<512x32xf32, #tpu.memory_space<vmem>>) attributes {dimension_semantics = [#tpu.dimension_semantics<parallel>], iteration_bounds = array<i64: 1>, scalar_prefetch = 0 : i64, scratch_operands = 0 : i64, tpu.core_type = #tpu.core_type<tc>, window_params = [{transform_indices = @transform_0, window_bounds = array<i64: 512, 8>}, {pipeline_mode = #tpu.pipeline_mode<synchronous>, transform_indices = @transform_1, window_bounds = array<i64: 8, 32>}, {pipeline_mode = #tpu.pipeline_mode<synchronous>, transform_indices = @transform_2, window_bounds = array<i64: 1, 32>}, {transform_indices = @transform_3, window_bounds = array<i64: 512, 32>}]} {
    %c0 = arith.constant 0 : index
    %c0_0 = arith.constant 0 : index
    %0 = vector.load %arg1[%c0, %c0_0] : memref<512x8xf32, #tpu.memory_space<vmem>>, vector<512x8xf32>
    %c0_1 = arith.constant 0 : index
    %c0_2 = arith.constant 0 : index
    %1 = vector.load %arg2[%c0_1, %c0_2] : memref<8x32xf32, #tpu.memory_space<vmem>>, vector<8x32xf32>
    %cst = arith.constant dense<0.000000e+00> : vector<512x32xf32>
    %2 = tpu.matmul %0, %1, %cst {dimension_numbers = #tpu.dot_dimension_numbers<[1], [0], [0], [1], [0, 0, 1, 1], [], []>} : vector<512x8xf32>, vector<8x32xf32>, vector<512x32xf32> -> vector<512x32xf32>
    %c0_3 = arith.constant 0 : index
    %c0_4 = arith.constant 0 : index
    %3 = vector.load %arg3[%c0_3, %c0_4] : memref<1x32xf32, #tpu.memory_space<vmem>>, vector<1x32xf32>
    %4 = vector.broadcast %3 : vector<1x32xf32> to vector<512x32xf32>
    %5 = arith.addf %2, %4 : vector<512x32xf32>
    %c0_5 = arith.constant 0 : index
    %c0_6 = arith.constant 0 : index
    %6 = vector.load %arg4[%c0_5, %c0_6] : memref<512x32xf32, #tpu.memory_space<vmem>>, vector<512x32xf32>
    tpu.vector_store %arg4[%c0_5, %c0_6], %5 {strides = array<i32>} : memref<512x32xf32, #tpu.memory_space<vmem>>, vector<512x32xf32>,
    return
  }
  func.func @transform_0(%arg0: i32) -> (i32, i32) {
    %c0_i32 = arith.constant 0 : i32
    %c0_i32_0 = arith.constant 0 : i32
    return %arg0, %c0_i32 : i32, i32
  }
  func.func @transform_1(%arg0: i32) -> (i32, i32) {
    %c0_i32 = arith.constant 0 : i32
    %c0_i32_0 = arith.constant 0 : i32
    %c0_i32_1 = arith.constant 0 : i32
    return %c0_i32, %c0_i32_0 : i32, i32
  }
  func.func @transform_2(%arg0: i32) -> (i32, i32) {
    %c0_i32 = arith.constant 0 : i32
    %c0_i32_0 = arith.constant 0 : i32
    %c0_i32_1 = arith.constant 0 : i32
    return %c0_i32, %c0_i32_0 : i32, i32
  }
  func.func @transform_3(%arg0: i32) -> (i32, i32) {
    %c0_i32 = arith.constant 0 : i32
    %c0_i32_0 = arith.constant 0 : i32
    return %arg0, %c0_i32 : i32, i32
  }
}

module attributes {stable_mosaic.version = 11 : i64} {
  func.func @_spectral_block_kernel(%arg0: i32, %arg1: memref<32x2x64xf32, #tpu.memory_space<vmem>>, %arg2: memref<32x64x64xf32, #tpu.memory_space<vmem>>, %arg3: memref<32x2x64xf32, #tpu.memory_space<vmem>>) attributes {dimension_semantics = [#tpu.dimension_semantics<parallel>], iteration_bounds = array<i64: 1>, scalar_prefetch = 0 : i64, scratch_operands = 0 : i64, tpu.core_type = #tpu.core_type<tc>, window_params = [{transform_indices = @transform_0, window_bounds = array<i64: 32, 2, 64>}, {transform_indices = @transform_1, window_bounds = array<i64: 32, 64, 64>}, {transform_indices = @transform_2, window_bounds = array<i64: 32, 2, 64>}]} {
    %c0 = arith.constant 0 : index
    %c0_0 = arith.constant 0 : index
    %c0_1 = arith.constant 0 : index
    %0 = vector.load %arg1[%c0, %c0_0, %c0_1] : memref<32x2x64xf32, #tpu.memory_space<vmem>>, vector<32x2x64xf32>
    %c0_2 = arith.constant 0 : index
    %c0_3 = arith.constant 0 : index
    %c0_4 = arith.constant 0 : index
    %1 = vector.load %arg2[%c0_2, %c0_3, %c0_4] : memref<32x64x64xf32, #tpu.memory_space<vmem>>, vector<32x64x64xf32>
    "tpu.trace_start"() <{level = 10 : i32, message = "kbi,kio->kbo"}> : () -> ()
    %cst = arith.constant dense<0.000000e+00> : vector<32x2x64xf32>
    %2 = tpu.matmul %0, %1, %cst {dimension_numbers = #tpu.dot_dimension_numbers<[2], [1], [1], [2], [0, 0, 0, 1, 1, 2], [0], [0]>} : vector<32x2x64xf32>, vector<32x64x64xf32>, vector<32x2x64xf32> -> vector<32x2x64xf32>
    "tpu.trace_stop"() : () -> ()
    %c0_5 = arith.constant 0 : index
    %c0_6 = arith.constant 0 : index
    %c0_7 = arith.constant 0 : index
    %3 = vector.load %arg3[%c0_5, %c0_6, %c0_7] : memref<32x2x64xf32, #tpu.memory_space<vmem>>, vector<32x2x64xf32>
    tpu.vector_store %arg3[%c0_5, %c0_6, %c0_7], %2 {strides = array<i32>} : memref<32x2x64xf32, #tpu.memory_space<vmem>>, vector<32x2x64xf32>,
    return
  }
  func.func @transform_0(%arg0: i32) -> (i32, i32, i32) {
    %c0_i32 = arith.constant 0 : i32
    %c0_i32_0 = arith.constant 0 : i32
    %c0_i32_1 = arith.constant 0 : i32
    return %arg0, %c0_i32, %c0_i32_0 : i32, i32, i32
  }
  func.func @transform_1(%arg0: i32) -> (i32, i32, i32) {
    %c0_i32 = arith.constant 0 : i32
    %c0_i32_0 = arith.constant 0 : i32
    %c0_i32_1 = arith.constant 0 : i32
    return %arg0, %c0_i32, %c0_i32_0 : i32, i32, i32
  }
  func.func @transform_2(%arg0: i32) -> (i32, i32, i32) {
    %c0_i32 = arith.constant 0 : i32
    %c0_i32_0 = arith.constant 0 : i32
    %c0_i32_1 = arith.constant 0 : i32
    return %arg0, %c0_i32, %c0_i32_0 : i32, i32, i32
  }
}

module attributes {stable_mosaic.version = 11 : i64} {
  func.func @_fourier_combine_kernel(%arg0: i32, %arg1: memref<648x32xf32, #tpu.memory_space<vmem>>, %arg2: memref<648x32xf32, #tpu.memory_space<vmem>>, %arg3: memref<32x32xf32, #tpu.memory_space<vmem>>, %arg4: memref<1x32xf32, #tpu.memory_space<vmem>>, %arg5: memref<648x32xf32, #tpu.memory_space<vmem>>) attributes {dimension_semantics = [#tpu.dimension_semantics<parallel>], iteration_bounds = array<i64: 1>, scalar_prefetch = 0 : i64, scratch_operands = 0 : i64, tpu.core_type = #tpu.core_type<tc>, window_params = [{transform_indices = @transform_0, window_bounds = array<i64: 648, 32>}, {transform_indices = @transform_1, window_bounds = array<i64: 648, 32>}, {pipeline_mode = #tpu.pipeline_mode<synchronous>, transform_indices = @transform_2, window_bounds = array<i64: 32, 32>}, {pipeline_mode = #tpu.pipeline_mode<synchronous>, transform_indices = @transform_3, window_bounds = array<i64: 1, 32>}, {transform_indices = @transform_4, window_bounds = array<i64: 648, 32>}]} {
    %c0 = arith.constant 0 : index
    %c0_0 = arith.constant 0 : index
    %0 = vector.load %arg1[%c0, %c0_0] : memref<648x32xf32, #tpu.memory_space<vmem>>, vector<648x32xf32>
    %c0_1 = arith.constant 0 : index
    %c0_2 = arith.constant 0 : index
    %1 = vector.load %arg3[%c0_1, %c0_2] : memref<32x32xf32, #tpu.memory_space<vmem>>, vector<32x32xf32>
    %cst = arith.constant dense<0.000000e+00> : vector<648x32xf32>
    %2 = tpu.matmul %0, %1, %cst {dimension_numbers = #tpu.dot_dimension_numbers<[1], [0], [0], [1], [0, 0, 1, 1], [], []>} : vector<648x32xf32>, vector<32x32xf32>, vector<648x32xf32> -> vector<648x32xf32>
    %c0_3 = arith.constant 0 : index
    %c0_4 = arith.constant 0 : index
    %3 = vector.load %arg4[%c0_3, %c0_4] : memref<1x32xf32, #tpu.memory_space<vmem>>, vector<1x32xf32>
    %4 = vector.broadcast %3 : vector<1x32xf32> to vector<648x32xf32>
    %5 = arith.addf %2, %4 : vector<648x32xf32>
    %c0_5 = arith.constant 0 : index
    %c0_6 = arith.constant 0 : index
    %6 = vector.load %arg2[%c0_5, %c0_6] : memref<648x32xf32, #tpu.memory_space<vmem>>, vector<648x32xf32>
    %7 = arith.addf %5, %6 : vector<648x32xf32>
    %cst_7 = arith.constant 5.000000e-01 : f32
    %8 = vector.broadcast %cst_7 : f32 to vector<648x32xf32>
    %9 = arith.mulf %8, %7 : vector<648x32xf32>
    %cst_8 = arith.constant 0.707106769 : f32
    %10 = vector.broadcast %cst_8 : f32 to vector<648x32xf32>
    %11 = arith.mulf %7, %10 : vector<648x32xf32>
    %12 = math.erf %11 : vector<648x32xf32>
    %cst_9 = arith.constant 1.000000e+00 : f32
    %13 = vector.broadcast %cst_9 : f32 to vector<648x32xf32>
    %14 = arith.addf %13, %12 : vector<648x32xf32>
    %15 = arith.mulf %9, %14 : vector<648x32xf32>
    %c0_10 = arith.constant 0 : index
    %c0_11 = arith.constant 0 : index
    %16 = vector.load %arg5[%c0_10, %c0_11] : memref<648x32xf32, #tpu.memory_space<vmem>>, vector<648x32xf32>
    tpu.vector_store %arg5[%c0_10, %c0_11], %15 {strides = array<i32>} : memref<648x32xf32, #tpu.memory_space<vmem>>, vector<648x32xf32>,
    return
  }
  func.func @transform_0(%arg0: i32) -> (i32, i32) {
    %c0_i32 = arith.constant 0 : i32
    %c0_i32_0 = arith.constant 0 : i32
    return %arg0, %c0_i32 : i32, i32
  }
  func.func @transform_1(%arg0: i32) -> (i32, i32) {
    %c0_i32 = arith.constant 0 : i32
    %c0_i32_0 = arith.constant 0 : i32
    return %arg0, %c0_i32 : i32, i32
  }
  func.func @transform_2(%arg0: i32) -> (i32, i32) {
    %c0_i32 = arith.constant 0 : i32
    %c0_i32_0 = arith.constant 0 : i32
    %c0_i32_1 = arith.constant 0 : i32
    return %c0_i32, %c0_i32_0 : i32, i32
  }
  func.func @transform_3(%arg0: i32) -> (i32, i32) {
    %c0_i32 = arith.constant 0 : i32
    %c0_i32_0 = arith.constant 0 : i32
    %c0_i32_1 = arith.constant 0 : i32
    return %c0_i32, %c0_i32_0 : i32, i32
  }
  func.func @transform_4(%arg0: i32) -> (i32, i32) {
    %c0_i32 = arith.constant 0 : i32
    %c0_i32_0 = arith.constant 0 : i32
    return %arg0, %c0_i32 : i32, i32
  }
}

module attributes {stable_mosaic.version = 11 : i64} {
  func.func @_fourier_combine_kernel(%arg0: i32, %arg1: memref<648x32xf32, #tpu.memory_space<vmem>>, %arg2: memref<648x32xf32, #tpu.memory_space<vmem>>, %arg3: memref<32x32xf32, #tpu.memory_space<vmem>>, %arg4: memref<1x32xf32, #tpu.memory_space<vmem>>, %arg5: memref<648x32xf32, #tpu.memory_space<vmem>>) attributes {dimension_semantics = [#tpu.dimension_semantics<parallel>], iteration_bounds = array<i64: 1>, scalar_prefetch = 0 : i64, scratch_operands = 0 : i64, tpu.core_type = #tpu.core_type<tc>, window_params = [{transform_indices = @transform_0, window_bounds = array<i64: 648, 32>}, {transform_indices = @transform_1, window_bounds = array<i64: 648, 32>}, {pipeline_mode = #tpu.pipeline_mode<synchronous>, transform_indices = @transform_2, window_bounds = array<i64: 32, 32>}, {pipeline_mode = #tpu.pipeline_mode<synchronous>, transform_indices = @transform_3, window_bounds = array<i64: 1, 32>}, {transform_indices = @transform_4, window_bounds = array<i64: 648, 32>}]} {
    %c0 = arith.constant 0 : index
    %c0_0 = arith.constant 0 : index
    %0 = vector.load %arg1[%c0, %c0_0] : memref<648x32xf32, #tpu.memory_space<vmem>>, vector<648x32xf32>
    %c0_1 = arith.constant 0 : index
    %c0_2 = arith.constant 0 : index
    %1 = vector.load %arg3[%c0_1, %c0_2] : memref<32x32xf32, #tpu.memory_space<vmem>>, vector<32x32xf32>
    %cst = arith.constant dense<0.000000e+00> : vector<648x32xf32>
    %2 = tpu.matmul %0, %1, %cst {dimension_numbers = #tpu.dot_dimension_numbers<[1], [0], [0], [1], [0, 0, 1, 1], [], []>} : vector<648x32xf32>, vector<32x32xf32>, vector<648x32xf32> -> vector<648x32xf32>
    %c0_3 = arith.constant 0 : index
    %c0_4 = arith.constant 0 : index
    %3 = vector.load %arg4[%c0_3, %c0_4] : memref<1x32xf32, #tpu.memory_space<vmem>>, vector<1x32xf32>
    %4 = vector.broadcast %3 : vector<1x32xf32> to vector<648x32xf32>
    %5 = arith.addf %2, %4 : vector<648x32xf32>
    %c0_5 = arith.constant 0 : index
    %c0_6 = arith.constant 0 : index
    %6 = vector.load %arg2[%c0_5, %c0_6] : memref<648x32xf32, #tpu.memory_space<vmem>>, vector<648x32xf32>
    %7 = arith.addf %5, %6 : vector<648x32xf32>
    %c0_7 = arith.constant 0 : index
    %c0_8 = arith.constant 0 : index
    %8 = vector.load %arg5[%c0_7, %c0_8] : memref<648x32xf32, #tpu.memory_space<vmem>>, vector<648x32xf32>
    tpu.vector_store %arg5[%c0_7, %c0_8], %7 {strides = array<i32>} : memref<648x32xf32, #tpu.memory_space<vmem>>, vector<648x32xf32>,
    return
  }
  func.func @transform_0(%arg0: i32) -> (i32, i32) {
    %c0_i32 = arith.constant 0 : i32
    %c0_i32_0 = arith.constant 0 : i32
    return %arg0, %c0_i32 : i32, i32
  }
  func.func @transform_1(%arg0: i32) -> (i32, i32) {
    %c0_i32 = arith.constant 0 : i32
    %c0_i32_0 = arith.constant 0 : i32
    return %arg0, %c0_i32 : i32, i32
  }
  func.func @transform_2(%arg0: i32) -> (i32, i32) {
    %c0_i32 = arith.constant 0 : i32
    %c0_i32_0 = arith.constant 0 : i32
    %c0_i32_1 = arith.constant 0 : i32
    return %c0_i32, %c0_i32_0 : i32, i32
  }
  func.func @transform_3(%arg0: i32) -> (i32, i32) {
    %c0_i32 = arith.constant 0 : i32
    %c0_i32_0 = arith.constant 0 : i32
    %c0_i32_1 = arith.constant 0 : i32
    return %c0_i32, %c0_i32_0 : i32, i32
  }
  func.func @transform_4(%arg0: i32) -> (i32, i32) {
    %c0_i32 = arith.constant 0 : i32
    %c0_i32_0 = arith.constant 0 : i32
    return %arg0, %c0_i32 : i32, i32
  }
}

module attributes {stable_mosaic.version = 11 : i64} {
  func.func @_head_kernel(%arg0: i32, %arg1: memref<512x32xf32, #tpu.memory_space<vmem>>, %arg2: memref<32x128xf32, #tpu.memory_space<vmem>>, %arg3: memref<1x128xf32, #tpu.memory_space<vmem>>, %arg4: memref<128x1xf32, #tpu.memory_space<vmem>>, %arg5: memref<1x1xf32, #tpu.memory_space<vmem>>, %arg6: memref<512x1xf32, #tpu.memory_space<vmem>>) attributes {dimension_semantics = [#tpu.dimension_semantics<parallel>], iteration_bounds = array<i64: 1>, scalar_prefetch = 0 : i64, scratch_operands = 0 : i64, tpu.core_type = #tpu.core_type<tc>, window_params = [{transform_indices = @transform_0, window_bounds = array<i64: 512, 32>}, {pipeline_mode = #tpu.pipeline_mode<synchronous>, transform_indices = @transform_1, window_bounds = array<i64: 32, 128>}, {pipeline_mode = #tpu.pipeline_mode<synchronous>, transform_indices = @transform_2, window_bounds = array<i64: 1, 128>}, {pipeline_mode = #tpu.pipeline_mode<synchronous>, transform_indices = @transform_3, window_bounds = array<i64: 128, 1>}, {pipeline_mode = #tpu.pipeline_mode<synchronous>, transform_indices = @transform_4, window_bounds = array<i64: 1, 1>}, {transform_indices = @transform_5, window_bounds = array<i64: 512, 1>}]} {
    %c0 = arith.constant 0 : index
    %c0_0 = arith.constant 0 : index
    %0 = vector.load %arg1[%c0, %c0_0] : memref<512x32xf32, #tpu.memory_space<vmem>>, vector<512x32xf32>
    %c0_1 = arith.constant 0 : index
    %c0_2 = arith.constant 0 : index
    %1 = vector.load %arg2[%c0_1, %c0_2] : memref<32x128xf32, #tpu.memory_space<vmem>>, vector<32x128xf32>
    %cst = arith.constant dense<0.000000e+00> : vector<512x128xf32>
    %2 = tpu.matmul %0, %1, %cst {dimension_numbers = #tpu.dot_dimension_numbers<[1], [0], [0], [1], [0, 0, 1, 1], [], []>} : vector<512x32xf32>, vector<32x128xf32>, vector<512x128xf32> -> vector<512x128xf32>
    %c0_3 = arith.constant 0 : index
    %c0_4 = arith.constant 0 : index
    %3 = vector.load %arg3[%c0_3, %c0_4] : memref<1x128xf32, #tpu.memory_space<vmem>>, vector<1x128xf32>
    %4 = vector.broadcast %3 : vector<1x128xf32> to vector<512x128xf32>
    %5 = arith.addf %2, %4 : vector<512x128xf32>
    %cst_5 = arith.constant 5.000000e-01 : f32
    %6 = vector.broadcast %cst_5 : f32 to vector<512x128xf32>
    %7 = arith.mulf %6, %5 : vector<512x128xf32>
    %cst_6 = arith.constant 0.707106769 : f32
    %8 = vector.broadcast %cst_6 : f32 to vector<512x128xf32>
    %9 = arith.mulf %5, %8 : vector<512x128xf32>
    %10 = math.erf %9 : vector<512x128xf32>
    %cst_7 = arith.constant 1.000000e+00 : f32
    %11 = vector.broadcast %cst_7 : f32 to vector<512x128xf32>
    %12 = arith.addf %11, %10 : vector<512x128xf32>
    %13 = arith.mulf %7, %12 : vector<512x128xf32>
    %c0_8 = arith.constant 0 : index
    %c0_9 = arith.constant 0 : index
    %14 = vector.load %arg4[%c0_8, %c0_9] : memref<128x1xf32, #tpu.memory_space<vmem>>, vector<128x1xf32>
    %cst_10 = arith.constant dense<0.000000e+00> : vector<512x1xf32>
    %15 = tpu.matmul %13, %14, %cst_10 {dimension_numbers = #tpu.dot_dimension_numbers<[1], [0], [0], [1], [0, 0, 1, 1], [], []>} : vector<512x128xf32>, vector<128x1xf32>, vector<512x1xf32> -> vector<512x1xf32>
    %c0_11 = arith.constant 0 : index
    %c0_12 = arith.constant 0 : index
    %16 = vector.load %arg5[%c0_11, %c0_12] : memref<1x1xf32, #tpu.memory_space<vmem>>, vector<1x1xf32>
    %17 = vector.broadcast %16 : vector<1x1xf32> to vector<512x1xf32>
    %18 = arith.addf %15, %17 : vector<512x1xf32>
    %c0_13 = arith.constant 0 : index
    %c0_14 = arith.constant 0 : index
    %19 = vector.load %arg6[%c0_13, %c0_14] : memref<512x1xf32, #tpu.memory_space<vmem>>, vector<512x1xf32>
    tpu.vector_store %arg6[%c0_13, %c0_14], %18 {strides = array<i32>} : memref<512x1xf32, #tpu.memory_space<vmem>>, vector<512x1xf32>,
    return
  }
  func.func @transform_0(%arg0: i32) -> (i32, i32) {
    %c0_i32 = arith.constant 0 : i32
    %c0_i32_0 = arith.constant 0 : i32
    return %arg0, %c0_i32 : i32, i32
  }
  func.func @transform_1(%arg0: i32) -> (i32, i32) {
    %c0_i32 = arith.constant 0 : i32
    %c0_i32_0 = arith.constant 0 : i32
    %c0_i32_1 = arith.constant 0 : i32
    return %c0_i32, %c0_i32_0 : i32, i32
  }
  func.func @transform_2(%arg0: i32) -> (i32, i32) {
    %c0_i32 = arith.constant 0 : i32
    %c0_i32_0 = arith.constant 0 : i32
    %c0_i32_1 = arith.constant 0 : i32
    return %c0_i32, %c0_i32_0 : i32, i32
  }
  func.func @transform_3(%arg0: i32) -> (i32, i32) {
    %c0_i32 = arith.constant 0 : i32
    %c0_i32_0 = arith.constant 0 : i32
    %c0_i32_1 = arith.constant 0 : i32
    return %c0_i32, %c0_i32_0 : i32, i32
  }
  func.func @transform_4(%arg0: i32) -> (i32, i32) {
    %c0_i32 = arith.constant 0 : i32
    %c0_i32_0 = arith.constant 0 : i32
    %c0_i32_1 = arith.constant 0 : i32
    return %c0_i32, %c0_i32_0 : i32, i32
  }
  func.func @transform_5(%arg0: i32) -> (i32, i32) {
    %c0_i32 = arith.constant 0 : i32
    %c0_i32_0 = arith.constant 0 : i32
    return %arg0, %c0_i32 : i32, i32
  }
}

</mosaic_0001>

<bundles_post_ra>
// kernel: fno2d_forward.10
= control target key start
LH: loop header
LB: loop body
LE: loop exit
PB: predicated region body
PF: predicated region fallthrough
CT: control target
= control target key end

     0   :  { %vm86_vm0 = vcmask 64512   ;;  %vm664_vm1 = vcmask 261120   ;;  %s1567_s1 = inlined_call_operand.vmem [shape: f32[8,32], index: 1, kind: input, shape index: {}]   ;;  %s1568_s0 = inlined_call_operand.vmem [shape: f32[512,8], index: 0, kind: input, shape index: {}]   ;;  %s1569_s2 = inlined_call_operand.vmem [shape: f32[1,32], index: 2, kind: input, shape index: {}]   ;;  %s1570_s3 = inlined_call_operand.vmem [shape: f32[512,32], index: 3, kind: output, shape index: {}]  }
   0x1   :  { %v78_v0 = vld [vmem:[%s1567_s1] sm:$0xff]  ;;  %v15_v3 = vld [vmem:[%s1568_s0 + $0x8] sm:$0xff]  ;;  %v16_v5 = vld [vmem:[%s1568_s0 + $0x10] sm:$0xff] }
   0x2   :  { %v14_v1 = vld [vmem:[%s1568_s0] sm:$0xff]  ;;  %863 = vmatprep.subr.mxu0 %v78_v0  ;;  %961 = vmatprep.subr.mxu1 %v78_v0  ;;  %v47_v4 = vld [vmem:[%s1568_s0 + $0x108] sm:$0xff]  ;;  %v48_v6 = vld [vmem:[%s1568_s0 + $0x110] sm:$0xff] }
   0x3   :  { %v46_v2 = vld [vmem:[%s1568_s0 + $0x100] sm:$0xff]  ;;  %864 = vmatpush3.msra.mxu0 %v78_v0  ;;  %962 = vmatpush3.msra.mxu1 %v78_v0  ;;  %v17_v7 = vld [vmem:[%s1568_s0 + $0x18] sm:$0xff]  ;;  %v19_v11 = vld [vmem:[%s1568_s0 + $0x28] sm:$0xff] }
   0x4   :  { %865 = vmatprep.mubr.msk.f32.mxu0 %vm86_vm0, %v14_v1  ;;  %913 = vmatprep.mubr.msk.f32.mxu1 %vm86_vm0, %v46_v2  ;;  %v49_v8 = vld [vmem:[%s1568_s0 + $0x118] sm:$0xff]  ;;  %v18_v9 = vld [vmem:[%s1568_s0 + $0x20] sm:$0xff]  ;;  %v51_v12 = vld [vmem:[%s1568_s0 + $0x128] sm:$0xff] }
   0x5   :  { %866 = vmatmul.mubr.msk.f32.vlgmr.msra.gmra.mxu0 %vm86_vm0, %v15_v3  ;;  %914 = vmatmul.mubr.msk.f32.vlgmr.msra.gmra.mxu1 %vm86_vm0, %v47_v4  ;;  %v50_v10 = vld [vmem:[%s1568_s0 + $0x120] sm:$0xff]  ;;  %v20_v13 = vld [vmem:[%s1568_s0 + $0x30] sm:$0xff]  ;;  %v21_v15 = vld [vmem:[%s1568_s0 + $0x38] sm:$0xff] }
   0x6   :  { %868 = vmatprep.mubr.msk.f32.mxu0 %vm86_vm0, %v16_v5  ;;  %916 = vmatprep.mubr.msk.f32.mxu1 %vm86_vm0, %v48_v6  ;;  %v52_v14 = vld [vmem:[%s1568_s0 + $0x130] sm:$0xff]  ;;  %v53_v16 = vld [vmem:[%s1568_s0 + $0x138] sm:$0xff]  ;;  %v22_v17 = vld [vmem:[%s1568_s0 + $0x40] sm:$0xff] }
   0x7   :  { %v54_v18 = vld [vmem:[%s1568_s0 + $0x140] sm:$0xff]  ;;  %v23_v19 = vld [vmem:[%s1568_s0 + $0x48] sm:$0xff]  ;;  %v24_v21 = vld [vmem:[%s1568_s0 + $0x50] sm:$0xff] }
   0x8   :  { %v55_v20 = vld [vmem:[%s1568_s0 + $0x148] sm:$0xff]  ;;  %v56_v22 = vld [vmem:[%s1568_s0 + $0x150] sm:$0xff]  ;;  %v25_v23 = vld [vmem:[%s1568_s0 + $0x58] sm:$0xff] }
   0x9   :  { %869 = vmatmul.mubr.msk.f32.gmra.mxu0 %vm86_vm0, %v17_v7  ;;  %917 = vmatmul.mubr.msk.f32.gmra.mxu1 %vm86_vm0, %v49_v8  ;;  %v57_v24 = vld [vmem:[%s1568_s0 + $0x158] sm:$0xff]  ;;  %v26_v25 = vld [vmem:[%s1568_s0 + $0x60] sm:$0xff]  ;;  %v27_v27 = vld [vmem:[%s1568_s0 + $0x68] sm:$0xff] }
   0xa   :  { %871 = vmatprep.mubr.msk.f32.mxu0 %vm86_vm0, %v18_v9  ;;  %919 = vmatprep.mubr.msk.f32.mxu1 %vm86_vm0, %v50_v10  ;;  %v58_v26 = vld [vmem:[%s1568_s0 + $0x160] sm:$0xff]  ;;  %v59_v28 = vld [vmem:[%s1568_s0 + $0x168] sm:$0xff]  ;;  %v28_v29 = vld [vmem:[%s1568_s0 + $0x70] sm:$0xff] }
   0xb   :  { %v60_v30 = vld [vmem:[%s1568_s0 + $0x170] sm:$0xff]  ;;  %v29_v31 = vld [vmem:[%s1568_s0 + $0x78] sm:$0xff]  ;;  %v30_v33 = vld [vmem:[%s1568_s0 + $0x80] sm:$0xff] }
   0xc   :  { %v61_v32 = vld [vmem:[%s1568_s0 + $0x178] sm:$0xff]  ;;  %v62_v34 = vld [vmem:[%s1568_s0 + $0x180] sm:$0xff]  ;;  %v31_v35 = vld [vmem:[%s1568_s0 + $0x88] sm:$0xff] }
   0xd   :  { %872 = vmatmul.mubr.msk.f32.gmra.mxu0 %vm86_vm0, %v19_v11  ;;  %920 = vmatmul.mubr.msk.f32.gmra.mxu1 %vm86_vm0, %v51_v12  ;;  %v63_v36 = vld [vmem:[%s1568_s0 + $0x188] sm:$0xff]  ;;  %v32_v37 = vld [vmem:[%s1568_s0 + $0x90] sm:$0xff]  ;;  %v33_v39 = vld [vmem:[%s1568_s0 + $0x98] sm:$0xff] }
   0xe   :  { %874 = vmatprep.mubr.msk.f32.mxu0 %vm86_vm0, %v20_v13  ;;  %922 = vmatprep.mubr.msk.f32.mxu1 %vm86_vm0, %v52_v14  ;;  %v64_v38 = vld [vmem:[%s1568_s0 + $0x190] sm:$0xff]  ;;  %v65_v40 = vld [vmem:[%s1568_s0 + $0x198] sm:$0xff]  ;;  %v34_v41 = vld [vmem:[%s1568_s0 + $0xa0] sm:$0xff] }
   0xf   :  { %v66_v42 = vld [vmem:[%s1568_s0 + $0x1a0] sm:$0xff]  ;;  %v35_v43 = vld [vmem:[%s1568_s0 + $0xa8] sm:$0xff]  ;;  %v36_v45 = vld [vmem:[%s1568_s0 + $0xb0] sm:$0xff] }
  0x10   :  { %v67_v44 = vld [vmem:[%s1568_s0 + $0x1a8] sm:$0xff]  ;;  %v68_v46 = vld [vmem:[%s1568_s0 + $0x1b0] sm:$0xff]  ;;  %v37_v47 = vld [vmem:[%s1568_s0 + $0xb8] sm:$0xff] }
  0x11   :  { %875 = vmatmul.mubr.msk.f32.gmra.mxu0 %vm86_vm0, %v21_v15  ;;  %923 = vmatmul.mubr.msk.f32.gmra.mxu1 %vm86_vm0, %v53_v16  ;;  %v69_v48 = vld [vmem:[%s1568_s0 + $0x1b8] sm:$0xff]  ;;  %v38_v49 = vld [vmem:[%s1568_s0 + $0xc0] sm:$0xff]  ;;  %v39_v51 = vld [vmem:[%s1568_s0 + $0xc8] sm:$0xff] }
  0x12   :  { %877 = vmatprep.mubr.msk.f32.mxu0 %vm86_vm0, %v22_v17  ;;  %925 = vmatprep.mubr.msk.f32.mxu1 %vm86_vm0, %v54_v18  ;;  %v70_v50 = vld [vmem:[%s1568_s0 + $0x1c0] sm:$0xff]  ;;  %v71_v52 = vld [vmem:[%s1568_s0 + $0x1c8] sm:$0xff]  ;;  %v40_v53 = vld [vmem:[%s1568_s0 + $0xd0] sm:$0xff] }
  0x13   :  { %v72_v54 = vld [vmem:[%s1568_s0 + $0x1d0] sm:$0xff]  ;;  %v41_v55 = vld [vmem:[%s1568_s0 + $0xd8] sm:$0xff]  ;;  %v42_v57 = vld [vmem:[%s1568_s0 + $0xe0] sm:$0xff] }
  0x14   :  { %v73_v56 = vld [vmem:[%s1568_s0 + $0x1d8] sm:$0xff]  ;;  %v74_v58 = vld [vmem:[%s1568_s0 + $0x1e0] sm:$0xff]  ;;  %v43_v59 = vld [vmem:[%s1568_s0 + $0xe8] sm:$0xff] }
  0x15   :  { %878 = vmatmul.mubr.msk.f32.gmra.mxu0 %vm86_vm0, %v23_v19  ;;  %926 = vmatmul.mubr.msk.f32.gmra.mxu1 %vm86_vm0, %v55_v20  ;;  %v75_v60 = vld [vmem:[%s1568_s0 + $0x1e8] sm:$0xff]  ;;  %v44_v61 = vld [vmem:[%s1568_s0 + $0xf0] sm:$0xff]  ;;  %v45_v63 = vld [vmem:[%s1568_s0 + $0xf8] sm:$0xff] }
  0x16   :  { %880 = vmatprep.mubr.msk.f32.mxu0 %vm86_vm0, %v24_v21  ;;  %928 = vmatprep.mubr.msk.f32.mxu1 %vm86_vm0, %v56_v22  ;;  %v76_v62 = vld [vmem:[%s1568_s0 + $0x1f0] sm:$0xff]  ;;  %v77_v0 = vld [vmem:[%s1568_s0 + $0x1f8] sm:$0xff]  ;;  %v1245_v1 = vld [vmem:[%s1569_s2] ss:$0 sm:$0xff] }
  0x19   :  { %881 = vmatmul.mubr.msk.f32.gmra.mxu0 %vm86_vm0, %v25_v23  ;;  %929 = vmatmul.mubr.msk.f32.gmra.mxu1 %vm86_vm0, %v57_v24 }
  0x1a   :  { %883 = vmatprep.mubr.msk.f32.mxu0 %vm86_vm0, %v26_v25  ;;  %931 = vmatprep.mubr.msk.f32.mxu1 %vm86_vm0, %v58_v26 }
  0x1d   :  { %884 = vmatmul.mubr.msk.f32.gmra.mxu0 %vm86_vm0, %v27_v27  ;;  %932 = vmatmul.mubr.msk.f32.gmra.mxu1 %vm86_vm0, %v59_v28 }
  0x1e   :  { %886 = vmatprep.mubr.msk.f32.mxu0 %vm86_vm0, %v28_v29  ;;  %934 = vmatprep.mubr.msk.f32.mxu1 %vm86_vm0, %v60_v30 }
  0x21   :  { %887 = vmatmul.mubr.msk.f32.gmra.mxu0 %vm86_vm0, %v29_v31  ;;  %935 = vmatmul.mubr.msk.f32.gmra.mxu1 %vm86_vm0, %v61_v32 }
  0x22   :  { %889 = vmatprep.mubr.msk.f32.mxu0 %vm86_vm0, %v30_v33  ;;  %937 = vmatprep.mubr.msk.f32.mxu1 %vm86_vm0, %v62_v34 }
  0x25   :  { %890 = vmatmul.mubr.msk.f32.gmra.mxu0 %vm86_vm0, %v31_v35  ;;  %938 = vmatmul.mubr.msk.f32.gmra.mxu1 %vm86_vm0, %v63_v36 }
  0x26   :  { %892 = vmatprep.mubr.msk.f32.mxu0 %vm86_vm0, %v32_v37  ;;  %940 = vmatprep.mubr.msk.f32.mxu1 %vm86_vm0, %v64_v38 }
  0x29   :  { %893 = vmatmul.mubr.msk.f32.gmra.mxu0 %vm86_vm0, %v33_v39  ;;  %941 = vmatmul.mubr.msk.f32.gmra.mxu1 %vm86_vm0, %v65_v40 }
  0x2a   :  { %895 = vmatprep.mubr.msk.f32.mxu0 %vm86_vm0, %v34_v41  ;;  %943 = vmatprep.mubr.msk.f32.mxu1 %vm86_vm0, %v66_v42 }
  0x2d   :  { %896 = vmatmul.mubr.msk.f32.gmra.mxu0 %vm86_vm0, %v35_v43  ;;  %944 = vmatmul.mubr.msk.f32.gmra.mxu1 %vm86_vm0, %v67_v44 }
  0x2e   :  { %898 = vmatprep.mubr.msk.f32.mxu0 %vm86_vm0, %v36_v45  ;;  %946 = vmatprep.mubr.msk.f32.mxu1 %vm86_vm0, %v68_v46 }
  0x31   :  { %899 = vmatmul.mubr.msk.f32.gmra.mxu0 %vm86_vm0, %v37_v47  ;;  %947 = vmatmul.mubr.msk.f32.gmra.mxu1 %vm86_vm0, %v69_v48 }
  0x32   :  { %901 = vmatprep.mubr.msk.f32.mxu0 %vm86_vm0, %v38_v49  ;;  %949 = vmatprep.mubr.msk.f32.mxu1 %vm86_vm0, %v70_v50 }
  0x35   :  { %902 = vmatmul.mubr.msk.f32.gmra.mxu0 %vm86_vm0, %v39_v51  ;;  %950 = vmatmul.mubr.msk.f32.gmra.mxu1 %vm86_vm0, %v71_v52 }
  0x36   :  { %904 = vmatprep.mubr.msk.f32.mxu0 %vm86_vm0, %v40_v53  ;;  %952 = vmatprep.mubr.msk.f32.mxu1 %vm86_vm0, %v72_v54 }
  0x39   :  { %905 = vmatmul.mubr.msk.f32.gmra.mxu0 %vm86_vm0, %v41_v55  ;;  %953 = vmatmul.mubr.msk.f32.gmra.mxu1 %vm86_vm0, %v73_v56 }
  0x3a   :  { %907 = vmatprep.mubr.msk.f32.mxu0 %vm86_vm0, %v42_v57  ;;  %955 = vmatprep.mubr.msk.f32.mxu1 %vm86_vm0, %v74_v58 }
  0x3d   :  { %908 = vmatmul.mubr.msk.f32.gmra.mxu0 %vm86_vm0, %v43_v59  ;;  %956 = vmatmul.mubr.msk.f32.gmra.mxu1 %vm86_vm0, %v75_v60 }
  0x3e   :  { %910 = vmatprep.mubr.msk.f32.mxu0 %vm86_vm0, %v44_v61  ;;  %958 = vmatprep.mubr.msk.f32.mxu1 %vm86_vm0, %v76_v62 }
  0x41   :  { %911 = vmatmul.mubr.msk.f32.gmra.mxu0 %vm86_vm0, %v45_v63  ;;  %959 = vmatmul.mubr.msk.f32.gmra.mxu1 %vm86_vm0, %v77_v0 }
  0xc5   :  { %v867_v2 = vpop.f32.mrf.mxu0  ;;  %v915_v3 = vpop.f32.mrf.mxu1 }
  0xc6   :  { %v351_v4 = vadd.f32 %v867_v2, %v1245_v1  ;;  %v511_v5 = vadd.f32 %v915_v3, %v1245_v1 }
  0xc7   :  { %v345_v6 = vpop.f32.mrf.mxu0  ;;  %v505_v7 = vpop.f32.mrf.mxu1 }
  0xc8   :  { %666 = vst.msk [vmem:[%s1570_s3 + $0x8] sm:$0xff] %vm664_vm1, %v351_v4  ;;  %698 = vst.msk [vmem:[%s1570_s3 + $0x108] sm:$0xff] %vm664_vm1, %v511_v5  ;;  %v346_v8 = vadd.f32 %v1245_v1, %v345_v6  ;;  %v506_v9 = vadd.f32 %v1245_v1, %v505_v7 }
  0xc9   :  { %v870_v10 = vpop.f32.mrf.mxu0  ;;  %v918_v11 = vpop.f32.mrf.mxu1 }
  0xca   :  { %665 = vst.msk [vmem:[%s1570_s3] sm:$0xff] %vm664_vm1, %v346_v8  ;;  %697 = vst.msk [vmem:[%s1570_s3 + $0x100] sm:$0xff] %vm664_vm1, %v506_v9  ;;  %v361_v12 = vadd.f32 %v870_v10, %v1245_v1  ;;  %v521_v13 = vadd.f32 %v918_v11, %v1245_v1 }
  0xcb   :  { %v355_v14 = vpop.f32.mrf.mxu0  ;;  %v515_v15 = vpop.f32.mrf.mxu1 }
  0xcc   :  { %668 = vst.msk [vmem:[%s1570_s3 + $0x18] sm:$0xff] %vm664_vm1, %v361_v12  ;;  %700 = vst.msk [vmem:[%s1570_s3 + $0x118] sm:$0xff] %vm664_vm1, %v521_v13  ;;  %v356_v16 = vadd.f32 %v1245_v1, %v355_v14  ;;  %v516_v17 = vadd.f32 %v1245_v1, %v515_v15 }
  0xcd   :  { %v873_v18 = vpop.f32.mrf.mxu0  ;;  %v921_v19 = vpop.f32.mrf.mxu1 }
  0xce   :  { %667 = vst.msk [vmem:[%s1570_s3 + $0x10] sm:$0xff] %vm664_vm1, %v356_v16  ;;  %699 = vst.msk [vmem:[%s1570_s3 + $0x110] sm:$0xff] %vm664_vm1, %v516_v17  ;;  %v371_v20 = vadd.f32 %v873_v18, %v1245_v1  ;;  %v531_v21 = vadd.f32 %v921_v19, %v1245_v1 }
  0xcf   :  { %v365_v22 = vpop.f32.mrf.mxu0  ;;  %v525_v23 = vpop.f32.mrf.mxu1 }
  0xd0   :  { %670 = vst.msk [vmem:[%s1570_s3 + $0x28] sm:$0xff] %vm664_vm1, %v371_v20  ;;  %702 = vst.msk [vmem:[%s1570_s3 + $0x128] sm:$0xff] %vm664_vm1, %v531_v21  ;;  %v366_v24 = vadd.f32 %v1245_v1, %v365_v22  ;;  %v526_v25 = vadd.f32 %v1245_v1, %v525_v23 }
  0xd1   :  { %v876_v26 = vpop.f32.mrf.mxu0  ;;  %v924_v27 = vpop.f32.mrf.mxu1 }
  0xd2   :  { %669 = vst.msk [vmem:[%s1570_s3 + $0x20] sm:$0xff] %vm664_vm1, %v366_v24  ;;  %701 = vst.msk [vmem:[%s1570_s3 + $0x120] sm:$0xff] %vm664_vm1, %v526_v25  ;;  %v381_v28 = vadd.f32 %v876_v26, %v1245_v1  ;;  %v541_v29 = vadd.f32 %v924_v27, %v1245_v1 }
  0xd3   :  { %v375_v30 = vpop.f32.mrf.mxu0  ;;  %v535_v31 = vpop.f32.mrf.mxu1 }
  0xd4   :  { %672 = vst.msk [vmem:[%s1570_s3 + $0x38] sm:$0xff] %vm664_vm1, %v381_v28  ;;  %704 = vst.msk [vmem:[%s1570_s3 + $0x138] sm:$0xff] %vm664_vm1, %v541_v29  ;;  %v376_v32 = vadd.f32 %v1245_v1, %v375_v30  ;;  %v536_v33 = vadd.f32 %v1245_v1, %v535_v31 }
  0xd5   :  { %v879_v34 = vpop.f32.mrf.mxu0  ;;  %v927_v35 = vpop.f32.mrf.mxu1 }
  0xd6   :  { %671 = vst.msk [vmem:[%s1570_s3 + $0x30] sm:$0xff] %vm664_vm1, %v376_v32  ;;  %703 = vst.msk [vmem:[%s1570_s3 + $0x130] sm:$0xff] %vm664_vm1, %v536_v33  ;;  %v391_v36 = vadd.f32 %v879_v34, %v1245_v1  ;;  %v551_v37 = vadd.f32 %v927_v35, %v1245_v1 }
  0xd7   :  { %v385_v38 = vpop.f32.mrf.mxu0  ;;  %v545_v39 = vpop.f32.mrf.mxu1 }
  0xd8   :  { %674 = vst.msk [vmem:[%s1570_s3 + $0x48] sm:$0xff] %vm664_vm1, %v391_v36  ;;  %706 = vst.msk [vmem:[%s1570_s3 + $0x148] sm:$0xff] %vm664_vm1, %v551_v37  ;;  %v386_v40 = vadd.f32 %v1245_v1, %v385_v38  ;;  %v546_v41 = vadd.f32 %v1245_v1, %v545_v39 }
  0xd9   :  { %v882_v42 = vpop.f32.mrf.mxu0  ;;  %v930_v43 = vpop.f32.mrf.mxu1 }
  0xda   :  { %673 = vst.msk [vmem:[%s1570_s3 + $0x40] sm:$0xff] %vm664_vm1, %v386_v40  ;;  %705 = vst.msk [vmem:[%s1570_s3 + $0x140] sm:$0xff] %vm664_vm1, %v546_v41  ;;  %v401_v44 = vadd.f32 %v882_v42, %v1245_v1  ;;  %v561_v45 = vadd.f32 %v930_v43, %v1245_v1 }
  0xdb   :  { %v395_v46 = vpop.f32.mrf.mxu0  ;;  %v555_v47 = vpop.f32.mrf.mxu1 }
  0xdc   :  { %676 = vst.msk [vmem:[%s1570_s3 + $0x58] sm:$0xff] %vm664_vm1, %v401_v44  ;;  %708 = vst.msk [vmem:[%s1570_s3 + $0x158] sm:$0xff] %vm664_vm1, %v561_v45  ;;  %v396_v48 = vadd.f32 %v1245_v1, %v395_v46  ;;  %v556_v49 = vadd.f32 %v1245_v1, %v555_v47 }
  0xdd   :  { %v885_v50 = vpop.f32.mrf.mxu0  ;;  %v933_v51 = vpop.f32.mrf.mxu1 }
  0xde   :  { %675 = vst.msk [vmem:[%s1570_s3 + $0x50] sm:$0xff] %vm664_vm1, %v396_v48  ;;  %707 = vst.msk [vmem:[%s1570_s3 + $0x150] sm:$0xff] %vm664_vm1, %v556_v49  ;;  %v411_v52 = vadd.f32 %v885_v50, %v1245_v1  ;;  %v571_v53 = vadd.f32 %v933_v51, %v1245_v1 }
  0xdf   :  { %v405_v54 = vpop.f32.mrf.mxu0  ;;  %v565_v55 = vpop.f32.mrf.mxu1 }
  0xe0   :  { %678 = vst.msk [vmem:[%s1570_s3 + $0x68] sm:$0xff] %vm664_vm1, %v411_v52  ;;  %710 = vst.msk [vmem:[%s1570_s3 + $0x168] sm:$0xff] %vm664_vm1, %v571_v53  ;;  %v406_v56 = vadd.f32 %v1245_v1, %v405_v54  ;;  %v566_v57 = vadd.f32 %v1245_v1, %v565_v55 }
  0xe1   :  { %v888_v58 = vpop.f32.mrf.mxu0  ;;  %v936_v59 = vpop.f32.mrf.mxu1 }
  0xe2   :  { %677 = vst.msk [vmem:[%s1570_s3 + $0x60] sm:$0xff] %vm664_vm1, %v406_v56  ;;  %709 = vst.msk [vmem:[%s1570_s3 + $0x160] sm:$0xff] %vm664_vm1, %v566_v57  ;;  %v421_v60 = vadd.f32 %v888_v58, %v1245_v1  ;;  %v581_v61 = vadd.f32 %v936_v59, %v1245_v1 }
  0xe3   :  { %v415_v62 = vpop.f32.mrf.mxu0  ;;  %v575_v63 = vpop.f32.mrf.mxu1 }
  0xe4   :  { %680 = vst.msk [vmem:[%s1570_s3 + $0x78] sm:$0xff] %vm664_vm1, %v421_v60  ;;  %712 = vst.msk [vmem:[%s1570_s3 + $0x178] sm:$0xff] %vm664_vm1, %v581_v61  ;;  %v416_v0 = vadd.f32 %v1245_v1, %v415_v62  ;;  %v576_v2 = vadd.f32 %v1245_v1, %v575_v63 }
  0xe5   :  { %v891_v3 = vpop.f32.mrf.mxu0  ;;  %v939_v4 = vpop.f32.mrf.mxu1 }
  0xe6   :  { %679 = vst.msk [vmem:[%s1570_s3 + $0x70] sm:$0xff] %vm664_vm1, %v416_v0  ;;  %711 = vst.msk [vmem:[%s1570_s3 + $0x170] sm:$0xff] %vm664_vm1, %v576_v2  ;;  %v431_v5 = vadd.f32 %v891_v3, %v1245_v1  ;;  %v591_v6 = vadd.f32 %v939_v4, %v1245_v1 }
  0xe7   :  { %v425_v7 = vpop.f32.mrf.mxu0  ;;  %v585_v8 = vpop.f32.mrf.mxu1 }
  0xe8   :  { %682 = vst.msk [vmem:[%s1570_s3 + $0x88] sm:$0xff] %vm664_vm1, %v431_v5  ;;  %714 = vst.msk [vmem:[%s1570_s3 + $0x188] sm:$0xff] %vm664_vm1, %v591_v6  ;;  %v426_v9 = vadd.f32 %v1245_v1, %v425_v7  ;;  %v586_v10 = vadd.f32 %v1245_v1, %v585_v8 }
  0xe9   :  { %v894_v11 = vpop.f32.mrf.mxu0  ;;  %v942_v12 = vpop.f32.mrf.mxu1 }
  0xea   :  { %681 = vst.msk [vmem:[%s1570_s3 + $0x80] sm:$0xff] %vm664_vm1, %v426_v9  ;;  %713 = vst.msk [vmem:[%s1570_s3 + $0x180] sm:$0xff] %vm664_vm1, %v586_v10  ;;  %v441_v13 = vadd.f32 %v894_v11, %v1245_v1  ;;  %v601_v14 = vadd.f32 %v942_v12, %v1245_v1 }
  0xeb   :  { %v435_v15 = vpop.f32.mrf.mxu0  ;;  %v595_v16 = vpop.f32.mrf.mxu1 }
  0xec   :  { %684 = vst.msk [vmem:[%s1570_s3 + $0x98] sm:$0xff] %vm664_vm1, %v441_v13  ;;  %716 = vst.msk [vmem:[%s1570_s3 + $0x198] sm:$0xff] %vm664_vm1, %v601_v14  ;;  %v436_v17 = vadd.f32 %v1245_v1, %v435_v15  ;;  %v596_v18 = vadd.f32 %v1245_v1, %v595_v16 }
  0xed   :  { %v897_v19 = vpop.f32.mrf.mxu0  ;;  %v945_v20 = vpop.f32.mrf.mxu1 }
  0xee   :  { %683 = vst.msk [vmem:[%s1570_s3 + $0x90] sm:$0xff] %vm664_vm1, %v436_v17  ;;  %715 = vst.msk [vmem:[%s1570_s3 + $0x190] sm:$0xff] %vm664_vm1, %v596_v18  ;;  %v451_v21 = vadd.f32 %v897_v19, %v1245_v1  ;;  %v611_v22 = vadd.f32 %v945_v20, %v1245_v1 }
  0xef   :  { %v445_v23 = vpop.f32.mrf.mxu0  ;;  %v605_v24 = vpop.f32.mrf.mxu1 }
  0xf0   :  { %686 = vst.msk [vmem:[%s1570_s3 + $0xa8] sm:$0xff] %vm664_vm1, %v451_v21  ;;  %718 = vst.msk [vmem:[%s1570_s3 + $0x1a8] sm:$0xff] %vm664_vm1, %v611_v22  ;;  %v446_v25 = vadd.f32 %v1245_v1, %v445_v23  ;;  %v606_v26 = vadd.f32 %v1245_v1, %v605_v24 }
  0xf1   :  { %v900_v27 = vpop.f32.mrf.mxu0  ;;  %v948_v28 = vpop.f32.mrf.mxu1 }
  0xf2   :  { %685 = vst.msk [vmem:[%s1570_s3 + $0xa0] sm:$0xff] %vm664_vm1, %v446_v25  ;;  %717 = vst.msk [vmem:[%s1570_s3 + $0x1a0] sm:$0xff] %vm664_vm1, %v606_v26  ;;  %v461_v29 = vadd.f32 %v900_v27, %v1245_v1  ;;  %v621_v30 = vadd.f32 %v948_v28, %v1245_v1 }
  0xf3   :  { %v455_v31 = vpop.f32.mrf.mxu0  ;;  %v615_v32 = vpop.f32.mrf.mxu1 }
  0xf4   :  { %688 = vst.msk [vmem:[%s1570_s3 + $0xb8] sm:$0xff] %vm664_vm1, %v461_v29  ;;  %720 = vst.msk [vmem:[%s1570_s3 + $0x1b8] sm:$0xff] %vm664_vm1, %v621_v30  ;;  %v456_v33 = vadd.f32 %v1245_v1, %v455_v31  ;;  %v616_v34 = vadd.f32 %v1245_v1, %v615_v32 }
  0xf5   :  { %v903_v35 = vpop.f32.mrf.mxu0  ;;  %v951_v36 = vpop.f32.mrf.mxu1 }
  0xf6   :  { %687 = vst.msk [vmem:[%s1570_s3 + $0xb0] sm:$0xff] %vm664_vm1, %v456_v33  ;;  %719 = vst.msk [vmem:[%s1570_s3 + $0x1b0] sm:$0xff] %vm664_vm1, %v616_v34  ;;  %v471_v37 = vadd.f32 %v903_v35, %v1245_v1  ;;  %v631_v38 = vadd.f32 %v951_v36, %v1245_v1 }
  0xf7   :  { %v465_v39 = vpop.f32.mrf.mxu0  ;;  %v625_v40 = vpop.f32.mrf.mxu1 }
  0xf8   :  { %690 = vst.msk [vmem:[%s1570_s3 + $0xc8] sm:$0xff] %vm664_vm1, %v471_v37  ;;  %722 = vst.msk [vmem:[%s1570_s3 + $0x1c8] sm:$0xff] %vm664_vm1, %v631_v38  ;;  %v466_v41 = vadd.f32 %v1245_v1, %v465_v39  ;;  %v626_v42 = vadd.f32 %v1245_v1, %v625_v40 }
  0xf9   :  { %v906_v43 = vpop.f32.mrf.mxu0  ;;  %v954_v44 = vpop.f32.mrf.mxu1 }
  0xfa   :  { %689 = vst.msk [vmem:[%s1570_s3 + $0xc0] sm:$0xff] %vm664_vm1, %v466_v41  ;;  %721 = vst.msk [vmem:[%s1570_s3 + $0x1c0] sm:$0xff] %vm664_vm1, %v626_v42  ;;  %v481_v45 = vadd.f32 %v906_v43, %v1245_v1  ;;  %v641_v46 = vadd.f32 %v954_v44, %v1245_v1 }
  0xfb   :  { %v475_v47 = vpop.f32.mrf.mxu0  ;;  %v635_v48 = vpop.f32.mrf.mxu1 }
  0xfc   :  { %692 = vst.msk [vmem:[%s1570_s3 + $0xd8] sm:$0xff] %vm664_vm1, %v481_v45  ;;  %724 = vst.msk [vmem:[%s1570_s3 + $0x1d8] sm:$0xff] %vm664_vm1, %v641_v46  ;;  %v476_v49 = vadd.f32 %v1245_v1, %v475_v47  ;;  %v636_v50 = vadd.f32 %v1245_v1, %v635_v48 }
  0xfd   :  { %v909_v51 = vpop.f32.mrf.mxu0  ;;  %v957_v52 = vpop.f32.mrf.mxu1 }
  0xfe   :  { %691 = vst.msk [vmem:[%s1570_s3 + $0xd0] sm:$0xff] %vm664_vm1, %v476_v49  ;;  %723 = vst.msk [vmem:[%s1570_s3 + $0x1d0] sm:$0xff] %vm664_vm1, %v636_v50  ;;  %v491_v53 = vadd.f32 %v909_v51, %v1245_v1  ;;  %v651_v54 = vadd.f32 %v957_v52, %v1245_v1 }
  0xff   :  { %v485_v55 = vpop.f32.mrf.mxu0  ;;  %v645_v56 = vpop.f32.mrf.mxu1 }
 0x100   :  { %694 = vst.msk [vmem:[%s1570_s3 + $0xe8] sm:$0xff] %vm664_vm1, %v491_v53  ;;  %726 = vst.msk [vmem:[%s1570_s3 + $0x1e8] sm:$0xff] %vm664_vm1, %v651_v54  ;;  %v486_v57 = vadd.f32 %v1245_v1, %v485_v55  ;;  %v646_v58 = vadd.f32 %v1245_v1, %v645_v56 }
 0x101   :  { %v912_v59 = vpop.f32.mrf.mxu0  ;;  %v960_v60 = vpop.f32.mrf.mxu1 }
 0x102   :  { %693 = vst.msk [vmem:[%s1570_s3 + $0xe0] sm:$0xff] %vm664_vm1, %v486_v57  ;;  %725 = vst.msk [vmem:[%s1570_s3 + $0x1e0] sm:$0xff] %vm664_vm1, %v646_v58  ;;  %v501_v61 = vadd.f32 %v912_v59, %v1245_v1  ;;  %v661_v62 = vadd.f32 %v960_v60, %v1245_v1 }
 0x103   :  { %v495_v63 = vpop.f32.mrf.mxu0  ;;  %v655_v0 = vpop.f32.mrf.mxu1 }
 0x104   :  { %696 = vst.msk [vmem:[%s1570_s3 + $0xf8] sm:$0xff] %vm664_vm1, %v501_v61  ;;  %728 = vst.msk [vmem:[%s1570_s3 + $0x1f8] sm:$0xff] %vm664_vm1, %v661_v62  ;;  %v496_v2 = vadd.f32 %v1245_v1, %v495_v63  ;;  %v656_v3 = vadd.f32 %v1245_v1, %v655_v0 }
 0x106   :  { %695 = vst.msk [vmem:[%s1570_s3 + $0xf0] sm:$0xff] %vm664_vm1, %v496_v2  ;;  %727 = vst.msk [vmem:[%s1570_s3 + $0x1f0] sm:$0xff] %vm664_vm1, %v656_v3 }

// kernel: fno2d_forward.11
= control target key start
LH: loop header
LB: loop body
LE: loop exit
PB: predicated region body
PF: predicated region fallthrough
CT: control target
= control target key end

     0   :  { %v3603_v0 = vmov 0.0   ;;  %vm299_vm0 = vcmask 523264   ;;  %vm3604_vm1 = vmmov 0   ;;  %vm2636_vm2 = vcmask 517120   ;;  %s4964_s1 = inlined_call_operand.vmem [shape: f32[32,64,64], index: 1, kind: input, shape index: {}]   ;;  %s4965_s0 = inlined_call_operand.vmem [shape: f32[32,2,64], index: 0, kind: input, shape index: {}]   ;;  %s4966_s2 = inlined_call_operand.vmem [shape: f32[32,2,64], index: 2, kind: output, shape index: {}]  }
   0x1   :  { %2993 = vmatprep.subr.mxu0 %v3603_v0  ;;  %3012 = vmatprep.subr.mxu1 %v3603_v0  ;;  %v50_v1 = vld [vmem:[%s4964_s1 + $0x38] sm:$0xff]  ;;  %v49_v3 = vld [vmem:[%s4964_s1 + $0x30] sm:$0xff]  ;;  %v48_v5 = vld [vmem:[%s4964_s1 + $0x28] sm:$0xff] }
   0x2   :  { %v58_v2 = vld [vmem:[%s4964_s1 + $0x78] sm:$0xff]  ;;  %2994 = vmatpush3.msra.mxu0 %v50_v1  ;;  %v57_v4 = vld [vmem:[%s4964_s1 + $0x70] sm:$0xff]  ;;  %v56_v6 = vld [vmem:[%s4964_s1 + $0x68] sm:$0xff]  ;;  %3009 = vmatprep.mubr.msk.f32.mxu0 %vm3604_vm1, %v3603_v0 }
   0x3   :  { %3013 = vmatpush3.msra.mxu1 %v58_v2  ;;  %2995 = vmatprep.subr.mxu0 %v3603_v0  ;;  %v47_v7 = vld [vmem:[%s4964_s1 + $0x20] sm:$0xff]  ;;  %v46_v9 = vld [vmem:[%s4964_s1 + $0x18] sm:$0xff]  ;;  %v45_v11 = vld [vmem:[%s4964_s1 + $0x10] sm:$0xff] }
   0x4   :  { %3014 = vmatprep.subr.mxu1 %v3603_v0  ;;  %2996 = vmatpush3.msra.mxu0 %v49_v3  ;;  %v55_v8 = vld [vmem:[%s4964_s1 + $0x60] sm:$0xff]  ;;  %v54_v10 = vld [vmem:[%s4964_s1 + $0x58] sm:$0xff]  ;;  %v53_v12 = vld [vmem:[%s4964_s1 + $0x50] sm:$0xff] }
   0x5   :  { %3015 = vmatpush3.msra.mxu1 %v57_v4  ;;  %2997 = vmatprep.subr.mxu0 %v3603_v0  ;;  %v44_v13 = vld [vmem:[%s4964_s1 + $0x8] sm:$0xff]  ;;  %v43_v15 = vld [vmem:[%s4964_s1] sm:$0xff]  ;;  %v66_v19 = vld [vmem:[%s4964_s1 + $0xb8] sm:$0xff] }
   0x6   :  { %3016 = vmatprep.subr.mxu1 %v3603_v0  ;;  %2998 = vmatpush3.msra.mxu0 %v48_v5  ;;  %v52_v14 = vld [vmem:[%s4964_s1 + $0x48] sm:$0xff]  ;;  %v51_v16 = vld [vmem:[%s4964_s1 + $0x40] sm:$0xff]  ;;  %v74_v20 = vld [vmem:[%s4964_s1 + $0xf8] sm:$0xff] }
   0x7   :  { %3017 = vmatpush3.msra.mxu1 %v56_v6  ;;  %2999 = vmatprep.subr.mxu0 %v3603_v0  ;;  %v11_v17 = vld [vmem:[%s4965_s0] sm:$0x3]  ;;  %v12_v18 = vld [vmem:[%s4965_s0 + $0x2] sm:$0x3]  ;;  %v65_v21 = vld [vmem:[%s4964_s1 + $0xb0] sm:$0xff] }
   0x8   :  { %3018 = vmatprep.subr.mxu1 %v3603_v0  ;;  %3000 = vmatpush3.msra.mxu0 %v47_v7  ;;  %v73_v22 = vld [vmem:[%s4964_s1 + $0xf0] sm:$0xff]  ;;  %v64_v23 = vld [vmem:[%s4964_s1 + $0xa8] sm:$0xff]  ;;  %v63_v25 = vld [vmem:[%s4964_s1 + $0xa0] sm:$0xff] }
   0x9   :  { %3019 = vmatpush3.msra.mxu1 %v55_v8  ;;  %3001 = vmatprep.subr.mxu0 %v3603_v0  ;;  %v72_v24 = vld [vmem:[%s4964_s1 + $0xe8] sm:$0xff]  ;;  %v71_v26 = vld [vmem:[%s4964_s1 + $0xe0] sm:$0xff]  ;;  %v62_v27 = vld [vmem:[%s4964_s1 + $0x98] sm:$0xff] }
   0xa   :  { %3020 = vmatprep.subr.mxu1 %v3603_v0  ;;  %3002 = vmatpush3.msra.mxu0 %v46_v9  ;;  %v70_v28 = vld [vmem:[%s4964_s1 + $0xd8] sm:$0xff]  ;;  %v61_v29 = vld [vmem:[%s4964_s1 + $0x90] sm:$0xff]  ;;  %v60_v31 = vld [vmem:[%s4964_s1 + $0x88] sm:$0xff] }
   0xb   :  { %3021 = vmatpush3.msra.mxu1 %v54_v10  ;;  %3003 = vmatprep.subr.mxu0 %v3603_v0  ;;  %v69_v30 = vld [vmem:[%s4964_s1 + $0xd0] sm:$0xff]  ;;  %v68_v32 = vld [vmem:[%s4964_s1 + $0xc8] sm:$0xff]  ;;  %v59_v33 = vld [vmem:[%s4964_s1 + $0x80] sm:$0xff] }
   0xc   :  { %3022 = vmatprep.subr.mxu1 %v3603_v0  ;;  %3004 = vmatpush3.msra.mxu0 %v45_v11  ;;  %v67_v34 = vld [vmem:[%s4964_s1 + $0xc0] sm:$0xff]  ;;  %v82_v37 = vld [vmem:[%s4964_s1 + $0x138] sm:$0xff]  ;;  %v81_v39 = vld [vmem:[%s4964_s1 + $0x130] sm:$0xff] }
   0xd   :  { %3023 = vmatpush3.msra.mxu1 %v53_v12  ;;  %3005 = vmatprep.subr.mxu0 %v3603_v0  ;;  %v13_v35 = vld [vmem:[%s4965_s0 + $0x4] sm:$0x3]  ;;  %v14_v36 = vld [vmem:[%s4965_s0 + $0x6] sm:$0x3]  ;;  %v90_v38 = vld [vmem:[%s4964_s1 + $0x178] sm:$0xff] }
   0xe   :  { %3024 = vmatprep.subr.mxu1 %v3603_v0  ;;  %3006 = vmatpush3.msra.mxu0 %v44_v13  ;;  %v89_v40 = vld [vmem:[%s4964_s1 + $0x170] sm:$0xff]  ;;  %v80_v41 = vld [vmem:[%s4964_s1 + $0x128] sm:$0xff]  ;;  %v79_v43 = vld [vmem:[%s4964_s1 + $0x120] sm:$0xff] }
   0xf   :  { %3025 = vmatpush3.msra.mxu1 %v52_v14  ;;  %3007 = vmatprep.subr.mxu0 %v3603_v0  ;;  %v88_v42 = vld [vmem:[%s4964_s1 + $0x168] sm:$0xff]  ;;  %v87_v44 = vld [vmem:[%s4964_s1 + $0x160] sm:$0xff]  ;;  %v78_v45 = vld [vmem:[%s4964_s1 + $0x118] sm:$0xff] }
  0x10   :  { %3026 = vmatprep.subr.mxu1 %v3603_v0  ;;  %3008 = vmatpush3.msra.mxu0 %v43_v15  ;;  %v86_v46 = vld [vmem:[%s4964_s1 + $0x158] sm:$0xff]  ;;  %v77_v47 = vld [vmem:[%s4964_s1 + $0x110] sm:$0xff]  ;;  %v76_v49 = vld [vmem:[%s4964_s1 + $0x108] sm:$0xff] }
  0x11   :  { %3027 = vmatpush3.msra.mxu1 %v51_v16  ;;  %3028 = vmatprep.mubr.msk.f32.mxu1 %vm3604_vm1, %v3603_v0  ;;  %v85_v48 = vld [vmem:[%s4964_s1 + $0x150] sm:$0xff]  ;;  %v84_v50 = vld [vmem:[%s4964_s1 + $0x148] sm:$0xff]  ;;  %v75_v51 = vld [vmem:[%s4964_s1 + $0x100] sm:$0xff] }
  0x12   :  { %3010 = vmatmul.mubr.msk.f32.vlgmr.msra.gmra.mxu0 %vm299_vm0, %v11_v17  ;;  %3029 = vmatmul.mubr.msk.f32.vlgmr.msra.gmra.mxu1 %vm299_vm0, %v12_v18  ;;  %v83_v52 = vld [vmem:[%s4964_s1 + $0x140] sm:$0xff]  ;;  %v15_v53 = vld [vmem:[%s4965_s0 + $0x8] sm:$0x3]  ;;  %v16_v54 = vld [vmem:[%s4965_s0 + $0xa] sm:$0x3] }
  0x13   :  { %3031 = vmatprep.subr.mxu0 %v3603_v0  ;;  %3050 = vmatprep.subr.mxu1 %v3603_v0  ;;  %v98_v55 = vld [vmem:[%s4964_s1 + $0x1b8] sm:$0xff]  ;;  %v97_v57 = vld [vmem:[%s4964_s1 + $0x1b0] sm:$0xff]  ;;  %v96_v59 = vld [vmem:[%s4964_s1 + $0x1a8] sm:$0xff] }
  0x14   :  { %3032 = vmatpush3.msra.mxu0 %v66_v19  ;;  %3051 = vmatpush3.msra.mxu1 %v74_v20  ;;  %v106_v56 = vld [vmem:[%s4964_s1 + $0x1f8] sm:$0xff]  ;;  %v105_v58 = vld [vmem:[%s4964_s1 + $0x1f0] sm:$0xff]  ;;  %v104_v60 = vld [vmem:[%s4964_s1 + $0x1e8] sm:$0xff] }
  0x15   :  { %3033 = vmatprep.subr.mxu0 %v3603_v0  ;;  %3052 = vmatprep.subr.mxu1 %v3603_v0  ;;  %v95_v61 = vld [vmem:[%s4964_s1 + $0x1a0] sm:$0xff]  ;;  %v94_v63 = vld [vmem:[%s4964_s1 + $0x198] sm:$0xff]  ;;  %v93_v2 = vld [vmem:[%s4964_s1 + $0x190] sm:$0xff] }
  0x16   :  { %3034 = vmatpush3.msra.mxu0 %v65_v21  ;;  %3053 = vmatpush3.msra.mxu1 %v73_v22  ;;  %v103_v62 = vld [vmem:[%s4964_s1 + $0x1e0] sm:$0xff]  ;;  %v102_v1 = vld [vmem:[%s4964_s1 + $0x1d8] sm:$0xff]  ;;  %v101_v3 = vld [vmem:[%s4964_s1 + $0x1d0] sm:$0xff] }
  0x17   :  { %3035 = vmatprep.subr.mxu0 %v3603_v0  ;;  %3054 = vmatprep.subr.mxu1 %v3603_v0  ;;  %v92_v4 = vld [vmem:[%s4964_s1 + $0x188] sm:$0xff]  ;;  %v91_v6 = vld [vmem:[%s4964_s1 + $0x180] sm:$0xff]  ;;  %v114_v10 = vld [vmem:[%s4964_s1 + $0x238] sm:$0xff] }
  0x18   :  { %3036 = vmatpush3.msra.mxu0 %v64_v23  ;;  %3055 = vmatpush3.msra.mxu1 %v72_v24  ;;  %v100_v5 = vld [vmem:[%s4964_s1 + $0x1c8] sm:$0xff]  ;;  %v99_v7 = vld [vmem:[%s4964_s1 + $0x1c0] sm:$0xff]  ;;  %v122_v11 = vld [vmem:[%s4964_s1 + $0x278] sm:$0xff] }
  0x19   :  { %3037 = vmatprep.subr.mxu0 %v3603_v0  ;;  %3056 = vmatprep.subr.mxu1 %v3603_v0  ;;  %v17_v8 = vld [vmem:[%s4965_s0 + $0xc] sm:$0x3]  ;;  %v18_v9 = vld [vmem:[%s4965_s0 + $0xe] sm:$0x3]  ;;  %v113_v12 = vld [vmem:[%s4964_s1 + $0x230] sm:$0xff] }
  0x1a   :  { %3038 = vmatpush3.msra.mxu0 %v63_v25  ;;  %3057 = vmatpush3.msra.mxu1 %v71_v26  ;;  %v121_v13 = vld [vmem:[%s4964_s1 + $0x270] sm:$0xff]  ;;  %v112_v14 = vld [vmem:[%s4964_s1 + $0x228] sm:$0xff]  ;;  %v111_v16 = vld [vmem:[%s4964_s1 + $0x220] sm:$0xff] }
  0x1b   :  { %3039 = vmatprep.subr.mxu0 %v3603_v0  ;;  %3058 = vmatprep.subr.mxu1 %v3603_v0  ;;  %v120_v15 = vld [vmem:[%s4964_s1 + $0x268] sm:$0xff]  ;;  %v119_v17 = vld [vmem:[%s4964_s1 + $0x260] sm:$0xff]  ;;  %v110_v18 = vld [vmem:[%s4964_s1 + $0x218] sm:$0xff] }
  0x1c   :  { %3040 = vmatpush3.msra.mxu0 %v62_v27  ;;  %3059 = vmatpush3.msra.mxu1 %v70_v28  ;;  %v118_v19 = vld [vmem:[%s4964_s1 + $0x258] sm:$0xff]  ;;  %v109_v20 = vld [vmem:[%s4964_s1 + $0x210] sm:$0xff]  ;;  %v108_v22 = vld [vmem:[%s4964_s1 + $0x208] sm:$0xff] }
  0x1d   :  { %3041 = vmatprep.subr.mxu0 %v3603_v0  ;;  %3060 = vmatprep.subr.mxu1 %v3603_v0  ;;  %v117_v21 = vld [vmem:[%s4964_s1 + $0x250] sm:$0xff]  ;;  %v116_v23 = vld [vmem:[%s4964_s1 + $0x248] sm:$0xff]  ;;  %v107_v24 = vld [vmem:[%s4964_s1 + $0x200] sm:$0xff] }
  0x1e   :  { %3042 = vmatpush3.msra.mxu0 %v61_v29  ;;  %3061 = vmatpush3.msra.mxu1 %v69_v30  ;;  %v115_v25 = vld [vmem:[%s4964_s1 + $0x240] sm:$0xff]  ;;  %v19_v26 = vld [vmem:[%s4965_s0 + $0x10] sm:$0x3]  ;;  %v20_v27 = vld [vmem:[%s4965_s0 + $0x12] sm:$0x3] }
  0x1f   :  { %3043 = vmatprep.subr.mxu0 %v3603_v0  ;;  %3062 = vmatprep.subr.mxu1 %v3603_v0  ;;  %v130_v28 = vld [vmem:[%s4964_s1 + $0x2b8] sm:$0xff]  ;;  %v129_v30 = vld [vmem:[%s4964_s1 + $0x2b0] sm:$0xff] }
  0x20   :  { %3044 = vmatpush3.msra.mxu0 %v60_v31  ;;  %3063 = vmatpush3.msra.mxu1 %v68_v32  ;;  %v138_v29 = vld [vmem:[%s4964_s1 + $0x2f8] sm:$0xff]  ;;  %v137_v31 = vld [vmem:[%s4964_s1 + $0x2f0] sm:$0xff]  ;;  %v128_v32 = vld [vmem:[%s4964_s1 + $0x2a8] sm:$0xff] }
  0x21   :  { %3045 = vmatprep.subr.mxu0 %v3603_v0  ;;  %3064 = vmatprep.subr.mxu1 %v3603_v0 }
  0x22   :  { %3046 = vmatpush3.msra.mxu0 %v59_v33  ;;  %3047 = vmatprep.mubr.msk.f32.mxu0 %vm3604_vm1, %v3603_v0  ;;  %v136_v33 = vld [vmem:[%s4964_s1 + $0x2e8] sm:$0xff] }
  0x23   :  { %3065 = vmatpush3.msra.mxu1 %v67_v34  ;;  %3066 = vmatprep.mubr.msk.f32.mxu1 %vm3604_vm1, %v3603_v0  ;;  %v127_v34 = vld [vmem:[%s4964_s1 + $0x2a0] sm:$0xff] }
  0x24   :  { %3048 = vmatmul.mubr.msk.f32.vlgmr.msra.gmra.mxu0 %vm299_vm0, %v13_v35  ;;  %3067 = vmatmul.mubr.msk.f32.vlgmr.msra.gmra.mxu1 %vm299_vm0, %v14_v36  ;;  %v135_v35 = vld [vmem:[%s4964_s1 + $0x2e0] sm:$0xff]  ;;  %v126_v36 = vld [vmem:[%s4964_s1 + $0x298] sm:$0xff] }
  0x25   :  { %3069 = vmatprep.subr.mxu0 %v3603_v0  ;;  %3088 = vmatprep.subr.mxu1 %v3603_v0 }
  0x26   :  { %3070 = vmatpush3.msra.mxu0 %v82_v37  ;;  %3089 = vmatpush3.msra.mxu1 %v90_v38  ;;  %v134_v37 = vld [vmem:[%s4964_s1 + $0x2d8] sm:$0xff]  ;;  %v125_v38 = vld [vmem:[%s4964_s1 + $0x290] sm:$0xff] }
  0x27   :  { %3071 = vmatprep.subr.mxu0 %v3603_v0  ;;  %3090 = vmatprep.subr.mxu1 %v3603_v0 }
  0x28   :  { %3072 = vmatpush3.msra.mxu0 %v81_v39  ;;  %3091 = vmatpush3.msra.mxu1 %v89_v40  ;;  %v133_v39 = vld [vmem:[%s4964_s1 + $0x2d0] sm:$0xff]  ;;  %v124_v40 = vld [vmem:[%s4964_s1 + $0x288] sm:$0xff] }
  0x29   :  { %3073 = vmatprep.subr.mxu0 %v3603_v0  ;;  %3092 = vmatprep.subr.mxu1 %v3603_v0 }
  0x2a   :  { %3074 = vmatpush3.msra.mxu0 %v80_v41  ;;  %3093 = vmatpush3.msra.mxu1 %v88_v42  ;;  %v132_v41 = vld [vmem:[%s4964_s1 + $0x2c8] sm:$0xff]  ;;  %v123_v42 = vld [vmem:[%s4964_s1 + $0x280] sm:$0xff] }
  0x2b   :  { %3075 = vmatprep.subr.mxu0 %v3603_v0  ;;  %3094 = vmatprep.subr.mxu1 %v3603_v0 }
  0x2c   :  { %3076 = vmatpush3.msra.mxu0 %v79_v43  ;;  %3095 = vmatpush3.msra.mxu1 %v87_v44  ;;  %v131_v43 = vld [vmem:[%s4964_s1 + $0x2c0] sm:$0xff]  ;;  %v21_v44 = vld [vmem:[%s4965_s0 + $0x14] sm:$0x3] }
  0x2d   :  { %3077 = vmatprep.subr.mxu0 %v3603_v0  ;;  %3096 = vmatprep.subr.mxu1 %v3603_v0 }
  0x2e   :  { %3078 = vmatpush3.msra.mxu0 %v78_v45  ;;  %3097 = vmatpush3.msra.mxu1 %v86_v46  ;;  %v22_v45 = vld [vmem:[%s4965_s0 + $0x16] sm:$0x3]  ;;  %v146_v46 = vld [vmem:[%s4964_s1 + $0x338] sm:$0xff] }
  0x2f   :  { %3079 = vmatprep.subr.mxu0 %v3603_v0  ;;  %3098 = vmatprep.subr.mxu1 %v3603_v0 }
  0x30   :  { %3080 = vmatpush3.msra.mxu0 %v77_v47  ;;  %3099 = vmatpush3.msra.mxu1 %v85_v48  ;;  %v154_v47 = vld [vmem:[%s4964_s1 + $0x378] sm:$0xff]  ;;  %v145_v48 = vld [vmem:[%s4964_s1 + $0x330] sm:$0xff] }
  0x31   :  { %3081 = vmatprep.subr.mxu0 %v3603_v0  ;;  %3100 = vmatprep.subr.mxu1 %v3603_v0 }
  0x32   :  { %3082 = vmatpush3.msra.mxu0 %v76_v49  ;;  %3101 = vmatpush3.msra.mxu1 %v84_v50  ;;  %v153_v49 = vld [vmem:[%s4964_s1 + $0x370] sm:$0xff]  ;;  %v144_v50 = vld [vmem:[%s4964_s1 + $0x328] sm:$0xff] }
  0x33   :  { %3083 = vmatprep.subr.mxu0 %v3603_v0  ;;  %3102 = vmatprep.subr.mxu1 %v3603_v0 }
  0x34   :  { %3084 = vmatpush3.msra.mxu0 %v75_v51  ;;  %3085 = vmatprep.mubr.msk.f32.mxu0 %vm3604_vm1, %v3603_v0  ;;  %v152_v51 = vld [vmem:[%s4964_s1 + $0x368] sm:$0xff] }
  0x35   :  { %3103 = vmatpush3.msra.mxu1 %v83_v52  ;;  %3104 = vmatprep.mubr.msk.f32.mxu1 %vm3604_vm1, %v3603_v0  ;;  %v143_v52 = vld [vmem:[%s4964_s1 + $0x320] sm:$0xff] }
  0x36   :  { %3086 = vmatmul.mubr.msk.f32.vlgmr.msra.gmra.mxu0 %vm299_vm0, %v15_v53  ;;  %3105 = vmatmul.mubr.msk.f32.vlgmr.msra.gmra.mxu1 %vm299_vm0, %v16_v54  ;;  %v151_v53 = vld [vmem:[%s4964_s1 + $0x360] sm:$0xff]  ;;  %v142_v54 = vld [vmem:[%s4964_s1 + $0x318] sm:$0xff] }
  0x37   :  { %3107 = vmatprep.subr.mxu0 %v3603_v0  ;;  %3126 = vmatprep.subr.mxu1 %v3603_v0 }
  0x38   :  { %3108 = vmatpush3.msra.mxu0 %v98_v55  ;;  %3127 = vmatpush3.msra.mxu1 %v106_v56  ;;  %v150_v55 = vld [vmem:[%s4964_s1 + $0x358] sm:$0xff]  ;;  %v141_v56 = vld [vmem:[%s4964_s1 + $0x310] sm:$0xff] }
  0x39   :  { %3109 = vmatprep.subr.mxu0 %v3603_v0  ;;  %3128 = vmatprep.subr.mxu1 %v3603_v0 }
  0x3a   :  { %3110 = vmatpush3.msra.mxu0 %v97_v57  ;;  %3129 = vmatpush3.msra.mxu1 %v105_v58  ;;  %v149_v57 = vld [vmem:[%s4964_s1 + $0x350] sm:$0xff]  ;;  %v140_v58 = vld [vmem:[%s4964_s1 + $0x308] sm:$0xff] }
  0x3b   :  { %3111 = vmatprep.subr.mxu0 %v3603_v0  ;;  %3130 = vmatprep.subr.mxu1 %v3603_v0 }
  0x3c   :  { %3112 = vmatpush3.msra.mxu0 %v96_v59  ;;  %3131 = vmatpush3.msra.mxu1 %v104_v60  ;;  %v148_v59 = vld [vmem:[%s4964_s1 + $0x348] sm:$0xff]  ;;  %v139_v60 = vld [vmem:[%s4964_s1 + $0x300] sm:$0xff] }
  0x3d   :  { %3113 = vmatprep.subr.mxu0 %v3603_v0  ;;  %3132 = vmatprep.subr.mxu1 %v3603_v0 }
  0x3e   :  { %3114 = vmatpush3.msra.mxu0 %v95_v61  ;;  %3133 = vmatpush3.msra.mxu1 %v103_v62  ;;  %v147_v61 = vld [vmem:[%s4964_s1 + $0x340] sm:$0xff]  ;;  %v23_v62 = vld [vmem:[%s4965_s0 + $0x18] sm:$0x3] }
  0x3f   :  { %3115 = vmatprep.subr.mxu0 %v3603_v0  ;;  %3134 = vmatprep.subr.mxu1 %v3603_v0 }
  0x40   :  { %3116 = vmatpush3.msra.mxu0 %v94_v63  ;;  %3135 = vmatpush3.msra.mxu1 %v102_v1  ;;  %v24_v63 = vld [vmem:[%s4965_s0 + $0x1a] sm:$0x3] }
  0x41   :  { %3117 = vmatprep.subr.mxu0 %v3603_v0  ;;  %3136 = vmatprep.subr.mxu1 %v3603_v0  ;;  %v162_v1 = vld [vmem:[%s4964_s1 + $0x3b8] sm:$0xff] }
  0x42   :  { %3118 = vmatpush3.msra.mxu0 %v93_v2  ;;  %3137 = vmatpush3.msra.mxu1 %v101_v3  ;;  %v170_v2 = vld [vmem:[%s4964_s1 + $0x3f8] sm:$0xff]  ;;  %v161_v3 = vld [vmem:[%s4964_s1 + $0x3b0] sm:$0xff] }
  0x43   :  { %3119 = vmatprep.subr.mxu0 %v3603_v0  ;;  %3138 = vmatprep.subr.mxu1 %v3603_v0 }
  0x44   :  { %3120 = vmatpush3.msra.mxu0 %v92_v4  ;;  %3139 = vmatpush3.msra.mxu1 %v100_v5  ;;  %v169_v4 = vld [vmem:[%s4964_s1 + $0x3f0] sm:$0xff]  ;;  %v160_v5 = vld [vmem:[%s4964_s1 + $0x3a8] sm:$0xff] }
  0x45   :  { %3121 = vmatprep.subr.mxu0 %v3603_v0  ;;  %3140 = vmatprep.subr.mxu1 %v3603_v0 }
  0x46   :  { %3122 = vmatpush3.msra.mxu0 %v91_v6  ;;  %3123 = vmatprep.mubr.msk.f32.mxu0 %vm3604_vm1, %v3603_v0  ;;  %v168_v6 = vld [vmem:[%s4964_s1 + $0x3e8] sm:$0xff] }
  0x47   :  { %3141 = vmatpush3.msra.mxu1 %v99_v7  ;;  %3142 = vmatprep.mubr.msk.f32.mxu1 %vm3604_vm1, %v3603_v0  ;;  %v159_v7 = vld [vmem:[%s4964_s1 + $0x3a0] sm:$0xff] }
  0x48   :  { %3124 = vmatmul.mubr.msk.f32.vlgmr.msra.gmra.mxu0 %vm299_vm0, %v17_v8  ;;  %3143 = vmatmul.mubr.msk.f32.vlgmr.msra.gmra.mxu1 %vm299_vm0, %v18_v9  ;;  %v167_v8 = vld [vmem:[%s4964_s1 + $0x3e0] sm:$0xff]  ;;  %v158_v9 = vld [vmem:[%s4964_s1 + $0x398] sm:$0xff] }
  0x49   :  { %3145 = vmatprep.subr.mxu0 %v3603_v0  ;;  %3164 = vmatprep.subr.mxu1 %v3603_v0 }
  0x4a   :  { %3146 = vmatpush3.msra.mxu0 %v114_v10  ;;  %3165 = vmatpush3.msra.mxu1 %v122_v11  ;;  %v166_v10 = vld [vmem:[%s4964_s1 + $0x3d8] sm:$0xff]  ;;  %v157_v11 = vld [vmem:[%s4964_s1 + $0x390] sm:$0xff] }
  0x4b   :  { %3147 = vmatprep.subr.mxu0 %v3603_v0  ;;  %3166 = vmatprep.subr.mxu1 %v3603_v0 }
  0x4c   :  { %3148 = vmatpush3.msra.mxu0 %v113_v12  ;;  %3167 = vmatpush3.msra.mxu1 %v121_v13  ;;  %v165_v12 = vld [vmem:[%s4964_s1 + $0x3d0] sm:$0xff]  ;;  %v156_v13 = vld [vmem:[%s4964_s1 + $0x388] sm:$0xff] }
  0x4d   :  { %3149 = vmatprep.subr.mxu0 %v3603_v0  ;;  %3168 = vmatprep.subr.mxu1 %v3603_v0 }
  0x4e   :  { %3150 = vmatpush3.msra.mxu0 %v112_v14  ;;  %3169 = vmatpush3.msra.mxu1 %v120_v15  ;;  %v164_v14 = vld [vmem:[%s4964_s1 + $0x3c8] sm:$0xff]  ;;  %v155_v15 = vld [vmem:[%s4964_s1 + $0x380] sm:$0xff] }
  0x4f   :  { %3151 = vmatprep.subr.mxu0 %v3603_v0  ;;  %3170 = vmatprep.subr.mxu1 %v3603_v0 }
  0x50   :  { %3152 = vmatpush3.msra.mxu0 %v111_v16  ;;  %3171 = vmatpush3.msra.mxu1 %v119_v17  ;;  %v163_v16 = vld [vmem:[%s4964_s1 + $0x3c0] sm:$0xff]  ;;  %v25_v17 = vld [vmem:[%s4965_s0 + $0x1c] sm:$0x3] }
  0x51   :  { %3153 = vmatprep.subr.mxu0 %v3603_v0  ;;  %3172 = vmatprep.subr.mxu1 %v3603_v0 }
  0x52   :  { %3154 = vmatpush3.msra.mxu0 %v110_v18  ;;  %3173 = vmatpush3.msra.mxu1 %v118_v19  ;;  %v26_v18 = vld [vmem:[%s4965_s0 + $0x1e] sm:$0x3] }
  0x53   :  { %3155 = vmatprep.subr.mxu0 %v3603_v0  ;;  %3174 = vmatprep.subr.mxu1 %v3603_v0  ;;  %v178_v19 = vld [vmem:[%s4964_s1 + $0x438] sm:$0xff] }
  0x54   :  { %3156 = vmatpush3.msra.mxu0 %v109_v20  ;;  %3175 = vmatpush3.msra.mxu1 %v117_v21  ;;  %v186_v20 = vld [vmem:[%s4964_s1 + $0x478] sm:$0xff]  ;;  %v177_v21 = vld [vmem:[%s4964_s1 + $0x430] sm:$0xff] }
  0x55   :  { %3157 = vmatprep.subr.mxu0 %v3603_v0  ;;  %3176 = vmatprep.subr.mxu1 %v3603_v0 }
  0x56   :  { %3158 = vmatpush3.msra.mxu0 %v108_v22  ;;  %3177 = vmatpush3.msra.mxu1 %v116_v23  ;;  %v185_v22 = vld [vmem:[%s4964_s1 + $0x470] sm:$0xff]  ;;  %v176_v23 = vld [vmem:[%s4964_s1 + $0x428] sm:$0xff] }
  0x57   :  { %3159 = vmatprep.subr.mxu0 %v3603_v0  ;;  %3178 = vmatprep.subr.mxu1 %v3603_v0 }
  0x58   :  { %3160 = vmatpush3.msra.mxu0 %v107_v24  ;;  %3161 = vmatprep.mubr.msk.f32.mxu0 %vm3604_vm1, %v3603_v0  ;;  %v184_v24 = vld [vmem:[%s4964_s1 + $0x468] sm:$0xff] }
  0x59   :  { %3179 = vmatpush3.msra.mxu1 %v115_v25  ;;  %3180 = vmatprep.mubr.msk.f32.mxu1 %vm3604_vm1, %v3603_v0  ;;  %v175_v25 = vld [vmem:[%s4964_s1 + $0x420] sm:$0xff] }
  0x5a   :  { %3162 = vmatmul.mubr.msk.f32.vlgmr.msra.gmra.mxu0 %vm299_vm0, %v19_v26  ;;  %3181 = vmatmul.mubr.msk.f32.vlgmr.msra.gmra.mxu1 %vm299_vm0, %v20_v27  ;;  %v183_v26 = vld [vmem:[%s4964_s1 + $0x460] sm:$0xff]  ;;  %v174_v27 = vld [vmem:[%s4964_s1 + $0x418] sm:$0xff] }
  0x5b   :  { %3183 = vmatprep.subr.mxu0 %v3603_v0  ;;  %3202 = vmatprep.subr.mxu1 %v3603_v0 }
  0x5c   :  { %3184 = vmatpush3.msra.mxu0 %v130_v28  ;;  %3203 = vmatpush3.msra.mxu1 %v138_v29  ;;  %v182_v28 = vld [vmem:[%s4964_s1 + $0x458] sm:$0xff]  ;;  %v173_v29 = vld [vmem:[%s4964_s1 + $0x410] sm:$0xff] }
  0x5d   :  { %3185 = vmatprep.subr.mxu0 %v3603_v0  ;;  %3204 = vmatprep.subr.mxu1 %v3603_v0 }
  0x5e   :  { %3186 = vmatpush3.msra.mxu0 %v129_v30  ;;  %3205 = vmatpush3.msra.mxu1 %v137_v31  ;;  %v181_v30 = vld [vmem:[%s4964_s1 + $0x450] sm:$0xff]  ;;  %v172_v31 = vld [vmem:[%s4964_s1 + $0x408] sm:$0xff] }
  0x5f   :  { %3187 = vmatprep.subr.mxu0 %v3603_v0  ;;  %3206 = vmatprep.subr.mxu1 %v3603_v0 }
  0x60   :  { %3188 = vmatpush3.msra.mxu0 %v128_v32  ;;  %3207 = vmatpush3.msra.mxu1 %v136_v33  ;;  %v180_v32 = vld [vmem:[%s4964_s1 + $0x448] sm:$0xff]  ;;  %v171_v33 = vld [vmem:[%s4964_s1 + $0x400] sm:$0xff] }
  0x61   :  { %3189 = vmatprep.subr.mxu0 %v3603_v0  ;;  %3208 = vmatprep.subr.mxu1 %v3603_v0 }
  0x62   :  { %3190 = vmatpush3.msra.mxu0 %v127_v34  ;;  %3209 = vmatpush3.msra.mxu1 %v135_v35  ;;  %v179_v34 = vld [vmem:[%s4964_s1 + $0x440] sm:$0xff] }
  0x63   :  { %3191 = vmatprep.subr.mxu0 %v3603_v0  ;;  %3210 = vmatprep.subr.mxu1 %v3603_v0  ;;  %v27_v35 = vld [vmem:[%s4965_s0 + $0x20] sm:$0x3] }
  0x64   :  { %3192 = vmatpush3.msra.mxu0 %v126_v36  ;;  %3211 = vmatpush3.msra.mxu1 %v134_v37  ;;  %v28_v36 = vld [vmem:[%s4965_s0 + $0x22] sm:$0x3]  ;;  %v194_v37 = vld [vmem:[%s4964_s1 + $0x4b8] sm:$0xff] }
  0x65   :  { %3193 = vmatprep.subr.mxu0 %v3603_v0  ;;  %3212 = vmatprep.subr.mxu1 %v3603_v0 }
  0x66   :  { %3194 = vmatpush3.msra.mxu0 %v125_v38  ;;  %3213 = vmatpush3.msra.mxu1 %v133_v39  ;;  %v202_v38 = vld [vmem:[%s4964_s1 + $0x4f8] sm:$0xff]  ;;  %v193_v39 = vld [vmem:[%s4964_s1 + $0x4b0] sm:$0xff] }
  0x67   :  { %3195 = vmatprep.subr.mxu0 %v3603_v0  ;;  %3214 = vmatprep.subr.mxu1 %v3603_v0 }
  0x68   :  { %3196 = vmatpush3.msra.mxu0 %v124_v40  ;;  %3215 = vmatpush3.msra.mxu1 %v132_v41  ;;  %v201_v40 = vld [vmem:[%s4964_s1 + $0x4f0] sm:$0xff]  ;;  %v192_v41 = vld [vmem:[%s4964_s1 + $0x4a8] sm:$0xff] }
  0x69   :  { %3197 = vmatprep.subr.mxu0 %v3603_v0  ;;  %3216 = vmatprep.subr.mxu1 %v3603_v0 }
  0x6a   :  { %3198 = vmatpush3.msra.mxu0 %v123_v42  ;;  %3199 = vmatprep.mubr.msk.f32.mxu0 %vm3604_vm1, %v3603_v0  ;;  %v200_v42 = vld [vmem:[%s4964_s1 + $0x4e8] sm:$0xff] }
  0x6b   :  { %3217 = vmatpush3.msra.mxu1 %v131_v43  ;;  %3218 = vmatprep.mubr.msk.f32.mxu1 %vm3604_vm1, %v3603_v0  ;;  %v191_v43 = vld [vmem:[%s4964_s1 + $0x4a0] sm:$0xff] }
  0x6c   :  { %3200 = vmatmul.mubr.msk.f32.vlgmr.msra.gmra.mxu0 %vm299_vm0, %v21_v44  ;;  %3219 = vmatmul.mubr.msk.f32.vlgmr.msra.gmra.mxu1 %vm299_vm0, %v22_v45  ;;  %v199_v44 = vld [vmem:[%s4964_s1 + $0x4e0] sm:$0xff]  ;;  %v190_v45 = vld [vmem:[%s4964_s1 + $0x498] sm:$0xff] }
  0x6d   :  { %3221 = vmatprep.subr.mxu0 %v3603_v0  ;;  %3240 = vmatprep.subr.mxu1 %v3603_v0 }
  0x6e   :  { %3222 = vmatpush3.msra.mxu0 %v146_v46  ;;  %3241 = vmatpush3.msra.mxu1 %v154_v47  ;;  %v198_v46 = vld [vmem:[%s4964_s1 + $0x4d8] sm:$0xff]  ;;  %v189_v47 = vld [vmem:[%s4964_s1 + $0x490] sm:$0xff] }
  0x6f   :  { %3223 = vmatprep.subr.mxu0 %v3603_v0  ;;  %3242 = vmatprep.subr.mxu1 %v3603_v0 }
  0x70   :  { %3224 = vmatpush3.msra.mxu0 %v145_v48  ;;  %3243 = vmatpush3.msra.mxu1 %v153_v49  ;;  %v197_v48 = vld [vmem:[%s4964_s1 + $0x4d0] sm:$0xff]  ;;  %v188_v49 = vld [vmem:[%s4964_s1 + $0x488] sm:$0xff] }
  0x71   :  { %3225 = vmatprep.subr.mxu0 %v3603_v0  ;;  %3244 = vmatprep.subr.mxu1 %v3603_v0 }
  0x72   :  { %3226 = vmatpush3.msra.mxu0 %v144_v50  ;;  %3245 = vmatpush3.msra.mxu1 %v152_v51  ;;  %v196_v50 = vld [vmem:[%s4964_s1 + $0x4c8] sm:$0xff]  ;;  %v187_v51 = vld [vmem:[%s4964_s1 + $0x480] sm:$0xff] }
  0x73   :  { %3227 = vmatprep.subr.mxu0 %v3603_v0  ;;  %3246 = vmatprep.subr.mxu1 %v3603_v0 }
  0x74   :  { %3228 = vmatpush3.msra.mxu0 %v143_v52  ;;  %3247 = vmatpush3.msra.mxu1 %v151_v53  ;;  %v195_v52 = vld [vmem:[%s4964_s1 + $0x4c0] sm:$0xff] }
  0x75   :  { %3229 = vmatprep.subr.mxu0 %v3603_v0  ;;  %3248 = vmatprep.subr.mxu1 %v3603_v0  ;;  %v29_v53 = vld [vmem:[%s4965_s0 + $0x24] sm:$0x3] }
  0x76   :  { %3230 = vmatpush3.msra.mxu0 %v142_v54  ;;  %3249 = vmatpush3.msra.mxu1 %v150_v55  ;;  %v30_v54 = vld [vmem:[%s4965_s0 + $0x26] sm:$0x3]  ;;  %v210_v55 = vld [vmem:[%s4964_s1 + $0x538] sm:$0xff] }
  0x77   :  { %3231 = vmatprep.subr.mxu0 %v3603_v0  ;;  %3250 = vmatprep.subr.mxu1 %v3603_v0 }
  0x78   :  { %3232 = vmatpush3.msra.mxu0 %v141_v56  ;;  %3251 = vmatpush3.msra.mxu1 %v149_v57  ;;  %v218_v56 = vld [vmem:[%s4964_s1 + $0x578] sm:$0xff]  ;;  %v209_v57 = vld [vmem:[%s4964_s1 + $0x530] sm:$0xff] }
  0x79   :  { %3233 = vmatprep.subr.mxu0 %v3603_v0  ;;  %3252 = vmatprep.subr.mxu1 %v3603_v0 }
  0x7a   :  { %3234 = vmatpush3.msra.mxu0 %v140_v58  ;;  %3253 = vmatpush3.msra.mxu1 %v148_v59  ;;  %v217_v58 = vld [vmem:[%s4964_s1 + $0x570] sm:$0xff]  ;;  %v208_v59 = vld [vmem:[%s4964_s1 + $0x528] sm:$0xff] }
  0x7b   :  { %3235 = vmatprep.subr.mxu0 %v3603_v0  ;;  %3254 = vmatprep.subr.mxu1 %v3603_v0 }
  0x7c   :  { %3236 = vmatpush3.msra.mxu0 %v139_v60  ;;  %3237 = vmatprep.mubr.msk.f32.mxu0 %vm3604_vm1, %v3603_v0  ;;  %v216_v60 = vld [vmem:[%s4964_s1 + $0x568] sm:$0xff] }
  0x7d   :  { %3255 = vmatpush3.msra.mxu1 %v147_v61  ;;  %3256 = vmatprep.mubr.msk.f32.mxu1 %vm3604_vm1, %v3603_v0  ;;  %v207_v61 = vld [vmem:[%s4964_s1 + $0x520] sm:$0xff] }
  0x7e   :  { %3238 = vmatmul.mubr.msk.f32.vlgmr.msra.gmra.mxu0 %vm299_vm0, %v23_v62  ;;  %3257 = vmatmul.mubr.msk.f32.vlgmr.msra.gmra.mxu1 %vm299_vm0, %v24_v63  ;;  %v215_v62 = vld [vmem:[%s4964_s1 + $0x560] sm:$0xff]  ;;  %v206_v63 = vld [vmem:[%s4964_s1 + $0x518] sm:$0xff] }
  0x7f   :  { %3259 = vmatprep.subr.mxu0 %v3603_v0  ;;  %3278 = vmatprep.subr.mxu1 %v3603_v0 }
  0x80   :  { %3260 = vmatpush3.msra.mxu0 %v162_v1  ;;  %3279 = vmatpush3.msra.mxu1 %v170_v2  ;;  %v214_v1 = vld [vmem:[%s4964_s1 + $0x558] sm:$0xff]  ;;  %v205_v2 = vld [vmem:[%s4964_s1 + $0x510] sm:$0xff] }
  0x81   :  { %3261 = vmatprep.subr.mxu0 %v3603_v0  ;;  %3280 = vmatprep.subr.mxu1 %v3603_v0 }
  0x82   :  { %3262 = vmatpush3.msra.mxu0 %v161_v3  ;;  %3281 = vmatpush3.msra.mxu1 %v169_v4  ;;  %v213_v3 = vld [vmem:[%s4964_s1 + $0x550] sm:$0xff]  ;;  %v204_v4 = vld [vmem:[%s4964_s1 + $0x508] sm:$0xff] }
  0x83   :  { %3263 = vmatprep.subr.mxu0 %v3603_v0  ;;  %3282 = vmatprep.subr.mxu1 %v3603_v0 }
  0x84   :  { %3264 = vmatpush3.msra.mxu0 %v160_v5  ;;  %3283 = vmatpush3.msra.mxu1 %v168_v6  ;;  %v212_v5 = vld [vmem:[%s4964_s1 + $0x548] sm:$0xff]  ;;  %v203_v6 = vld [vmem:[%s4964_s1 + $0x500] sm:$0xff] }
  0x85   :  { %3265 = vmatprep.subr.mxu0 %v3603_v0  ;;  %3284 = vmatprep.subr.mxu1 %v3603_v0 }
  0x86   :  { %3266 = vmatpush3.msra.mxu0 %v159_v7  ;;  %3285 = vmatpush3.msra.mxu1 %v167_v8  ;;  %v211_v7 = vld [vmem:[%s4964_s1 + $0x540] sm:$0xff]  ;;  %v31_v8 = vld [vmem:[%s4965_s0 + $0x28] sm:$0x3] }
  0x87   :  { %3267 = vmatprep.subr.mxu0 %v3603_v0  ;;  %3286 = vmatprep.subr.mxu1 %v3603_v0 }
  0x88   :  { %3268 = vmatpush3.msra.mxu0 %v158_v9  ;;  %3287 = vmatpush3.msra.mxu1 %v166_v10  ;;  %v32_v9 = vld [vmem:[%s4965_s0 + $0x2a] sm:$0x3]  ;;  %v226_v10 = vld [vmem:[%s4964_s1 + $0x5b8] sm:$0xff] }
  0x89   :  { %3269 = vmatprep.subr.mxu0 %v3603_v0  ;;  %3288 = vmatprep.subr.mxu1 %v3603_v0 }
  0x8a   :  { %3270 = vmatpush3.msra.mxu0 %v157_v11  ;;  %3289 = vmatpush3.msra.mxu1 %v165_v12  ;;  %v234_v11 = vld [vmem:[%s4964_s1 + $0x5f8] sm:$0xff]  ;;  %v225_v12 = vld [vmem:[%s4964_s1 + $0x5b0] sm:$0xff] }
  0x8b   :  { %3271 = vmatprep.subr.mxu0 %v3603_v0  ;;  %3290 = vmatprep.subr.mxu1 %v3603_v0 }
  0x8c   :  { %3272 = vmatpush3.msra.mxu0 %v156_v13  ;;  %3291 = vmatpush3.msra.mxu1 %v164_v14  ;;  %v233_v13 = vld [vmem:[%s4964_s1 + $0x5f0] sm:$0xff]  ;;  %v224_v14 = vld [vmem:[%s4964_s1 + $0x5a8] sm:$0xff] }
  0x8d   :  { %3273 = vmatprep.subr.mxu0 %v3603_v0  ;;  %3292 = vmatprep.subr.mxu1 %v3603_v0 }
  0x8e   :  { %3274 = vmatpush3.msra.mxu0 %v155_v15  ;;  %3275 = vmatprep.mubr.msk.f32.mxu0 %vm3604_vm1, %v3603_v0  ;;  %v232_v15 = vld [vmem:[%s4964_s1 + $0x5e8] sm:$0xff] }
  0x8f   :  { %3293 = vmatpush3.msra.mxu1 %v163_v16  ;;  %3294 = vmatprep.mubr.msk.f32.mxu1 %vm3604_vm1, %v3603_v0  ;;  %v223_v16 = vld [vmem:[%s4964_s1 + $0x5a0] sm:$0xff] }
  0x90   :  { %3276 = vmatmul.mubr.msk.f32.vlgmr.msra.gmra.mxu0 %vm299_vm0, %v25_v17  ;;  %3295 = vmatmul.mubr.msk.f32.vlgmr.msra.gmra.mxu1 %vm299_vm0, %v26_v18  ;;  %v231_v17 = vld [vmem:[%s4964_s1 + $0x5e0] sm:$0xff]  ;;  %v222_v18 = vld [vmem:[%s4964_s1 + $0x598] sm:$0xff] }
  0x91   :  { %3297 = vmatprep.subr.mxu0 %v3603_v0  ;;  %3316 = vmatprep.subr.mxu1 %v3603_v0 }
  0x92   :  { %3298 = vmatpush3.msra.mxu0 %v178_v19  ;;  %3317 = vmatpush3.msra.mxu1 %v186_v20  ;;  %v230_v19 = vld [vmem:[%s4964_s1 + $0x5d8] sm:$0xff]  ;;  %v221_v20 = vld [vmem:[%s4964_s1 + $0x590] sm:$0xff] }
  0x93   :  { %3299 = vmatprep.subr.mxu0 %v3603_v0  ;;  %3318 = vmatprep.subr.mxu1 %v3603_v0 }
  0x94   :  { %3300 = vmatpush3.msra.mxu0 %v177_v21  ;;  %3319 = vmatpush3.msra.mxu1 %v185_v22  ;;  %v229_v21 = vld [vmem:[%s4964_s1 + $0x5d0] sm:$0xff]  ;;  %v220_v22 = vld [vmem:[%s4964_s1 + $0x588] sm:$0xff] }
  0x95   :  { %3301 = vmatprep.subr.mxu0 %v3603_v0  ;;  %3320 = vmatprep.subr.mxu1 %v3603_v0 }
  0x96   :  { %3302 = vmatpush3.msra.mxu0 %v176_v23  ;;  %3321 = vmatpush3.msra.mxu1 %v184_v24  ;;  %v228_v23 = vld [vmem:[%s4964_s1 + $0x5c8] sm:$0xff] }
  0x97   :  { %3303 = vmatprep.subr.mxu0 %v3603_v0  ;;  %3322 = vmatprep.subr.mxu1 %v3603_v0 }
  0x98   :  { %3304 = vmatpush3.msra.mxu0 %v175_v25  ;;  %3323 = vmatpush3.msra.mxu1 %v183_v26  ;;  %v219_v26 = vld [vmem:[%s4964_s1 + $0x580] sm:$0xff] }
  0x99   :  { %3305 = vmatprep.subr.mxu0 %v3603_v0  ;;  %3324 = vmatprep.subr.mxu1 %v3603_v0 }
  0x9a   :  { %3306 = vmatpush3.msra.mxu0 %v174_v27  ;;  %3325 = vmatpush3.msra.mxu1 %v182_v28  ;;  %v227_v27 = vld [vmem:[%s4964_s1 + $0x5c0] sm:$0xff] }
  0x9b   :  { %3307 = vmatprep.subr.mxu0 %v3603_v0  ;;  %3326 = vmatprep.subr.mxu1 %v3603_v0 }
  0x9c   :  { %3308 = vmatpush3.msra.mxu0 %v173_v29  ;;  %3327 = vmatpush3.msra.mxu1 %v181_v30  ;;  %v33_v30 = vld [vmem:[%s4965_s0 + $0x2c] sm:$0x3] }
  0x9d   :  { %3309 = vmatprep.subr.mxu0 %v3603_v0  ;;  %3328 = vmatprep.subr.mxu1 %v3603_v0 }
  0x9e   :  { %3310 = vmatpush3.msra.mxu0 %v172_v31  ;;  %3329 = vmatpush3.msra.mxu1 %v180_v32  ;;  %v34_v31 = vld [vmem:[%s4965_s0 + $0x2e] sm:$0x3]  ;;  %v242_v32 = vld [vmem:[%s4964_s1 + $0x638] sm:$0xff] }
  0x9f   :  { %3311 = vmatprep.subr.mxu0 %v3603_v0  ;;  %3330 = vmatprep.subr.mxu1 %v3603_v0 }
  0xa0   :  { %3312 = vmatpush3.msra.mxu0 %v171_v33  ;;  %3313 = vmatprep.mubr.msk.f32.mxu0 %vm3604_vm1, %v3603_v0  ;;  %v250_v33 = vld [vmem:[%s4964_s1 + $0x678] sm:$0xff] }
  0xa1   :  { %3331 = vmatpush3.msra.mxu1 %v179_v34  ;;  %3332 = vmatprep.mubr.msk.f32.mxu1 %vm3604_vm1, %v3603_v0  ;;  %v241_v34 = vld [vmem:[%s4964_s1 + $0x630] sm:$0xff] }
  0xa2   :  { %3314 = vmatmul.mubr.msk.f32.vlgmr.msra.gmra.mxu0 %vm299_vm0, %v27_v35  ;;  %3333 = vmatmul.mubr.msk.f32.vlgmr.msra.gmra.mxu1 %vm299_vm0, %v28_v36  ;;  %v249_v35 = vld [vmem:[%s4964_s1 + $0x670] sm:$0xff]  ;;  %v240_v36 = vld [vmem:[%s4964_s1 + $0x628] sm:$0xff] }
  0xa3   :  { %3335 = vmatprep.subr.mxu0 %v3603_v0  ;;  %3354 = vmatprep.subr.mxu1 %v3603_v0 }
  0xa4   :  { %3336 = vmatpush3.msra.mxu0 %v194_v37  ;;  %3355 = vmatpush3.msra.mxu1 %v202_v38  ;;  %v248_v37 = vld [vmem:[%s4964_s1 + $0x668] sm:$0xff]  ;;  %v239_v38 = vld [vmem:[%s4964_s1 + $0x620] sm:$0xff] }
  0xa5   :  { %3337 = vmatprep.subr.mxu0 %v3603_v0  ;;  %3356 = vmatprep.subr.mxu1 %v3603_v0 }
  0xa6   :  { %3338 = vmatpush3.msra.mxu0 %v193_v39  ;;  %3357 = vmatpush3.msra.mxu1 %v201_v40  ;;  %v247_v39 = vld [vmem:[%s4964_s1 + $0x660] sm:$0xff]  ;;  %v238_v40 = vld [vmem:[%s4964_s1 + $0x618] sm:$0xff] }
  0xa7   :  { %3339 = vmatprep.subr.mxu0 %v3603_v0  ;;  %3358 = vmatprep.subr.mxu1 %v3603_v0 }
  0xa8   :  { %3340 = vmatpush3.msra.mxu0 %v192_v41  ;;  %3359 = vmatpush3.msra.mxu1 %v200_v42  ;;  %v246_v41 = vld [vmem:[%s4964_s1 + $0x658] sm:$0xff]  ;;  %v237_v42 = vld [vmem:[%s4964_s1 + $0x610] sm:$0xff] }
  0xa9   :  { %3341 = vmatprep.subr.mxu0 %v3603_v0  ;;  %3360 = vmatprep.subr.mxu1 %v3603_v0 }
  0xaa   :  { %3342 = vmatpush3.msra.mxu0 %v191_v43  ;;  %3361 = vmatpush3.msra.mxu1 %v199_v44  ;;  %v245_v43 = vld [vmem:[%s4964_s1 + $0x650] sm:$0xff]  ;;  %v236_v44 = vld [vmem:[%s4964_s1 + $0x608] sm:$0xff] }
  0xab   :  { %3343 = vmatprep.subr.mxu0 %v3603_v0  ;;  %3362 = vmatprep.subr.mxu1 %v3603_v0 }
  0xac   :  { %3344 = vmatpush3.msra.mxu0 %v190_v45  ;;  %3363 = vmatpush3.msra.mxu1 %v198_v46  ;;  %v244_v45 = vld [vmem:[%s4964_s1 + $0x648] sm:$0xff] }
  0xad   :  { %3345 = vmatprep.subr.mxu0 %v3603_v0  ;;  %3364 = vmatprep.subr.mxu1 %v3603_v0 }
  0xae   :  { %3346 = vmatpush3.msra.mxu0 %v189_v47  ;;  %3365 = vmatpush3.msra.mxu1 %v197_v48  ;;  %v235_v48 = vld [vmem:[%s4964_s1 + $0x600] sm:$0xff] }
  0xaf   :  { %3347 = vmatprep.subr.mxu0 %v3603_v0  ;;  %3366 = vmatprep.subr.mxu1 %v3603_v0 }
  0xb0   :  { %3348 = vmatpush3.msra.mxu0 %v188_v49  ;;  %3367 = vmatpush3.msra.mxu1 %v196_v50  ;;  %v243_v49 = vld [vmem:[%s4964_s1 + $0x640] sm:$0xff] }
  0xb1   :  { %3349 = vmatprep.subr.mxu0 %v3603_v0  ;;  %3368 = vmatprep.subr.mxu1 %v3603_v0 }
  0xb2   :  { %3350 = vmatpush3.msra.mxu0 %v187_v51  ;;  %3351 = vmatprep.mubr.msk.f32.mxu0 %vm3604_vm1, %v3603_v0 }
  0xb3   :  { %3369 = vmatpush3.msra.mxu1 %v195_v52  ;;  %3370 = vmatprep.mubr.msk.f32.mxu1 %vm3604_vm1, %v3603_v0  ;;  %v35_v52 = vld [vmem:[%s4965_s0 + $0x30] sm:$0x3] }
  0xb4   :  { %3352 = vmatmul.mubr.msk.f32.vlgmr.msra.gmra.mxu0 %vm299_vm0, %v29_v53  ;;  %3371 = vmatmul.mubr.msk.f32.vlgmr.msra.gmra.mxu1 %vm299_vm0, %v30_v54  ;;  %v36_v53 = vld [vmem:[%s4965_s0 + $0x32] sm:$0x3]  ;;  %v258_v54 = vld [vmem:[%s4964_s1 + $0x6b8] sm:$0xff] }
  0xb5   :  { %3373 = vmatprep.subr.mxu0 %v3603_v0  ;;  %3392 = vmatprep.subr.mxu1 %v3603_v0 }
  0xb6   :  { %3374 = vmatpush3.msra.mxu0 %v210_v55  ;;  %3393 = vmatpush3.msra.mxu1 %v218_v56  ;;  %v266_v55 = vld [vmem:[%s4964_s1 + $0x6f8] sm:$0xff]  ;;  %v257_v56 = vld [vmem:[%s4964_s1 + $0x6b0] sm:$0xff] }
  0xb7   :  { %3375 = vmatprep.subr.mxu0 %v3603_v0  ;;  %3394 = vmatprep.subr.mxu1 %v3603_v0 }
  0xb8   :  { %3376 = vmatpush3.msra.mxu0 %v209_v57  ;;  %3395 = vmatpush3.msra.mxu1 %v217_v58  ;;  %v265_v57 = vld [vmem:[%s4964_s1 + $0x6f0] sm:$0xff]  ;;  %v256_v58 = vld [vmem:[%s4964_s1 + $0x6a8] sm:$0xff] }
  0xb9   :  { %3377 = vmatprep.subr.mxu0 %v3603_v0  ;;  %3396 = vmatprep.subr.mxu1 %v3603_v0 }
  0xba   :  { %3378 = vmatpush3.msra.mxu0 %v208_v59  ;;  %3397 = vmatpush3.msra.mxu1 %v216_v60  ;;  %v264_v59 = vld [vmem:[%s4964_s1 + $0x6e8] sm:$0xff]  ;;  %v255_v60 = vld [vmem:[%s4964_s1 + $0x6a0] sm:$0xff] }
  0xbb   :  { %3379 = vmatprep.subr.mxu0 %v3603_v0  ;;  %3398 = vmatprep.subr.mxu1 %v3603_v0 }
  0xbc   :  { %3380 = vmatpush3.msra.mxu0 %v207_v61  ;;  %3399 = vmatpush3.msra.mxu1 %v215_v62  ;;  %v263_v61 = vld [vmem:[%s4964_s1 + $0x6e0] sm:$0xff]  ;;  %v254_v62 = vld [vmem:[%s4964_s1 + $0x698] sm:$0xff] }
  0xbd   :  { %3381 = vmatprep.subr.mxu0 %v3603_v0  ;;  %3400 = vmatprep.subr.mxu1 %v3603_v0 }
  0xbe   :  { %3382 = vmatpush3.msra.mxu0 %v206_v63  ;;  %3401 = vmatpush3.msra.mxu1 %v214_v1  ;;  %v262_v63 = vld [vmem:[%s4964_s1 + $0x6d8] sm:$0xff]  ;;  %v253_v1 = vld [vmem:[%s4964_s1 + $0x690] sm:$0xff] }
  0xbf   :  { %3383 = vmatprep.subr.mxu0 %v3603_v0  ;;  %3402 = vmatprep.subr.mxu1 %v3603_v0 }
  0xc0   :  { %3384 = vmatpush3.msra.mxu0 %v205_v2  ;;  %3403 = vmatpush3.msra.mxu1 %v213_v3  ;;  %v261_v2 = vld [vmem:[%s4964_s1 + $0x6d0] sm:$0xff]  ;;  %v252_v3 = vld [vmem:[%s4964_s1 + $0x688] sm:$0xff] }
  0xc1   :  { %3385 = vmatprep.subr.mxu0 %v3603_v0  ;;  %3404 = vmatprep.subr.mxu1 %v3603_v0 }
  0xc2   :  { %3386 = vmatpush3.msra.mxu0 %v204_v4  ;;  %3405 = vmatpush3.msra.mxu1 %v212_v5  ;;  %v260_v4 = vld [vmem:[%s4964_s1 + $0x6c8] sm:$0xff] }
  0xc3   :  { %3387 = vmatprep.subr.mxu0 %v3603_v0  ;;  %3406 = vmatprep.subr.mxu1 %v3603_v0 }
  0xc4   :  { %3388 = vmatpush3.msra.mxu0 %v203_v6  ;;  %3389 = vmatprep.mubr.msk.f32.mxu0 %vm3604_vm1, %v3603_v0 }
  0xc5   :  { %3407 = vmatpush3.msra.mxu1 %v211_v7  ;;  %3408 = vmatprep.mubr.msk.f32.mxu1 %vm3604_vm1, %v3603_v0  ;;  %v251_v7 = vld [vmem:[%s4964_s1 + $0x680] sm:$0xff] }
  0xc6   :  { %3390 = vmatmul.mubr.msk.f32.vlgmr.msra.gmra.mxu0 %vm299_vm0, %v31_v8  ;;  %3409 = vmatmul.mubr.msk.f32.vlgmr.msra.gmra.mxu1 %vm299_vm0, %v32_v9  ;;  %v259_v8 = vld [vmem:[%s4964_s1 + $0x6c0] sm:$0xff] }
  0xc7   :  { %3411 = vmatprep.subr.mxu0 %v3603_v0  ;;  %3430 = vmatprep.subr.mxu1 %v3603_v0 }
  0xc8   :  { %3412 = vmatpush3.msra.mxu0 %v226_v10  ;;  %3431 = vmatpush3.msra.mxu1 %v234_v11  ;;  %v37_v11 = vld [vmem:[%s4965_s0 + $0x34] sm:$0x3] }
  0xc9   :  { %3413 = vmatprep.subr.mxu0 %v3603_v0  ;;  %3432 = vmatprep.subr.mxu1 %v3603_v0 }
  0xca   :  { %3414 = vmatpush3.msra.mxu0 %v225_v12  ;;  %3433 = vmatpush3.msra.mxu1 %v233_v13  ;;  %v38_v12 = vld [vmem:[%s4965_s0 + $0x36] sm:$0x3]  ;;  %v274_v13 = vld [vmem:[%s4964_s1 + $0x738] sm:$0xff] }
  0xcb   :  { %3415 = vmatprep.subr.mxu0 %v3603_v0  ;;  %3434 = vmatprep.subr.mxu1 %v3603_v0 }
  0xcc   :  { %3416 = vmatpush3.msra.mxu0 %v224_v14  ;;  %3435 = vmatpush3.msra.mxu1 %v232_v15  ;;  %v282_v14 = vld [vmem:[%s4964_s1 + $0x778] sm:$0xff]  ;;  %v273_v15 = vld [vmem:[%s4964_s1 + $0x730] sm:$0xff] }
  0xcd   :  { %3417 = vmatprep.subr.mxu0 %v3603_v0  ;;  %3436 = vmatprep.subr.mxu1 %v3603_v0 }
  0xce   :  { %3418 = vmatpush3.msra.mxu0 %v223_v16  ;;  %3437 = vmatpush3.msra.mxu1 %v231_v17  ;;  %v281_v16 = vld [vmem:[%s4964_s1 + $0x770] sm:$0xff]  ;;  %v272_v17 = vld [vmem:[%s4964_s1 + $0x728] sm:$0xff] }
  0xcf   :  { %3419 = vmatprep.subr.mxu0 %v3603_v0  ;;  %3438 = vmatprep.subr.mxu1 %v3603_v0 }
  0xd0   :  { %3420 = vmatpush3.msra.mxu0 %v222_v18  ;;  %3439 = vmatpush3.msra.mxu1 %v230_v19  ;;  %v280_v18 = vld [vmem:[%s4964_s1 + $0x768] sm:$0xff]  ;;  %v271_v19 = vld [vmem:[%s4964_s1 + $0x720] sm:$0xff] }
  0xd1   :  { %3421 = vmatprep.subr.mxu0 %v3603_v0  ;;  %3440 = vmatprep.subr.mxu1 %v3603_v0 }
  0xd2   :  { %3422 = vmatpush3.msra.mxu0 %v221_v20  ;;  %3441 = vmatpush3.msra.mxu1 %v229_v21  ;;  %v369_v24 = vpop.f32.mrf.mxu0  ;;  %v442_v25 = vpop.f32.mrf.mxu1  ;;  %v279_v20 = vld [vmem:[%s4964_s1 + $0x760] sm:$0xff]  ;;  %v270_v21 = vld [vmem:[%s4964_s1 + $0x718] sm:$0xff] }
  0xd3   :  { %3423 = vmatprep.subr.mxu0 %v3603_v0  ;;  %3442 = vmatprep.subr.mxu1 %v3603_v0  ;;  %2637 = vst.msk [vmem:[%s4966_s2] sm:$0x3] %vm2636_vm2, %v369_v24  ;;  %2638 = vst.msk [vmem:[%s4966_s2 + $0x2] sm:$0x3] %vm2636_vm2, %v442_v25  ;;  %v277_v24 = vld [vmem:[%s4964_s1 + $0x750] sm:$0xff]  ;;  %v268_v25 = vld [vmem:[%s4964_s1 + $0x708] sm:$0xff] }
  0xd4   :  { %3424 = vmatpush3.msra.mxu0 %v220_v22  ;;  %3443 = vmatpush3.msra.mxu1 %v228_v23  ;;  %v3011_v28 = vpop.f32.mrf.mxu0  ;;  %v3030_v29 = vpop.f32.mrf.mxu1  ;;  %v278_v22 = vld [vmem:[%s4964_s1 + $0x758] sm:$0xff]  ;;  %v269_v23 = vld [vmem:[%s4964_s1 + $0x710] sm:$0xff] }
  0xd5   :  { %3425 = vmatprep.subr.mxu0 %v3603_v0  ;;  %3444 = vmatprep.subr.mxu1 %v3603_v0  ;;  %v267_v29 = vld [vmem:[%s4964_s1 + $0x700] sm:$0xff] }
  0xd6   :  { %3426 = vmatpush3.msra.mxu0 %v219_v26  ;;  %3427 = vmatprep.mubr.msk.f32.mxu0 %vm3604_vm1, %v3603_v0  ;;  %v276_v26 = vld [vmem:[%s4964_s1 + $0x748] sm:$0xff] }
  0xd7   :  { %3445 = vmatpush3.msra.mxu1 %v227_v27  ;;  %3446 = vmatprep.mubr.msk.f32.mxu1 %vm3604_vm1, %v3603_v0 }
  0xd8   :  { %3428 = vmatmul.mubr.msk.f32.vlgmr.msra.gmra.mxu0 %vm299_vm0, %v33_v30  ;;  %3447 = vmatmul.mubr.msk.f32.vlgmr.msra.gmra.mxu1 %vm299_vm0, %v34_v31  ;;  %v275_v30 = vld [vmem:[%s4964_s1 + $0x740] sm:$0xff] }
  0xd9   :  { %3449 = vmatprep.subr.mxu0 %v3603_v0  ;;  %3468 = vmatprep.subr.mxu1 %v3603_v0 }
  0xda   :  { %3450 = vmatpush3.msra.mxu0 %v242_v32  ;;  %3469 = vmatpush3.msra.mxu1 %v250_v33  ;;  %v39_v33 = vld [vmem:[%s4965_s0 + $0x38] sm:$0x3] }
  0xdb   :  { %3451 = vmatprep.subr.mxu0 %v3603_v0  ;;  %3470 = vmatprep.subr.mxu1 %v3603_v0 }
  0xdc   :  { %3452 = vmatpush3.msra.mxu0 %v241_v34  ;;  %3471 = vmatpush3.msra.mxu1 %v249_v35  ;;  %v40_v34 = vld [vmem:[%s4965_s0 + $0x3a] sm:$0x3] }
  0xdd   :  { %3453 = vmatprep.subr.mxu0 %v3603_v0  ;;  %3472 = vmatprep.subr.mxu1 %v3603_v0  ;;  %v290_v35 = vld [vmem:[%s4964_s1 + $0x7b8] sm:$0xff] }
  0xde   :  { %3454 = vmatpush3.msra.mxu0 %v240_v36  ;;  %3473 = vmatpush3.msra.mxu1 %v248_v37  ;;  %v298_v36 = vld [vmem:[%s4964_s1 + $0x7f8] sm:$0xff]  ;;  %v289_v37 = vld [vmem:[%s4964_s1 + $0x7b0] sm:$0xff] }
  0xdf   :  { %3455 = vmatprep.subr.mxu0 %v3603_v0  ;;  %3474 = vmatprep.subr.mxu1 %v3603_v0 }
  0xe0   :  { %3456 = vmatpush3.msra.mxu0 %v239_v38  ;;  %3475 = vmatpush3.msra.mxu1 %v247_v39  ;;  %v297_v38 = vld [vmem:[%s4964_s1 + $0x7f0] sm:$0xff]  ;;  %v288_v39 = vld [vmem:[%s4964_s1 + $0x7a8] sm:$0xff] }
  0xe1   :  { %3457 = vmatprep.subr.mxu0 %v3603_v0  ;;  %3476 = vmatprep.subr.mxu1 %v3603_v0 }
  0xe2   :  { %3458 = vmatpush3.msra.mxu0 %v238_v40  ;;  %3477 = vmatpush3.msra.mxu1 %v246_v41  ;;  %v296_v40 = vld [vmem:[%s4964_s1 + $0x7e8] sm:$0xff]  ;;  %v287_v41 = vld [vmem:[%s4964_s1 + $0x7a0] sm:$0xff] }
  0xe3   :  { %3459 = vmatprep.subr.mxu0 %v3603_v0  ;;  %3478 = vmatprep.subr.mxu1 %v3603_v0 }
  0xe4   :  { %3460 = vmatpush3.msra.mxu0 %v237_v42  ;;  %3479 = vmatpush3.msra.mxu1 %v245_v43  ;;  %v515_v46 = vpop.f32.mrf.mxu0  ;;  %v588_v47 = vpop.f32.mrf.mxu1  ;;  %v295_v42 = vld [vmem:[%s4964_s1 + $0x7e0] sm:$0xff]  ;;  %v286_v43 = vld [vmem:[%s4964_s1 + $0x798] sm:$0xff] }
  0xe5   :  { %3461 = vmatprep.subr.mxu0 %v3603_v0  ;;  %3480 = vmatprep.subr.mxu1 %v3603_v0  ;;  %2639 = vst.msk [vmem:[%s4966_s2 + $0x4] sm:$0x3] %vm2636_vm2, %v515_v46  ;;  %2640 = vst.msk [vmem:[%s4966_s2 + $0x6] sm:$0x3] %vm2636_vm2, %v588_v47  ;;  %v293_v46 = vld [vmem:[%s4964_s1 + $0x7d0] sm:$0xff]  ;;  %v284_v47 = vld [vmem:[%s4964_s1 + $0x788] sm:$0xff] }
  0xe6   :  { %3462 = vmatpush3.msra.mxu0 %v236_v44  ;;  %3481 = vmatpush3.msra.mxu1 %v244_v45  ;;  %v3049_v50 = vpop.f32.mrf.mxu0  ;;  %v3068_v51 = vpop.f32.mrf.mxu1  ;;  %v294_v44 = vld [vmem:[%s4964_s1 + $0x7d8] sm:$0xff]  ;;  %v285_v45 = vld [vmem:[%s4964_s1 + $0x790] sm:$0xff] }
  0xe7   :  { %3463 = vmatprep.subr.mxu0 %v3603_v0  ;;  %3482 = vmatprep.subr.mxu1 %v3603_v0  ;;  %v283_v51 = vld [vmem:[%s4964_s1 + $0x780] sm:$0xff] }
  0xe8   :  { %3464 = vmatpush3.msra.mxu0 %v235_v48  ;;  %3465 = vmatprep.mubr.msk.f32.mxu0 %vm3604_vm1, %v3603_v0  ;;  %v292_v48 = vld [vmem:[%s4964_s1 + $0x7c8] sm:$0xff] }
  0xe9   :  { %3483 = vmatpush3.msra.mxu1 %v243_v49  ;;  %3484 = vmatprep.mubr.msk.f32.mxu1 %vm3604_vm1, %v3603_v0 }
  0xea   :  { %3466 = vmatmul.mubr.msk.f32.vlgmr.msra.gmra.mxu0 %vm299_vm0, %v35_v52  ;;  %3485 = vmatmul.mubr.msk.f32.vlgmr.msra.gmra.mxu1 %vm299_vm0, %v36_v53  ;;  %v291_v52 = vld [vmem:[%s4964_s1 + $0x7c0] sm:$0xff] }
  0xeb   :  { %3487 = vmatprep.subr.mxu0 %v3603_v0  ;;  %3506 = vmatprep.subr.mxu1 %v3603_v0 }
  0xec   :  { %3488 = vmatpush3.msra.mxu0 %v258_v54  ;;  %3507 = vmatpush3.msra.mxu1 %v266_v55  ;;  %v41_v55 = vld [vmem:[%s4965_s0 + $0x3c] sm:$0x3] }
  0xed   :  { %3489 = vmatprep.subr.mxu0 %v3603_v0  ;;  %3508 = vmatprep.subr.mxu1 %v3603_v0 }
  0xee   :  { %3490 = vmatpush3.msra.mxu0 %v257_v56  ;;  %3509 = vmatpush3.msra.mxu1 %v265_v57  ;;  %v42_v56 = vld [vmem:[%s4965_s0 + $0x3e] sm:$0x3] }
  0xef   :  { %3491 = vmatprep.subr.mxu0 %v3603_v0  ;;  %3510 = vmatprep.subr.mxu1 %v3603_v0 }
  0xf0   :  { %3492 = vmatpush3.msra.mxu0 %v256_v58  ;;  %3511 = vmatpush3.msra.mxu1 %v264_v59 }
  0xf1   :  { %3493 = vmatprep.subr.mxu0 %v3603_v0  ;;  %3512 = vmatprep.subr.mxu1 %v3603_v0 }
  0xf2   :  { %3494 = vmatpush3.msra.mxu0 %v255_v60  ;;  %3513 = vmatpush3.msra.mxu1 %v263_v61 }
  0xf3   :  { %3495 = vmatprep.subr.mxu0 %v3603_v0  ;;  %3514 = vmatprep.subr.mxu1 %v3603_v0 }
  0xf4   :  { %3496 = vmatpush3.msra.mxu0 %v254_v62  ;;  %3515 = vmatpush3.msra.mxu1 %v262_v63 }
  0xf5   :  { %3497 = vmatprep.subr.mxu0 %v3603_v0  ;;  %3516 = vmatprep.subr.mxu1 %v3603_v0 }
  0xf6   :  { %3498 = vmatpush3.msra.mxu0 %v253_v1  ;;  %3517 = vmatpush3.msra.mxu1 %v261_v2  ;;  %v661_v5 = vpop.f32.mrf.mxu0  ;;  %v734_v6 = vpop.f32.mrf.mxu1 }
  0xf7   :  { %3499 = vmatprep.subr.mxu0 %v3603_v0  ;;  %3518 = vmatprep.subr.mxu1 %v3603_v0  ;;  %2641 = vst.msk [vmem:[%s4966_s2 + $0x8] sm:$0x3] %vm2636_vm2, %v661_v5  ;;  %2642 = vst.msk [vmem:[%s4966_s2 + $0xa] sm:$0x3] %vm2636_vm2, %v734_v6 }
  0xf8   :  { %3500 = vmatpush3.msra.mxu0 %v252_v3  ;;  %3519 = vmatpush3.msra.mxu1 %v260_v4  ;;  %v3087_v9 = vpop.f32.mrf.mxu0  ;;  %v3106_v10 = vpop.f32.mrf.mxu1 }
  0xf9   :  { %3501 = vmatprep.subr.mxu0 %v3603_v0  ;;  %3520 = vmatprep.subr.mxu1 %v3603_v0 }
  0xfa   :  { %3502 = vmatpush3.msra.mxu0 %v251_v7  ;;  %3503 = vmatprep.mubr.msk.f32.mxu0 %vm3604_vm1, %v3603_v0 }
  0xfb   :  { %3521 = vmatpush3.msra.mxu1 %v259_v8  ;;  %3522 = vmatprep.mubr.msk.f32.mxu1 %vm3604_vm1, %v3603_v0 }
  0xfc   :  { %3504 = vmatmul.mubr.msk.f32.vlgmr.msra.gmra.mxu0 %vm299_vm0, %v37_v11  ;;  %3523 = vmatmul.mubr.msk.f32.vlgmr.msra.gmra.mxu1 %vm299_vm0, %v38_v12 }
  0xfd   :  { %3525 = vmatprep.subr.mxu0 %v3603_v0  ;;  %3544 = vmatprep.subr.mxu1 %v3603_v0 }
  0xfe   :  { %3526 = vmatpush3.msra.mxu0 %v274_v13  ;;  %3545 = vmatpush3.msra.mxu1 %v282_v14 }
  0xff   :  { %3527 = vmatprep.subr.mxu0 %v3603_v0  ;;  %3546 = vmatprep.subr.mxu1 %v3603_v0 }
 0x100   :  { %3528 = vmatpush3.msra.mxu0 %v273_v15  ;;  %3547 = vmatpush3.msra.mxu1 %v281_v16 }
 0x101   :  { %3529 = vmatprep.subr.mxu0 %v3603_v0  ;;  %3548 = vmatprep.subr.mxu1 %v3603_v0 }
 0x102   :  { %3530 = vmatpush3.msra.mxu0 %v272_v17  ;;  %3549 = vmatpush3.msra.mxu1 %v280_v18 }
 0x103   :  { %3531 = vmatprep.subr.mxu0 %v3603_v0  ;;  %3550 = vmatprep.subr.mxu1 %v3603_v0 }
 0x104   :  { %3532 = vmatpush3.msra.mxu0 %v271_v19  ;;  %3551 = vmatpush3.msra.mxu1 %v279_v20 }
 0x105   :  { %3533 = vmatprep.subr.mxu0 %v3603_v0  ;;  %3552 = vmatprep.subr.mxu1 %v3603_v0 }
 0x106   :  { %3534 = vmatpush3.msra.mxu0 %v270_v21  ;;  %3553 = vmatpush3.msra.mxu1 %v278_v22 }
 0x107   :  { %3535 = vmatprep.subr.mxu0 %v3603_v0  ;;  %3554 = vmatprep.subr.mxu1 %v3603_v0 }
 0x108   :  { %3536 = vmatpush3.msra.mxu0 %v269_v23  ;;  %3555 = vmatpush3.msra.mxu1 %v277_v24  ;;  %v807_v27 = vpop.f32.mrf.mxu0  ;;  %v880_v28 = vpop.f32.mrf.mxu1 }
 0x109   :  { %3537 = vmatprep.subr.mxu0 %v3603_v0  ;;  %3556 = vmatprep.subr.mxu1 %v3603_v0  ;;  %2643 = vst.msk [vmem:[%s4966_s2 + $0xc] sm:$0x3] %vm2636_vm2, %v807_v27  ;;  %2644 = vst.msk [vmem:[%s4966_s2 + $0xe] sm:$0x3] %vm2636_vm2, %v880_v28 }
 0x10a   :  { %3538 = vmatpush3.msra.mxu0 %v268_v25  ;;  %3557 = vmatpush3.msra.mxu1 %v276_v26  ;;  %v3125_v31 = vpop.f32.mrf.mxu0  ;;  %v3144_v32 = vpop.f32.mrf.mxu1 }
 0x10b   :  { %3539 = vmatprep.subr.mxu0 %v3603_v0  ;;  %3558 = vmatprep.subr.mxu1 %v3603_v0 }
 0x10c   :  { %3540 = vmatpush3.msra.mxu0 %v267_v29  ;;  %3541 = vmatprep.mubr.msk.f32.mxu0 %vm3604_vm1, %v3603_v0 }
 0x10d   :  { %3559 = vmatpush3.msra.mxu1 %v275_v30  ;;  %3560 = vmatprep.mubr.msk.f32.mxu1 %vm3604_vm1, %v3603_v0 }
 0x10e   :  { %3542 = vmatmul.mubr.msk.f32.vlgmr.msra.gmra.mxu0 %vm299_vm0, %v39_v33  ;;  %3561 = vmatmul.mubr.msk.f32.vlgmr.msra.gmra.mxu1 %vm299_vm0, %v40_v34 }
 0x10f   :  { %3563 = vmatprep.subr.mxu0 %v3603_v0  ;;  %3582 = vmatprep.subr.mxu1 %v3603_v0 }
 0x110   :  { %3564 = vmatpush3.msra.mxu0 %v290_v35  ;;  %3583 = vmatpush3.msra.mxu1 %v298_v36 }
 0x111   :  { %3565 = vmatprep.subr.mxu0 %v3603_v0  ;;  %3584 = vmatprep.subr.mxu1 %v3603_v0 }
 0x112   :  { %3566 = vmatpush3.msra.mxu0 %v289_v37  ;;  %3585 = vmatpush3.msra.mxu1 %v297_v38 }
 0x113   :  { %3567 = vmatprep.subr.mxu0 %v3603_v0  ;;  %3586 = vmatprep.subr.mxu1 %v3603_v0 }
 0x114   :  { %3568 = vmatpush3.msra.mxu0 %v288_v39  ;;  %3587 = vmatpush3.msra.mxu1 %v296_v40 }
 0x115   :  { %3569 = vmatprep.subr.mxu0 %v3603_v0  ;;  %3588 = vmatprep.subr.mxu1 %v3603_v0 }
 0x116   :  { %3570 = vmatpush3.msra.mxu0 %v287_v41  ;;  %3589 = vmatpush3.msra.mxu1 %v295_v42 }
 0x117   :  { %3571 = vmatprep.subr.mxu0 %v3603_v0  ;;  %3590 = vmatprep.subr.mxu1 %v3603_v0 }
 0x118   :  { %3572 = vmatpush3.msra.mxu0 %v286_v43  ;;  %3591 = vmatpush3.msra.mxu1 %v294_v44 }
 0x119   :  { %3573 = vmatprep.subr.mxu0 %v3603_v0  ;;  %3592 = vmatprep.subr.mxu1 %v3603_v0 }
 0x11a   :  { %3574 = vmatpush3.msra.mxu0 %v285_v45  ;;  %3593 = vmatpush3.msra.mxu1 %v293_v46  ;;  %v953_v49 = vpop.f32.mrf.mxu0  ;;  %v1026_v50 = vpop.f32.mrf.mxu1 }
 0x11b   :  { %3575 = vmatprep.subr.mxu0 %v3603_v0  ;;  %3594 = vmatprep.subr.mxu1 %v3603_v0  ;;  %2645 = vst.msk [vmem:[%s4966_s2 + $0x10] sm:$0x3] %vm2636_vm2, %v953_v49  ;;  %2646 = vst.msk [vmem:[%s4966_s2 + $0x12] sm:$0x3] %vm2636_vm2, %v1026_v50 }
 0x11c   :  { %3576 = vmatpush3.msra.mxu0 %v284_v47  ;;  %3595 = vmatpush3.msra.mxu1 %v292_v48  ;;  %v3163_v53 = vpop.f32.mrf.mxu0  ;;  %v3182_v54 = vpop.f32.mrf.mxu1 }
 0x11d   :  { %3577 = vmatprep.subr.mxu0 %v3603_v0  ;;  %3596 = vmatprep.subr.mxu1 %v3603_v0 }
 0x11e   :  { %3578 = vmatpush3.msra.mxu0 %v283_v51  ;;  %3579 = vmatprep.mubr.msk.f32.mxu0 %vm3604_vm1, %v3603_v0 }
 0x11f   :  { %3597 = vmatpush3.msra.mxu1 %v291_v52  ;;  %3598 = vmatprep.mubr.msk.f32.mxu1 %vm3604_vm1, %v3603_v0 }
 0x120   :  { %3580 = vmatmul.mubr.msk.f32.vlgmr.msra.gmra.mxu0 %vm299_vm0, %v41_v55  ;;  %3599 = vmatmul.mubr.msk.f32.vlgmr.msra.gmra.mxu1 %vm299_vm0, %v42_v56 }
 0x12c   :  { %v1099_v57 = vpop.f32.mrf.mxu0  ;;  %v1172_v58 = vpop.f32.mrf.mxu1 }
 0x12d   :  { %2647 = vst.msk [vmem:[%s4966_s2 + $0x14] sm:$0x3] %vm2636_vm2, %v1099_v57  ;;  %2648 = vst.msk [vmem:[%s4966_s2 + $0x16] sm:$0x3] %vm2636_vm2, %v1172_v58 }
 0x12e   :  { %v3201_v59 = vpop.f32.mrf.mxu0  ;;  %v3220_v60 = vpop.f32.mrf.mxu1 }
 0x13e   :  { %v1245_v61 = vpop.f32.mrf.mxu0  ;;  %v1318_v0 = vpop.f32.mrf.mxu1 }
 0x13f   :  { %2649 = vst.msk [vmem:[%s4966_s2 + $0x18] sm:$0x3] %vm2636_vm2, %v1245_v61  ;;  %2650 = vst.msk [vmem:[%s4966_s2 + $0x1a] sm:$0x3] %vm2636_vm2, %v1318_v0 }
 0x140   :  { %v3239_v62 = vpop.f32.mrf.mxu0  ;;  %v3258_v63 = vpop.f32.mrf.mxu1 }
 0x150   :  { %v1391_v1 = vpop.f32.mrf.mxu0  ;;  %v1464_v2 = vpop.f32.mrf.mxu1 }
 0x151   :  { %2651 = vst.msk [vmem:[%s4966_s2 + $0x1c] sm:$0x3] %vm2636_vm2, %v1391_v1  ;;  %2652 = vst.msk [vmem:[%s4966_s2 + $0x1e] sm:$0x3] %vm2636_vm2, %v1464_v2 }
 0x152   :  { %v3277_v3 = vpop.f32.mrf.mxu0  ;;  %v3296_v4 = vpop.f32.mrf.mxu1 }
 0x162   :  { %v1537_v5 = vpop.f32.mrf.mxu0  ;;  %v1610_v6 = vpop.f32.mrf.mxu1 }
 0x163   :  { %2653 = vst.msk [vmem:[%s4966_s2 + $0x20] sm:$0x3] %vm2636_vm2, %v1537_v5  ;;  %2654 = vst.msk [vmem:[%s4966_s2 + $0x22] sm:$0x3] %vm2636_vm2, %v1610_v6 }
 0x164   :  { %v3315_v7 = vpop.f32.mrf.mxu0  ;;  %v3334_v8 = vpop.f32.mrf.mxu1 }
 0x174   :  { %v1683_v9 = vpop.f32.mrf.mxu0  ;;  %v1756_v10 = vpop.f32.mrf.mxu1 }
 0x175   :  { %2655 = vst.msk [vmem:[%s4966_s2 + $0x24] sm:$0x3] %vm2636_vm2, %v1683_v9  ;;  %2656 = vst.msk [vmem:[%s4966_s2 + $0x26] sm:$0x3] %vm2636_vm2, %v1756_v10 }
 0x176   :  { %v3353_v11 = vpop.f32.mrf.mxu0  ;;  %v3372_v12 = vpop.f32.mrf.mxu1 }
 0x186   :  { %v1829_v13 = vpop.f32.mrf.mxu0  ;;  %v1902_v14 = vpop.f32.mrf.mxu1 }
 0x187   :  { %2657 = vst.msk [vmem:[%s4966_s2 + $0x28] sm:$0x3] %vm2636_vm2, %v1829_v13  ;;  %2658 = vst.msk [vmem:[%s4966_s2 + $0x2a] sm:$0x3] %vm2636_vm2, %v1902_v14 }
 0x188   :  { %v3391_v15 = vpop.f32.mrf.mxu0  ;;  %v3410_v16 = vpop.f32.mrf.mxu1 }
 0x198   :  { %v1975_v17 = vpop.f32.mrf.mxu0  ;;  %v2048_v18 = vpop.f32.mrf.mxu1 }
 0x199   :  { %2659 = vst.msk [vmem:[%s4966_s2 + $0x2c] sm:$0x3] %vm2636_vm2, %v1975_v17  ;;  %2660 = vst.msk [vmem:[%s4966_s2 + $0x2e] sm:$0x3] %vm2636_vm2, %v2048_v18 }
 0x19a   :  { %v3429_v19 = vpop.f32.mrf.mxu0  ;;  %v3448_v20 = vpop.f32.mrf.mxu1 }
 0x1aa   :  { %v2121_v21 = vpop.f32.mrf.mxu0  ;;  %v2194_v22 = vpop.f32.mrf.mxu1 }
 0x1ab   :  { %2661 = vst.msk [vmem:[%s4966_s2 + $0x30] sm:$0x3] %vm2636_vm2, %v2121_v21  ;;  %2662 = vst.msk [vmem:[%s4966_s2 + $0x32] sm:$0x3] %vm2636_vm2, %v2194_v22 }
 0x1ac   :  { %v3467_v23 = vpop.f32.mrf.mxu0  ;;  %v3486_v24 = vpop.f32.mrf.mxu1 }
 0x1bc   :  { %v2267_v25 = vpop.f32.mrf.mxu0  ;;  %v2340_v26 = vpop.f32.mrf.mxu1 }
 0x1bd   :  { %2663 = vst.msk [vmem:[%s4966_s2 + $0x34] sm:$0x3] %vm2636_vm2, %v2267_v25  ;;  %2664 = vst.msk [vmem:[%s4966_s2 + $0x36] sm:$0x3] %vm2636_vm2, %v2340_v26 }
 0x1be   :  { %v3505_v27 = vpop.f32.mrf.mxu0  ;;  %v3524_v28 = vpop.f32.mrf.mxu1 }
 0x1ce   :  { %v2413_v29 = vpop.f32.mrf.mxu0  ;;  %v2486_v30 = vpop.f32.mrf.mxu1 }
 0x1cf   :  { %2665 = vst.msk [vmem:[%s4966_s2 + $0x38] sm:$0x3] %vm2636_vm2, %v2413_v29  ;;  %2666 = vst.msk [vmem:[%s4966_s2 + $0x3a] sm:$0x3] %vm2636_vm2, %v2486_v30 }
 0x1d0   :  { %v3543_v31 = vpop.f32.mrf.mxu0  ;;  %v3562_v32 = vpop.f32.mrf.mxu1 }
 0x1e0   :  { %v2559_v33 = vpop.f32.mrf.mxu0  ;;  %v2632_v34 = vpop.f32.mrf.mxu1 }
 0x1e1   :  { %2667 = vst.msk [vmem:[%s4966_s2 + $0x3c] sm:$0x3] %vm2636_vm2, %v2559_v33  ;;  %2668 = vst.msk [vmem:[%s4966_s2 + $0x3e] sm:$0x3] %vm2636_vm2, %v2632_v34 }
 0x1e2   :  { %v3581_v35 = vpop.f32.mrf.mxu0  ;;  %v3600_v36 = vpop.f32.mrf.mxu1 }

// kernel: reverse.8
= control target key start
LH: loop header
LB: loop body
LE: loop exit
PB: predicated region body
PF: predicated region fallthrough
CT: control target
= control target key end

     0   :  { %s584_s0 = inlined_call_operand.vmem [shape: f32[2,32,18,8], index: 0, kind: input, shape index: {}]   ;;  %s585_s1 = inlined_call_operand.vmem [shape: f32[2,32,18,8], index: 1, kind: output, shape index: {}]  }
   0x1   :  { %v192_v0 = vld [vmem:[%s584_s0 + $0xa8] sm:$0xff]  ;;  %v195_v2 = vld [vmem:[%s584_s0 + $0x90] sm:$0xff]  ;;  %v199_v4 = vld [vmem:[%s584_s0 + $0x78] sm:$0xff] }
   0x2   :  { %v193_v1 = vld [vmem:[%s584_s0 + $0x168] sm:$0xff]  ;;  %4 = vst [vmem:[%s585_s1] sm:$0xff] %v192_v0  ;;  %196 = vst [vmem:[%s585_s1 + $0x18] sm:$0xff] %v195_v2  ;;  %v197_v3 = vld [vmem:[%s584_s0 + $0x150] sm:$0xff] }
   0x3   :  { %194 = vst [vmem:[%s585_s1 + $0xc0] sm:$0xff] %v193_v1  ;;  %v201_v5 = vld [vmem:[%s584_s0 + $0x138] sm:$0xff]  ;;  %198 = vst [vmem:[%s585_s1 + $0xd8] sm:$0xff] %v197_v3  ;;  %v203_v6 = vld [vmem:[%s584_s0 + $0x60] sm:$0xff] }
   0x4   :  { %200 = vst [vmem:[%s585_s1 + $0x30] sm:$0xff] %v199_v4  ;;  %202 = vst [vmem:[%s585_s1 + $0xf0] sm:$0xff] %v201_v5  ;;  %v205_v7 = vld [vmem:[%s584_s0 + $0x120] sm:$0xff]  ;;  %v207_v8 = vld [vmem:[%s584_s0 + $0x48] sm:$0xff] }
   0x5   :  { %204 = vst [vmem:[%s585_s1 + $0x48] sm:$0xff] %v203_v6  ;;  %206 = vst [vmem:[%s585_s1 + $0x108] sm:$0xff] %v205_v7  ;;  %v209_v9 = vld [vmem:[%s584_s0 + $0x108] sm:$0xff]  ;;  %v211_v10 = vld [vmem:[%s584_s0 + $0x30] sm:$0xff] }
   0x6   :  { %208 = vst [vmem:[%s585_s1 + $0x60] sm:$0xff] %v207_v8  ;;  %v213_v11 = vld [vmem:[%s584_s0 + $0xf0] sm:$0xff]  ;;  %210 = vst [vmem:[%s585_s1 + $0x120] sm:$0xff] %v209_v9  ;;  %v215_v12 = vld [vmem:[%s584_s0 + $0x18] sm:$0xff] }
   0x7   :  { %212 = vst [vmem:[%s585_s1 + $0x78] sm:$0xff] %v211_v10  ;;  %214 = vst [vmem:[%s585_s1 + $0x138] sm:$0xff] %v213_v11  ;;  %v217_v13 = vld [vmem:[%s584_s0 + $0xd8] sm:$0xff]  ;;  %v57_v14 = vld [vmem:[%s584_s0] sm:$0xff] }
   0x8   :  { %216 = vst [vmem:[%s585_s1 + $0x90] sm:$0xff] %v215_v12  ;;  %218 = vst [vmem:[%s585_s1 + $0x150] sm:$0xff] %v217_v13  ;;  %v220_v15 = vld [vmem:[%s584_s0 + $0xc0] sm:$0xff]  ;;  %v222_v16 = vld [vmem:[%s584_s0 + $0xb0] sm:$0xff] }
   0x9   :  { %219 = vst [vmem:[%s585_s1 + $0xa8] sm:$0xff] %v57_v14  ;;  %v224_v17 = vld [vmem:[%s584_s0 + $0x170] sm:$0xff]  ;;  %221 = vst [vmem:[%s585_s1 + $0x168] sm:$0xff] %v220_v15  ;;  %v226_v18 = vld [vmem:[%s584_s0 + $0x98] sm:$0xff] }
   0xa   :  { %223 = vst [vmem:[%s585_s1 + $0x8] sm:$0xff] %v222_v16  ;;  %225 = vst [vmem:[%s585_s1 + $0xc8] sm:$0xff] %v224_v17  ;;  %v228_v19 = vld [vmem:[%s584_s0 + $0x158] sm:$0xff]  ;;  %v230_v20 = vld [vmem:[%s584_s0 + $0x80] sm:$0xff] }
   0xb   :  { %227 = vst [vmem:[%s585_s1 + $0x20] sm:$0xff] %v226_v18  ;;  %229 = vst [vmem:[%s585_s1 + $0xe0] sm:$0xff] %v228_v19  ;;  %v232_v21 = vld [vmem:[%s584_s0 + $0x140] sm:$0xff]  ;;  %v234_v22 = vld [vmem:[%s584_s0 + $0x68] sm:$0xff] }
   0xc   :  { %231 = vst [vmem:[%s585_s1 + $0x38] sm:$0xff] %v230_v20  ;;  %v236_v23 = vld [vmem:[%s584_s0 + $0x128] sm:$0xff]  ;;  %233 = vst [vmem:[%s585_s1 + $0xf8] sm:$0xff] %v232_v21  ;;  %v238_v24 = vld [vmem:[%s584_s0 + $0x50] sm:$0xff] }
   0xd   :  { %235 = vst [vmem:[%s585_s1 + $0x50] sm:$0xff] %v234_v22  ;;  %237 = vst [vmem:[%s585_s1 + $0x110] sm:$0xff] %v236_v23  ;;  %v240_v25 = vld [vmem:[%s584_s0 + $0x110] sm:$0xff]  ;;  %v242_v26 = vld [vmem:[%s584_s0 + $0x38] sm:$0xff] }
   0xe   :  { %239 = vst [vmem:[%s585_s1 + $0x68] sm:$0xff] %v238_v24  ;;  %241 = vst [vmem:[%s585_s1 + $0x128] sm:$0xff] %v240_v25  ;;  %v244_v27 = vld [vmem:[%s584_s0 + $0xf8] sm:$0xff]  ;;  %v246_v28 = vld [vmem:[%s584_s0 + $0x20] sm:$0xff] }
   0xf   :  { %243 = vst [vmem:[%s585_s1 + $0x80] sm:$0xff] %v242_v26  ;;  %v248_v29 = vld [vmem:[%s584_s0 + $0xe0] sm:$0xff]  ;;  %245 = vst [vmem:[%s585_s1 + $0x140] sm:$0xff] %v244_v27  ;;  %v250_v30 = vld [vmem:[%s584_s0 + $0x8] sm:$0xff] }
  0x10   :  { %247 = vst [vmem:[%s585_s1 + $0x98] sm:$0xff] %v246_v28  ;;  %249 = vst [vmem:[%s585_s1 + $0x158] sm:$0xff] %v248_v29  ;;  %v252_v31 = vld [vmem:[%s584_s0 + $0xc8] sm:$0xff]  ;;  %v254_v32 = vld [vmem:[%s584_s0 + $0xb8] sm:$0xff] }
  0x11   :  { %251 = vst [vmem:[%s585_s1 + $0xb0] sm:$0xff] %v250_v30  ;;  %253 = vst [vmem:[%s585_s1 + $0x170] sm:$0xff] %v252_v31  ;;  %v256_v33 = vld [vmem:[%s584_s0 + $0x178] sm:$0xff]  ;;  %v258_v34 = vld [vmem:[%s584_s0 + $0xa0] sm:$0xff] }
  0x12   :  { %255 = vst [vmem:[%s585_s1 + $0x10] sm:$0xff] %v254_v32  ;;  %v260_v35 = vld [vmem:[%s584_s0 + $0x160] sm:$0xff]  ;;  %257 = vst [vmem:[%s585_s1 + $0xd0] sm:$0xff] %v256_v33  ;;  %v262_v36 = vld [vmem:[%s584_s0 + $0x88] sm:$0xff] }
  0x13   :  { %259 = vst [vmem:[%s585_s1 + $0x28] sm:$0xff] %v258_v34  ;;  %261 = vst [vmem:[%s585_s1 + $0xe8] sm:$0xff] %v260_v35  ;;  %v264_v37 = vld [vmem:[%s584_s0 + $0x148] sm:$0xff]  ;;  %v266_v38 = vld [vmem:[%s584_s0 + $0x70] sm:$0xff] }
  0x14   :  { %263 = vst [vmem:[%s585_s1 + $0x40] sm:$0xff] %v262_v36  ;;  %265 = vst [vmem:[%s585_s1 + $0x100] sm:$0xff] %v264_v37  ;;  %v268_v39 = vld [vmem:[%s584_s0 + $0x130] sm:$0xff]  ;;  %v270_v40 = vld [vmem:[%s584_s0 + $0x58] sm:$0xff] }
  0x15   :  { %267 = vst [vmem:[%s585_s1 + $0x58] sm:$0xff] %v266_v38  ;;  %v272_v41 = vld [vmem:[%s584_s0 + $0x118] sm:$0xff]  ;;  %269 = vst [vmem:[%s585_s1 + $0x118] sm:$0xff] %v268_v39  ;;  %v274_v42 = vld [vmem:[%s584_s0 + $0x40] sm:$0xff] }
  0x16   :  { %271 = vst [vmem:[%s585_s1 + $0x70] sm:$0xff] %v270_v40  ;;  %273 = vst [vmem:[%s585_s1 + $0x130] sm:$0xff] %v272_v41  ;;  %v276_v43 = vld [vmem:[%s584_s0 + $0x100] sm:$0xff]  ;;  %v278_v44 = vld [vmem:[%s584_s0 + $0x28] sm:$0xff] }
  0x17   :  { %275 = vst [vmem:[%s585_s1 + $0x88] sm:$0xff] %v274_v42  ;;  %277 = vst [vmem:[%s585_s1 + $0x148] sm:$0xff] %v276_v43  ;;  %v280_v45 = vld [vmem:[%s584_s0 + $0xe8] sm:$0xff]  ;;  %v282_v46 = vld [vmem:[%s584_s0 + $0x10] sm:$0xff] }
  0x18   :  { %279 = vst [vmem:[%s585_s1 + $0xa0] sm:$0xff] %v278_v44  ;;  %v284_v47 = vld [vmem:[%s584_s0 + $0xd0] sm:$0xff]  ;;  %281 = vst [vmem:[%s585_s1 + $0x160] sm:$0xff] %v280_v45 }
  0x19   :  { %283 = vst [vmem:[%s585_s1 + $0xb8] sm:$0xff] %v282_v46  ;;  %285 = vst [vmem:[%s585_s1 + $0x178] sm:$0xff] %v284_v47 }

// kernel: fno2d_forward.12
= control target key start
LH: loop header
LB: loop body
LE: loop exit
PB: predicated region body
PF: predicated region fallthrough
CT: control target
= control target key end

     0   :  { %v2066_v0 = vmov 0.0   ;;  %vm109_vm0 = vcmask 261120   ;;  %vm2067_vm1 = vmmov 0   ;;  %s3565_s2 = inlined_call_operand.vmem [shape: f32[32,32], index: 2, kind: input, shape index: {}]   ;;  %s3566_s0 = inlined_call_operand.vmem [shape: f32[648,32], index: 0, kind: input, shape index: {}]   ;;  %s3567_s3 = inlined_call_operand.vmem [shape: f32[1,32], index: 3, kind: input, shape index: {}]   ;;  %s3568_s1 = inlined_call_operand.vmem [shape: f32[648,32], index: 1, kind: input, shape index: {}]   ;;  %s3569_s4 = inlined_call_operand.vmem [shape: f32[648,32], index: 4, kind: output, shape index: {}]  }
   0x1   :  { %1642 = vmatprep.subr.mxu0 %v2066_v0  ;;  %1893 = vmatprep.subr.mxu1 %v2066_v0  ;;  %v101_v1 = vld [vmem:[%s3565_s2 + $0x18] sm:$0xff]  ;;  %v100_v2 = vld [vmem:[%s3565_s2 + $0x10] sm:$0xff]  ;;  %v99_v3 = vld [vmem:[%s3565_s2 + $0x8] sm:$0xff] }
   0x2   :  { %1643 = vmatpush3.msra.mxu0 %v101_v1  ;;  %1897 = vmatpush3.msra.mxu1 %v101_v1  ;;  %v98_v4 = vld [vmem:[%s3565_s2] sm:$0xff]  ;;  %v58_v6 = vld [vmem:[%s3566_s0 + $0x148] sm:$0xff]  ;;  %v59_v8 = vld [vmem:[%s3566_s0 + $0x150] sm:$0xff] }
   0x3   :  { %1644 = vmatprep.subr.mxu0 %v2066_v0  ;;  %1894 = vmatprep.subr.mxu1 %v2066_v0  ;;  %v17_v5 = vld [vmem:[%s3566_s0] sm:$0xff]  ;;  %v18_v7 = vld [vmem:[%s3566_s0 + $0x8] sm:$0xff]  ;;  %v19_v9 = vld [vmem:[%s3566_s0 + $0x10] sm:$0xff] }
   0x4   :  { %1645 = vmatpush3.msra.mxu0 %v100_v2  ;;  %1898 = vmatpush3.msra.mxu1 %v100_v2  ;;  %v60_v10 = vld [vmem:[%s3566_s0 + $0x158] sm:$0xff]  ;;  %v61_v12 = vld [vmem:[%s3566_s0 + $0x160] sm:$0xff]  ;;  %v62_v14 = vld [vmem:[%s3566_s0 + $0x168] sm:$0xff] }
   0x5   :  { %1646 = vmatprep.subr.mxu0 %v2066_v0  ;;  %1895 = vmatprep.subr.mxu1 %v2066_v0  ;;  %v20_v11 = vld [vmem:[%s3566_s0 + $0x18] sm:$0xff]  ;;  %v21_v13 = vld [vmem:[%s3566_s0 + $0x20] sm:$0xff]  ;;  %v22_v15 = vld [vmem:[%s3566_s0 + $0x28] sm:$0xff] }
   0x6   :  { %1647 = vmatpush3.msra.mxu0 %v99_v3  ;;  %1899 = vmatpush3.msra.mxu1 %v99_v3  ;;  %v63_v16 = vld [vmem:[%s3566_s0 + $0x170] sm:$0xff]  ;;  %v64_v18 = vld [vmem:[%s3566_s0 + $0x178] sm:$0xff]  ;;  %v65_v20 = vld [vmem:[%s3566_s0 + $0x180] sm:$0xff] }
   0x7   :  { %1648 = vmatprep.subr.mxu0 %v2066_v0  ;;  %1896 = vmatprep.subr.mxu1 %v2066_v0  ;;  %v23_v17 = vld [vmem:[%s3566_s0 + $0x30] sm:$0xff]  ;;  %v24_v19 = vld [vmem:[%s3566_s0 + $0x38] sm:$0xff]  ;;  %v25_v21 = vld [vmem:[%s3566_s0 + $0x40] sm:$0xff] }
   0x8   :  { %1649 = vmatpush3.msra.mxu0 %v98_v4  ;;  %1900 = vmatpush3.msra.mxu1 %v98_v4  ;;  %v66_v22 = vld [vmem:[%s3566_s0 + $0x188] sm:$0xff]  ;;  %v67_v24 = vld [vmem:[%s3566_s0 + $0x190] sm:$0xff]  ;;  %v68_v26 = vld [vmem:[%s3566_s0 + $0x198] sm:$0xff] }
   0x9   :  { %1650 = vmatprep.mubr.msk.f32.mxu0 %vm2067_vm1, %v2066_v0  ;;  %1773 = vmatprep.mubr.msk.f32.mxu1 %vm2067_vm1, %v2066_v0  ;;  %v26_v23 = vld [vmem:[%s3566_s0 + $0x48] sm:$0xff]  ;;  %v27_v25 = vld [vmem:[%s3566_s0 + $0x50] sm:$0xff]  ;;  %v28_v27 = vld [vmem:[%s3566_s0 + $0x58] sm:$0xff] }
   0xa   :  { %1651 = vmatmul.mubr.msk.f32.vlgmr.msra.gmra.mxu0 %vm109_vm0, %v17_v5  ;;  %1774 = vmatmul.mubr.msk.f32.vlgmr.msra.gmra.mxu1 %vm109_vm0, %v58_v6  ;;  %v69_v28 = vld [vmem:[%s3566_s0 + $0x1a0] sm:$0xff]  ;;  %v70_v30 = vld [vmem:[%s3566_s0 + $0x1a8] sm:$0xff]  ;;  %v71_v32 = vld [vmem:[%s3566_s0 + $0x1b0] sm:$0xff] }
   0xb   :  { %1653 = vmatprep.mubr.msk.f32.mxu0 %vm2067_vm1, %v2066_v0  ;;  %1776 = vmatprep.mubr.msk.f32.mxu1 %vm2067_vm1, %v2066_v0  ;;  %v29_v29 = vld [vmem:[%s3566_s0 + $0x60] sm:$0xff]  ;;  %v30_v31 = vld [vmem:[%s3566_s0 + $0x68] sm:$0xff]  ;;  %v31_v33 = vld [vmem:[%s3566_s0 + $0x70] sm:$0xff] }
   0xc   :  { %v72_v34 = vld [vmem:[%s3566_s0 + $0x1b8] sm:$0xff]  ;;  %v73_v36 = vld [vmem:[%s3566_s0 + $0x1c0] sm:$0xff]  ;;  %v74_v38 = vld [vmem:[%s3566_s0 + $0x1c8] sm:$0xff] }
   0xd   :  { %v32_v35 = vld [vmem:[%s3566_s0 + $0x78] sm:$0xff]  ;;  %v33_v37 = vld [vmem:[%s3566_s0 + $0x80] sm:$0xff]  ;;  %v34_v39 = vld [vmem:[%s3566_s0 + $0x88] sm:$0xff] }
   0xe   :  { %1654 = vmatmul.mubr.msk.f32.gmra.mxu0 %vm109_vm0, %v18_v7  ;;  %1777 = vmatmul.mubr.msk.f32.gmra.mxu1 %vm109_vm0, %v59_v8  ;;  %v75_v40 = vld [vmem:[%s3566_s0 + $0x1d0] sm:$0xff]  ;;  %v76_v42 = vld [vmem:[%s3566_s0 + $0x1d8] sm:$0xff]  ;;  %v77_v44 = vld [vmem:[%s3566_s0 + $0x1e0] sm:$0xff] }
   0xf   :  { %1656 = vmatprep.mubr.msk.f32.mxu0 %vm2067_vm1, %v2066_v0  ;;  %1779 = vmatprep.mubr.msk.f32.mxu1 %vm2067_vm1, %v2066_v0  ;;  %v35_v41 = vld [vmem:[%s3566_s0 + $0x90] sm:$0xff]  ;;  %v36_v43 = vld [vmem:[%s3566_s0 + $0x98] sm:$0xff]  ;;  %v37_v45 = vld [vmem:[%s3566_s0 + $0xa0] sm:$0xff] }
  0x10   :  { %v78_v46 = vld [vmem:[%s3566_s0 + $0x1e8] sm:$0xff]  ;;  %v79_v48 = vld [vmem:[%s3566_s0 + $0x1f0] sm:$0xff]  ;;  %v80_v50 = vld [vmem:[%s3566_s0 + $0x1f8] sm:$0xff] }
  0x11   :  { %v38_v47 = vld [vmem:[%s3566_s0 + $0xa8] sm:$0xff]  ;;  %v39_v49 = vld [vmem:[%s3566_s0 + $0xb0] sm:$0xff]  ;;  %v40_v51 = vld [vmem:[%s3566_s0 + $0xb8] sm:$0xff] }
  0x12   :  { %1657 = vmatmul.mubr.msk.f32.gmra.mxu0 %vm109_vm0, %v19_v9  ;;  %1780 = vmatmul.mubr.msk.f32.gmra.mxu1 %vm109_vm0, %v60_v10  ;;  %v81_v52 = vld [vmem:[%s3566_s0 + $0x200] sm:$0xff]  ;;  %v82_v54 = vld [vmem:[%s3566_s0 + $0x208] sm:$0xff]  ;;  %v83_v56 = vld [vmem:[%s3566_s0 + $0x210] sm:$0xff] }
  0x13   :  { %1659 = vmatprep.mubr.msk.f32.mxu0 %vm2067_vm1, %v2066_v0  ;;  %1782 = vmatprep.mubr.msk.f32.mxu1 %vm2067_vm1, %v2066_v0  ;;  %v41_v53 = vld [vmem:[%s3566_s0 + $0xc0] sm:$0xff]  ;;  %v42_v55 = vld [vmem:[%s3566_s0 + $0xc8] sm:$0xff]  ;;  %v43_v57 = vld [vmem:[%s3566_s0 + $0xd0] sm:$0xff] }
  0x14   :  { %v84_v58 = vld [vmem:[%s3566_s0 + $0x218] sm:$0xff]  ;;  %v85_v60 = vld [vmem:[%s3566_s0 + $0x220] sm:$0xff]  ;;  %v86_v62 = vld [vmem:[%s3566_s0 + $0x228] sm:$0xff] }
  0x15   :  { %v44_v59 = vld [vmem:[%s3566_s0 + $0xd8] sm:$0xff]  ;;  %v45_v61 = vld [vmem:[%s3566_s0 + $0xe0] sm:$0xff]  ;;  %v46_v63 = vld [vmem:[%s3566_s0 + $0xe8] sm:$0xff] }
  0x16   :  { %1660 = vmatmul.mubr.msk.f32.gmra.mxu0 %vm109_vm0, %v20_v11  ;;  %1783 = vmatmul.mubr.msk.f32.gmra.mxu1 %vm109_vm0, %v61_v12  ;;  %v87_v1 = vld [vmem:[%s3566_s0 + $0x230] sm:$0xff]  ;;  %v88_v3 = vld [vmem:[%s3566_s0 + $0x238] sm:$0xff]  ;;  %v89_v5 = vld [vmem:[%s3566_s0 + $0x240] sm:$0xff] }
  0x17   :  { %1662 = vmatprep.mubr.msk.f32.mxu0 %vm2067_vm1, %v2066_v0  ;;  %1785 = vmatprep.mubr.msk.f32.mxu1 %vm2067_vm1, %v2066_v0  ;;  %v47_v2 = vld [vmem:[%s3566_s0 + $0xf0] sm:$0xff]  ;;  %v48_v4 = vld [vmem:[%s3566_s0 + $0xf8] sm:$0xff]  ;;  %v49_v6 = vld [vmem:[%s3566_s0 + $0x100] sm:$0xff] }
  0x18   :  { %v90_v7 = vld [vmem:[%s3566_s0 + $0x248] sm:$0xff]  ;;  %v91_v9 = vld [vmem:[%s3566_s0 + $0x250] sm:$0xff]  ;;  %v92_v11 = vld [vmem:[%s3566_s0 + $0x258] sm:$0xff] }
  0x19   :  { %v50_v8 = vld [vmem:[%s3566_s0 + $0x108] sm:$0xff]  ;;  %v51_v10 = vld [vmem:[%s3566_s0 + $0x110] sm:$0xff]  ;;  %v52_v12 = vld [vmem:[%s3566_s0 + $0x118] sm:$0xff] }
  0x1a   :  { %1663 = vmatmul.mubr.msk.f32.gmra.mxu0 %vm109_vm0, %v21_v13  ;;  %1786 = vmatmul.mubr.msk.f32.gmra.mxu1 %vm109_vm0, %v62_v14  ;;  %v93_v13 = vld [vmem:[%s3566_s0 + $0x260] sm:$0xff] }
  0x1b   :  { %1665 = vmatprep.mubr.msk.f32.mxu0 %vm2067_vm1, %v2066_v0  ;;  %1788 = vmatprep.mubr.msk.f32.mxu1 %vm2067_vm1, %v2066_v0  ;;  %v53_v14 = vld [vmem:[%s3566_s0 + $0x120] sm:$0xff] }
  0x1e   :  { %1666 = vmatmul.mubr.msk.f32.gmra.mxu0 %vm109_vm0, %v22_v15  ;;  %1789 = vmatmul.mubr.msk.f32.gmra.mxu1 %vm109_vm0, %v63_v16  ;;  %v94_v15 = vld [vmem:[%s3566_s0 + $0x268] sm:$0xff] }
  0x1f   :  { %1668 = vmatprep.mubr.msk.f32.mxu0 %vm2067_vm1, %v2066_v0  ;;  %1791 = vmatprep.mubr.msk.f32.mxu1 %vm2067_vm1, %v2066_v0  ;;  %v54_v16 = vld [vmem:[%s3566_s0 + $0x128] sm:$0xff] }
  0x22   :  { %1669 = vmatmul.mubr.msk.f32.gmra.mxu0 %vm109_vm0, %v23_v17  ;;  %1792 = vmatmul.mubr.msk.f32.gmra.mxu1 %vm109_vm0, %v64_v18  ;;  %v95_v17 = vld [vmem:[%s3566_s0 + $0x270] sm:$0xff] }
  0x23   :  { %1671 = vmatprep.mubr.msk.f32.mxu0 %vm2067_vm1, %v2066_v0  ;;  %1794 = vmatprep.mubr.msk.f32.mxu1 %vm2067_vm1, %v2066_v0  ;;  %v55_v18 = vld [vmem:[%s3566_s0 + $0x130] sm:$0xff] }
  0x26   :  { %1672 = vmatmul.mubr.msk.f32.gmra.mxu0 %vm109_vm0, %v24_v19  ;;  %1795 = vmatmul.mubr.msk.f32.gmra.mxu1 %vm109_vm0, %v65_v20  ;;  %v96_v19 = vld [vmem:[%s3566_s0 + $0x278] sm:$0xff] }
  0x27   :  { %1674 = vmatprep.mubr.msk.f32.mxu0 %vm2067_vm1, %v2066_v0  ;;  %1797 = vmatprep.mubr.msk.f32.mxu1 %vm2067_vm1, %v2066_v0  ;;  %v56_v20 = vld [vmem:[%s3566_s0 + $0x138] sm:$0xff] }
  0x2a   :  { %1675 = vmatmul.mubr.msk.f32.gmra.mxu0 %vm109_vm0, %v25_v21  ;;  %1798 = vmatmul.mubr.msk.f32.gmra.mxu1 %vm109_vm0, %v66_v22  ;;  %v97_v21 = vld [vmem:[%s3566_s0 + $0x280] sm:$0xff] }
  0x2b   :  { %1677 = vmatprep.mubr.msk.f32.mxu0 %vm2067_vm1, %v2066_v0  ;;  %1800 = vmatprep.mubr.msk.f32.mxu1 %vm2067_vm1, %v2066_v0  ;;  %v57_v22 = vld [vmem:[%s3566_s0 + $0x140] sm:$0xff] }
  0x2e   :  { %1678 = vmatmul.mubr.msk.f32.gmra.mxu0 %vm109_vm0, %v26_v23  ;;  %1801 = vmatmul.mubr.msk.f32.gmra.mxu1 %vm109_vm0, %v67_v24  ;;  %v2602_v23 = vld [vmem:[%s3567_s3] ss:$0 sm:$0xff] }
  0x2f   :  { %1680 = vmatprep.mubr.msk.f32.mxu0 %vm2067_vm1, %v2066_v0  ;;  %1803 = vmatprep.mubr.msk.f32.mxu1 %vm2067_vm1, %v2066_v0 }
  0x32   :  { %1681 = vmatmul.mubr.msk.f32.gmra.mxu0 %vm109_vm0, %v27_v25  ;;  %1804 = vmatmul.mubr.msk.f32.gmra.mxu1 %vm109_vm0, %v68_v26  ;;  %v823_v25 = vld [vmem:[%s3568_s1] sm:$0xff] }
  0x33   :  { %1683 = vmatprep.mubr.msk.f32.mxu0 %vm2067_vm1, %v2066_v0  ;;  %1806 = vmatprep.mubr.msk.f32.mxu1 %vm2067_vm1, %v2066_v0 }
  0x36   :  { %1684 = vmatmul.mubr.msk.f32.gmra.mxu0 %vm109_vm0, %v28_v27  ;;  %1807 = vmatmul.mubr.msk.f32.gmra.mxu1 %vm109_vm0, %v69_v28 }
  0x37   :  { %1686 = vmatprep.mubr.msk.f32.mxu0 %vm2067_vm1, %v2066_v0  ;;  %1809 = vmatprep.mubr.msk.f32.mxu1 %vm2067_vm1, %v2066_v0 }
  0x3a   :  { %1687 = vmatmul.mubr.msk.f32.gmra.mxu0 %vm109_vm0, %v29_v29  ;;  %1810 = vmatmul.mubr.msk.f32.gmra.mxu1 %vm109_vm0, %v70_v30 }
  0x3b   :  { %1689 = vmatprep.mubr.msk.f32.mxu0 %vm2067_vm1, %v2066_v0  ;;  %1812 = vmatprep.mubr.msk.f32.mxu1 %vm2067_vm1, %v2066_v0 }
  0x3e   :  { %1690 = vmatmul.mubr.msk.f32.gmra.mxu0 %vm109_vm0, %v30_v31  ;;  %1813 = vmatmul.mubr.msk.f32.gmra.mxu1 %vm109_vm0, %v71_v32 }
  0x3f   :  { %1692 = vmatprep.mubr.msk.f32.mxu0 %vm2067_vm1, %v2066_v0  ;;  %1815 = vmatprep.mubr.msk.f32.mxu1 %vm2067_vm1, %v2066_v0 }
  0x42   :  { %1693 = vmatmul.mubr.msk.f32.gmra.mxu0 %vm109_vm0, %v31_v33  ;;  %1816 = vmatmul.mubr.msk.f32.gmra.mxu1 %vm109_vm0, %v72_v34 }
  0x43   :  { %1695 = vmatprep.mubr.msk.f32.mxu0 %vm2067_vm1, %v2066_v0  ;;  %1818 = vmatprep.mubr.msk.f32.mxu1 %vm2067_vm1, %v2066_v0 }
  0x46   :  { %1696 = vmatmul.mubr.msk.f32.gmra.mxu0 %vm109_vm0, %v32_v35  ;;  %1819 = vmatmul.mubr.msk.f32.gmra.mxu1 %vm109_vm0, %v73_v36 }
  0x47   :  { %1698 = vmatprep.mubr.msk.f32.mxu0 %vm2067_vm1, %v2066_v0  ;;  %1821 = vmatprep.mubr.msk.f32.mxu1 %vm2067_vm1, %v2066_v0 }
  0x4a   :  { %1699 = vmatmul.mubr.msk.f32.gmra.mxu0 %vm109_vm0, %v33_v37  ;;  %1822 = vmatmul.mubr.msk.f32.gmra.mxu1 %vm109_vm0, %v74_v38  ;;  %v824_v37 = vld [vmem:[%s3568_s1 + $0x8] sm:$0xff]  ;;  %v865_v38 = vld [vmem:[%s3568_s1 + $0x150] sm:$0xff] }
  0x4b   :  { %1701 = vmatprep.mubr.msk.f32.mxu0 %vm2067_vm1, %v2066_v0  ;;  %1824 = vmatprep.mubr.msk.f32.mxu1 %vm2067_vm1, %v2066_v0 }
  0x4e   :  { %1702 = vmatmul.mubr.msk.f32.gmra.mxu0 %vm109_vm0, %v34_v39  ;;  %1825 = vmatmul.mubr.msk.f32.gmra.mxu1 %vm109_vm0, %v75_v40 }
  0x4f   :  { %1704 = vmatprep.mubr.msk.f32.mxu0 %vm2067_vm1, %v2066_v0  ;;  %1827 = vmatprep.mubr.msk.f32.mxu1 %vm2067_vm1, %v2066_v0 }
  0x52   :  { %1705 = vmatmul.mubr.msk.f32.gmra.mxu0 %vm109_vm0, %v35_v41  ;;  %1828 = vmatmul.mubr.msk.f32.gmra.mxu1 %vm109_vm0, %v76_v42 }
  0x53   :  { %1707 = vmatprep.mubr.msk.f32.mxu0 %vm2067_vm1, %v2066_v0  ;;  %1830 = vmatprep.mubr.msk.f32.mxu1 %vm2067_vm1, %v2066_v0 }
  0x56   :  { %1708 = vmatmul.mubr.msk.f32.gmra.mxu0 %vm109_vm0, %v36_v43  ;;  %1831 = vmatmul.mubr.msk.f32.gmra.mxu1 %vm109_vm0, %v77_v44 }
  0x57   :  { %1710 = vmatprep.mubr.msk.f32.mxu0 %vm2067_vm1, %v2066_v0  ;;  %1833 = vmatprep.mubr.msk.f32.mxu1 %vm2067_vm1, %v2066_v0 }
  0x5a   :  { %1711 = vmatmul.mubr.msk.f32.gmra.mxu0 %vm109_vm0, %v37_v45  ;;  %1834 = vmatmul.mubr.msk.f32.gmra.mxu1 %vm109_vm0, %v78_v46  ;;  %v825_v46 = vld [vmem:[%s3568_s1 + $0x10] sm:$0xff] }
  0x5b   :  { %1713 = vmatprep.mubr.msk.f32.mxu0 %vm2067_vm1, %v2066_v0  ;;  %1836 = vmatprep.mubr.msk.f32.mxu1 %vm2067_vm1, %v2066_v0 }
  0x5e   :  { %1714 = vmatmul.mubr.msk.f32.gmra.mxu0 %vm109_vm0, %v38_v47  ;;  %1837 = vmatmul.mubr.msk.f32.gmra.mxu1 %vm109_vm0, %v79_v48  ;;  %v866_v48 = vld [vmem:[%s3568_s1 + $0x158] sm:$0xff] }
  0x5f   :  { %1716 = vmatprep.mubr.msk.f32.mxu0 %vm2067_vm1, %v2066_v0  ;;  %1839 = vmatprep.mubr.msk.f32.mxu1 %vm2067_vm1, %v2066_v0 }
  0x62   :  { %1717 = vmatmul.mubr.msk.f32.gmra.mxu0 %vm109_vm0, %v39_v49  ;;  %1840 = vmatmul.mubr.msk.f32.gmra.mxu1 %vm109_vm0, %v80_v50 }
  0x63   :  { %1719 = vmatprep.mubr.msk.f32.mxu0 %vm2067_vm1, %v2066_v0  ;;  %1842 = vmatprep.mubr.msk.f32.mxu1 %vm2067_vm1, %v2066_v0 }
  0x66   :  { %1720 = vmatmul.mubr.msk.f32.gmra.mxu0 %vm109_vm0, %v40_v51  ;;  %1843 = vmatmul.mubr.msk.f32.gmra.mxu1 %vm109_vm0, %v81_v52 }
  0x67   :  { %1722 = vmatprep.mubr.msk.f32.mxu0 %vm2067_vm1, %v2066_v0  ;;  %1845 = vmatprep.mubr.msk.f32.mxu1 %vm2067_vm1, %v2066_v0 }
  0x6a   :  { %1723 = vmatmul.mubr.msk.f32.gmra.mxu0 %vm109_vm0, %v41_v53  ;;  %1846 = vmatmul.mubr.msk.f32.gmra.mxu1 %vm109_vm0, %v82_v54 }
  0x6b   :  { %1725 = vmatprep.mubr.msk.f32.mxu0 %vm2067_vm1, %v2066_v0  ;;  %1848 = vmatprep.mubr.msk.f32.mxu1 %vm2067_vm1, %v2066_v0 }
  0x6e   :  { %1726 = vmatmul.mubr.msk.f32.gmra.mxu0 %vm109_vm0, %v42_v55  ;;  %1849 = vmatmul.mubr.msk.f32.gmra.mxu1 %vm109_vm0, %v83_v56 }
  0x6f   :  { %1728 = vmatprep.mubr.msk.f32.mxu0 %vm2067_vm1, %v2066_v0  ;;  %1851 = vmatprep.mubr.msk.f32.mxu1 %vm2067_vm1, %v2066_v0 }
  0x72   :  { %1729 = vmatmul.mubr.msk.f32.gmra.mxu0 %vm109_vm0, %v43_v57  ;;  %1852 = vmatmul.mubr.msk.f32.gmra.mxu1 %vm109_vm0, %v84_v58 }
  0x73   :  { %1731 = vmatprep.mubr.msk.f32.mxu0 %vm2067_vm1, %v2066_v0  ;;  %1854 = vmatprep.mubr.msk.f32.mxu1 %vm2067_vm1, %v2066_v0 }
  0x76   :  { %1732 = vmatmul.mubr.msk.f32.gmra.mxu0 %vm109_vm0, %v44_v59  ;;  %1855 = vmatmul.mubr.msk.f32.gmra.mxu1 %vm109_vm0, %v85_v60  ;;  %v826_v60 = vld [vmem:[%s3568_s1 + $0x18] sm:$0xff] }
  0x77   :  { %1734 = vmatprep.mubr.msk.f32.mxu0 %vm2067_vm1, %v2066_v0  ;;  %1857 = vmatprep.mubr.msk.f32.mxu1 %vm2067_vm1, %v2066_v0 }
  0x7a   :  { %1735 = vmatmul.mubr.msk.f32.gmra.mxu0 %vm109_vm0, %v45_v61  ;;  %1858 = vmatmul.mubr.msk.f32.gmra.mxu1 %vm109_vm0, %v86_v62  ;;  %v867_v61 = vld [vmem:[%s3568_s1 + $0x160] sm:$0xff] }
  0x7b   :  { %1737 = vmatprep.mubr.msk.f32.mxu0 %vm2067_vm1, %v2066_v0  ;;  %1860 = vmatprep.mubr.msk.f32.mxu1 %vm2067_vm1, %v2066_v0 }
  0x7e   :  { %1738 = vmatmul.mubr.msk.f32.gmra.mxu0 %vm109_vm0, %v46_v63  ;;  %1861 = vmatmul.mubr.msk.f32.gmra.mxu1 %vm109_vm0, %v87_v1 }
  0x7f   :  { %1740 = vmatprep.mubr.msk.f32.mxu0 %vm2067_vm1, %v2066_v0  ;;  %1863 = vmatprep.mubr.msk.f32.mxu1 %vm2067_vm1, %v2066_v0 }
  0x82   :  { %1741 = vmatmul.mubr.msk.f32.gmra.mxu0 %vm109_vm0, %v47_v2  ;;  %1864 = vmatmul.mubr.msk.f32.gmra.mxu1 %vm109_vm0, %v88_v3 }
  0x83   :  { %1743 = vmatprep.mubr.msk.f32.mxu0 %vm2067_vm1, %v2066_v0  ;;  %1866 = vmatprep.mubr.msk.f32.mxu1 %vm2067_vm1, %v2066_v0 }
  0x86   :  { %1744 = vmatmul.mubr.msk.f32.gmra.mxu0 %vm109_vm0, %v48_v4  ;;  %1867 = vmatmul.mubr.msk.f32.gmra.mxu1 %vm109_vm0, %v89_v5 }
  0x87   :  { %1746 = vmatprep.mubr.msk.f32.mxu0 %vm2067_vm1, %v2066_v0  ;;  %1869 = vmatprep.mubr.msk.f32.mxu1 %vm2067_vm1, %v2066_v0 }
  0x8a   :  { %1747 = vmatmul.mubr.msk.f32.gmra.mxu0 %vm109_vm0, %v49_v6  ;;  %1870 = vmatmul.mubr.msk.f32.gmra.mxu1 %vm109_vm0, %v90_v7  ;;  %v827_v7 = vld [vmem:[%s3568_s1 + $0x20] sm:$0xff] }
  0x8b   :  { %1749 = vmatprep.mubr.msk.f32.mxu0 %vm2067_vm1, %v2066_v0  ;;  %1872 = vmatprep.mubr.msk.f32.mxu1 %vm2067_vm1, %v2066_v0 }
  0x8e   :  { %1750 = vmatmul.mubr.msk.f32.gmra.mxu0 %vm109_vm0, %v50_v8  ;;  %1873 = vmatmul.mubr.msk.f32.gmra.mxu1 %vm109_vm0, %v91_v9  ;;  %v868_v9 = vld [vmem:[%s3568_s1 + $0x168] sm:$0xff] }
  0x8f   :  { %1752 = vmatprep.mubr.msk.f32.mxu0 %vm2067_vm1, %v2066_v0  ;;  %1875 = vmatprep.mubr.msk.f32.mxu1 %vm2067_vm1, %v2066_v0 }
  0x92   :  { %1753 = vmatmul.mubr.msk.f32.gmra.mxu0 %vm109_vm0, %v51_v10  ;;  %1876 = vmatmul.mubr.msk.f32.gmra.mxu1 %vm109_vm0, %v92_v11 }
  0x93   :  { %1755 = vmatprep.mubr.msk.f32.mxu0 %vm2067_vm1, %v2066_v0  ;;  %1878 = vmatprep.mubr.msk.f32.mxu1 %vm2067_vm1, %v2066_v0 }
  0x96   :  { %1756 = vmatmul.mubr.msk.f32.gmra.mxu0 %vm109_vm0, %v52_v12  ;;  %1879 = vmatmul.mubr.msk.f32.gmra.mxu1 %vm109_vm0, %v93_v13 }
  0x97   :  { %1758 = vmatprep.mubr.msk.f32.mxu0 %vm2067_vm1, %v2066_v0  ;;  %1881 = vmatprep.mubr.msk.f32.mxu1 %vm2067_vm1, %v2066_v0 }
  0x9a   :  { %1759 = vmatmul.mubr.msk.f32.gmra.mxu0 %vm109_vm0, %v53_v14  ;;  %1882 = vmatmul.mubr.msk.f32.gmra.mxu1 %vm109_vm0, %v94_v15 }
  0x9b   :  { %1761 = vmatprep.mubr.msk.f32.mxu0 %vm2067_vm1, %v2066_v0  ;;  %1884 = vmatprep.mubr.msk.f32.mxu1 %vm2067_vm1, %v2066_v0 }
  0x9e   :  { %1762 = vmatmul.mubr.msk.f32.gmra.mxu0 %vm109_vm0, %v54_v16  ;;  %1885 = vmatmul.mubr.msk.f32.gmra.mxu1 %vm109_vm0, %v95_v17 }
  0x9f   :  { %1764 = vmatprep.mubr.msk.f32.mxu0 %vm2067_vm1, %v2066_v0  ;;  %1887 = vmatprep.mubr.msk.f32.mxu1 %vm2067_vm1, %v2066_v0 }
  0xa2   :  { %1765 = vmatmul.mubr.msk.f32.gmra.mxu0 %vm109_vm0, %v55_v18  ;;  %1888 = vmatmul.mubr.msk.f32.gmra.mxu1 %vm109_vm0, %v96_v19 }
  0xa3   :  { %1767 = vmatprep.mubr.msk.f32.mxu0 %vm2067_vm1, %v2066_v0  ;;  %1890 = vmatprep.mubr.msk.f32.mxu1 %vm2067_vm1, %v2066_v0 }
  0xa6   :  { %1768 = vmatmul.mubr.msk.f32.gmra.mxu0 %vm109_vm0, %v56_v20  ;;  %1891 = vmatmul.mubr.msk.f32.gmra.mxu1 %vm109_vm0, %v97_v21 }
  0xa7   :  { %1770 = vmatprep.mubr.msk.f32.mxu0 %vm2067_vm1, %v2066_v0  ;;  %v864_v0 = vld [vmem:[%s3568_s1 + $0x148] sm:$0xff] }
  0xaa   :  { %1771 = vmatmul.mubr.msk.f32.gmra.mxu0 %vm109_vm0, %v57_v22 }
  0xca   :  { %v419_v24 = vpop.f32.mrf.mxu0  ;;  %v624_v26 = vpop.f32.mrf.mxu1 }
  0xcb   :  { %v420_v27 = vadd.f32 %v2602_v23, %v419_v24  ;;  %v625_v28 = vadd.f32 %v2602_v23, %v624_v26  ;;  %v828_v26 = vld [vmem:[%s3568_s1 + $0x28] sm:$0xff] }
  0xcc   :  { %v1652_v29 = vpop.f32.mrf.mxu0  ;;  %v1775_v30 = vpop.f32.mrf.mxu1 }
  0xcd   :  { %v904_v31 = vadd.f32 %v823_v25, %v420_v27  ;;  %v2612_v32 = vadd.f32 %v864_v0, %v625_v28  ;;  %v869_v30 = vld [vmem:[%s3568_s1 + $0x170] sm:$0xff] }
  0xce   :  { %v424_v33 = vpop.f32.mrf.mxu0  ;;  %v629_v34 = vpop.f32.mrf.mxu1 }
  0xcf   :  { %v1066_v35 = vmul.f32 0.70710677, %v904_v31  ;;  %v1107_v36 = vmul.f32 0.70710677, %v2612_v32  ;;  %v425_v39 = vadd.f32 %v2602_v23, %v424_v33  ;;  %v630_v40 = vadd.f32 %v2602_v23, %v629_v34 }
  0xd0   :  { %v1655_v41 = vpop.f32.mrf.mxu0  ;;  %v1778_v42 = vpop.f32.mrf.mxu1  ;;  %v985_v22 = vmul.f32 0.5, %v904_v31  ;;  %v1026_v0 = vmul.f32 0.5, %v2612_v32 }
  0xd1   :  { %1903 = verf.f32 %v1066_v35  ;;  %v2623_v43 = vadd.f32 %v824_v37, %v425_v39  ;;  %v2625_v44 = vadd.f32 %v865_v38, %v630_v40  ;;  %v829_v38 = vld [vmem:[%s3568_s1 + $0x30] sm:$0xff] }
  0xd2   :  { %1905 = verf.f32 %v1107_v36  ;;  %v429_v45 = vpop.f32.mrf.mxu0  ;;  %v634_v47 = vpop.f32.mrf.mxu1 }
  0xd3   :  { %v430_v49 = vadd.f32 %v2602_v23, %v429_v45  ;;  %v635_v50 = vadd.f32 %v2602_v23, %v634_v47  ;;  %v1067_v51 = vmul.f32 0.70710677, %v2623_v43  ;;  %v1108_v52 = vmul.f32 0.70710677, %v2625_v44 }
  0xd4   :  { %v1658_v53 = vpop.f32.mrf.mxu0  ;;  %v1781_v54 = vpop.f32.mrf.mxu1 }
  0xd5   :  { %v2637_v55 = vadd.f32 %v825_v46, %v430_v49  ;;  %v2639_v56 = vadd.f32 %v866_v48, %v635_v50  ;;  %1907 = verf.f32 %v1067_v51  ;;  %v870_v46 = vld [vmem:[%s3568_s1 + $0x178] sm:$0xff]  ;;  %v986_v48 = vmul.f32 0.5, %v2623_v43 }
  0xd6   :  { %v434_v57 = vpop.f32.mrf.mxu0  ;;  %v639_v58 = vpop.f32.mrf.mxu1  ;;  %1909 = verf.f32 %v1108_v52  ;;  %v1027_v53 = vmul.f32 0.5, %v2625_v44  ;;  %v830_v44 = vld [vmem:[%s3568_s1 + $0x38] sm:$0xff] }
  0xd7   :  { %v1068_v59 = vmul.f32 0.70710677, %v2637_v55  ;;  %v1109_v62 = vmul.f32 0.70710677, %v2639_v56  ;;  %v435_v63 = vadd.f32 %v2602_v23, %v434_v57  ;;  %v640_v1 = vadd.f32 %v2602_v23, %v639_v58 }
  0xd8   :  { %v1661_v2 = vpop.f32.mrf.mxu0  ;;  %v1784_v3 = vpop.f32.mrf.mxu1 }
  0xd9   :  { %1911 = verf.f32 %v1068_v59  ;;  %v2651_v4 = vadd.f32 %v826_v60, %v435_v63  ;;  %v2653_v5 = vadd.f32 %v867_v61, %v640_v1  ;;  %v987_v2 = vmul.f32 0.5, %v2637_v55 }
  0xda   :  { %1913 = verf.f32 %v1109_v62  ;;  %v439_v6 = vpop.f32.mrf.mxu0  ;;  %v644_v8 = vpop.f32.mrf.mxu1 }
  0xdb   :  { %v440_v10 = vadd.f32 %v2602_v23, %v439_v6  ;;  %v645_v11 = vadd.f32 %v2602_v23, %v644_v8  ;;  %v1069_v12 = vmul.f32 0.70710677, %v2651_v4  ;;  %v1110_v13 = vmul.f32 0.70710677, %v2653_v5  ;;  %v871_v6 = vld [vmem:[%s3568_s1 + $0x180] sm:$0xff] }
  0xdc   :  { %v1664_v14 = vpop.f32.mrf.mxu0  ;;  %v1787_v15 = vpop.f32.mrf.mxu1 }
  0xdd   :  { %v2665_v16 = vadd.f32 %v827_v7, %v440_v10  ;;  %v2667_v17 = vadd.f32 %v868_v9, %v645_v11  ;;  %1915 = verf.f32 %v1069_v12  ;;  %v1028_v7 = vmul.f32 0.5, %v2639_v56 }
  0xde   :  { %v1904_v18 = vpop.eup %1903  ;;  %v444_v19 = vpop.f32.mrf.mxu0  ;;  %1917 = verf.f32 %v1110_v13 }
  0xdf   :  { %v649_v20 = vpop.f32.mrf.mxu1  ;;  %v1906_v21 = vpop.eup %1905  ;;  %v1228_v24 = vadd.f32 1.0, %v1904_v18  ;;  %v1070_v25 = vmul.f32 0.70710677, %v2665_v16  ;;  %v1111_v28 = vmul.f32 0.70710677, %v2667_v17  ;;  %v445_v29 = vadd.f32 %v2602_v23, %v444_v19 }
  0xe0   :  { %v1269_v27 = vadd.f32 1.0, %v1906_v21  ;;  %v1667_v31 = vpop.f32.mrf.mxu0  ;;  %v650_v35 = vadd.f32 %v2602_v23, %v649_v20 }
  0xe1   :  { %v1790_v33 = vpop.f32.mrf.mxu1  ;;  %v1309_v34 = vmul.f32 %v1228_v24, %v985_v22  ;;  %1919 = verf.f32 %v1070_v25  ;;  %v2680_v37 = vadd.f32 %v828_v26, %v445_v29  ;;  %v831_v24 = vld [vmem:[%s3568_s1 + $0x40] sm:$0xff]  ;;  %v872_v25 = vld [vmem:[%s3568_s1 + $0x188] sm:$0xff]  ;;  %v1029_v31 = vmul.f32 0.5, %v2653_v5 }
  0xe2   :  { %v1350_v36 = vmul.f32 %v1269_v27, %v1026_v0  ;;  %1921 = verf.f32 %v1111_v28  ;;  %v449_v32 = vpop.f32.mrf.mxu0  ;;  %v1908_v40 = vpop.eup %1907  ;;  %v2689_v41 = vadd.f32 %v869_v30, %v650_v35  ;;  %v988_v0 = vmul.f32 0.5, %v2651_v4 }
  0xe3   :  { %v654_v39 = vpop.f32.mrf.mxu1  ;;  %1390 = vst.msk [vmem:[%s3569_s4] sm:$0xff] %vm109_vm0, %v1309_v34  ;;  %v450_v42 = vadd.f32 %v2602_v23, %v449_v32  ;;  %v1910_v47 = vpop.eup %1909  ;;  %v1229_v49 = vadd.f32 1.0, %v1908_v40  ;;  %v1071_v50 = vmul.f32 0.70710677, %v2680_v37  ;;  %v989_v34 = vmul.f32 0.5, %v2665_v16 }
  0xe4   :  { %v655_v45 = vadd.f32 %v2602_v23, %v654_v39  ;;  %1431 = vst.msk [vmem:[%s3569_s4 + $0x148] sm:$0xff] %vm109_vm0, %v1350_v36  ;;  %v1670_v51 = vpop.f32.mrf.mxu0  ;;  %v1270_v54 = vadd.f32 1.0, %v1910_v47  ;;  %v1112_v57 = vmul.f32 0.70710677, %v2689_v41 }
  0xe5   :  { %v1793_v52 = vpop.f32.mrf.mxu1  ;;  %v2704_v58 = vadd.f32 %v829_v38, %v450_v42  ;;  %v1310_v60 = vmul.f32 %v1229_v49, %v986_v48  ;;  %1923 = verf.f32 %v1071_v50  ;;  %v832_v42 = vld [vmem:[%s3568_s1 + $0x48] sm:$0xff]  ;;  %v1030_v48 = vmul.f32 0.5, %v2667_v17  ;;  %v873_v17 = vld [vmem:[%s3568_s1 + $0x190] sm:$0xff] }
  0xe6   :  { %v1912_v59 = vpop.eup %1911  ;;  %v2706_v61 = vadd.f32 %v870_v46, %v655_v45  ;;  %v454_v62 = vpop.f32.mrf.mxu0  ;;  %v1351_v1 = vmul.f32 %v1270_v54, %v1027_v53  ;;  %1925 = verf.f32 %v1112_v57 }
  0xe7   :  { %v659_v63 = vpop.f32.mrf.mxu1  ;;  %v1914_v43 = vpop.eup %1913  ;;  %v1230_v3 = vadd.f32 1.0, %v1912_v59  ;;  %1391 = vst.msk [vmem:[%s3569_s4 + $0x8] sm:$0xff] %vm109_vm0, %v1310_v60  ;;  %v1072_v55 = vmul.f32 0.70710677, %v2704_v58  ;;  %v455_v13 = vadd.f32 %v2602_v23, %v454_v62 }
  0xe8   :  { %v1271_v8 = vadd.f32 1.0, %v1914_v43  ;;  %v1113_v9 = vmul.f32 0.70710677, %v2706_v61  ;;  %v1673_v10 = vpop.f32.mrf.mxu0  ;;  %1432 = vst.msk [vmem:[%s3569_s4 + $0x150] sm:$0xff] %vm109_vm0, %v1351_v1  ;;  %v660_v14 = vadd.f32 %v2602_v23, %v659_v63  ;;  %v833_v63 = vld [vmem:[%s3568_s1 + $0x50] sm:$0xff] }
  0xe9   :  { %v1796_v11 = vpop.f32.mrf.mxu1  ;;  %v1311_v12 = vmul.f32 %v1230_v3, %v987_v2  ;;  %1927 = verf.f32 %v1072_v55  ;;  %v2732_v20 = vadd.f32 %v830_v44, %v455_v13  ;;  %v874_v44 = vld [vmem:[%s3568_s1 + $0x198] sm:$0xff] }
  0xea   :  { %v1352_v15 = vmul.f32 %v1271_v8, %v1028_v7  ;;  %v459_v56 = vpop.f32.mrf.mxu0  ;;  %v1916_v19 = vpop.eup %1915  ;;  %1929 = verf.f32 %v1113_v9  ;;  %v2734_v21 = vadd.f32 %v871_v6, %v660_v14  ;;  %v990_v7 = vmul.f32 0.5, %v2680_v37  ;;  %v834_v37 = vld [vmem:[%s3568_s1 + $0x58] sm:$0xff] }
  0xeb   :  { %v664_v18 = vpop.f32.mrf.mxu1  ;;  %1392 = vst.msk [vmem:[%s3569_s4 + $0x10] sm:$0xff] %vm109_vm0, %v1311_v12  ;;  %v460_v22 = vadd.f32 %v2602_v23, %v459_v56  ;;  %v1918_v26 = vpop.eup %1917  ;;  %v1231_v27 = vadd.f32 1.0, %v1916_v19  ;;  %v1073_v35 = vmul.f32 0.70710677, %v2732_v20  ;;  %v1031_v12 = vmul.f32 0.5, %v2689_v41 }
  0xec   :  { %1433 = vst.msk [vmem:[%s3569_s4 + $0x158] sm:$0xff] %vm109_vm0, %v1352_v15  ;;  %v665_v28 = vadd.f32 %v2602_v23, %v664_v18  ;;  %v1676_v29 = vpop.f32.mrf.mxu0  ;;  %v1272_v33 = vadd.f32 1.0, %v1918_v26  ;;  %v1114_v38 = vmul.f32 0.70710677, %v2734_v21  ;;  %v991_v26 = vmul.f32 0.5, %v2704_v58  ;;  %v875_v58 = vld [vmem:[%s3568_s1 + $0x1a0] sm:$0xff] }
  0xed   :  { %v1799_v30 = vpop.f32.mrf.mxu1  ;;  %v1312_v32 = vmul.f32 %v1231_v27, %v988_v0  ;;  %v2753_v39 = vadd.f32 %v831_v24, %v460_v22  ;;  %1931 = verf.f32 %v1073_v35  ;;  %v1032_v29 = vmul.f32 0.5, %v2706_v61 }
  0xee   :  { %v1920_v36 = vpop.eup %1919  ;;  %v2755_v40 = vadd.f32 %v872_v25, %v665_v28  ;;  %v464_v4 = vpop.f32.mrf.mxu0  ;;  %v1353_v46 = vmul.f32 %v1272_v33, %v1029_v31  ;;  %1933 = verf.f32 %v1114_v38 }
  0xef   :  { %v669_v45 = vpop.f32.mrf.mxu1  ;;  %v1922_v5 = vpop.eup %1921  ;;  %v1232_v47 = vadd.f32 1.0, %v1920_v36  ;;  %v465_v16 = vadd.f32 %v2602_v23, %v464_v4  ;;  %1393 = vst.msk [vmem:[%s3569_s4 + $0x18] sm:$0xff] %vm109_vm0, %v1312_v32  ;;  %v1074_v50 = vmul.f32 0.70710677, %v2753_v39 }
  0xf0   :  { %v1273_v49 = vadd.f32 1.0, %v1922_v5  ;;  %v1679_v51 = vpop.f32.mrf.mxu0  ;;  %1434 = vst.msk [vmem:[%s3569_s4 + $0x160] sm:$0xff] %vm109_vm0, %v1353_v46  ;;  %v1115_v54 = vmul.f32 0.70710677, %v2755_v40  ;;  %v670_v60 = vadd.f32 %v2602_v23, %v669_v45  ;;  %v835_v5 = vld [vmem:[%s3568_s1 + $0x60] sm:$0xff]  ;;  %v876_v46 = vld [vmem:[%s3568_s1 + $0x1a8] sm:$0xff] }
  0xf1   :  { %v1802_v52 = vpop.f32.mrf.mxu1  ;;  %v1313_v53 = vmul.f32 %v1232_v47, %v989_v34  ;;  %v2772_v57 = vadd.f32 %v832_v42, %v465_v16  ;;  %1935 = verf.f32 %v1074_v50 }
  0xf2   :  { %v1354_v59 = vmul.f32 %v1273_v49, %v1030_v48  ;;  %v469_v62 = vpop.f32.mrf.mxu0  ;;  %v1924_v1 = vpop.eup %1923  ;;  %1937 = verf.f32 %v1115_v54  ;;  %v2795_v55 = vadd.f32 %v873_v17, %v670_v60  ;;  %v992_v52 = vmul.f32 0.5, %v2732_v20 }
  0xf3   :  { %v674_v43 = vpop.f32.mrf.mxu1  ;;  %1394 = vst.msk [vmem:[%s3569_s4 + $0x20] sm:$0xff] %vm109_vm0, %v1313_v53  ;;  %v1075_v2 = vmul.f32 0.70710677, %v2772_v57  ;;  %v470_v3 = vadd.f32 %v2602_v23, %v469_v62  ;;  %v1926_v6 = vpop.eup %1925  ;;  %v1233_v8 = vadd.f32 1.0, %v1924_v1  ;;  %v1033_v17 = vmul.f32 0.5, %v2734_v21  ;;  %v877_v21 = vld [vmem:[%s3568_s1 + $0x1b0] sm:$0xff] }
  0xf4   :  { %1435 = vst.msk [vmem:[%s3569_s4 + $0x168] sm:$0xff] %vm109_vm0, %v1354_v59  ;;  %v675_v9 = vadd.f32 %v2602_v23, %v674_v43  ;;  %v1682_v10 = vpop.f32.mrf.mxu0  ;;  %v1274_v13 = vadd.f32 1.0, %v1926_v6  ;;  %v1116_v56 = vmul.f32 0.70710677, %v2795_v55  ;;  %v836_v43 = vld [vmem:[%s3568_s1 + $0x68] sm:$0xff] }
  0xf5   :  { %v1805_v11 = vpop.f32.mrf.mxu1  ;;  %1939 = verf.f32 %v1075_v2  ;;  %v2799_v14 = vadd.f32 %v833_v63, %v470_v3  ;;  %v1314_v15 = vmul.f32 %v1233_v8, %v990_v7  ;;  %v993_v8 = vmul.f32 0.5, %v2753_v39 }
  0xf6   :  { %v2802_v18 = vadd.f32 %v874_v44, %v675_v9  ;;  %v474_v19 = vpop.f32.mrf.mxu0  ;;  %v1928_v24 = vpop.eup %1927  ;;  %v1355_v25 = vmul.f32 %v1274_v13, %v1031_v12  ;;  %1941 = verf.f32 %v1116_v56  ;;  %v1034_v13 = vmul.f32 0.5, %v2755_v40 }
  0xf7   :  { %v679_v22 = vpop.f32.mrf.mxu1  ;;  %v1076_v41 = vmul.f32 0.70710677, %v2799_v14  ;;  %v475_v0 = vadd.f32 %v2602_v23, %v474_v19  ;;  %v1930_v27 = vpop.eup %1929  ;;  %1395 = vst.msk [vmem:[%s3569_s4 + $0x28] sm:$0xff] %vm109_vm0, %v1314_v15  ;;  %v1234_v28 = vadd.f32 1.0, %v1928_v24  ;;  %v994_v40 = vmul.f32 0.5, %v2772_v57  ;;  %v878_v57 = vld [vmem:[%s3568_s1 + $0x1b8] sm:$0xff] }
  0xf8   :  { %v1117_v30 = vmul.f32 0.70710677, %v2802_v18  ;;  %v1685_v31 = vpop.f32.mrf.mxu0  ;;  %1436 = vst.msk [vmem:[%s3569_s4 + $0x170] sm:$0xff] %vm109_vm0, %v1355_v25  ;;  %v1275_v34 = vadd.f32 1.0, %v1930_v27  ;;  %v680_v61 = vadd.f32 %v2602_v23, %v679_v22 }
  0xf9   :  { %v1808_v33 = vpop.f32.mrf.mxu1  ;;  %1943 = verf.f32 %v1076_v41  ;;  %v2823_v35 = vadd.f32 %v834_v37, %v475_v0  ;;  %v1315_v36 = vmul.f32 %v1234_v28, %v991_v26  ;;  %v837_v0 = vld [vmem:[%s3568_s1 + $0x70] sm:$0xff] }
  0xfa   :  { %1945 = verf.f32 %v1117_v30  ;;  %v479_v32 = vpop.f32.mrf.mxu0  ;;  %v1356_v4 = vmul.f32 %v1275_v34, %v1032_v29  ;;  %v2827_v45 = vadd.f32 %v875_v58, %v680_v61  ;;  %v1932_v47 = vpop.eup %1931  ;;  %v1035_v34 = vmul.f32 0.5, %v2795_v55 }
  0xfb   :  { %v684_v38 = vpop.f32.mrf.mxu1  ;;  %v1077_v42 = vmul.f32 0.70710677, %v2823_v35  ;;  %1396 = vst.msk [vmem:[%s3569_s4 + $0x30] sm:$0xff] %vm109_vm0, %v1315_v36  ;;  %v480_v16 = vadd.f32 %v2602_v23, %v479_v32  ;;  %v1934_v51 = vpop.eup %1933  ;;  %v1235_v53 = vadd.f32 1.0, %v1932_v47 }
  0xfc   :  { %v685_v48 = vadd.f32 %v2602_v23, %v684_v38  ;;  %v1688_v49 = vpop.f32.mrf.mxu0  ;;  %1437 = vst.msk [vmem:[%s3569_s4 + $0x178] sm:$0xff] %vm109_vm0, %v1356_v4  ;;  %v1118_v54 = vmul.f32 0.70710677, %v2827_v45  ;;  %v1276_v59 = vadd.f32 1.0, %v1934_v51  ;;  %v995_v38 = vmul.f32 0.5, %v2799_v14 }
  0xfd   :  { %v1811_v50 = vpop.f32.mrf.mxu1  ;;  %1947 = verf.f32 %v1077_v42  ;;  %v2848_v60 = vadd.f32 %v835_v5, %v480_v16  ;;  %v1316_v3 = vmul.f32 %v1235_v53, %v992_v52  ;;  %v838_v5 = vld [vmem:[%s3568_s1 + $0x78] sm:$0xff]  ;;  %v1036_v49 = vmul.f32 0.5, %v2802_v18 }
  0xfe   :  { %v2850_v62 = vadd.f32 %v876_v46, %v685_v48  ;;  %v484_v63 = vpop.f32.mrf.mxu0  ;;  %v1936_v2 = vpop.eup %1935  ;;  %1949 = verf.f32 %v1118_v54  ;;  %v1357_v7 = vmul.f32 %v1276_v59, %v1033_v17 }
  0xff   :  { %v689_v1 = vpop.f32.mrf.mxu1  ;;  %v485_v20 = vadd.f32 %v2602_v23, %v484_v63  ;;  %v1938_v6 = vpop.eup %1937  ;;  %v1236_v9 = vadd.f32 1.0, %v1936_v2  ;;  %v1078_v10 = vmul.f32 0.70710677, %v2848_v60  ;;  %1397 = vst.msk [vmem:[%s3569_s4 + $0x38] sm:$0xff] %vm109_vm0, %v1316_v3  ;;  %v879_v63 = vld [vmem:[%s3568_s1 + $0x1c0] sm:$0xff] }
 0x100   :  { %v690_v44 = vadd.f32 %v2602_v23, %v689_v1  ;;  %v1691_v11 = vpop.f32.mrf.mxu0  ;;  %v1277_v15 = vadd.f32 1.0, %v1938_v6  ;;  %v1119_v56 = vmul.f32 0.70710677, %v2850_v62  ;;  %1438 = vst.msk [vmem:[%s3569_s4 + $0x180] sm:$0xff] %vm109_vm0, %v1357_v7  ;;  %v839_v6 = vld [vmem:[%s3568_s1 + $0x80] sm:$0xff]  ;;  %v880_v7 = vld [vmem:[%s3568_s1 + $0x1c8] sm:$0xff] }
 0x101   :  { %v1814_v12 = vpop.f32.mrf.mxu1  ;;  %v2868_v19 = vadd.f32 %v836_v43, %v485_v20  ;;  %v1317_v39 = vmul.f32 %v1236_v9, %v993_v8  ;;  %1951 = verf.f32 %v1078_v10  ;;  %v996_v20 = vmul.f32 0.5, %v2823_v35 }
 0x102   :  { %v1940_v37 = vpop.eup %1939  ;;  %v2874_v22 = vadd.f32 %v877_v21, %v690_v44  ;;  %v489_v24 = vpop.f32.mrf.mxu0  ;;  %v1358_v26 = vmul.f32 %v1277_v15, %v1034_v13  ;;  %1953 = verf.f32 %v1119_v56  ;;  %v1037_v15 = vmul.f32 0.5, %v2827_v45 }
 0x103   :  { %v694_v25 = vpop.f32.mrf.mxu1  ;;  %v1237_v41 = vadd.f32 1.0, %v1940_v37  ;;  %1398 = vst.msk [vmem:[%s3569_s4 + $0x40] sm:$0xff] %vm109_vm0, %v1317_v39  ;;  %v1079_v27 = vmul.f32 0.70710677, %v2868_v19  ;;  %v490_v29 = vadd.f32 %v2602_v23, %v489_v24  ;;  %v1942_v31 = vpop.eup %1941 }
 0x104   :  { %v1120_v28 = vmul.f32 0.70710677, %v2874_v22  ;;  %v1694_v30 = vpop.f32.mrf.mxu0  ;;  %1439 = vst.msk [vmem:[%s3569_s4 + $0x188] sm:$0xff] %vm109_vm0, %v1358_v26  ;;  %v695_v61 = vadd.f32 %v2602_v23, %v694_v25  ;;  %v1278_v32 = vadd.f32 1.0, %v1942_v31  ;;  %v840_v26 = vld [vmem:[%s3568_s1 + $0x88] sm:$0xff] }
 0x105   :  { %v1817_v58 = vpop.f32.mrf.mxu1  ;;  %v1318_v33 = vmul.f32 %v1237_v41, %v994_v40  ;;  %1955 = verf.f32 %v1079_v27  ;;  %v2897_v4 = vadd.f32 %v837_v0, %v490_v29 }
 0x106   :  { %v1944_v36 = vpop.eup %1943  ;;  %v494_v42 = vpop.f32.mrf.mxu0  ;;  %1957 = verf.f32 %v1120_v28  ;;  %v2906_v16 = vadd.f32 %v878_v57, %v695_v61  ;;  %v1359_v48 = vmul.f32 %v1278_v32, %v1035_v34  ;;  %v881_v28 = vld [vmem:[%s3568_s1 + $0x1d0] sm:$0xff]  ;;  %v997_v57 = vmul.f32 0.5, %v2848_v60 }
 0x107   :  { %v699_v46 = vpop.f32.mrf.mxu1  ;;  %v1946_v47 = vpop.eup %1945  ;;  %1399 = vst.msk [vmem:[%s3569_s4 + $0x48] sm:$0xff] %vm109_vm0, %v1318_v33  ;;  %v1238_v55 = vadd.f32 1.0, %v1944_v36  ;;  %v495_v14 = vadd.f32 %v2602_v23, %v494_v42  ;;  %v1080_v51 = vmul.f32 0.70710677, %v2897_v4  ;;  %v1038_v34 = vmul.f32 0.5, %v2850_v62  ;;  %v841_v62 = vld [vmem:[%s3568_s1 + $0x90] sm:$0xff] }
 0x108   :  { %v1279_v50 = vadd.f32 1.0, %v1946_v47  ;;  %v1697_v52 = vpop.f32.mrf.mxu0  ;;  %v1121_v17 = vmul.f32 0.70710677, %v2906_v16  ;;  %1440 = vst.msk [vmem:[%s3569_s4 + $0x190] sm:$0xff] %vm109_vm0, %v1359_v48  ;;  %v700_v1 = vadd.f32 %v2602_v23, %v699_v46  ;;  %v998_v48 = vmul.f32 0.5, %v2868_v19 }
 0x109   :  { %v1820_v53 = vpop.f32.mrf.mxu1  ;;  %v1319_v54 = vmul.f32 %v1238_v55, %v995_v38  ;;  %v2912_v59 = vadd.f32 %v838_v5, %v495_v14  ;;  %1959 = verf.f32 %v1080_v51  ;;  %v882_v52 = vld [vmem:[%s3568_s1 + $0x1d8] sm:$0xff] }
 0x10a   :  { %v1948_v43 = vpop.eup %1947  ;;  %v1360_v18 = vmul.f32 %v1279_v50, %v1036_v49  ;;  %v499_v2 = vpop.f32.mrf.mxu0  ;;  %1961 = verf.f32 %v1121_v17  ;;  %v2938_v9 = vadd.f32 %v879_v63, %v700_v1  ;;  %v1039_v17 = vmul.f32 0.5, %v2874_v22 }
 0x10b   :  { %v704_v3 = vpop.f32.mrf.mxu1  ;;  %1400 = vst.msk [vmem:[%s3569_s4 + $0x50] sm:$0xff] %vm109_vm0, %v1319_v54  ;;  %v1239_v44 = vadd.f32 1.0, %v1948_v43  ;;  %v1081_v21 = vmul.f32 0.70710677, %v2912_v59  ;;  %v1950_v8 = vpop.eup %1949  ;;  %v500_v35 = vadd.f32 %v2602_v23, %v499_v2  ;;  %v842_v2 = vld [vmem:[%s3568_s1 + $0x98] sm:$0xff] }
 0x10c   :  { %1441 = vst.msk [vmem:[%s3569_s4 + $0x198] sm:$0xff] %vm109_vm0, %v1360_v18  ;;  %v705_v10 = vadd.f32 %v2602_v23, %v704_v3  ;;  %v1700_v11 = vpop.f32.mrf.mxu0  ;;  %v1280_v56 = vadd.f32 1.0, %v1950_v8  ;;  %v1122_v37 = vmul.f32 0.70710677, %v2938_v9 }
 0x10d   :  { %v1823_v12 = vpop.f32.mrf.mxu1  ;;  %v1320_v13 = vmul.f32 %v1239_v44, %v996_v20  ;;  %1963 = verf.f32 %v1081_v21  ;;  %v2944_v39 = vadd.f32 %v839_v6, %v500_v35  ;;  %v999_v35 = vmul.f32 0.5, %v2897_v4 }
 0x10e   :  { %v2946_v24 = vadd.f32 %v880_v7, %v705_v10  ;;  %v504_v25 = vpop.f32.mrf.mxu0  ;;  %v1952_v41 = vpop.eup %1951  ;;  %v1361_v45 = vmul.f32 %v1280_v56, %v1037_v15  ;;  %1965 = verf.f32 %v1122_v37  ;;  %v883_v7 = vld [vmem:[%s3568_s1 + $0x1e0] sm:$0xff]  ;;  %v1040_v15 = vmul.f32 0.5, %v2906_v16 }
 0x10f   :  { %v709_v40 = vpop.f32.mrf.mxu1  ;;  %1401 = vst.msk [vmem:[%s3569_s4 + $0x58] sm:$0xff] %vm109_vm0, %v1320_v13  ;;  %v505_v0 = vadd.f32 %v2602_v23, %v504_v25  ;;  %v1954_v29 = vpop.eup %1953  ;;  %v1240_v30 = vadd.f32 1.0, %v1952_v41  ;;  %v1082_v58 = vmul.f32 0.70710677, %v2944_v39  ;;  %v843_v16 = vld [vmem:[%s3568_s1 + $0xa0] sm:$0xff] }
 0x110   :  { %v710_v27 = vadd.f32 %v2602_v23, %v709_v40  ;;  %v1703_v31 = vpop.f32.mrf.mxu0  ;;  %1442 = vst.msk [vmem:[%s3569_s4 + $0x1a0] sm:$0xff] %vm109_vm0, %v1361_v45  ;;  %v1281_v61 = vadd.f32 1.0, %v1954_v29  ;;  %v1123_v36 = vmul.f32 0.70710677, %v2946_v24 }
 0x111   :  { %v1826_v33 = vpop.f32.mrf.mxu1  ;;  %v2968_v32 = vadd.f32 %v840_v26, %v505_v0  ;;  %v1321_v38 = vmul.f32 %v1240_v30, %v997_v57  ;;  %1967 = verf.f32 %v1082_v58 }
 0x112   :  { %v2970_v60 = vadd.f32 %v881_v28, %v710_v27  ;;  %v509_v42 = vpop.f32.mrf.mxu0  ;;  %v1956_v46 = vpop.eup %1955  ;;  %v1362_v47 = vmul.f32 %v1281_v61, %v1038_v34  ;;  %1969 = verf.f32 %v1123_v36  ;;  %v1000_v27 = vmul.f32 0.5, %v2912_v59  ;;  %v884_v59 = vld [vmem:[%s3568_s1 + $0x1e8] sm:$0xff] }
 0x113   :  { %v714_v5 = vpop.f32.mrf.mxu1  ;;  %v1083_v55 = vmul.f32 0.70710677, %v2968_v32  ;;  %v1958_v14 = vpop.eup %1957  ;;  %1402 = vst.msk [vmem:[%s3569_s4 + $0x60] sm:$0xff] %vm109_vm0, %v1321_v38  ;;  %v1241_v49 = vadd.f32 1.0, %v1956_v46  ;;  %v510_v51 = vadd.f32 %v2602_v23, %v509_v42  ;;  %v1041_v36 = vmul.f32 0.5, %v2938_v9  ;;  %v844_v46 = vld [vmem:[%s3568_s1 + $0xa8] sm:$0xff] }
 0x114   :  { %v1124_v50 = vmul.f32 0.70710677, %v2970_v60  ;;  %v1706_v53 = vpop.f32.mrf.mxu0  ;;  %1443 = vst.msk [vmem:[%s3569_s4 + $0x1a8] sm:$0xff] %vm109_vm0, %v1362_v47  ;;  %v1282_v63 = vadd.f32 1.0, %v1958_v14  ;;  %v715_v19 = vadd.f32 %v2602_v23, %v714_v5 }
 0x115   :  { %v1829_v54 = vpop.f32.mrf.mxu1  ;;  %1971 = verf.f32 %v1083_v55  ;;  %v1322_v43 = vmul.f32 %v1241_v49, %v998_v48  ;;  %v2992_v18 = vadd.f32 %v841_v62, %v510_v51  ;;  %v885_v48 = vld [vmem:[%s3568_s1 + $0x1f0] sm:$0xff]  ;;  %v1001_v51 = vmul.f32 0.5, %v2944_v39 }
 0x116   :  { %1973 = verf.f32 %v1124_v50  ;;  %v514_v1 = vpop.f32.mrf.mxu0  ;;  %v1960_v20 = vpop.eup %1959  ;;  %v1363_v44 = vmul.f32 %v1282_v63, %v1039_v17  ;;  %v2997_v21 = vadd.f32 %v882_v52, %v715_v19  ;;  %v1042_v63 = vmul.f32 0.5, %v2946_v24 }
 0x117   :  { %v719_v3 = vpop.f32.mrf.mxu1  ;;  %v515_v22 = vadd.f32 %v2602_v23, %v514_v1  ;;  %v1962_v8 = vpop.eup %1961  ;;  %1403 = vst.msk [vmem:[%s3569_s4 + $0x68] sm:$0xff] %vm109_vm0, %v1322_v43  ;;  %v1242_v10 = vadd.f32 1.0, %v1960_v20  ;;  %v1084_v11 = vmul.f32 0.70710677, %v2992_v18  ;;  %v1002_v24 = vmul.f32 0.5, %v2968_v32 }
 0x118   :  { %v720_v6 = vadd.f32 %v2602_v23, %v719_v3  ;;  %v1709_v12 = vpop.f32.mrf.mxu0  ;;  %1444 = vst.msk [vmem:[%s3569_s4 + $0x1b0] sm:$0xff] %vm109_vm0, %v1363_v44  ;;  %v1283_v56 = vadd.f32 1.0, %v1962_v8  ;;  %v1125_v37 = vmul.f32 0.70710677, %v2997_v21  ;;  %v845_v8 = vld [vmem:[%s3568_s1 + $0xb0] sm:$0xff] }
 0x119   :  { %v1832_v13 = vpop.f32.mrf.mxu1  ;;  %v3016_v25 = vadd.f32 %v842_v2, %v515_v22  ;;  %v1323_v40 = vmul.f32 %v1242_v10, %v999_v35  ;;  %1975 = verf.f32 %v1084_v11  ;;  %v886_v35 = vld [vmem:[%s3568_s1 + $0x1f8] sm:$0xff]  ;;  %v1043_v10 = vmul.f32 0.5, %v2970_v60 }
 0x11a   :  { %v1964_v26 = vpop.eup %1963  ;;  %v3018_v4 = vadd.f32 %v883_v7, %v720_v6  ;;  %v519_v41 = vpop.f32.mrf.mxu0  ;;  %v1364_v0 = vmul.f32 %v1283_v56, %v1040_v15  ;;  %1977 = verf.f32 %v1125_v37 }
 0x11b   :  { %v724_v45 = vpop.f32.mrf.mxu1  ;;  %v1243_v28 = vadd.f32 1.0, %v1964_v26  ;;  %1404 = vst.msk [vmem:[%s3569_s4 + $0x70] sm:$0xff] %vm109_vm0, %v1323_v40  ;;  %v1085_v29 = vmul.f32 0.70710677, %v3016_v25  ;;  %v520_v30 = vadd.f32 %v2602_v23, %v519_v41  ;;  %v1966_v33 = vpop.eup %1965 }
 0x11c   :  { %v1126_v57 = vmul.f32 0.70710677, %v3018_v4  ;;  %v1712_v58 = vpop.f32.mrf.mxu0  ;;  %1445 = vst.msk [vmem:[%s3569_s4 + $0x1b8] sm:$0xff] %vm109_vm0, %v1364_v0  ;;  %v725_v61 = vadd.f32 %v2602_v23, %v724_v45  ;;  %v1284_v38 = vadd.f32 1.0, %v1966_v33 }
 0x11d   :  { %v1835_v31 = vpop.f32.mrf.mxu1  ;;  %v1324_v34 = vmul.f32 %v1243_v28, %v1000_v27  ;;  %1979 = verf.f32 %v1085_v29  ;;  %v3040_v42 = vadd.f32 %v843_v16, %v520_v30  ;;  %v846_v16 = vld [vmem:[%s3568_s1 + $0xb8] sm:$0xff]  ;;  %v887_v29 = vld [vmem:[%s3568_s1 + $0x200] sm:$0xff]  ;;  %v1003_v30 = vmul.f32 0.5, %v2992_v18 }
 0x11e   :  { %v524_v5 = vpop.f32.mrf.mxu0  ;;  %v1968_v55 = vpop.eup %1967  ;;  %1981 = verf.f32 %v1126_v57  ;;  %v3049_v62 = vadd.f32 %v884_v59, %v725_v61  ;;  %v1365_v50 = vmul.f32 %v1284_v38, %v1041_v36  ;;  %v847_v18 = vld [vmem:[%s3568_s1 + $0xc0] sm:$0xff] }
 0x11f   :  { %v729_v47 = vpop.f32.mrf.mxu1  ;;  %1405 = vst.msk [vmem:[%s3569_s4 + $0x78] sm:$0xff] %vm109_vm0, %v1324_v34  ;;  %v525_v9 = vadd.f32 %v2602_v23, %v524_v5  ;;  %v1970_v49 = vpop.eup %1969  ;;  %v1244_v52 = vadd.f32 1.0, %v1968_v55  ;;  %v1086_v53 = vmul.f32 0.70710677, %v3040_v42  ;;  %v1044_v34 = vmul.f32 0.5, %v2997_v21 }
 0x120   :  { %v730_v14 = vadd.f32 %v2602_v23, %v729_v47  ;;  %v1715_v54 = vpop.f32.mrf.mxu0  ;;  %v1285_v19 = vadd.f32 1.0, %v1970_v49  ;;  %v1127_v43 = vmul.f32 0.70710677, %v3049_v62  ;;  %1446 = vst.msk [vmem:[%s3569_s4 + $0x1c0] sm:$0xff] %vm109_vm0, %v1365_v50  ;;  %v3122_v21 = vld [vmem:[%s3567_s3] ss:$0 sm:$0xff] }
 0x121   :  { %v1838_v17 = vpop.f32.mrf.mxu1  ;;  %v3060_v1 = vadd.f32 %v844_v46, %v525_v9  ;;  %v1325_v3 = vmul.f32 %v1244_v52, %v1001_v51  ;;  %1983 = verf.f32 %v1086_v53  ;;  %v888_v50 = vld [vmem:[%s3568_s1 + $0x208] sm:$0xff]  ;;  %v1004_v52 = vmul.f32 0.5, %v3016_v25 }
 0x122   :  { %v1972_v2 = vpop.eup %1971  ;;  %v3066_v39 = vadd.f32 %v885_v48, %v730_v14  ;;  %v529_v20 = vpop.f32.mrf.mxu0  ;;  %v1366_v6 = vmul.f32 %v1285_v19, %v1042_v63  ;;  %1985 = verf.f32 %v1127_v43  ;;  %v1045_v19 = vmul.f32 0.5, %v3018_v4  ;;  %v848_v4 = vld [vmem:[%s3568_s1 + $0xc8] sm:$0xff] }
 0x123   :  { %v734_v44 = vpop.f32.mrf.mxu1  ;;  %v1974_v22 = vpop.eup %1973  ;;  %v1245_v7 = vadd.f32 1.0, %v1972_v2  ;;  %1406 = vst.msk [vmem:[%s3569_s4 + $0x80] sm:$0xff] %vm109_vm0, %v1325_v3  ;;  %v1087_v32 = vmul.f32 0.70710677, %v3060_v1  ;;  %v530_v37 = vadd.f32 %v2602_v23, %v529_v20 }
 0x124   :  { %v1286_v11 = vadd.f32 1.0, %v1974_v22  ;;  %v1128_v12 = vmul.f32 0.70710677, %v3066_v39  ;;  %v1718_v13 = vpop.f32.mrf.mxu0  ;;  %1447 = vst.msk [vmem:[%s3569_s4 + $0x1c8] sm:$0xff] %vm109_vm0, %v1366_v6  ;;  %v735_v26 = vadd.f32 %v2602_v23, %v734_v44 }
 0x125   :  { %v1841_v15 = vpop.f32.mrf.mxu1  ;;  %v1326_v56 = vmul.f32 %v1245_v7, %v1002_v24  ;;  %1987 = verf.f32 %v1087_v32  ;;  %v3092_v0 = vadd.f32 %v845_v8, %v530_v37 }
 0x126   :  { %v1367_v40 = vmul.f32 %v1286_v11, %v1043_v10  ;;  %v534_v60 = vpop.f32.mrf.mxu0  ;;  %v1976_v45 = vpop.eup %1975  ;;  %1989 = verf.f32 %v1128_v12  ;;  %v3094_v27 = vadd.f32 %v886_v35, %v735_v26  ;;  %v1005_v35 = vmul.f32 0.5, %v3040_v42  ;;  %v889_v12 = vld [vmem:[%s3568_s1 + $0x210] sm:$0xff] }
 0x127   :  { %v739_v41 = vpop.f32.mrf.mxu1  ;;  %1407 = vst.msk [vmem:[%s3569_s4 + $0x88] sm:$0xff] %vm109_vm0, %v1326_v56  ;;  %v535_v28 = vadd.f32 %v2602_v23, %v534_v60  ;;  %v1978_v57 = vpop.eup %1977  ;;  %v1246_v59 = vadd.f32 1.0, %v1976_v45  ;;  %v1088_v36 = vmul.f32 0.70710677, %v3092_v0  ;;  %v1046_v56 = vmul.f32 0.5, %v3049_v62 }
 0x128   :  { %1448 = vst.msk [vmem:[%s3569_s4 + $0x1d0] sm:$0xff] %vm109_vm0, %v1367_v40  ;;  %v740_v58 = vadd.f32 %v2602_v23, %v739_v41  ;;  %v1721_v31 = vpop.f32.mrf.mxu0  ;;  %v1287_v61 = vadd.f32 1.0, %v1978_v57  ;;  %v1129_v5 = vmul.f32 0.70710677, %v3094_v27  ;;  %v849_v41 = vld [vmem:[%s3568_s1 + $0xd0] sm:$0xff] }
 0x129   :  { %v1844_v33 = vpop.f32.mrf.mxu1  ;;  %v1327_v38 = vmul.f32 %v1246_v59, %v1003_v30  ;;  %v3112_v46 = vadd.f32 %v846_v16, %v535_v28  ;;  %1991 = verf.f32 %v1088_v36  ;;  %v890_v30 = vld [vmem:[%s3568_s1 + $0x218] sm:$0xff]  ;;  %v1047_v36 = vmul.f32 0.5, %v3066_v39  ;;  %v891_v39 = vld [vmem:[%s3568_s1 + $0x220] sm:$0xff] }
 0x12a   :  { %v3114_v47 = vadd.f32 %v887_v29, %v740_v58  ;;  %v539_v55 = vpop.f32.mrf.mxu0  ;;  %v1980_v9 = vpop.eup %1979  ;;  %v1368_v14 = vmul.f32 %v1287_v61, %v1044_v34  ;;  %1993 = verf.f32 %v1129_v5  ;;  %v1006_v58 = vmul.f32 0.5, %v3060_v1 }
 0x12b   :  { %v744_v23 = vpop.f32.mrf.mxu1  ;;  %v540_v48 = vadd.f32 %v3122_v21, %v539_v55  ;;  %v1982_v51 = vpop.eup %1981  ;;  %1408 = vst.msk [vmem:[%s3569_s4 + $0x90] sm:$0xff] %vm109_vm0, %v1327_v38  ;;  %v1247_v53 = vadd.f32 1.0, %v1980_v9  ;;  %v1089_v54 = vmul.f32 0.70710677, %v3112_v46 }
 0x12c   :  { %v745_v49 = vadd.f32 %v3122_v21, %v744_v23  ;;  %v1724_v17 = vpop.f32.mrf.mxu0  ;;  %1449 = vst.msk [vmem:[%s3569_s4 + $0x1d8] sm:$0xff] %vm109_vm0, %v1368_v14  ;;  %v1288_v43 = vadd.f32 1.0, %v1982_v51  ;;  %v1130_v2 = vmul.f32 0.70710677, %v3114_v47 }
 0x12d   :  { %v1847_v63 = vpop.f32.mrf.mxu1  ;;  %v3141_v3 = vadd.f32 %v847_v18, %v540_v48  ;;  %v1328_v20 = vmul.f32 %v1247_v53, %v1004_v52  ;;  %1995 = verf.f32 %v1089_v54 }
 0x12e   :  { %v3143_v25 = vadd.f32 %v888_v50, %v745_v49  ;;  %v544_v44 = vpop.f32.mrf.mxu0  ;;  %v1984_v6 = vpop.eup %1983  ;;  %v1369_v24 = vmul.f32 %v1288_v43, %v1045_v19  ;;  %1997 = verf.f32 %v1130_v2  ;;  %v850_v49 = vld [vmem:[%s3568_s1 + $0xd8] sm:$0xff]  ;;  %v1007_v19 = vmul.f32 0.5, %v3092_v0 }
 0x12f   :  { %v749_v22 = vpop.f32.mrf.mxu1  ;;  %v1090_v7 = vmul.f32 0.70710677, %v3141_v3  ;;  %v1986_v8 = vpop.eup %1985  ;;  %1409 = vst.msk [vmem:[%s3569_s4 + $0x98] sm:$0xff] %vm109_vm0, %v1328_v20  ;;  %v1248_v10 = vadd.f32 1.0, %v1984_v6  ;;  %v545_v32 = vadd.f32 %v3122_v21, %v544_v44  ;;  %v1048_v2 = vmul.f32 0.5, %v3094_v27  ;;  %v892_v27 = vld [vmem:[%s3568_s1 + $0x228] sm:$0xff] }
 0x130   :  { %v1131_v11 = vmul.f32 0.70710677, %v3143_v25  ;;  %v1727_v13 = vpop.f32.mrf.mxu0  ;;  %1450 = vst.msk [vmem:[%s3569_s4 + $0x1e0] sm:$0xff] %vm109_vm0, %v1369_v24  ;;  %v1289_v37 = vadd.f32 1.0, %v1986_v8  ;;  %v750_v42 = vadd.f32 %v3122_v21, %v749_v22  ;;  %v851_v24 = vld [vmem:[%s3568_s1 + $0xe0] sm:$0xff] }
 0x131   :  { %v1850_v15 = vpop.f32.mrf.mxu1  ;;  %1999 = verf.f32 %v1090_v7  ;;  %v1329_v26 = vmul.f32 %v1248_v10, %v1005_v35  ;;  %v3165_v40 = vadd.f32 %v848_v4, %v545_v32  ;;  %v1008_v32 = vmul.f32 0.5, %v3112_v46 }
 0x132   :  { %2001 = verf.f32 %v1131_v11  ;;  %v549_v60 = vpop.f32.mrf.mxu0  ;;  %v1988_v28 = vpop.eup %1987  ;;  %v1370_v16 = vmul.f32 %v1289_v37, %v1046_v56  ;;  %v3170_v29 = vadd.f32 %v889_v12, %v750_v42  ;;  %v1049_v37 = vmul.f32 0.5, %v3114_v47 }
 0x133   :  { %v754_v45 = vpop.f32.mrf.mxu1  ;;  %v550_v62 = vadd.f32 %v3122_v21, %v549_v60  ;;  %v1990_v59 = vpop.eup %1989  ;;  %1410 = vst.msk [vmem:[%s3569_s4 + $0xa0] sm:$0xff] %vm109_vm0, %v1329_v26  ;;  %v1249_v31 = vadd.f32 1.0, %v1988_v28  ;;  %v1091_v33 = vmul.f32 0.70710677, %v3165_v40  ;;  %v1009_v47 = vmul.f32 0.5, %v3141_v3 }
 0x134   :  { %v755_v57 = vadd.f32 %v3122_v21, %v754_v45  ;;  %v1730_v34 = vpop.f32.mrf.mxu0  ;;  %1451 = vst.msk [vmem:[%s3569_s4 + $0x1e8] sm:$0xff] %vm109_vm0, %v1370_v16  ;;  %v1290_v38 = vadd.f32 1.0, %v1990_v59  ;;  %v1132_v5 = vmul.f32 0.70710677, %v3170_v29  ;;  %v852_v59 = vld [vmem:[%s3568_s1 + $0xe8] sm:$0xff] }
 0x135   :  { %v1853_v61 = vpop.f32.mrf.mxu1  ;;  %v3189_v55 = vadd.f32 %v849_v41, %v550_v62  ;;  %v1330_v18 = vmul.f32 %v1249_v31, %v1006_v58  ;;  %2003 = verf.f32 %v1091_v33  ;;  %v893_v58 = vld [vmem:[%s3568_s1 + $0x230] sm:$0xff]  ;;  %v1050_v31 = vmul.f32 0.5, %v3143_v25 }
 0x136   :  { %v3191_v1 = vadd.f32 %v890_v30, %v755_v57  ;;  %v554_v23 = vpop.f32.mrf.mxu0  ;;  %v1371_v14 = vmul.f32 %v1290_v38, %v1047_v36  ;;  %2005 = verf.f32 %v1132_v5  ;;  %v1992_v50 = vpop.eup %1991 }
 0x137   :  { %v759_v9 = vpop.f32.mrf.mxu1  ;;  %v1092_v48 = vmul.f32 0.70710677, %v3189_v55  ;;  %1411 = vst.msk [vmem:[%s3569_s4 + $0xa8] sm:$0xff] %vm109_vm0, %v1330_v18  ;;  %v555_v52 = vadd.f32 %v3122_v21, %v554_v23  ;;  %v1994_v63 = vpop.eup %1993  ;;  %v1250_v43 = vadd.f32 1.0, %v1992_v50  ;;  %v853_v50 = vld [vmem:[%s3568_s1 + $0xf0] sm:$0xff] }
 0x138   :  { %v1133_v51 = vmul.f32 0.70710677, %v3191_v1  ;;  %v760_v53 = vadd.f32 %v3122_v21, %v759_v9  ;;  %v1733_v54 = vpop.f32.mrf.mxu0  ;;  %1452 = vst.msk [vmem:[%s3569_s4 + $0x1f0] sm:$0xff] %vm109_vm0, %v1371_v14  ;;  %v1291_v20 = vadd.f32 1.0, %v1994_v63 }
 0x139   :  { %v1856_v17 = vpop.f32.mrf.mxu1  ;;  %2007 = verf.f32 %v1092_v48  ;;  %v3213_v44 = vadd.f32 %v850_v49, %v555_v52  ;;  %v1331_v8 = vmul.f32 %v1250_v43, %v1007_v19  ;;  %v1051_v43 = vmul.f32 0.5, %v3170_v29 }
 0x13a   :  { %2009 = verf.f32 %v1133_v51  ;;  %v3215_v22 = vadd.f32 %v891_v39, %v760_v53  ;;  %v559_v6 = vpop.f32.mrf.mxu0  ;;  %v1996_v4 = vpop.eup %1995  ;;  %v1372_v11 = vmul.f32 %v1291_v20, %v1048_v2  ;;  %v894_v51 = vld [vmem:[%s3568_s1 + $0x238] sm:$0xff]  ;;  %v1010_v53 = vmul.f32 0.5, %v3165_v40 }
 0x13b   :  { %v764_v7 = vpop.f32.mrf.mxu1  ;;  %v560_v0 = vadd.f32 %v3122_v21, %v559_v6  ;;  %v1998_v10 = vpop.eup %1997  ;;  %v1251_v12 = vadd.f32 1.0, %v1996_v4  ;;  %v1093_v13 = vmul.f32 0.70710677, %v3213_v44  ;;  %1412 = vst.msk [vmem:[%s3569_s4 + $0xb0] sm:$0xff] %vm109_vm0, %v1331_v8  ;;  %v1011_v20 = vmul.f32 0.5, %v3189_v55 }
 0x13c   :  { %v765_v35 = vadd.f32 %v3122_v21, %v764_v7  ;;  %v1736_v15 = vpop.f32.mrf.mxu0  ;;  %v1292_v42 = vadd.f32 1.0, %v1998_v10  ;;  %v1134_v26 = vmul.f32 0.70710677, %v3215_v22  ;;  %1453 = vst.msk [vmem:[%s3569_s4 + $0x1f8] sm:$0xff] %vm109_vm0, %v1372_v11 }
 0x13d   :  { %v1859_v56 = vpop.f32.mrf.mxu1  ;;  %v3233_v60 = vadd.f32 %v851_v24, %v560_v0  ;;  %v1332_v46 = vmul.f32 %v1251_v12, %v1008_v32  ;;  %2011 = verf.f32 %v1093_v13  ;;  %v1052_v32 = vmul.f32 0.5, %v3191_v1  ;;  %v895_v1 = vld [vmem:[%s3568_s1 + $0x240] sm:$0xff] }
 0x13e   :  { %v2000_v41 = vpop.eup %1999  ;;  %v3239_v45 = vadd.f32 %v892_v27, %v765_v35  ;;  %v564_v28 = vpop.f32.mrf.mxu0  ;;  %v1373_v57 = vmul.f32 %v1292_v42, %v1049_v37  ;;  %2013 = verf.f32 %v1134_v26  ;;  %v854_v35 = vld [vmem:[%s3568_s1 + $0xf8] sm:$0xff] }
 0x13f   :  { %v769_v16 = vpop.f32.mrf.mxu1  ;;  %v2002_v62 = vpop.eup %2001  ;;  %v1252_v30 = vadd.f32 1.0, %v2000_v41  ;;  %1413 = vst.msk [vmem:[%s3569_s4 + $0xb8] sm:$0xff] %vm109_vm0, %v1332_v46  ;;  %v1094_v3 = vmul.f32 0.70710677, %v3233_v60  ;;  %v565_v5 = vadd.f32 %v3122_v21, %v564_v28 }
 0x140   :  { %v1293_v33 = vadd.f32 1.0, %v2002_v62  ;;  %v1135_v34 = vmul.f32 0.70710677, %v3239_v45  ;;  %v1739_v61 = vpop.f32.mrf.mxu0  ;;  %1454 = vst.msk [vmem:[%s3569_s4 + $0x200] sm:$0xff] %vm109_vm0, %v1373_v57  ;;  %v770_v18 = vadd.f32 %v3122_v21, %v769_v16  ;;  %v855_v16 = vld [vmem:[%s3568_s1 + $0x100] sm:$0xff] }
 0x141   :  { %v1862_v36 = vpop.f32.mrf.mxu1  ;;  %v1333_v38 = vmul.f32 %v1252_v30, %v1009_v47  ;;  %2015 = verf.f32 %v1094_v3  ;;  %v3265_v48 = vadd.f32 %v852_v59, %v565_v5  ;;  %v896_v59 = vld [vmem:[%s3568_s1 + $0x248] sm:$0xff] }
 0x142   :  { %v1374_v23 = vmul.f32 %v1293_v33, %v1050_v31  ;;  %v569_v25 = vpop.f32.mrf.mxu0  ;;  %v2004_v14 = vpop.eup %2003  ;;  %2017 = verf.f32 %v1135_v34  ;;  %v3267_v49 = vadd.f32 %v893_v58, %v770_v18  ;;  %v1012_v31 = vmul.f32 0.5, %v3213_v44  ;;  %v856_v44 = vld [vmem:[%s3568_s1 + $0x108] sm:$0xff] }
 0x143   :  { %v774_v9 = vpop.f32.mrf.mxu1  ;;  %1414 = vst.msk [vmem:[%s3569_s4 + $0xc0] sm:$0xff] %vm109_vm0, %v1333_v38  ;;  %v570_v39 = vadd.f32 %v3122_v21, %v569_v25  ;;  %v2006_v52 = vpop.eup %2005  ;;  %v1253_v54 = vadd.f32 1.0, %v2004_v14  ;;  %v1095_v6 = vmul.f32 0.70710677, %v3265_v48  ;;  %v1053_v38 = vmul.f32 0.5, %v3215_v22 }
 0x144   :  { %1455 = vst.msk [vmem:[%s3569_s4 + $0x208] sm:$0xff] %vm109_vm0, %v1374_v23  ;;  %v775_v17 = vadd.f32 %v3122_v21, %v774_v9  ;;  %v1742_v63 = vpop.f32.mrf.mxu0  ;;  %v1294_v2 = vadd.f32 1.0, %v2006_v52  ;;  %v1136_v4 = vmul.f32 0.70710677, %v3267_v49  ;;  %v1013_v52 = vmul.f32 0.5, %v3233_v60  ;;  %v897_v60 = vld [vmem:[%s3568_s1 + $0x250] sm:$0xff] }
 0x145   :  { %v1865_v19 = vpop.f32.mrf.mxu1  ;;  %v1334_v7 = vmul.f32 %v1253_v54, %v1010_v53  ;;  %v3286_v8 = vadd.f32 %v853_v50, %v570_v39  ;;  %2019 = verf.f32 %v1095_v6  ;;  %v1054_v63 = vmul.f32 0.5, %v3239_v45 }
 0x146   :  { %v2008_v24 = vpop.eup %2007  ;;  %v3288_v0 = vadd.f32 %v894_v51, %v775_v17  ;;  %v574_v40 = vpop.f32.mrf.mxu0  ;;  %v1375_v10 = vmul.f32 %v1294_v2, %v1051_v43  ;;  %2021 = verf.f32 %v1136_v4 }
 0x147   :  { %v779_v27 = vpop.f32.mrf.mxu1  ;;  %v2010_v29 = vpop.eup %2009  ;;  %v1254_v11 = vadd.f32 1.0, %v2008_v24  ;;  %v575_v55 = vadd.f32 %v3122_v21, %v574_v40  ;;  %1415 = vst.msk [vmem:[%s3569_s4 + $0xc8] sm:$0xff] %vm109_vm0, %v1334_v7  ;;  %v1096_v13 = vmul.f32 0.70710677, %v3286_v8 }
 0x148   :  { %v1295_v12 = vadd.f32 1.0, %v2010_v29  ;;  %v1745_v15 = vpop.f32.mrf.mxu0  ;;  %1456 = vst.msk [vmem:[%s3569_s4 + $0x210] sm:$0xff] %vm109_vm0, %v1375_v10  ;;  %v1137_v42 = vmul.f32 0.70710677, %v3288_v0  ;;  %v780_v46 = vadd.f32 %v3122_v21, %v779_v27  ;;  %v857_v29 = vld [vmem:[%s3568_s1 + $0x110] sm:$0xff]  ;;  %v898_v10 = vld [vmem:[%s3568_s1 + $0x258] sm:$0xff] }
 0x149   :  { %v1868_v56 = vpop.f32.mrf.mxu1  ;;  %v1335_v37 = vmul.f32 %v1254_v11, %v1011_v20  ;;  %v3305_v26 = vadd.f32 %v854_v35, %v575_v55  ;;  %2023 = verf.f32 %v1096_v13 }
 0x14a   :  { %v1376_v41 = vmul.f32 %v1295_v12, %v1052_v32  ;;  %v579_v28 = vpop.f32.mrf.mxu0  ;;  %v2012_v57 = vpop.eup %2011  ;;  %2025 = verf.f32 %v1137_v42  ;;  %v3328_v3 = vadd.f32 %v895_v1, %v780_v46  ;;  %v1014_v56 = vmul.f32 0.5, %v3265_v48 }
 0x14b   :  { %v784_v62 = vpop.f32.mrf.mxu1  ;;  %1416 = vst.msk [vmem:[%s3569_s4 + $0xd0] sm:$0xff] %vm109_vm0, %v1335_v37  ;;  %v1097_v47 = vmul.f32 0.70710677, %v3305_v26  ;;  %v580_v30 = vadd.f32 %v3122_v21, %v579_v28  ;;  %v2014_v58 = vpop.eup %2013  ;;  %v1255_v33 = vadd.f32 1.0, %v2012_v57  ;;  %v1055_v1 = vmul.f32 0.5, %v3267_v49  ;;  %v899_v49 = vld [vmem:[%s3568_s1 + $0x260] sm:$0xff] }
 0x14c   :  { %1457 = vst.msk [vmem:[%s3569_s4 + $0x218] sm:$0xff] %vm109_vm0, %v1376_v41  ;;  %v785_v34 = vadd.f32 %v3122_v21, %v784_v62  ;;  %v1748_v61 = vpop.f32.mrf.mxu0  ;;  %v1296_v5 = vadd.f32 1.0, %v2014_v58  ;;  %v1138_v25 = vmul.f32 0.70710677, %v3328_v3  ;;  %v858_v62 = vld [vmem:[%s3568_s1 + $0x118] sm:$0xff] }
 0x14d   :  { %v1871_v36 = vpop.f32.mrf.mxu1  ;;  %2027 = verf.f32 %v1097_v47  ;;  %v3332_v18 = vadd.f32 %v855_v16, %v580_v30  ;;  %v1336_v23 = vmul.f32 %v1255_v33, %v1012_v31  ;;  %v1015_v33 = vmul.f32 0.5, %v3286_v8 }
 0x14e   :  { %v3335_v9 = vadd.f32 %v896_v59, %v785_v34  ;;  %v584_v14 = vpop.f32.mrf.mxu0  ;;  %v2016_v50 = vpop.eup %2015  ;;  %v1377_v51 = vmul.f32 %v1296_v5, %v1053_v38  ;;  %2029 = verf.f32 %v1138_v25  ;;  %v1056_v5 = vmul.f32 0.5, %v3288_v0 }
 0x14f   :  { %v789_v39 = vpop.f32.mrf.mxu1  ;;  %v1098_v22 = vmul.f32 0.70710677, %v3332_v18  ;;  %v585_v53 = vadd.f32 %v3122_v21, %v584_v14  ;;  %v2018_v54 = vpop.eup %2017  ;;  %1417 = vst.msk [vmem:[%s3569_s4 + $0xd8] sm:$0xff] %vm109_vm0, %v1336_v23  ;;  %v1256_v17 = vadd.f32 1.0, %v2016_v50  ;;  %v1016_v0 = vmul.f32 0.5, %v3305_v26  ;;  %v900_v26 = vld [vmem:[%s3568_s1 + $0x268] sm:$0xff] }
 0x150   :  { %v1139_v19 = vmul.f32 0.70710677, %v3335_v9  ;;  %v1751_v43 = vpop.f32.mrf.mxu0  ;;  %1458 = vst.msk [vmem:[%s3569_s4 + $0x220] sm:$0xff] %vm109_vm0, %v1377_v51  ;;  %v1297_v20 = vadd.f32 1.0, %v2018_v54  ;;  %v790_v45 = vadd.f32 %v3122_v21, %v789_v39 }
 0x151   :  { %v1874_v2 = vpop.f32.mrf.mxu1  ;;  %2031 = verf.f32 %v1098_v22  ;;  %v3356_v6 = vadd.f32 %v856_v44, %v585_v53  ;;  %v1337_v24 = vmul.f32 %v1256_v17, %v1013_v52  ;;  %v859_v53 = vld [vmem:[%s3568_s1 + $0x120] sm:$0xff] }
 0x152   :  { %2033 = verf.f32 %v1139_v19  ;;  %v589_v7 = vpop.f32.mrf.mxu0  ;;  %v1378_v40 = vmul.f32 %v1297_v20, %v1054_v63  ;;  %v3360_v27 = vadd.f32 %v897_v60, %v790_v45  ;;  %v2020_v11 = vpop.eup %2019  ;;  %v1057_v20 = vmul.f32 0.5, %v3328_v3 }
 0x153   :  { %v794_v4 = vpop.f32.mrf.mxu1  ;;  %v1099_v35 = vmul.f32 0.70710677, %v3356_v6  ;;  %1418 = vst.msk [vmem:[%s3569_s4 + $0xe0] sm:$0xff] %vm109_vm0, %v1337_v24  ;;  %v590_v55 = vadd.f32 %v3122_v21, %v589_v7  ;;  %v2022_v15 = vpop.eup %2021  ;;  %v1257_v37 = vadd.f32 1.0, %v2020_v11 }
 0x154   :  { %v795_v32 = vadd.f32 %v3122_v21, %v794_v4  ;;  %v1754_v12 = vpop.f32.mrf.mxu0  ;;  %1459 = vst.msk [vmem:[%s3569_s4 + $0x228] sm:$0xff] %vm109_vm0, %v1378_v40  ;;  %v1140_v42 = vmul.f32 0.70710677, %v3360_v27  ;;  %v1298_v41 = vadd.f32 1.0, %v2022_v15  ;;  %v1017_v4 = vmul.f32 0.5, %v3332_v18 }
 0x155   :  { %v1877_v13 = vpop.f32.mrf.mxu1  ;;  %2035 = verf.f32 %v1099_v35  ;;  %v3381_v46 = vadd.f32 %v857_v29, %v590_v55  ;;  %v1338_v30 = vmul.f32 %v1257_v37, %v1014_v56  ;;  %v860_v29 = vld [vmem:[%s3568_s1 + $0x128] sm:$0xff]  ;;  %v1058_v12 = vmul.f32 0.5, %v3335_v9 }
 0x156   :  { %v3383_v28 = vadd.f32 %v898_v10, %v795_v32  ;;  %v594_v16 = vpop.f32.mrf.mxu0  ;;  %v2024_v47 = vpop.eup %2023  ;;  %2037 = verf.f32 %v1140_v42  ;;  %v1379_v31 = vmul.f32 %v1298_v41, %v1055_v1 }
 0x157   :  { %v799_v57 = vpop.f32.mrf.mxu1  ;;  %v595_v48 = vadd.f32 %v3122_v21, %v594_v16  ;;  %v2026_v58 = vpop.eup %2025  ;;  %v1258_v34 = vadd.f32 1.0, %v2024_v47  ;;  %v1100_v61 = vmul.f32 0.70710677, %v3381_v46  ;;  %1419 = vst.msk [vmem:[%s3569_s4 + $0xe8] sm:$0xff] %vm109_vm0, %v1338_v30  ;;  %v901_v16 = vld [vmem:[%s3568_s1 + $0x270] sm:$0xff] }
 0x158   :  { %v800_v59 = vadd.f32 %v3122_v21, %v799_v57  ;;  %v1757_v36 = vpop.f32.mrf.mxu0  ;;  %v1299_v23 = vadd.f32 1.0, %v2026_v58  ;;  %v1141_v25 = vmul.f32 0.70710677, %v3383_v28  ;;  %1460 = vst.msk [vmem:[%s3569_s4 + $0x230] sm:$0xff] %vm109_vm0, %v1379_v31  ;;  %v861_v58 = vld [vmem:[%s3568_s1 + $0x130] sm:$0xff]  ;;  %v902_v31 = vld [vmem:[%s3568_s1 + $0x278] sm:$0xff] }
 0x159   :  { %v1880_v38 = vpop.f32.mrf.mxu1  ;;  %v3401_v14 = vadd.f32 %v858_v62, %v595_v48  ;;  %v1339_v8 = vmul.f32 %v1258_v34, %v1015_v33  ;;  %2039 = verf.f32 %v1100_v61  ;;  %v1018_v48 = vmul.f32 0.5, %v3356_v6 }
 0x15a   :  { %v2028_v44 = vpop.eup %2027  ;;  %v3407_v39 = vadd.f32 %v899_v49, %v800_v59  ;;  %v599_v50 = vpop.f32.mrf.mxu0  ;;  %v1380_v52 = vmul.f32 %v1299_v23, %v1056_v5  ;;  %2041 = verf.f32 %v1141_v25  ;;  %v1059_v23 = vmul.f32 0.5, %v3360_v27 }
 0x15b   :  { %v804_v51 = vpop.f32.mrf.mxu1  ;;  %v1259_v22 = vadd.f32 1.0, %v2028_v44  ;;  %1420 = vst.msk [vmem:[%s3569_s4 + $0xf0] sm:$0xff] %vm109_vm0, %v1339_v8  ;;  %v1101_v54 = vmul.f32 0.70710677, %v3401_v14  ;;  %v600_v63 = vadd.f32 %v3122_v21, %v599_v50  ;;  %v2030_v43 = vpop.eup %2029 }
 0x15c   :  { %v1142_v17 = vmul.f32 0.70710677, %v3407_v39  ;;  %v1760_v19 = vpop.f32.mrf.mxu0  ;;  %1461 = vst.msk [vmem:[%s3569_s4 + $0x238] sm:$0xff] %vm109_vm0, %v1380_v52  ;;  %v805_v45 = vadd.f32 %v3122_v21, %v804_v51  ;;  %v1300_v7 = vadd.f32 1.0, %v2030_v43  ;;  %v862_v52 = vld [vmem:[%s3568_s1 + $0x138] sm:$0xff] }
 0x15d   :  { %v1883_v60 = vpop.f32.mrf.mxu1  ;;  %v1340_v2 = vmul.f32 %v1259_v22, %v1016_v0  ;;  %2043 = verf.f32 %v1101_v54  ;;  %v3430_v40 = vadd.f32 %v859_v53, %v600_v63 }
 0x15e   :  { %v2032_v24 = vpop.eup %2031  ;;  %v604_v35 = vpop.f32.mrf.mxu0  ;;  %2045 = verf.f32 %v1142_v17  ;;  %v3439_v55 = vadd.f32 %v900_v26, %v805_v45  ;;  %v1381_v32 = vmul.f32 %v1300_v7, %v1057_v20  ;;  %v903_v17 = vld [vmem:[%s3568_s1 + $0x280] sm:$0xff]  ;;  %v1019_v26 = vmul.f32 0.5, %v3381_v46 }
 0x15f   :  { %v809_v10 = vpop.f32.mrf.mxu1  ;;  %v2034_v11 = vpop.eup %2033  ;;  %1421 = vst.msk [vmem:[%s3569_s4 + $0xf8] sm:$0xff] %vm109_vm0, %v1340_v2  ;;  %v1260_v3 = vadd.f32 1.0, %v2032_v24  ;;  %v605_v18 = vadd.f32 %v3122_v21, %v604_v35  ;;  %v1102_v15 = vmul.f32 0.70710677, %v3430_v40  ;;  %v1060_v20 = vmul.f32 0.5, %v3383_v28 }
 0x160   :  { %v1301_v13 = vadd.f32 1.0, %v2034_v11  ;;  %v1763_v56 = vpop.f32.mrf.mxu0  ;;  %v1143_v1 = vmul.f32 0.70710677, %v3439_v55  ;;  %1462 = vst.msk [vmem:[%s3569_s4 + $0x240] sm:$0xff] %vm109_vm0, %v1381_v32  ;;  %v810_v57 = vadd.f32 %v3122_v21, %v809_v10  ;;  %v1020_v28 = vmul.f32 0.5, %v3401_v14 }
 0x161   :  { %v1886_v37 = vpop.f32.mrf.mxu1  ;;  %v1341_v42 = vmul.f32 %v1260_v3, %v1017_v4  ;;  %v3445_v41 = vadd.f32 %v860_v29, %v605_v18  ;;  %2047 = verf.f32 %v1102_v15  ;;  %v863_v3 = vld [vmem:[%s3568_s1 + $0x140] sm:$0xff]  ;;  %v1061_v56 = vmul.f32 0.5, %v3407_v39 }
 0x162   :  { %v2036_v62 = vpop.eup %2035  ;;  %v1382_v9 = vmul.f32 %v1301_v13, %v1058_v12  ;;  %v609_v47 = vpop.f32.mrf.mxu0  ;;  %2049 = verf.f32 %v1143_v1  ;;  %v3471_v34 = vadd.f32 %v901_v16, %v810_v57  ;;  %v1062_v39 = vmul.f32 0.5, %v3439_v55 }
 0x163   :  { %v814_v30 = vpop.f32.mrf.mxu1  ;;  %1422 = vst.msk [vmem:[%s3569_s4 + $0x100] sm:$0xff] %vm109_vm0, %v1341_v42  ;;  %v1261_v59 = vadd.f32 1.0, %v2036_v62  ;;  %v1103_v49 = vmul.f32 0.70710677, %v3445_v41  ;;  %v2038_v33 = vpop.eup %2037  ;;  %v610_v6 = vadd.f32 %v3122_v21, %v609_v47 }
 0x164   :  { %1463 = vst.msk [vmem:[%s3569_s4 + $0x248] sm:$0xff] %vm109_vm0, %v1382_v9  ;;  %v815_v61 = vadd.f32 %v3122_v21, %v814_v30  ;;  %v1766_v36 = vpop.f32.mrf.mxu0  ;;  %v1302_v25 = vadd.f32 1.0, %v2038_v33  ;;  %v1144_v44 = vmul.f32 0.70710677, %v3471_v34 }
 0x165   :  { %v1889_v38 = vpop.f32.mrf.mxu1  ;;  %v1342_v5 = vmul.f32 %v1261_v59, %v1018_v48  ;;  %2051 = verf.f32 %v1103_v49  ;;  %v3477_v8 = vadd.f32 %v861_v58, %v610_v6  ;;  %v1022_v49 = vmul.f32 0.5, %v3445_v41 }
 0x166   :  { %v3479_v50 = vadd.f32 %v902_v31, %v815_v61  ;;  %v614_v51 = vpop.f32.mrf.mxu0  ;;  %v2040_v22 = vpop.eup %2039  ;;  %v1383_v27 = vmul.f32 %v1302_v25, %v1059_v23  ;;  %2053 = verf.f32 %v1144_v44  ;;  %v1063_v31 = vmul.f32 0.5, %v3471_v34 }
 0x167   :  { %v819_v0 = vpop.f32.mrf.mxu1  ;;  %1423 = vst.msk [vmem:[%s3569_s4 + $0x108] sm:$0xff] %vm109_vm0, %v1342_v5  ;;  %v615_v53 = vadd.f32 %v3122_v21, %v614_v51  ;;  %v2042_v63 = vpop.eup %2041  ;;  %v1262_v19 = vadd.f32 1.0, %v2040_v22  ;;  %v1104_v60 = vmul.f32 0.70710677, %v3477_v8  ;;  %v1023_v36 = vmul.f32 0.5, %v3477_v8 }
 0x168   :  { %v820_v54 = vadd.f32 %v3122_v21, %v819_v0  ;;  %v1769_v43 = vpop.f32.mrf.mxu0  ;;  %1464 = vst.msk [vmem:[%s3569_s4 + $0x250] sm:$0xff] %vm109_vm0, %v1383_v27  ;;  %v1303_v45 = vadd.f32 1.0, %v2042_v63  ;;  %v1145_v24 = vmul.f32 0.70710677, %v3479_v50  ;;  %v1064_v5 = vmul.f32 0.5, %v3479_v50 }
 0x169   :  { %v1892_v2 = vpop.f32.mrf.mxu1  ;;  %v943_v7 = vadd.f32 %v862_v52, %v615_v53  ;;  %v1343_v4 = vmul.f32 %v1262_v19, %v1019_v26  ;;  %2055 = verf.f32 %v1104_v60 }
 0x16a   :  { %v984_v46 = vadd.f32 %v903_v17, %v820_v54  ;;  %v619_v35 = vpop.f32.mrf.mxu0  ;;  %v2044_v29 = vpop.eup %2043  ;;  %v1384_v10 = vmul.f32 %v1303_v45, %v1060_v20  ;;  %2057 = verf.f32 %v1145_v24 }
 0x16b   :  { %v1105_v11 = vmul.f32 0.70710677, %v943_v7  ;;  %v2046_v18 = vpop.eup %2045  ;;  %1424 = vst.msk [vmem:[%s3569_s4 + $0x110] sm:$0xff] %vm109_vm0, %v1343_v4  ;;  %v1263_v32 = vadd.f32 1.0, %v2044_v29  ;;  %v620_v13 = vadd.f32 %v3122_v21, %v619_v35  ;;  %v1021_v21 = vmul.f32 0.5, %v3430_v40 }
 0x16c   :  { %v1146_v12 = vmul.f32 0.70710677, %v984_v46  ;;  %v1772_v15 = vpop.f32.mrf.mxu0  ;;  %1465 = vst.msk [vmem:[%s3569_s4 + $0x258] sm:$0xff] %vm109_vm0, %v1384_v10  ;;  %v1304_v37 = vadd.f32 1.0, %v2046_v18  ;;  %v1024_v52 = vmul.f32 0.5, %v943_v7  ;;  %v1065_v8 = vmul.f32 0.5, %v984_v46 }
 0x16d   :  { %2059 = verf.f32 %v1105_v11  ;;  %v1344_v42 = vmul.f32 %v1263_v32, %v1020_v28  ;;  %v944_v1 = vadd.f32 %v863_v3, %v620_v13 }
 0x16e   :  { %2061 = verf.f32 %v1146_v12  ;;  %v2048_v16 = vpop.eup %2047  ;;  %v1385_v62 = vmul.f32 %v1304_v37, %v1061_v56 }
 0x16f   :  { %v2050_v14 = vpop.eup %2049  ;;  %1425 = vst.msk [vmem:[%s3569_s4 + $0x118] sm:$0xff] %vm109_vm0, %v1344_v42  ;;  %v1264_v9 = vadd.f32 1.0, %v2048_v16  ;;  %v1106_v57 = vmul.f32 0.70710677, %v944_v1  ;;  %v1025_v54 = vmul.f32 0.5, %v944_v1 }
 0x170   :  { %1466 = vst.msk [vmem:[%s3569_s4 + $0x260] sm:$0xff] %vm109_vm0, %v1385_v62  ;;  %v1305_v47 = vadd.f32 1.0, %v2050_v14 }
 0x171   :  { %v1345_v48 = vmul.f32 %v1264_v9, %v1021_v21  ;;  %2063 = verf.f32 %v1106_v57 }
 0x172   :  { %v2052_v30 = vpop.eup %2051  ;;  %v1386_v59 = vmul.f32 %v1305_v47, %v1062_v39 }
 0x173   :  { %v1265_v58 = vadd.f32 1.0, %v2052_v30  ;;  %1426 = vst.msk [vmem:[%s3569_s4 + $0x120] sm:$0xff] %vm109_vm0, %v1345_v48  ;;  %v2054_v40 = vpop.eup %2053 }
 0x174   :  { %1467 = vst.msk [vmem:[%s3569_s4 + $0x268] sm:$0xff] %vm109_vm0, %v1386_v59  ;;  %v1306_v33 = vadd.f32 1.0, %v2054_v40 }
 0x175   :  { %v1346_v55 = vmul.f32 %v1265_v58, %v1022_v49 }
 0x176   :  { %v2056_v6 = vpop.eup %2055  ;;  %v1387_v61 = vmul.f32 %v1306_v33, %v1063_v31 }
 0x177   :  { %1427 = vst.msk [vmem:[%s3569_s4 + $0x128] sm:$0xff] %vm109_vm0, %v1346_v55  ;;  %v2058_v41 = vpop.eup %2057  ;;  %v1266_v38 = vadd.f32 1.0, %v2056_v6 }
 0x178   :  { %v1307_v23 = vadd.f32 1.0, %v2058_v41  ;;  %1468 = vst.msk [vmem:[%s3569_s4 + $0x270] sm:$0xff] %vm109_vm0, %v1387_v61 }
 0x179   :  { %v1347_v34 = vmul.f32 %v1266_v38, %v1023_v36 }
 0x17a   :  { %v2060_v25 = vpop.eup %2059  ;;  %v1388_v51 = vmul.f32 %v1307_v23, %v1064_v5 }
 0x17b   :  { %v2062_v44 = vpop.eup %2061  ;;  %v1267_v0 = vadd.f32 1.0, %v2060_v25  ;;  %1428 = vst.msk [vmem:[%s3569_s4 + $0x130] sm:$0xff] %vm109_vm0, %v1347_v34 }
 0x17c   :  { %v1308_v22 = vadd.f32 1.0, %v2062_v44  ;;  %1469 = vst.msk [vmem:[%s3569_s4 + $0x278] sm:$0xff] %vm109_vm0, %v1388_v51 }
 0x17d   :  { %v1348_v50 = vmul.f32 %v1267_v0, %v1024_v52 }
 0x17e   :  { %v1389_v27 = vmul.f32 %v1308_v22, %v1065_v8  ;;  %v2064_v53 = vpop.eup %2063 }
 0x17f   :  { %1429 = vst.msk [vmem:[%s3569_s4 + $0x138] sm:$0xff] %vm109_vm0, %v1348_v50  ;;  %v1268_v17 = vadd.f32 1.0, %v2064_v53 }
 0x180   :  { %1470 = vst.msk [vmem:[%s3569_s4 + $0x280] sm:$0xff] %vm109_vm0, %v1389_v27 }
 0x181   :  { %v1349_v63 = vmul.f32 %v1268_v17, %v1025_v54 }
 0x183   :  { %1430 = vst.msk [vmem:[%s3569_s4 + $0x140] sm:$0xff] %vm109_vm0, %v1349_v63 }

// kernel: fno2d_forward.18
= control target key start
LH: loop header
LB: loop body
LE: loop exit
PB: predicated region body
PF: predicated region fallthrough
CT: control target
= control target key end

     0   :  { %v1498_v0 = vmov 0.0   ;;  %vm109_vm0 = vcmask 261120   ;;  %vm1499_vm1 = vmmov 0   ;;  %s2684_s2 = inlined_call_operand.vmem [shape: f32[32,32], index: 2, kind: input, shape index: {}]   ;;  %s2685_s0 = inlined_call_operand.vmem [shape: f32[648,32], index: 0, kind: input, shape index: {}]   ;;  %s2686_s3 = inlined_call_operand.vmem [shape: f32[1,32], index: 3, kind: input, shape index: {}]   ;;  %s2687_s1 = inlined_call_operand.vmem [shape: f32[648,32], index: 1, kind: input, shape index: {}]   ;;  %s2688_s4 = inlined_call_operand.vmem [shape: f32[648,32], index: 4, kind: output, shape index: {}]  }
   0x1   :  { %1237 = vmatprep.subr.mxu0 %v1498_v0  ;;  %v101_v1 = vld [vmem:[%s2684_s2 + $0x18] sm:$0xff]  ;;  %1488 = vmatprep.subr.mxu1 %v1498_v0  ;;  %v100_v2 = vld [vmem:[%s2684_s2 + $0x10] sm:$0xff]  ;;  %v99_v3 = vld [vmem:[%s2684_s2 + $0x8] sm:$0xff] }
   0x2   :  { %1238 = vmatpush3.msra.mxu0 %v101_v1  ;;  %1492 = vmatpush3.msra.mxu1 %v101_v1  ;;  %v98_v4 = vld [vmem:[%s2684_s2] sm:$0xff]  ;;  %v58_v6 = vld [vmem:[%s2685_s0 + $0x148] sm:$0xff]  ;;  %v59_v8 = vld [vmem:[%s2685_s0 + $0x150] sm:$0xff] }
   0x3   :  { %1239 = vmatprep.subr.mxu0 %v1498_v0  ;;  %1489 = vmatprep.subr.mxu1 %v1498_v0  ;;  %v17_v5 = vld [vmem:[%s2685_s0] sm:$0xff]  ;;  %v18_v7 = vld [vmem:[%s2685_s0 + $0x8] sm:$0xff]  ;;  %v19_v9 = vld [vmem:[%s2685_s0 + $0x10] sm:$0xff] }
   0x4   :  { %1240 = vmatpush3.msra.mxu0 %v100_v2  ;;  %1493 = vmatpush3.msra.mxu1 %v100_v2  ;;  %v60_v10 = vld [vmem:[%s2685_s0 + $0x158] sm:$0xff]  ;;  %v61_v12 = vld [vmem:[%s2685_s0 + $0x160] sm:$0xff]  ;;  %v62_v14 = vld [vmem:[%s2685_s0 + $0x168] sm:$0xff] }
   0x5   :  { %1241 = vmatprep.subr.mxu0 %v1498_v0  ;;  %1490 = vmatprep.subr.mxu1 %v1498_v0  ;;  %v20_v11 = vld [vmem:[%s2685_s0 + $0x18] sm:$0xff]  ;;  %v21_v13 = vld [vmem:[%s2685_s0 + $0x20] sm:$0xff]  ;;  %v22_v15 = vld [vmem:[%s2685_s0 + $0x28] sm:$0xff] }
   0x6   :  { %1242 = vmatpush3.msra.mxu0 %v99_v3  ;;  %1494 = vmatpush3.msra.mxu1 %v99_v3  ;;  %v63_v16 = vld [vmem:[%s2685_s0 + $0x170] sm:$0xff]  ;;  %v64_v18 = vld [vmem:[%s2685_s0 + $0x178] sm:$0xff]  ;;  %v65_v20 = vld [vmem:[%s2685_s0 + $0x180] sm:$0xff] }
   0x7   :  { %1243 = vmatprep.subr.mxu0 %v1498_v0  ;;  %1245 = vmatprep.mubr.msk.f32.mxu0 %vm1499_vm1, %v1498_v0  ;;  %v23_v17 = vld [vmem:[%s2685_s0 + $0x30] sm:$0xff]  ;;  %v24_v19 = vld [vmem:[%s2685_s0 + $0x38] sm:$0xff]  ;;  %v25_v21 = vld [vmem:[%s2685_s0 + $0x40] sm:$0xff] }
   0x8   :  { %1244 = vmatpush3.msra.mxu0 %v98_v4  ;;  %1491 = vmatprep.subr.mxu1 %v1498_v0  ;;  %v66_v22 = vld [vmem:[%s2685_s0 + $0x188] sm:$0xff]  ;;  %v67_v24 = vld [vmem:[%s2685_s0 + $0x190] sm:$0xff]  ;;  %v68_v26 = vld [vmem:[%s2685_s0 + $0x198] sm:$0xff] }
   0x9   :  { %1246 = vmatmul.mubr.msk.f32.vlgmr.msra.gmra.mxu0 %vm109_vm0, %v17_v5  ;;  %1495 = vmatpush3.msra.mxu1 %v98_v4  ;;  %v26_v23 = vld [vmem:[%s2685_s0 + $0x48] sm:$0xff]  ;;  %v27_v25 = vld [vmem:[%s2685_s0 + $0x50] sm:$0xff]  ;;  %v28_v27 = vld [vmem:[%s2685_s0 + $0x58] sm:$0xff] }
   0xa   :  { %1368 = vmatprep.mubr.msk.f32.mxu1 %vm1499_vm1, %v1498_v0  ;;  %1248 = vmatprep.mubr.msk.f32.mxu0 %vm1499_vm1, %v1498_v0  ;;  %v69_v28 = vld [vmem:[%s2685_s0 + $0x1a0] sm:$0xff]  ;;  %v70_v30 = vld [vmem:[%s2685_s0 + $0x1a8] sm:$0xff]  ;;  %v71_v32 = vld [vmem:[%s2685_s0 + $0x1b0] sm:$0xff] }
   0xb   :  { %1369 = vmatmul.mubr.msk.f32.vlgmr.msra.gmra.mxu1 %vm109_vm0, %v58_v6  ;;  %v29_v29 = vld [vmem:[%s2685_s0 + $0x60] sm:$0xff]  ;;  %v30_v31 = vld [vmem:[%s2685_s0 + $0x68] sm:$0xff]  ;;  %v31_v33 = vld [vmem:[%s2685_s0 + $0x70] sm:$0xff] }
   0xc   :  { %1371 = vmatprep.mubr.msk.f32.mxu1 %vm1499_vm1, %v1498_v0  ;;  %v72_v34 = vld [vmem:[%s2685_s0 + $0x1b8] sm:$0xff]  ;;  %v73_v36 = vld [vmem:[%s2685_s0 + $0x1c0] sm:$0xff]  ;;  %v74_v38 = vld [vmem:[%s2685_s0 + $0x1c8] sm:$0xff] }
   0xd   :  { %1249 = vmatmul.mubr.msk.f32.gmra.mxu0 %vm109_vm0, %v18_v7  ;;  %v32_v35 = vld [vmem:[%s2685_s0 + $0x78] sm:$0xff]  ;;  %v33_v37 = vld [vmem:[%s2685_s0 + $0x80] sm:$0xff]  ;;  %v34_v39 = vld [vmem:[%s2685_s0 + $0x88] sm:$0xff] }
   0xe   :  { %1251 = vmatprep.mubr.msk.f32.mxu0 %vm1499_vm1, %v1498_v0  ;;  %v75_v40 = vld [vmem:[%s2685_s0 + $0x1d0] sm:$0xff]  ;;  %v76_v42 = vld [vmem:[%s2685_s0 + $0x1d8] sm:$0xff]  ;;  %v77_v44 = vld [vmem:[%s2685_s0 + $0x1e0] sm:$0xff] }
   0xf   :  { %1372 = vmatmul.mubr.msk.f32.gmra.mxu1 %vm109_vm0, %v59_v8  ;;  %v35_v41 = vld [vmem:[%s2685_s0 + $0x90] sm:$0xff]  ;;  %v36_v43 = vld [vmem:[%s2685_s0 + $0x98] sm:$0xff]  ;;  %v37_v45 = vld [vmem:[%s2685_s0 + $0xa0] sm:$0xff] }
  0x10   :  { %1374 = vmatprep.mubr.msk.f32.mxu1 %vm1499_vm1, %v1498_v0  ;;  %v78_v46 = vld [vmem:[%s2685_s0 + $0x1e8] sm:$0xff]  ;;  %v79_v48 = vld [vmem:[%s2685_s0 + $0x1f0] sm:$0xff]  ;;  %v80_v50 = vld [vmem:[%s2685_s0 + $0x1f8] sm:$0xff] }
  0x11   :  { %1252 = vmatmul.mubr.msk.f32.gmra.mxu0 %vm109_vm0, %v19_v9  ;;  %v38_v47 = vld [vmem:[%s2685_s0 + $0xa8] sm:$0xff]  ;;  %v39_v49 = vld [vmem:[%s2685_s0 + $0xb0] sm:$0xff]  ;;  %v40_v51 = vld [vmem:[%s2685_s0 + $0xb8] sm:$0xff] }
  0x12   :  { %1254 = vmatprep.mubr.msk.f32.mxu0 %vm1499_vm1, %v1498_v0  ;;  %v81_v52 = vld [vmem:[%s2685_s0 + $0x200] sm:$0xff]  ;;  %v82_v54 = vld [vmem:[%s2685_s0 + $0x208] sm:$0xff]  ;;  %v83_v56 = vld [vmem:[%s2685_s0 + $0x210] sm:$0xff] }
  0x13   :  { %1375 = vmatmul.mubr.msk.f32.gmra.mxu1 %vm109_vm0, %v60_v10  ;;  %v41_v53 = vld [vmem:[%s2685_s0 + $0xc0] sm:$0xff]  ;;  %v42_v55 = vld [vmem:[%s2685_s0 + $0xc8] sm:$0xff]  ;;  %v43_v57 = vld [vmem:[%s2685_s0 + $0xd0] sm:$0xff] }
  0x14   :  { %1377 = vmatprep.mubr.msk.f32.mxu1 %vm1499_vm1, %v1498_v0  ;;  %v84_v58 = vld [vmem:[%s2685_s0 + $0x218] sm:$0xff]  ;;  %v85_v60 = vld [vmem:[%s2685_s0 + $0x220] sm:$0xff]  ;;  %v86_v62 = vld [vmem:[%s2685_s0 + $0x228] sm:$0xff] }
  0x15   :  { %1255 = vmatmul.mubr.msk.f32.gmra.mxu0 %vm109_vm0, %v20_v11  ;;  %v44_v59 = vld [vmem:[%s2685_s0 + $0xd8] sm:$0xff]  ;;  %v45_v61 = vld [vmem:[%s2685_s0 + $0xe0] sm:$0xff]  ;;  %v46_v63 = vld [vmem:[%s2685_s0 + $0xe8] sm:$0xff] }
  0x16   :  { %1257 = vmatprep.mubr.msk.f32.mxu0 %vm1499_vm1, %v1498_v0  ;;  %v87_v1 = vld [vmem:[%s2685_s0 + $0x230] sm:$0xff]  ;;  %v88_v3 = vld [vmem:[%s2685_s0 + $0x238] sm:$0xff]  ;;  %v89_v5 = vld [vmem:[%s2685_s0 + $0x240] sm:$0xff] }
  0x17   :  { %1378 = vmatmul.mubr.msk.f32.gmra.mxu1 %vm109_vm0, %v61_v12  ;;  %v47_v2 = vld [vmem:[%s2685_s0 + $0xf0] sm:$0xff]  ;;  %v48_v4 = vld [vmem:[%s2685_s0 + $0xf8] sm:$0xff]  ;;  %v49_v6 = vld [vmem:[%s2685_s0 + $0x100] sm:$0xff] }
  0x18   :  { %1380 = vmatprep.mubr.msk.f32.mxu1 %vm1499_vm1, %v1498_v0  ;;  %v90_v7 = vld [vmem:[%s2685_s0 + $0x248] sm:$0xff]  ;;  %v91_v9 = vld [vmem:[%s2685_s0 + $0x250] sm:$0xff]  ;;  %v92_v11 = vld [vmem:[%s2685_s0 + $0x258] sm:$0xff] }
  0x19   :  { %1258 = vmatmul.mubr.msk.f32.gmra.mxu0 %vm109_vm0, %v21_v13  ;;  %v50_v8 = vld [vmem:[%s2685_s0 + $0x108] sm:$0xff]  ;;  %v51_v10 = vld [vmem:[%s2685_s0 + $0x110] sm:$0xff]  ;;  %v52_v12 = vld [vmem:[%s2685_s0 + $0x118] sm:$0xff] }
  0x1a   :  { %1260 = vmatprep.mubr.msk.f32.mxu0 %vm1499_vm1, %v1498_v0  ;;  %v93_v13 = vld [vmem:[%s2685_s0 + $0x260] sm:$0xff] }
  0x1b   :  { %1381 = vmatmul.mubr.msk.f32.gmra.mxu1 %vm109_vm0, %v62_v14  ;;  %v53_v14 = vld [vmem:[%s2685_s0 + $0x120] sm:$0xff] }
  0x1c   :  { %1383 = vmatprep.mubr.msk.f32.mxu1 %vm1499_vm1, %v1498_v0 }
  0x1d   :  { %1261 = vmatmul.mubr.msk.f32.gmra.mxu0 %vm109_vm0, %v22_v15  ;;  %v94_v15 = vld [vmem:[%s2685_s0 + $0x268] sm:$0xff] }
  0x1e   :  { %1263 = vmatprep.mubr.msk.f32.mxu0 %vm1499_vm1, %v1498_v0 }
  0x1f   :  { %1384 = vmatmul.mubr.msk.f32.gmra.mxu1 %vm109_vm0, %v63_v16  ;;  %v54_v16 = vld [vmem:[%s2685_s0 + $0x128] sm:$0xff] }
  0x20   :  { %1386 = vmatprep.mubr.msk.f32.mxu1 %vm1499_vm1, %v1498_v0 }
  0x21   :  { %1264 = vmatmul.mubr.msk.f32.gmra.mxu0 %vm109_vm0, %v23_v17  ;;  %v95_v17 = vld [vmem:[%s2685_s0 + $0x270] sm:$0xff] }
  0x22   :  { %1266 = vmatprep.mubr.msk.f32.mxu0 %vm1499_vm1, %v1498_v0 }
  0x23   :  { %1387 = vmatmul.mubr.msk.f32.gmra.mxu1 %vm109_vm0, %v64_v18  ;;  %v55_v18 = vld [vmem:[%s2685_s0 + $0x130] sm:$0xff] }
  0x24   :  { %1389 = vmatprep.mubr.msk.f32.mxu1 %vm1499_vm1, %v1498_v0 }
  0x25   :  { %1267 = vmatmul.mubr.msk.f32.gmra.mxu0 %vm109_vm0, %v24_v19  ;;  %v96_v19 = vld [vmem:[%s2685_s0 + $0x278] sm:$0xff] }
  0x26   :  { %1269 = vmatprep.mubr.msk.f32.mxu0 %vm1499_vm1, %v1498_v0 }
  0x27   :  { %1390 = vmatmul.mubr.msk.f32.gmra.mxu1 %vm109_vm0, %v65_v20  ;;  %v56_v20 = vld [vmem:[%s2685_s0 + $0x138] sm:$0xff] }
  0x28   :  { %1392 = vmatprep.mubr.msk.f32.mxu1 %vm1499_vm1, %v1498_v0 }
  0x29   :  { %1270 = vmatmul.mubr.msk.f32.gmra.mxu0 %vm109_vm0, %v25_v21  ;;  %v97_v21 = vld [vmem:[%s2685_s0 + $0x280] sm:$0xff] }
  0x2a   :  { %1272 = vmatprep.mubr.msk.f32.mxu0 %vm1499_vm1, %v1498_v0 }
  0x2b   :  { %1393 = vmatmul.mubr.msk.f32.gmra.mxu1 %vm109_vm0, %v66_v22  ;;  %v57_v22 = vld [vmem:[%s2685_s0 + $0x140] sm:$0xff] }
  0x2c   :  { %1395 = vmatprep.mubr.msk.f32.mxu1 %vm1499_vm1, %v1498_v0 }
  0x2d   :  { %1273 = vmatmul.mubr.msk.f32.gmra.mxu0 %vm109_vm0, %v26_v23  ;;  %v2034_v23 = vld [vmem:[%s2686_s3] ss:$0 sm:$0xff] }
  0x2e   :  { %1275 = vmatprep.mubr.msk.f32.mxu0 %vm1499_vm1, %v1498_v0 }
  0x2f   :  { %1396 = vmatmul.mubr.msk.f32.gmra.mxu1 %vm109_vm0, %v67_v24 }
  0x30   :  { %1398 = vmatprep.mubr.msk.f32.mxu1 %vm1499_vm1, %v1498_v0 }
  0x31   :  { %1276 = vmatmul.mubr.msk.f32.gmra.mxu0 %vm109_vm0, %v27_v25  ;;  %v823_v25 = vld [vmem:[%s2687_s1] sm:$0xff] }
  0x32   :  { %1278 = vmatprep.mubr.msk.f32.mxu0 %vm1499_vm1, %v1498_v0 }
  0x33   :  { %1399 = vmatmul.mubr.msk.f32.gmra.mxu1 %vm109_vm0, %v68_v26 }
  0x34   :  { %1401 = vmatprep.mubr.msk.f32.mxu1 %vm1499_vm1, %v1498_v0 }
  0x35   :  { %1279 = vmatmul.mubr.msk.f32.gmra.mxu0 %vm109_vm0, %v28_v27 }
  0x36   :  { %1281 = vmatprep.mubr.msk.f32.mxu0 %vm1499_vm1, %v1498_v0 }
  0x37   :  { %1402 = vmatmul.mubr.msk.f32.gmra.mxu1 %vm109_vm0, %v69_v28  ;;  %v864_v28 = vld [vmem:[%s2687_s1 + $0x148] sm:$0xff] }
  0x38   :  { %1404 = vmatprep.mubr.msk.f32.mxu1 %vm1499_vm1, %v1498_v0 }
  0x39   :  { %1282 = vmatmul.mubr.msk.f32.gmra.mxu0 %vm109_vm0, %v29_v29 }
  0x3a   :  { %1284 = vmatprep.mubr.msk.f32.mxu0 %vm1499_vm1, %v1498_v0 }
  0x3b   :  { %1405 = vmatmul.mubr.msk.f32.gmra.mxu1 %vm109_vm0, %v70_v30 }
  0x3c   :  { %1407 = vmatprep.mubr.msk.f32.mxu1 %vm1499_vm1, %v1498_v0 }
  0x3d   :  { %1285 = vmatmul.mubr.msk.f32.gmra.mxu0 %vm109_vm0, %v30_v31 }
  0x3e   :  { %1287 = vmatprep.mubr.msk.f32.mxu0 %vm1499_vm1, %v1498_v0 }
  0x3f   :  { %1408 = vmatmul.mubr.msk.f32.gmra.mxu1 %vm109_vm0, %v71_v32  ;;  %v824_v32 = vld [vmem:[%s2687_s1 + $0x8] sm:$0xff] }
  0x40   :  { %1410 = vmatprep.mubr.msk.f32.mxu1 %vm1499_vm1, %v1498_v0 }
  0x41   :  { %1288 = vmatmul.mubr.msk.f32.gmra.mxu0 %vm109_vm0, %v31_v33 }
  0x42   :  { %1290 = vmatprep.mubr.msk.f32.mxu0 %vm1499_vm1, %v1498_v0 }
  0x43   :  { %1411 = vmatmul.mubr.msk.f32.gmra.mxu1 %vm109_vm0, %v72_v34 }
  0x44   :  { %1413 = vmatprep.mubr.msk.f32.mxu1 %vm1499_vm1, %v1498_v0 }
  0x45   :  { %1291 = vmatmul.mubr.msk.f32.gmra.mxu0 %vm109_vm0, %v32_v35 }
  0x46   :  { %1293 = vmatprep.mubr.msk.f32.mxu0 %vm1499_vm1, %v1498_v0 }
  0x47   :  { %1414 = vmatmul.mubr.msk.f32.gmra.mxu1 %vm109_vm0, %v73_v36 }
  0x48   :  { %1416 = vmatprep.mubr.msk.f32.mxu1 %vm1499_vm1, %v1498_v0 }
  0x49   :  { %1294 = vmatmul.mubr.msk.f32.gmra.mxu0 %vm109_vm0, %v33_v37 }
  0x4a   :  { %1296 = vmatprep.mubr.msk.f32.mxu0 %vm1499_vm1, %v1498_v0 }
  0x4b   :  { %1417 = vmatmul.mubr.msk.f32.gmra.mxu1 %vm109_vm0, %v74_v38  ;;  %v865_v38 = vld [vmem:[%s2687_s1 + $0x150] sm:$0xff] }
  0x4c   :  { %1419 = vmatprep.mubr.msk.f32.mxu1 %vm1499_vm1, %v1498_v0 }
  0x4d   :  { %1297 = vmatmul.mubr.msk.f32.gmra.mxu0 %vm109_vm0, %v34_v39 }
  0x4e   :  { %1299 = vmatprep.mubr.msk.f32.mxu0 %vm1499_vm1, %v1498_v0 }
  0x4f   :  { %1420 = vmatmul.mubr.msk.f32.gmra.mxu1 %vm109_vm0, %v75_v40 }
  0x50   :  { %1422 = vmatprep.mubr.msk.f32.mxu1 %vm1499_vm1, %v1498_v0 }
  0x51   :  { %1300 = vmatmul.mubr.msk.f32.gmra.mxu0 %vm109_vm0, %v35_v41 }
  0x52   :  { %1302 = vmatprep.mubr.msk.f32.mxu0 %vm1499_vm1, %v1498_v0 }
  0x53   :  { %1423 = vmatmul.mubr.msk.f32.gmra.mxu1 %vm109_vm0, %v76_v42  ;;  %v825_v42 = vld [vmem:[%s2687_s1 + $0x10] sm:$0xff] }
  0x54   :  { %1425 = vmatprep.mubr.msk.f32.mxu1 %vm1499_vm1, %v1498_v0 }
  0x55   :  { %1303 = vmatmul.mubr.msk.f32.gmra.mxu0 %vm109_vm0, %v36_v43 }
  0x56   :  { %1305 = vmatprep.mubr.msk.f32.mxu0 %vm1499_vm1, %v1498_v0 }
  0x57   :  { %1426 = vmatmul.mubr.msk.f32.gmra.mxu1 %vm109_vm0, %v77_v44 }
  0x58   :  { %1428 = vmatprep.mubr.msk.f32.mxu1 %vm1499_vm1, %v1498_v0 }
  0x59   :  { %1306 = vmatmul.mubr.msk.f32.gmra.mxu0 %vm109_vm0, %v37_v45 }
  0x5a   :  { %1308 = vmatprep.mubr.msk.f32.mxu0 %vm1499_vm1, %v1498_v0 }
  0x5b   :  { %1429 = vmatmul.mubr.msk.f32.gmra.mxu1 %vm109_vm0, %v78_v46 }
  0x5c   :  { %1431 = vmatprep.mubr.msk.f32.mxu1 %vm1499_vm1, %v1498_v0 }
  0x5d   :  { %1309 = vmatmul.mubr.msk.f32.gmra.mxu0 %vm109_vm0, %v38_v47 }
  0x5e   :  { %1311 = vmatprep.mubr.msk.f32.mxu0 %vm1499_vm1, %v1498_v0 }
  0x5f   :  { %1432 = vmatmul.mubr.msk.f32.gmra.mxu1 %vm109_vm0, %v79_v48  ;;  %v866_v48 = vld [vmem:[%s2687_s1 + $0x158] sm:$0xff] }
  0x60   :  { %1434 = vmatprep.mubr.msk.f32.mxu1 %vm1499_vm1, %v1498_v0 }
  0x61   :  { %1312 = vmatmul.mubr.msk.f32.gmra.mxu0 %vm109_vm0, %v39_v49 }
  0x62   :  { %1314 = vmatprep.mubr.msk.f32.mxu0 %vm1499_vm1, %v1498_v0 }
  0x63   :  { %1435 = vmatmul.mubr.msk.f32.gmra.mxu1 %vm109_vm0, %v80_v50 }
  0x64   :  { %1437 = vmatprep.mubr.msk.f32.mxu1 %vm1499_vm1, %v1498_v0 }
  0x65   :  { %1315 = vmatmul.mubr.msk.f32.gmra.mxu0 %vm109_vm0, %v40_v51 }
  0x66   :  { %1317 = vmatprep.mubr.msk.f32.mxu0 %vm1499_vm1, %v1498_v0 }
  0x67   :  { %1438 = vmatmul.mubr.msk.f32.gmra.mxu1 %vm109_vm0, %v81_v52  ;;  %v826_v52 = vld [vmem:[%s2687_s1 + $0x18] sm:$0xff] }
  0x68   :  { %1440 = vmatprep.mubr.msk.f32.mxu1 %vm1499_vm1, %v1498_v0 }
  0x69   :  { %1318 = vmatmul.mubr.msk.f32.gmra.mxu0 %vm109_vm0, %v41_v53 }
  0x6a   :  { %1320 = vmatprep.mubr.msk.f32.mxu0 %vm1499_vm1, %v1498_v0 }
  0x6b   :  { %1441 = vmatmul.mubr.msk.f32.gmra.mxu1 %vm109_vm0, %v82_v54 }
  0x6c   :  { %1443 = vmatprep.mubr.msk.f32.mxu1 %vm1499_vm1, %v1498_v0 }
  0x6d   :  { %1321 = vmatmul.mubr.msk.f32.gmra.mxu0 %vm109_vm0, %v42_v55 }
  0x6e   :  { %1323 = vmatprep.mubr.msk.f32.mxu0 %vm1499_vm1, %v1498_v0 }
  0x6f   :  { %1444 = vmatmul.mubr.msk.f32.gmra.mxu1 %vm109_vm0, %v83_v56 }
  0x70   :  { %1446 = vmatprep.mubr.msk.f32.mxu1 %vm1499_vm1, %v1498_v0 }
  0x71   :  { %1324 = vmatmul.mubr.msk.f32.gmra.mxu0 %vm109_vm0, %v43_v57 }
  0x72   :  { %1326 = vmatprep.mubr.msk.f32.mxu0 %vm1499_vm1, %v1498_v0 }
  0x73   :  { %1447 = vmatmul.mubr.msk.f32.gmra.mxu1 %vm109_vm0, %v84_v58  ;;  %v867_v58 = vld [vmem:[%s2687_s1 + $0x160] sm:$0xff] }
  0x74   :  { %1449 = vmatprep.mubr.msk.f32.mxu1 %vm1499_vm1, %v1498_v0 }
  0x75   :  { %1327 = vmatmul.mubr.msk.f32.gmra.mxu0 %vm109_vm0, %v44_v59 }
  0x76   :  { %1329 = vmatprep.mubr.msk.f32.mxu0 %vm1499_vm1, %v1498_v0 }
  0x77   :  { %1450 = vmatmul.mubr.msk.f32.gmra.mxu1 %vm109_vm0, %v85_v60 }
  0x78   :  { %1452 = vmatprep.mubr.msk.f32.mxu1 %vm1499_vm1, %v1498_v0 }
  0x79   :  { %1330 = vmatmul.mubr.msk.f32.gmra.mxu0 %vm109_vm0, %v45_v61 }
  0x7a   :  { %1332 = vmatprep.mubr.msk.f32.mxu0 %vm1499_vm1, %v1498_v0 }
  0x7b   :  { %1453 = vmatmul.mubr.msk.f32.gmra.mxu1 %vm109_vm0, %v86_v62  ;;  %v827_v62 = vld [vmem:[%s2687_s1 + $0x20] sm:$0xff] }
  0x7c   :  { %1455 = vmatprep.mubr.msk.f32.mxu1 %vm1499_vm1, %v1498_v0 }
  0x7d   :  { %1333 = vmatmul.mubr.msk.f32.gmra.mxu0 %vm109_vm0, %v46_v63 }
  0x7e   :  { %1335 = vmatprep.mubr.msk.f32.mxu0 %vm1499_vm1, %v1498_v0 }
  0x7f   :  { %1456 = vmatmul.mubr.msk.f32.gmra.mxu1 %vm109_vm0, %v87_v1 }
  0x80   :  { %1458 = vmatprep.mubr.msk.f32.mxu1 %vm1499_vm1, %v1498_v0 }
  0x81   :  { %1336 = vmatmul.mubr.msk.f32.gmra.mxu0 %vm109_vm0, %v47_v2 }
  0x82   :  { %1338 = vmatprep.mubr.msk.f32.mxu0 %vm1499_vm1, %v1498_v0 }
  0x83   :  { %1459 = vmatmul.mubr.msk.f32.gmra.mxu1 %vm109_vm0, %v88_v3 }
  0x84   :  { %1461 = vmatprep.mubr.msk.f32.mxu1 %vm1499_vm1, %v1498_v0 }
  0x85   :  { %1339 = vmatmul.mubr.msk.f32.gmra.mxu0 %vm109_vm0, %v48_v4 }
  0x86   :  { %1341 = vmatprep.mubr.msk.f32.mxu0 %vm1499_vm1, %v1498_v0 }
  0x87   :  { %1462 = vmatmul.mubr.msk.f32.gmra.mxu1 %vm109_vm0, %v89_v5  ;;  %v868_v5 = vld [vmem:[%s2687_s1 + $0x168] sm:$0xff] }
  0x88   :  { %1464 = vmatprep.mubr.msk.f32.mxu1 %vm1499_vm1, %v1498_v0 }
  0x89   :  { %1342 = vmatmul.mubr.msk.f32.gmra.mxu0 %vm109_vm0, %v49_v6 }
  0x8a   :  { %1344 = vmatprep.mubr.msk.f32.mxu0 %vm1499_vm1, %v1498_v0 }
  0x8b   :  { %1465 = vmatmul.mubr.msk.f32.gmra.mxu1 %vm109_vm0, %v90_v7 }
  0x8c   :  { %1467 = vmatprep.mubr.msk.f32.mxu1 %vm1499_vm1, %v1498_v0 }
  0x8d   :  { %1345 = vmatmul.mubr.msk.f32.gmra.mxu0 %vm109_vm0, %v50_v8 }
  0x8e   :  { %1347 = vmatprep.mubr.msk.f32.mxu0 %vm1499_vm1, %v1498_v0 }
  0x8f   :  { %1468 = vmatmul.mubr.msk.f32.gmra.mxu1 %vm109_vm0, %v91_v9  ;;  %v828_v9 = vld [vmem:[%s2687_s1 + $0x28] sm:$0xff] }
  0x90   :  { %1470 = vmatprep.mubr.msk.f32.mxu1 %vm1499_vm1, %v1498_v0 }
  0x91   :  { %1348 = vmatmul.mubr.msk.f32.gmra.mxu0 %vm109_vm0, %v51_v10 }
  0x92   :  { %1350 = vmatprep.mubr.msk.f32.mxu0 %vm1499_vm1, %v1498_v0 }
  0x93   :  { %1471 = vmatmul.mubr.msk.f32.gmra.mxu1 %vm109_vm0, %v92_v11 }
  0x94   :  { %1473 = vmatprep.mubr.msk.f32.mxu1 %vm1499_vm1, %v1498_v0 }
  0x95   :  { %1351 = vmatmul.mubr.msk.f32.gmra.mxu0 %vm109_vm0, %v52_v12 }
  0x96   :  { %1353 = vmatprep.mubr.msk.f32.mxu0 %vm1499_vm1, %v1498_v0 }
  0x97   :  { %1474 = vmatmul.mubr.msk.f32.gmra.mxu1 %vm109_vm0, %v93_v13 }
  0x98   :  { %1476 = vmatprep.mubr.msk.f32.mxu1 %vm1499_vm1, %v1498_v0 }
  0x99   :  { %1354 = vmatmul.mubr.msk.f32.gmra.mxu0 %vm109_vm0, %v53_v14 }
  0x9a   :  { %1356 = vmatprep.mubr.msk.f32.mxu0 %vm1499_vm1, %v1498_v0 }
  0x9b   :  { %1477 = vmatmul.mubr.msk.f32.gmra.mxu1 %vm109_vm0, %v94_v15  ;;  %v869_v15 = vld [vmem:[%s2687_s1 + $0x170] sm:$0xff] }
  0x9c   :  { %1479 = vmatprep.mubr.msk.f32.mxu1 %vm1499_vm1, %v1498_v0 }
  0x9d   :  { %1357 = vmatmul.mubr.msk.f32.gmra.mxu0 %vm109_vm0, %v54_v16 }
  0x9e   :  { %1359 = vmatprep.mubr.msk.f32.mxu0 %vm1499_vm1, %v1498_v0 }
  0x9f   :  { %1480 = vmatmul.mubr.msk.f32.gmra.mxu1 %vm109_vm0, %v95_v17 }
  0xa0   :  { %1482 = vmatprep.mubr.msk.f32.mxu1 %vm1499_vm1, %v1498_v0 }
  0xa1   :  { %1360 = vmatmul.mubr.msk.f32.gmra.mxu0 %vm109_vm0, %v55_v18 }
  0xa2   :  { %1362 = vmatprep.mubr.msk.f32.mxu0 %vm1499_vm1, %v1498_v0 }
  0xa3   :  { %1483 = vmatmul.mubr.msk.f32.gmra.mxu1 %vm109_vm0, %v96_v19  ;;  %v829_v19 = vld [vmem:[%s2687_s1 + $0x30] sm:$0xff] }
  0xa4   :  { %1485 = vmatprep.mubr.msk.f32.mxu1 %vm1499_vm1, %v1498_v0 }
  0xa5   :  { %1363 = vmatmul.mubr.msk.f32.gmra.mxu0 %vm109_vm0, %v56_v20 }
  0xa6   :  { %1365 = vmatprep.mubr.msk.f32.mxu0 %vm1499_vm1, %v1498_v0 }
  0xa7   :  { %1486 = vmatmul.mubr.msk.f32.gmra.mxu1 %vm109_vm0, %v97_v21 }
  0xa9   :  { %1366 = vmatmul.mubr.msk.f32.gmra.mxu0 %vm109_vm0, %v57_v22 }
  0xc9   :  { %v419_v24 = vpop.f32.mrf.mxu0 }
  0xca   :  { %v420_v0 = vadd.f32 %v2034_v23, %v419_v24 }
  0xcb   :  { %v1247_v26 = vpop.f32.mrf.mxu0  ;;  %v624_v27 = vpop.f32.mrf.mxu1 }
  0xcc   :  { %v904_v29 = vadd.f32 %v823_v25, %v420_v0  ;;  %v625_v30 = vadd.f32 %v2034_v23, %v624_v27  ;;  %v870_v0 = vld [vmem:[%s2687_s1 + $0x178] sm:$0xff] }
  0xcd   :  { %v424_v31 = vpop.f32.mrf.mxu0  ;;  %v1370_v33 = vpop.f32.mrf.mxu1 }
  0xce   :  { %985 = vst.msk [vmem:[%s2688_s4] sm:$0xff] %vm109_vm0, %v904_v29  ;;  %v945_v34 = vadd.f32 %v864_v28, %v625_v30  ;;  %v425_v35 = vadd.f32 %v2034_v23, %v424_v31  ;;  %v830_v29 = vld [vmem:[%s2687_s1 + $0x38] sm:$0xff] }
  0xcf   :  { %v1250_v36 = vpop.f32.mrf.mxu0  ;;  %v629_v37 = vpop.f32.mrf.mxu1 }
  0xd0   :  { %1026 = vst.msk [vmem:[%s2688_s4 + $0x148] sm:$0xff] %vm109_vm0, %v945_v34  ;;  %v905_v39 = vadd.f32 %v824_v32, %v425_v35  ;;  %v630_v40 = vadd.f32 %v2034_v23, %v629_v37  ;;  %v871_v35 = vld [vmem:[%s2687_s1 + $0x180] sm:$0xff] }
  0xd1   :  { %v429_v41 = vpop.f32.mrf.mxu0  ;;  %v1373_v43 = vpop.f32.mrf.mxu1 }
  0xd2   :  { %986 = vst.msk [vmem:[%s2688_s4 + $0x8] sm:$0xff] %vm109_vm0, %v905_v39  ;;  %v946_v44 = vadd.f32 %v865_v38, %v630_v40  ;;  %v430_v45 = vadd.f32 %v2034_v23, %v429_v41  ;;  %v831_v39 = vld [vmem:[%s2687_s1 + $0x40] sm:$0xff] }
  0xd3   :  { %v1253_v46 = vpop.f32.mrf.mxu0  ;;  %v634_v47 = vpop.f32.mrf.mxu1 }
  0xd4   :  { %1027 = vst.msk [vmem:[%s2688_s4 + $0x150] sm:$0xff] %vm109_vm0, %v946_v44  ;;  %v906_v49 = vadd.f32 %v825_v42, %v430_v45  ;;  %v635_v50 = vadd.f32 %v2034_v23, %v634_v47  ;;  %v872_v45 = vld [vmem:[%s2687_s1 + $0x188] sm:$0xff] }
  0xd5   :  { %v434_v51 = vpop.f32.mrf.mxu0  ;;  %v1376_v53 = vpop.f32.mrf.mxu1 }
  0xd6   :  { %987 = vst.msk [vmem:[%s2688_s4 + $0x10] sm:$0xff] %vm109_vm0, %v906_v49  ;;  %v947_v54 = vadd.f32 %v866_v48, %v635_v50  ;;  %v435_v55 = vadd.f32 %v2034_v23, %v434_v51  ;;  %v832_v49 = vld [vmem:[%s2687_s1 + $0x48] sm:$0xff] }
  0xd7   :  { %v1256_v56 = vpop.f32.mrf.mxu0  ;;  %v639_v57 = vpop.f32.mrf.mxu1 }
  0xd8   :  { %1028 = vst.msk [vmem:[%s2688_s4 + $0x158] sm:$0xff] %vm109_vm0, %v947_v54  ;;  %v907_v59 = vadd.f32 %v826_v52, %v435_v55  ;;  %v640_v60 = vadd.f32 %v2034_v23, %v639_v57  ;;  %v873_v55 = vld [vmem:[%s2687_s1 + $0x190] sm:$0xff] }
  0xd9   :  { %v439_v61 = vpop.f32.mrf.mxu0  ;;  %v1379_v63 = vpop.f32.mrf.mxu1 }
  0xda   :  { %988 = vst.msk [vmem:[%s2688_s4 + $0x18] sm:$0xff] %vm109_vm0, %v907_v59  ;;  %v948_v1 = vadd.f32 %v867_v58, %v640_v60  ;;  %v440_v2 = vadd.f32 %v2034_v23, %v439_v61  ;;  %v833_v59 = vld [vmem:[%s2687_s1 + $0x50] sm:$0xff] }
  0xdb   :  { %v1259_v3 = vpop.f32.mrf.mxu0  ;;  %v644_v4 = vpop.f32.mrf.mxu1 }
  0xdc   :  { %1029 = vst.msk [vmem:[%s2688_s4 + $0x160] sm:$0xff] %vm109_vm0, %v948_v1  ;;  %v908_v6 = vadd.f32 %v827_v62, %v440_v2  ;;  %v645_v7 = vadd.f32 %v2034_v23, %v644_v4  ;;  %v874_v2 = vld [vmem:[%s2687_s1 + $0x198] sm:$0xff] }
  0xdd   :  { %v444_v8 = vpop.f32.mrf.mxu0  ;;  %v1382_v10 = vpop.f32.mrf.mxu1 }
  0xde   :  { %989 = vst.msk [vmem:[%s2688_s4 + $0x20] sm:$0xff] %vm109_vm0, %v908_v6  ;;  %v949_v11 = vadd.f32 %v868_v5, %v645_v7  ;;  %v445_v12 = vadd.f32 %v2034_v23, %v444_v8  ;;  %v834_v6 = vld [vmem:[%s2687_s1 + $0x58] sm:$0xff] }
  0xdf   :  { %v1262_v13 = vpop.f32.mrf.mxu0  ;;  %v649_v14 = vpop.f32.mrf.mxu1 }
  0xe0   :  { %1030 = vst.msk [vmem:[%s2688_s4 + $0x168] sm:$0xff] %vm109_vm0, %v949_v11  ;;  %v909_v16 = vadd.f32 %v828_v9, %v445_v12  ;;  %v650_v17 = vadd.f32 %v2034_v23, %v649_v14  ;;  %v875_v12 = vld [vmem:[%s2687_s1 + $0x1a0] sm:$0xff] }
  0xe1   :  { %v449_v18 = vpop.f32.mrf.mxu0  ;;  %v1385_v20 = vpop.f32.mrf.mxu1 }
  0xe2   :  { %990 = vst.msk [vmem:[%s2688_s4 + $0x28] sm:$0xff] %vm109_vm0, %v909_v16  ;;  %v950_v21 = vadd.f32 %v869_v15, %v650_v17  ;;  %v450_v22 = vadd.f32 %v2034_v23, %v449_v18  ;;  %v835_v16 = vld [vmem:[%s2687_s1 + $0x60] sm:$0xff] }
  0xe3   :  { %v1265_v24 = vpop.f32.mrf.mxu0  ;;  %v654_v25 = vpop.f32.mrf.mxu1 }
  0xe4   :  { %1031 = vst.msk [vmem:[%s2688_s4 + $0x170] sm:$0xff] %vm109_vm0, %v950_v21  ;;  %v910_v26 = vadd.f32 %v829_v19, %v450_v22  ;;  %v655_v27 = vadd.f32 %v2034_v23, %v654_v25  ;;  %v876_v22 = vld [vmem:[%s2687_s1 + $0x1a8] sm:$0xff] }
  0xe5   :  { %v454_v28 = vpop.f32.mrf.mxu0  ;;  %v1388_v30 = vpop.f32.mrf.mxu1 }
  0xe6   :  { %991 = vst.msk [vmem:[%s2688_s4 + $0x30] sm:$0xff] %vm109_vm0, %v910_v26  ;;  %v951_v31 = vadd.f32 %v870_v0, %v655_v27  ;;  %v455_v32 = vadd.f32 %v2034_v23, %v454_v28  ;;  %v836_v26 = vld [vmem:[%s2687_s1 + $0x68] sm:$0xff] }
  0xe7   :  { %v1268_v33 = vpop.f32.mrf.mxu0  ;;  %v659_v34 = vpop.f32.mrf.mxu1 }
  0xe8   :  { %1032 = vst.msk [vmem:[%s2688_s4 + $0x178] sm:$0xff] %vm109_vm0, %v951_v31  ;;  %v911_v36 = vadd.f32 %v830_v29, %v455_v32  ;;  %v660_v37 = vadd.f32 %v2034_v23, %v659_v34  ;;  %v877_v32 = vld [vmem:[%s2687_s1 + $0x1b0] sm:$0xff] }
  0xe9   :  { %v459_v38 = vpop.f32.mrf.mxu0  ;;  %v1391_v40 = vpop.f32.mrf.mxu1 }
  0xea   :  { %992 = vst.msk [vmem:[%s2688_s4 + $0x38] sm:$0xff] %vm109_vm0, %v911_v36  ;;  %v952_v41 = vadd.f32 %v871_v35, %v660_v37  ;;  %v460_v42 = vadd.f32 %v2034_v23, %v459_v38  ;;  %v837_v36 = vld [vmem:[%s2687_s1 + $0x70] sm:$0xff] }
  0xeb   :  { %v1271_v43 = vpop.f32.mrf.mxu0  ;;  %v664_v44 = vpop.f32.mrf.mxu1 }
  0xec   :  { %1033 = vst.msk [vmem:[%s2688_s4 + $0x180] sm:$0xff] %vm109_vm0, %v952_v41  ;;  %v912_v46 = vadd.f32 %v831_v39, %v460_v42  ;;  %v665_v47 = vadd.f32 %v2034_v23, %v664_v44  ;;  %v878_v42 = vld [vmem:[%s2687_s1 + $0x1b8] sm:$0xff] }
  0xed   :  { %v464_v48 = vpop.f32.mrf.mxu0  ;;  %v1394_v50 = vpop.f32.mrf.mxu1 }
  0xee   :  { %993 = vst.msk [vmem:[%s2688_s4 + $0x40] sm:$0xff] %vm109_vm0, %v912_v46  ;;  %v953_v51 = vadd.f32 %v872_v45, %v665_v47  ;;  %v465_v52 = vadd.f32 %v2034_v23, %v464_v48  ;;  %v838_v46 = vld [vmem:[%s2687_s1 + $0x78] sm:$0xff] }
  0xef   :  { %v1274_v53 = vpop.f32.mrf.mxu0  ;;  %v669_v54 = vpop.f32.mrf.mxu1 }
  0xf0   :  { %1034 = vst.msk [vmem:[%s2688_s4 + $0x188] sm:$0xff] %vm109_vm0, %v953_v51  ;;  %v913_v56 = vadd.f32 %v832_v49, %v465_v52  ;;  %v670_v57 = vadd.f32 %v2034_v23, %v669_v54  ;;  %v879_v52 = vld [vmem:[%s2687_s1 + $0x1c0] sm:$0xff] }
  0xf1   :  { %v469_v58 = vpop.f32.mrf.mxu0  ;;  %v1397_v60 = vpop.f32.mrf.mxu1 }
  0xf2   :  { %994 = vst.msk [vmem:[%s2688_s4 + $0x48] sm:$0xff] %vm109_vm0, %v913_v56  ;;  %v954_v61 = vadd.f32 %v873_v55, %v670_v57  ;;  %v470_v62 = vadd.f32 %v2034_v23, %v469_v58  ;;  %v839_v56 = vld [vmem:[%s2687_s1 + $0x80] sm:$0xff] }
  0xf3   :  { %v1277_v63 = vpop.f32.mrf.mxu0  ;;  %v674_v1 = vpop.f32.mrf.mxu1 }
  0xf4   :  { %1035 = vst.msk [vmem:[%s2688_s4 + $0x190] sm:$0xff] %vm109_vm0, %v954_v61  ;;  %v914_v3 = vadd.f32 %v833_v59, %v470_v62  ;;  %v675_v4 = vadd.f32 %v2034_v23, %v674_v1  ;;  %v880_v62 = vld [vmem:[%s2687_s1 + $0x1c8] sm:$0xff] }
  0xf5   :  { %v474_v5 = vpop.f32.mrf.mxu0  ;;  %v1400_v7 = vpop.f32.mrf.mxu1 }
  0xf6   :  { %995 = vst.msk [vmem:[%s2688_s4 + $0x50] sm:$0xff] %vm109_vm0, %v914_v3  ;;  %v955_v8 = vadd.f32 %v874_v2, %v675_v4  ;;  %v475_v9 = vadd.f32 %v2034_v23, %v474_v5  ;;  %v840_v3 = vld [vmem:[%s2687_s1 + $0x88] sm:$0xff] }
  0xf7   :  { %v1280_v10 = vpop.f32.mrf.mxu0  ;;  %v679_v11 = vpop.f32.mrf.mxu1 }
  0xf8   :  { %1036 = vst.msk [vmem:[%s2688_s4 + $0x198] sm:$0xff] %vm109_vm0, %v955_v8  ;;  %v915_v13 = vadd.f32 %v834_v6, %v475_v9  ;;  %v680_v14 = vadd.f32 %v2034_v23, %v679_v11  ;;  %v881_v9 = vld [vmem:[%s2687_s1 + $0x1d0] sm:$0xff] }
  0xf9   :  { %v479_v15 = vpop.f32.mrf.mxu0  ;;  %v1403_v17 = vpop.f32.mrf.mxu1 }
  0xfa   :  { %996 = vst.msk [vmem:[%s2688_s4 + $0x58] sm:$0xff] %vm109_vm0, %v915_v13  ;;  %v956_v18 = vadd.f32 %v875_v12, %v680_v14  ;;  %v480_v19 = vadd.f32 %v2034_v23, %v479_v15  ;;  %v841_v13 = vld [vmem:[%s2687_s1 + $0x90] sm:$0xff] }
  0xfb   :  { %v1283_v20 = vpop.f32.mrf.mxu0  ;;  %v684_v21 = vpop.f32.mrf.mxu1 }
  0xfc   :  { %1037 = vst.msk [vmem:[%s2688_s4 + $0x1a0] sm:$0xff] %vm109_vm0, %v956_v18  ;;  %v916_v24 = vadd.f32 %v835_v16, %v480_v19  ;;  %v685_v25 = vadd.f32 %v2034_v23, %v684_v21  ;;  %v882_v19 = vld [vmem:[%s2687_s1 + $0x1d8] sm:$0xff] }
  0xfd   :  { %v484_v0 = vpop.f32.mrf.mxu0  ;;  %v1406_v27 = vpop.f32.mrf.mxu1 }
  0xfe   :  { %997 = vst.msk [vmem:[%s2688_s4 + $0x60] sm:$0xff] %vm109_vm0, %v916_v24  ;;  %v957_v28 = vadd.f32 %v876_v22, %v685_v25  ;;  %v485_v29 = vadd.f32 %v2034_v23, %v484_v0  ;;  %v842_v24 = vld [vmem:[%s2687_s1 + $0x98] sm:$0xff] }
  0xff   :  { %v1286_v30 = vpop.f32.mrf.mxu0  ;;  %v689_v31 = vpop.f32.mrf.mxu1 }
 0x100   :  { %1038 = vst.msk [vmem:[%s2688_s4 + $0x1a8] sm:$0xff] %vm109_vm0, %v957_v28  ;;  %v917_v33 = vadd.f32 %v836_v26, %v485_v29  ;;  %v690_v34 = vadd.f32 %v2034_v23, %v689_v31  ;;  %v883_v29 = vld [vmem:[%s2687_s1 + $0x1e0] sm:$0xff] }
 0x101   :  { %v489_v35 = vpop.f32.mrf.mxu0  ;;  %v1409_v37 = vpop.f32.mrf.mxu1 }
 0x102   :  { %998 = vst.msk [vmem:[%s2688_s4 + $0x68] sm:$0xff] %vm109_vm0, %v917_v33  ;;  %v958_v38 = vadd.f32 %v877_v32, %v690_v34  ;;  %v490_v39 = vadd.f32 %v2034_v23, %v489_v35  ;;  %v843_v33 = vld [vmem:[%s2687_s1 + $0xa0] sm:$0xff] }
 0x103   :  { %v1289_v40 = vpop.f32.mrf.mxu0  ;;  %v694_v41 = vpop.f32.mrf.mxu1 }
 0x104   :  { %1039 = vst.msk [vmem:[%s2688_s4 + $0x1b0] sm:$0xff] %vm109_vm0, %v958_v38  ;;  %v918_v43 = vadd.f32 %v837_v36, %v490_v39  ;;  %v695_v44 = vadd.f32 %v2034_v23, %v694_v41  ;;  %v884_v39 = vld [vmem:[%s2687_s1 + $0x1e8] sm:$0xff] }
 0x105   :  { %v494_v45 = vpop.f32.mrf.mxu0  ;;  %v1412_v47 = vpop.f32.mrf.mxu1 }
 0x106   :  { %999 = vst.msk [vmem:[%s2688_s4 + $0x70] sm:$0xff] %vm109_vm0, %v918_v43  ;;  %v959_v48 = vadd.f32 %v878_v42, %v695_v44  ;;  %v495_v49 = vadd.f32 %v2034_v23, %v494_v45  ;;  %v844_v43 = vld [vmem:[%s2687_s1 + $0xa8] sm:$0xff] }
 0x107   :  { %v1292_v50 = vpop.f32.mrf.mxu0  ;;  %v699_v51 = vpop.f32.mrf.mxu1 }
 0x108   :  { %1040 = vst.msk [vmem:[%s2688_s4 + $0x1b8] sm:$0xff] %vm109_vm0, %v959_v48  ;;  %v919_v53 = vadd.f32 %v838_v46, %v495_v49  ;;  %v700_v54 = vadd.f32 %v2034_v23, %v699_v51  ;;  %v885_v49 = vld [vmem:[%s2687_s1 + $0x1f0] sm:$0xff] }
 0x109   :  { %v499_v55 = vpop.f32.mrf.mxu0  ;;  %v1415_v57 = vpop.f32.mrf.mxu1 }
 0x10a   :  { %1000 = vst.msk [vmem:[%s2688_s4 + $0x78] sm:$0xff] %vm109_vm0, %v919_v53  ;;  %v960_v58 = vadd.f32 %v879_v52, %v700_v54  ;;  %v500_v59 = vadd.f32 %v2034_v23, %v499_v55  ;;  %v845_v53 = vld [vmem:[%s2687_s1 + $0xb0] sm:$0xff] }
 0x10b   :  { %v1295_v60 = vpop.f32.mrf.mxu0  ;;  %v704_v61 = vpop.f32.mrf.mxu1 }
 0x10c   :  { %1041 = vst.msk [vmem:[%s2688_s4 + $0x1c0] sm:$0xff] %vm109_vm0, %v960_v58  ;;  %v920_v63 = vadd.f32 %v839_v56, %v500_v59  ;;  %v705_v1 = vadd.f32 %v2034_v23, %v704_v61  ;;  %v886_v59 = vld [vmem:[%s2687_s1 + $0x1f8] sm:$0xff] }
 0x10d   :  { %v504_v2 = vpop.f32.mrf.mxu0  ;;  %v1418_v4 = vpop.f32.mrf.mxu1 }
 0x10e   :  { %1001 = vst.msk [vmem:[%s2688_s4 + $0x80] sm:$0xff] %vm109_vm0, %v920_v63  ;;  %v961_v5 = vadd.f32 %v880_v62, %v705_v1  ;;  %v505_v6 = vadd.f32 %v2034_v23, %v504_v2  ;;  %v846_v63 = vld [vmem:[%s2687_s1 + $0xb8] sm:$0xff] }
 0x10f   :  { %v1298_v7 = vpop.f32.mrf.mxu0  ;;  %v709_v8 = vpop.f32.mrf.mxu1 }
 0x110   :  { %1042 = vst.msk [vmem:[%s2688_s4 + $0x1c8] sm:$0xff] %vm109_vm0, %v961_v5  ;;  %v921_v10 = vadd.f32 %v840_v3, %v505_v6  ;;  %v710_v11 = vadd.f32 %v2034_v23, %v709_v8  ;;  %v887_v6 = vld [vmem:[%s2687_s1 + $0x200] sm:$0xff] }
 0x111   :  { %v509_v12 = vpop.f32.mrf.mxu0  ;;  %v1421_v14 = vpop.f32.mrf.mxu1 }
 0x112   :  { %1002 = vst.msk [vmem:[%s2688_s4 + $0x88] sm:$0xff] %vm109_vm0, %v921_v10  ;;  %v962_v15 = vadd.f32 %v881_v9, %v710_v11  ;;  %v510_v16 = vadd.f32 %v2034_v23, %v509_v12  ;;  %v847_v10 = vld [vmem:[%s2687_s1 + $0xc0] sm:$0xff] }
 0x113   :  { %v1301_v17 = vpop.f32.mrf.mxu0  ;;  %v714_v18 = vpop.f32.mrf.mxu1 }
 0x114   :  { %1043 = vst.msk [vmem:[%s2688_s4 + $0x1d0] sm:$0xff] %vm109_vm0, %v962_v15  ;;  %v922_v20 = vadd.f32 %v841_v13, %v510_v16  ;;  %v715_v21 = vadd.f32 %v2034_v23, %v714_v18  ;;  %v888_v16 = vld [vmem:[%s2687_s1 + $0x208] sm:$0xff] }
 0x115   :  { %v514_v22 = vpop.f32.mrf.mxu0  ;;  %v1424_v25 = vpop.f32.mrf.mxu1 }
 0x116   :  { %1003 = vst.msk [vmem:[%s2688_s4 + $0x90] sm:$0xff] %vm109_vm0, %v922_v20  ;;  %v963_v0 = vadd.f32 %v882_v19, %v715_v21  ;;  %v515_v26 = vadd.f32 %v2034_v23, %v514_v22  ;;  %v848_v20 = vld [vmem:[%s2687_s1 + $0xc8] sm:$0xff] }
 0x117   :  { %v1304_v27 = vpop.f32.mrf.mxu0  ;;  %v719_v28 = vpop.f32.mrf.mxu1 }
 0x118   :  { %1044 = vst.msk [vmem:[%s2688_s4 + $0x1d8] sm:$0xff] %vm109_vm0, %v963_v0  ;;  %v923_v30 = vadd.f32 %v842_v24, %v515_v26  ;;  %v720_v31 = vadd.f32 %v2034_v23, %v719_v28  ;;  %v889_v26 = vld [vmem:[%s2687_s1 + $0x210] sm:$0xff] }
 0x119   :  { %v519_v32 = vpop.f32.mrf.mxu0  ;;  %v1427_v34 = vpop.f32.mrf.mxu1 }
 0x11a   :  { %1004 = vst.msk [vmem:[%s2688_s4 + $0x98] sm:$0xff] %vm109_vm0, %v923_v30  ;;  %v964_v35 = vadd.f32 %v883_v29, %v720_v31  ;;  %v520_v36 = vadd.f32 %v2034_v23, %v519_v32  ;;  %v849_v30 = vld [vmem:[%s2687_s1 + $0xd0] sm:$0xff] }
 0x11b   :  { %v1307_v37 = vpop.f32.mrf.mxu0  ;;  %v724_v38 = vpop.f32.mrf.mxu1 }
 0x11c   :  { %1045 = vst.msk [vmem:[%s2688_s4 + $0x1e0] sm:$0xff] %vm109_vm0, %v964_v35  ;;  %v924_v40 = vadd.f32 %v843_v33, %v520_v36  ;;  %v725_v41 = vadd.f32 %v2034_v23, %v724_v38  ;;  %v890_v36 = vld [vmem:[%s2687_s1 + $0x218] sm:$0xff] }
 0x11d   :  { %v524_v42 = vpop.f32.mrf.mxu0  ;;  %v1430_v44 = vpop.f32.mrf.mxu1 }
 0x11e   :  { %1005 = vst.msk [vmem:[%s2688_s4 + $0xa0] sm:$0xff] %vm109_vm0, %v924_v40  ;;  %v965_v45 = vadd.f32 %v884_v39, %v725_v41  ;;  %v525_v46 = vadd.f32 %v2034_v23, %v524_v42  ;;  %v850_v40 = vld [vmem:[%s2687_s1 + $0xd8] sm:$0xff] }
 0x11f   :  { %v1310_v47 = vpop.f32.mrf.mxu0  ;;  %v729_v48 = vpop.f32.mrf.mxu1 }
 0x120   :  { %1046 = vst.msk [vmem:[%s2688_s4 + $0x1e8] sm:$0xff] %vm109_vm0, %v965_v45  ;;  %v925_v50 = vadd.f32 %v844_v43, %v525_v46  ;;  %v730_v51 = vadd.f32 %v2034_v23, %v729_v48  ;;  %v891_v46 = vld [vmem:[%s2687_s1 + $0x220] sm:$0xff] }
 0x121   :  { %v529_v52 = vpop.f32.mrf.mxu0  ;;  %v1433_v54 = vpop.f32.mrf.mxu1 }
 0x122   :  { %1006 = vst.msk [vmem:[%s2688_s4 + $0xa8] sm:$0xff] %vm109_vm0, %v925_v50  ;;  %v966_v55 = vadd.f32 %v885_v49, %v730_v51  ;;  %v530_v56 = vadd.f32 %v2034_v23, %v529_v52  ;;  %v851_v50 = vld [vmem:[%s2687_s1 + $0xe0] sm:$0xff] }
 0x123   :  { %v1313_v57 = vpop.f32.mrf.mxu0  ;;  %v734_v58 = vpop.f32.mrf.mxu1 }
 0x124   :  { %1047 = vst.msk [vmem:[%s2688_s4 + $0x1f0] sm:$0xff] %vm109_vm0, %v966_v55  ;;  %v926_v60 = vadd.f32 %v845_v53, %v530_v56  ;;  %v735_v61 = vadd.f32 %v2034_v23, %v734_v58  ;;  %v892_v56 = vld [vmem:[%s2687_s1 + $0x228] sm:$0xff] }
 0x125   :  { %v534_v62 = vpop.f32.mrf.mxu0  ;;  %v1436_v1 = vpop.f32.mrf.mxu1 }
 0x126   :  { %1007 = vst.msk [vmem:[%s2688_s4 + $0xb0] sm:$0xff] %vm109_vm0, %v926_v60  ;;  %v967_v2 = vadd.f32 %v886_v59, %v735_v61  ;;  %v535_v3 = vadd.f32 %v2034_v23, %v534_v62  ;;  %v852_v60 = vld [vmem:[%s2687_s1 + $0xe8] sm:$0xff] }
 0x127   :  { %v1316_v4 = vpop.f32.mrf.mxu0  ;;  %v739_v5 = vpop.f32.mrf.mxu1 }
 0x128   :  { %1048 = vst.msk [vmem:[%s2688_s4 + $0x1f8] sm:$0xff] %vm109_vm0, %v967_v2  ;;  %v927_v7 = vadd.f32 %v846_v63, %v535_v3  ;;  %v740_v8 = vadd.f32 %v2034_v23, %v739_v5  ;;  %v893_v3 = vld [vmem:[%s2687_s1 + $0x230] sm:$0xff] }
 0x129   :  { %v539_v9 = vpop.f32.mrf.mxu0  ;;  %v1439_v11 = vpop.f32.mrf.mxu1 }
 0x12a   :  { %1008 = vst.msk [vmem:[%s2688_s4 + $0xb8] sm:$0xff] %vm109_vm0, %v927_v7  ;;  %v968_v12 = vadd.f32 %v887_v6, %v740_v8  ;;  %v540_v13 = vadd.f32 %v2034_v23, %v539_v9  ;;  %v853_v7 = vld [vmem:[%s2687_s1 + $0xf0] sm:$0xff] }
 0x12b   :  { %v1319_v14 = vpop.f32.mrf.mxu0  ;;  %v744_v15 = vpop.f32.mrf.mxu1 }
 0x12c   :  { %1049 = vst.msk [vmem:[%s2688_s4 + $0x200] sm:$0xff] %vm109_vm0, %v968_v12  ;;  %v928_v17 = vadd.f32 %v847_v10, %v540_v13  ;;  %v745_v18 = vadd.f32 %v2034_v23, %v744_v15  ;;  %v894_v13 = vld [vmem:[%s2687_s1 + $0x238] sm:$0xff] }
 0x12d   :  { %v544_v19 = vpop.f32.mrf.mxu0  ;;  %v1442_v21 = vpop.f32.mrf.mxu1 }
 0x12e   :  { %1009 = vst.msk [vmem:[%s2688_s4 + $0xc0] sm:$0xff] %vm109_vm0, %v928_v17  ;;  %v969_v22 = vadd.f32 %v888_v16, %v745_v18  ;;  %v545_v24 = vadd.f32 %v2034_v23, %v544_v19  ;;  %v854_v17 = vld [vmem:[%s2687_s1 + $0xf8] sm:$0xff] }
 0x12f   :  { %v1322_v25 = vpop.f32.mrf.mxu0  ;;  %v749_v0 = vpop.f32.mrf.mxu1 }
 0x130   :  { %1050 = vst.msk [vmem:[%s2688_s4 + $0x208] sm:$0xff] %vm109_vm0, %v969_v22  ;;  %v929_v27 = vadd.f32 %v848_v20, %v545_v24  ;;  %v750_v28 = vadd.f32 %v2034_v23, %v749_v0  ;;  %v895_v24 = vld [vmem:[%s2687_s1 + $0x240] sm:$0xff] }
 0x131   :  { %v549_v29 = vpop.f32.mrf.mxu0  ;;  %v1445_v31 = vpop.f32.mrf.mxu1 }
 0x132   :  { %1010 = vst.msk [vmem:[%s2688_s4 + $0xc8] sm:$0xff] %vm109_vm0, %v929_v27  ;;  %v970_v32 = vadd.f32 %v889_v26, %v750_v28  ;;  %v550_v33 = vadd.f32 %v2034_v23, %v549_v29  ;;  %v855_v27 = vld [vmem:[%s2687_s1 + $0x100] sm:$0xff] }
 0x133   :  { %v1325_v34 = vpop.f32.mrf.mxu0  ;;  %v754_v35 = vpop.f32.mrf.mxu1 }
 0x134   :  { %1051 = vst.msk [vmem:[%s2688_s4 + $0x210] sm:$0xff] %vm109_vm0, %v970_v32  ;;  %v930_v37 = vadd.f32 %v849_v30, %v550_v33  ;;  %v755_v38 = vadd.f32 %v2034_v23, %v754_v35  ;;  %v896_v33 = vld [vmem:[%s2687_s1 + $0x248] sm:$0xff] }
 0x135   :  { %v554_v39 = vpop.f32.mrf.mxu0  ;;  %v1448_v41 = vpop.f32.mrf.mxu1 }
 0x136   :  { %1011 = vst.msk [vmem:[%s2688_s4 + $0xd0] sm:$0xff] %vm109_vm0, %v930_v37  ;;  %v971_v42 = vadd.f32 %v890_v36, %v755_v38  ;;  %v555_v43 = vadd.f32 %v2034_v23, %v554_v39  ;;  %v856_v37 = vld [vmem:[%s2687_s1 + $0x108] sm:$0xff] }
 0x137   :  { %v1328_v44 = vpop.f32.mrf.mxu0  ;;  %v759_v45 = vpop.f32.mrf.mxu1 }
 0x138   :  { %1052 = vst.msk [vmem:[%s2688_s4 + $0x218] sm:$0xff] %vm109_vm0, %v971_v42  ;;  %v931_v47 = vadd.f32 %v850_v40, %v555_v43  ;;  %v760_v48 = vadd.f32 %v2034_v23, %v759_v45  ;;  %v897_v43 = vld [vmem:[%s2687_s1 + $0x250] sm:$0xff] }
 0x139   :  { %v559_v49 = vpop.f32.mrf.mxu0  ;;  %v1451_v51 = vpop.f32.mrf.mxu1 }
 0x13a   :  { %1012 = vst.msk [vmem:[%s2688_s4 + $0xd8] sm:$0xff] %vm109_vm0, %v931_v47  ;;  %v972_v52 = vadd.f32 %v891_v46, %v760_v48  ;;  %v560_v53 = vadd.f32 %v2034_v23, %v559_v49  ;;  %v857_v47 = vld [vmem:[%s2687_s1 + $0x110] sm:$0xff] }
 0x13b   :  { %v1331_v54 = vpop.f32.mrf.mxu0  ;;  %v764_v55 = vpop.f32.mrf.mxu1 }
 0x13c   :  { %1053 = vst.msk [vmem:[%s2688_s4 + $0x220] sm:$0xff] %vm109_vm0, %v972_v52  ;;  %v932_v57 = vadd.f32 %v851_v50, %v560_v53  ;;  %v765_v58 = vadd.f32 %v2034_v23, %v764_v55  ;;  %v898_v53 = vld [vmem:[%s2687_s1 + $0x258] sm:$0xff] }
 0x13d   :  { %v564_v59 = vpop.f32.mrf.mxu0  ;;  %v1454_v61 = vpop.f32.mrf.mxu1 }
 0x13e   :  { %1013 = vst.msk [vmem:[%s2688_s4 + $0xe0] sm:$0xff] %vm109_vm0, %v932_v57  ;;  %v973_v62 = vadd.f32 %v892_v56, %v765_v58  ;;  %v565_v63 = vadd.f32 %v2034_v23, %v564_v59  ;;  %v858_v57 = vld [vmem:[%s2687_s1 + $0x118] sm:$0xff] }
 0x13f   :  { %v1334_v1 = vpop.f32.mrf.mxu0  ;;  %v769_v2 = vpop.f32.mrf.mxu1 }
 0x140   :  { %1054 = vst.msk [vmem:[%s2688_s4 + $0x228] sm:$0xff] %vm109_vm0, %v973_v62  ;;  %v933_v4 = vadd.f32 %v852_v60, %v565_v63  ;;  %v770_v5 = vadd.f32 %v2034_v23, %v769_v2  ;;  %v899_v63 = vld [vmem:[%s2687_s1 + $0x260] sm:$0xff] }
 0x141   :  { %v569_v6 = vpop.f32.mrf.mxu0  ;;  %v1457_v8 = vpop.f32.mrf.mxu1 }
 0x142   :  { %1014 = vst.msk [vmem:[%s2688_s4 + $0xe8] sm:$0xff] %vm109_vm0, %v933_v4  ;;  %v974_v9 = vadd.f32 %v893_v3, %v770_v5  ;;  %v570_v10 = vadd.f32 %v2034_v23, %v569_v6  ;;  %v859_v4 = vld [vmem:[%s2687_s1 + $0x120] sm:$0xff] }
 0x143   :  { %v1337_v11 = vpop.f32.mrf.mxu0  ;;  %v774_v12 = vpop.f32.mrf.mxu1 }
 0x144   :  { %1055 = vst.msk [vmem:[%s2688_s4 + $0x230] sm:$0xff] %vm109_vm0, %v974_v9  ;;  %v934_v14 = vadd.f32 %v853_v7, %v570_v10  ;;  %v775_v15 = vadd.f32 %v2034_v23, %v774_v12  ;;  %v900_v10 = vld [vmem:[%s2687_s1 + $0x268] sm:$0xff] }
 0x145   :  { %v574_v16 = vpop.f32.mrf.mxu0  ;;  %v1460_v18 = vpop.f32.mrf.mxu1 }
 0x146   :  { %1015 = vst.msk [vmem:[%s2688_s4 + $0xf0] sm:$0xff] %vm109_vm0, %v934_v14  ;;  %v975_v19 = vadd.f32 %v894_v13, %v775_v15  ;;  %v575_v20 = vadd.f32 %v2034_v23, %v574_v16  ;;  %v860_v14 = vld [vmem:[%s2687_s1 + $0x128] sm:$0xff] }
 0x147   :  { %v1340_v21 = vpop.f32.mrf.mxu0  ;;  %v779_v22 = vpop.f32.mrf.mxu1 }
 0x148   :  { %1056 = vst.msk [vmem:[%s2688_s4 + $0x238] sm:$0xff] %vm109_vm0, %v975_v19  ;;  %v935_v25 = vadd.f32 %v854_v17, %v575_v20  ;;  %v780_v0 = vadd.f32 %v2034_v23, %v779_v22  ;;  %v901_v20 = vld [vmem:[%s2687_s1 + $0x270] sm:$0xff] }
 0x149   :  { %v579_v26 = vpop.f32.mrf.mxu0  ;;  %v1463_v28 = vpop.f32.mrf.mxu1 }
 0x14a   :  { %1016 = vst.msk [vmem:[%s2688_s4 + $0xf8] sm:$0xff] %vm109_vm0, %v935_v25  ;;  %v976_v29 = vadd.f32 %v895_v24, %v780_v0  ;;  %v580_v30 = vadd.f32 %v2034_v23, %v579_v26  ;;  %v861_v25 = vld [vmem:[%s2687_s1 + $0x130] sm:$0xff] }
 0x14b   :  { %v1343_v31 = vpop.f32.mrf.mxu0  ;;  %v784_v32 = vpop.f32.mrf.mxu1 }
 0x14c   :  { %1057 = vst.msk [vmem:[%s2688_s4 + $0x240] sm:$0xff] %vm109_vm0, %v976_v29  ;;  %v936_v34 = vadd.f32 %v855_v27, %v580_v30  ;;  %v785_v35 = vadd.f32 %v2034_v23, %v784_v32  ;;  %v902_v30 = vld [vmem:[%s2687_s1 + $0x278] sm:$0xff] }
 0x14d   :  { %v584_v36 = vpop.f32.mrf.mxu0  ;;  %v1466_v38 = vpop.f32.mrf.mxu1 }
 0x14e   :  { %1017 = vst.msk [vmem:[%s2688_s4 + $0x100] sm:$0xff] %vm109_vm0, %v936_v34  ;;  %v977_v39 = vadd.f32 %v896_v33, %v785_v35  ;;  %v585_v40 = vadd.f32 %v2034_v23, %v584_v36  ;;  %v862_v34 = vld [vmem:[%s2687_s1 + $0x138] sm:$0xff] }
 0x14f   :  { %v1346_v41 = vpop.f32.mrf.mxu0  ;;  %v789_v42 = vpop.f32.mrf.mxu1 }
 0x150   :  { %1058 = vst.msk [vmem:[%s2688_s4 + $0x248] sm:$0xff] %vm109_vm0, %v977_v39  ;;  %v937_v44 = vadd.f32 %v856_v37, %v585_v40  ;;  %v790_v45 = vadd.f32 %v2034_v23, %v789_v42  ;;  %v903_v40 = vld [vmem:[%s2687_s1 + $0x280] sm:$0xff] }
 0x151   :  { %v589_v46 = vpop.f32.mrf.mxu0  ;;  %v1469_v48 = vpop.f32.mrf.mxu1 }
 0x152   :  { %1018 = vst.msk [vmem:[%s2688_s4 + $0x108] sm:$0xff] %vm109_vm0, %v937_v44  ;;  %v978_v49 = vadd.f32 %v897_v43, %v790_v45  ;;  %v590_v50 = vadd.f32 %v2034_v23, %v589_v46  ;;  %v863_v44 = vld [vmem:[%s2687_s1 + $0x140] sm:$0xff] }
 0x153   :  { %v1349_v51 = vpop.f32.mrf.mxu0  ;;  %v794_v52 = vpop.f32.mrf.mxu1 }
 0x154   :  { %1059 = vst.msk [vmem:[%s2688_s4 + $0x250] sm:$0xff] %vm109_vm0, %v978_v49  ;;  %v938_v54 = vadd.f32 %v857_v47, %v590_v50  ;;  %v795_v55 = vadd.f32 %v2034_v23, %v794_v52 }
 0x155   :  { %v594_v56 = vpop.f32.mrf.mxu0  ;;  %v1472_v58 = vpop.f32.mrf.mxu1 }
 0x156   :  { %1019 = vst.msk [vmem:[%s2688_s4 + $0x110] sm:$0xff] %vm109_vm0, %v938_v54  ;;  %v979_v59 = vadd.f32 %v898_v53, %v795_v55  ;;  %v595_v60 = vadd.f32 %v2034_v23, %v594_v56 }
 0x157   :  { %v1352_v61 = vpop.f32.mrf.mxu0  ;;  %v799_v62 = vpop.f32.mrf.mxu1 }
 0x158   :  { %1060 = vst.msk [vmem:[%s2688_s4 + $0x258] sm:$0xff] %vm109_vm0, %v979_v59  ;;  %v939_v1 = vadd.f32 %v858_v57, %v595_v60  ;;  %v800_v2 = vadd.f32 %v2034_v23, %v799_v62 }
 0x159   :  { %v599_v3 = vpop.f32.mrf.mxu0  ;;  %v1475_v5 = vpop.f32.mrf.mxu1 }
 0x15a   :  { %1020 = vst.msk [vmem:[%s2688_s4 + $0x118] sm:$0xff] %vm109_vm0, %v939_v1  ;;  %v980_v6 = vadd.f32 %v899_v63, %v800_v2  ;;  %v600_v7 = vadd.f32 %v2034_v23, %v599_v3 }
 0x15b   :  { %v1355_v8 = vpop.f32.mrf.mxu0  ;;  %v804_v9 = vpop.f32.mrf.mxu1 }
 0x15c   :  { %1061 = vst.msk [vmem:[%s2688_s4 + $0x260] sm:$0xff] %vm109_vm0, %v980_v6  ;;  %v940_v11 = vadd.f32 %v859_v4, %v600_v7  ;;  %v805_v12 = vadd.f32 %v2034_v23, %v804_v9 }
 0x15d   :  { %v604_v13 = vpop.f32.mrf.mxu0  ;;  %v1478_v15 = vpop.f32.mrf.mxu1 }
 0x15e   :  { %1021 = vst.msk [vmem:[%s2688_s4 + $0x120] sm:$0xff] %vm109_vm0, %v940_v11  ;;  %v981_v16 = vadd.f32 %v900_v10, %v805_v12  ;;  %v605_v17 = vadd.f32 %v2034_v23, %v604_v13 }
 0x15f   :  { %v1358_v18 = vpop.f32.mrf.mxu0  ;;  %v809_v19 = vpop.f32.mrf.mxu1 }
 0x160   :  { %1062 = vst.msk [vmem:[%s2688_s4 + $0x268] sm:$0xff] %vm109_vm0, %v981_v16  ;;  %v941_v21 = vadd.f32 %v860_v14, %v605_v17  ;;  %v810_v22 = vadd.f32 %v2034_v23, %v809_v19 }
 0x161   :  { %v609_v24 = vpop.f32.mrf.mxu0  ;;  %v1481_v0 = vpop.f32.mrf.mxu1 }
 0x162   :  { %1022 = vst.msk [vmem:[%s2688_s4 + $0x128] sm:$0xff] %vm109_vm0, %v941_v21  ;;  %v982_v26 = vadd.f32 %v901_v20, %v810_v22  ;;  %v610_v27 = vadd.f32 %v2034_v23, %v609_v24 }
 0x163   :  { %v1361_v28 = vpop.f32.mrf.mxu0  ;;  %v814_v29 = vpop.f32.mrf.mxu1 }
 0x164   :  { %1063 = vst.msk [vmem:[%s2688_s4 + $0x270] sm:$0xff] %vm109_vm0, %v982_v26  ;;  %v942_v31 = vadd.f32 %v861_v25, %v610_v27  ;;  %v815_v32 = vadd.f32 %v2034_v23, %v814_v29 }
 0x165   :  { %v614_v33 = vpop.f32.mrf.mxu0  ;;  %v1484_v35 = vpop.f32.mrf.mxu1 }
 0x166   :  { %1023 = vst.msk [vmem:[%s2688_s4 + $0x130] sm:$0xff] %vm109_vm0, %v942_v31  ;;  %v983_v36 = vadd.f32 %v902_v30, %v815_v32  ;;  %v615_v37 = vadd.f32 %v2034_v23, %v614_v33 }
 0x167   :  { %v1364_v38 = vpop.f32.mrf.mxu0  ;;  %v819_v39 = vpop.f32.mrf.mxu1 }
 0x168   :  { %1064 = vst.msk [vmem:[%s2688_s4 + $0x278] sm:$0xff] %vm109_vm0, %v983_v36  ;;  %v943_v41 = vadd.f32 %v862_v34, %v615_v37  ;;  %v820_v42 = vadd.f32 %v2034_v23, %v819_v39 }
 0x169   :  { %v619_v43 = vpop.f32.mrf.mxu0  ;;  %v1487_v45 = vpop.f32.mrf.mxu1 }
 0x16a   :  { %1024 = vst.msk [vmem:[%s2688_s4 + $0x138] sm:$0xff] %vm109_vm0, %v943_v41  ;;  %v984_v46 = vadd.f32 %v903_v40, %v820_v42  ;;  %v620_v47 = vadd.f32 %v2034_v23, %v619_v43 }
 0x16b   :  { %v1367_v48 = vpop.f32.mrf.mxu0 }
 0x16c   :  { %1065 = vst.msk [vmem:[%s2688_s4 + $0x280] sm:$0xff] %vm109_vm0, %v984_v46  ;;  %v944_v49 = vadd.f32 %v863_v44, %v620_v47 }
 0x16e   :  { %1025 = vst.msk [vmem:[%s2688_s4 + $0x140] sm:$0xff] %vm109_vm0, %v944_v49 }

// kernel: fno2d_forward.19
= control target key start
LH: loop header
LB: loop body
LE: loop exit
PB: predicated region body
PF: predicated region fallthrough
CT: control target
= control target key end

     0   :  { %vm97_vm0 = vcmask 261120   ;;  %vm1403_vm1 = vcmask 7168   ;;  %s3044_s1 = inlined_call_operand.vmem [shape: f32[32,128], index: 1, kind: input, shape index: {}]   ;;  %s3045_s0 = inlined_call_operand.vmem [shape: f32[512,32], index: 0, kind: input, shape index: {}]   ;;  %s3046_s3 = inlined_call_operand.vmem [shape: f32[128,1], index: 3, kind: input, shape index: {}]   ;;  %s3047_s2 = inlined_call_operand.vmem [shape: f32[1,128], index: 2, kind: input, shape index: {}]   ;;  %s3048_s4 = inlined_call_operand.<no memory space> [shape: f32[1,1], index: 4, kind: input, shape index: {}]   ;;  %s3049_s5 = inlined_call_operand.vmem [shape: f32[512,1], index: 5, kind: output, shape index: {}]  }
   0x1   :  { %v89_v0 = vld [vmem:[%s3044_s1 + $0x18] sm:$0xff]  ;;  %v88_v1 = vld [vmem:[%s3044_s1 + $0x10] sm:$0xff]  ;;  %v22_v2 = vld [vmem:[%s3045_s0] sm:$0xff] }
   0x2   :  { %1686 = vmatprep.subr.mxu0 %v89_v0  ;;  %v87_v3 = vld [vmem:[%s3044_s1 + $0x8] sm:$0xff]  ;;  %1694 = vmatprep.mubr.msk.f32.mxu0 %vm97_vm0, %v22_v2  ;;  %v86_v4 = vld [vmem:[%s3044_s1] sm:$0xff]  ;;  %v24_v6 = vld [vmem:[%s3045_s0 + $0x10] sm:$0xff] }
   0x3   :  { %1687 = vmatpush3.msra.mxu0 %v89_v0  ;;  %v23_v5 = vld [vmem:[%s3045_s0 + $0x8] sm:$0xff]  ;;  %v25_v7 = vld [vmem:[%s3045_s0 + $0x18] sm:$0xff]  ;;  %v26_v8 = vld [vmem:[%s3045_s0 + $0x20] sm:$0xff] }
   0x4   :  { %1688 = vmatprep.subr.mxu0 %v88_v1  ;;  %v27_v9 = vld [vmem:[%s3045_s0 + $0x28] sm:$0xff]  ;;  %v28_v10 = vld [vmem:[%s3045_s0 + $0x30] sm:$0xff]  ;;  %v29_v11 = vld [vmem:[%s3045_s0 + $0x38] sm:$0xff] }
   0x5   :  { %1689 = vmatpush3.msra.mxu0 %v88_v1  ;;  %v30_v12 = vld [vmem:[%s3045_s0 + $0x40] sm:$0xff]  ;;  %v31_v13 = vld [vmem:[%s3045_s0 + $0x48] sm:$0xff]  ;;  %v1010_v14 = vld [vmem:[%s3046_s3 + $0x78] sm:$0xff] }
   0x6   :  { %1690 = vmatprep.subr.mxu0 %v87_v3  ;;  %v32_v15 = vld [vmem:[%s3045_s0 + $0x50] sm:$0xff]  ;;  %1918 = vmatprep.subr.mxu1 %v1010_v14  ;;  %v1008_v17 = vld [vmem:[%s3046_s3 + $0x68] sm:$0xff]  ;;  %v33_v18 = vld [vmem:[%s3045_s0 + $0x58] sm:$0xff] }
   0x7   :  { %1691 = vmatpush3.msra.mxu0 %v87_v3  ;;  %v1009_v16 = vld [vmem:[%s3046_s3 + $0x70] sm:$0xff]  ;;  %1934 = vmatpush3.msra.mxu1 %v1010_v14  ;;  %v34_v19 = vld [vmem:[%s3045_s0 + $0x60] sm:$0xff]  ;;  %v35_v20 = vld [vmem:[%s3045_s0 + $0x68] sm:$0xff] }
   0x8   :  { %1692 = vmatprep.subr.mxu0 %v86_v4  ;;  %1919 = vmatprep.subr.mxu1 %v1009_v16  ;;  %v36_v21 = vld [vmem:[%s3045_s0 + $0x70] sm:$0xff]  ;;  %v37_v22 = vld [vmem:[%s3045_s0 + $0x78] sm:$0xff]  ;;  %v38_v23 = vld [vmem:[%s3045_s0 + $0x80] sm:$0xff] }
   0x9   :  { %1693 = vmatpush3.msra.mxu0 %v86_v4  ;;  %1935 = vmatpush3.msra.mxu1 %v1009_v16  ;;  %v39_v24 = vld [vmem:[%s3045_s0 + $0x88] sm:$0xff]  ;;  %v40_v25 = vld [vmem:[%s3045_s0 + $0x90] sm:$0xff]  ;;  %v41_v26 = vld [vmem:[%s3045_s0 + $0x98] sm:$0xff] }
   0xa   :  { %1695 = vmatmul.mubr.msk.f32.vlgmr.msra.gmra.mxu0 %vm97_vm0, %v23_v5  ;;  %1790 = vmatprep.subr.mxu0 %v1010_v14  ;;  %v42_v27 = vld [vmem:[%s3045_s0 + $0xa0] sm:$0xff]  ;;  %v43_v28 = vld [vmem:[%s3045_s0 + $0xa8] sm:$0xff]  ;;  %v44_v29 = vld [vmem:[%s3045_s0 + $0xb0] sm:$0xff] }
   0xb   :  { %1697 = vmatprep.mubr.msk.f32.mxu0 %vm97_vm0, %v24_v6  ;;  %1791 = vmatpush3.msra.mxu0 %v1010_v14  ;;  %v45_v30 = vld [vmem:[%s3045_s0 + $0xb8] sm:$0xff]  ;;  %v46_v31 = vld [vmem:[%s3045_s0 + $0xc0] sm:$0xff]  ;;  %v47_v32 = vld [vmem:[%s3045_s0 + $0xc8] sm:$0xff] }
   0xc   :  { %1792 = vmatprep.subr.mxu0 %v1009_v16  ;;  %1920 = vmatprep.subr.mxu1 %v1008_v17  ;;  %v48_v33 = vld [vmem:[%s3045_s0 + $0xd0] sm:$0xff]  ;;  %v49_v34 = vld [vmem:[%s3045_s0 + $0xd8] sm:$0xff]  ;;  %v50_v35 = vld [vmem:[%s3045_s0 + $0xe0] sm:$0xff] }
   0xd   :  { %1793 = vmatpush3.msra.mxu0 %v1009_v16  ;;  %1936 = vmatpush3.msra.mxu1 %v1008_v17  ;;  %v51_v36 = vld [vmem:[%s3045_s0 + $0xe8] sm:$0xff]  ;;  %v52_v37 = vld [vmem:[%s3045_s0 + $0xf0] sm:$0xff]  ;;  %v53_v38 = vld [vmem:[%s3045_s0 + $0xf8] sm:$0xff] }
   0xe   :  { %1698 = vmatmul.mubr.msk.f32.gmra.mxu0 %vm97_vm0, %v25_v7  ;;  %1794 = vmatprep.subr.mxu0 %v1008_v17  ;;  %v54_v39 = vld [vmem:[%s3045_s0 + $0x100] sm:$0xff]  ;;  %v55_v40 = vld [vmem:[%s3045_s0 + $0x108] sm:$0xff]  ;;  %v56_v41 = vld [vmem:[%s3045_s0 + $0x110] sm:$0xff] }
   0xf   :  { %1700 = vmatprep.mubr.msk.f32.mxu0 %vm97_vm0, %v26_v8  ;;  %1795 = vmatpush3.msra.mxu0 %v1008_v17  ;;  %v1007_v42 = vld [vmem:[%s3046_s3 + $0x60] sm:$0xff]  ;;  %v57_v43 = vld [vmem:[%s3045_s0 + $0x118] sm:$0xff]  ;;  %v1005_v46 = vld [vmem:[%s3046_s3 + $0x50] sm:$0xff] }
  0x10   :  { %1796 = vmatprep.subr.mxu0 %v1007_v42  ;;  %v1006_v44 = vld [vmem:[%s3046_s3 + $0x58] sm:$0xff]  ;;  %v58_v45 = vld [vmem:[%s3045_s0 + $0x120] sm:$0xff]  ;;  %1921 = vmatprep.subr.mxu1 %v1007_v42  ;;  %v59_v47 = vld [vmem:[%s3045_s0 + $0x128] sm:$0xff] }
  0x11   :  { %1797 = vmatpush3.msra.mxu0 %v1007_v42  ;;  %1937 = vmatpush3.msra.mxu1 %v1007_v42  ;;  %v1004_v48 = vld [vmem:[%s3046_s3 + $0x48] sm:$0xff]  ;;  %v60_v49 = vld [vmem:[%s3045_s0 + $0x130] sm:$0xff]  ;;  %v1003_v50 = vld [vmem:[%s3046_s3 + $0x40] sm:$0xff] }
  0x12   :  { %1701 = vmatmul.mubr.msk.f32.gmra.mxu0 %vm97_vm0, %v27_v9  ;;  %1798 = vmatprep.subr.mxu0 %v1006_v44  ;;  %v61_v51 = vld [vmem:[%s3045_s0 + $0x138] sm:$0xff]  ;;  %v62_v53 = vld [vmem:[%s3045_s0 + $0x140] sm:$0xff]  ;;  %v1001_v54 = vld [vmem:[%s3046_s3 + $0x30] sm:$0xff] }
  0x13   :  { %1703 = vmatprep.mubr.msk.f32.mxu0 %vm97_vm0, %v28_v10  ;;  %1799 = vmatpush3.msra.mxu0 %v1006_v44  ;;  %v1002_v52 = vld [vmem:[%s3046_s3 + $0x38] sm:$0xff]  ;;  %v63_v55 = vld [vmem:[%s3045_s0 + $0x148] sm:$0xff]  ;;  %v64_v57 = vld [vmem:[%s3045_s0 + $0x150] sm:$0xff] }
  0x14   :  { %1800 = vmatprep.subr.mxu0 %v1005_v46  ;;  %1922 = vmatprep.subr.mxu1 %v1006_v44  ;;  %v1000_v56 = vld [vmem:[%s3046_s3 + $0x28] sm:$0xff]  ;;  %v999_v58 = vld [vmem:[%s3046_s3 + $0x20] sm:$0xff]  ;;  %v65_v59 = vld [vmem:[%s3045_s0 + $0x158] sm:$0xff] }
  0x15   :  { %1801 = vmatpush3.msra.mxu0 %v1005_v46  ;;  %1938 = vmatpush3.msra.mxu1 %v1006_v44  ;;  %v66_v60 = vld [vmem:[%s3045_s0 + $0x160] sm:$0xff]  ;;  %v998_v61 = vld [vmem:[%s3046_s3 + $0x18] sm:$0xff]  ;;  %v997_v62 = vld [vmem:[%s3046_s3 + $0x10] sm:$0xff] }
  0x16   :  { %1704 = vmatmul.mubr.msk.f32.gmra.mxu0 %vm97_vm0, %v29_v11  ;;  %1802 = vmatprep.subr.mxu0 %v1004_v48  ;;  %v67_v63 = vld [vmem:[%s3045_s0 + $0x168] sm:$0xff]  ;;  %v68_v0 = vld [vmem:[%s3045_s0 + $0x170] sm:$0xff]  ;;  %v995_v2 = vld [vmem:[%s3046_s3] sm:$0xff] }
  0x17   :  { %1706 = vmatprep.mubr.msk.f32.mxu0 %vm97_vm0, %v30_v12  ;;  %1803 = vmatpush3.msra.mxu0 %v1004_v48  ;;  %v996_v1 = vld [vmem:[%s3046_s3 + $0x8] sm:$0xff]  ;;  %v69_v3 = vld [vmem:[%s3045_s0 + $0x178] sm:$0xff]  ;;  %v70_v4 = vld [vmem:[%s3045_s0 + $0x180] sm:$0xff] }
  0x18   :  { %1804 = vmatprep.subr.mxu0 %v1003_v50  ;;  %1923 = vmatprep.subr.mxu1 %v1005_v46  ;;  %v71_v5 = vld [vmem:[%s3045_s0 + $0x188] sm:$0xff]  ;;  %v72_v6 = vld [vmem:[%s3045_s0 + $0x190] sm:$0xff]  ;;  %v73_v7 = vld [vmem:[%s3045_s0 + $0x198] sm:$0xff] }
  0x19   :  { %1805 = vmatpush3.msra.mxu0 %v1003_v50  ;;  %1939 = vmatpush3.msra.mxu1 %v1005_v46  ;;  %v74_v8 = vld [vmem:[%s3045_s0 + $0x1a0] sm:$0xff]  ;;  %v75_v9 = vld [vmem:[%s3045_s0 + $0x1a8] sm:$0xff]  ;;  %v76_v10 = vld [vmem:[%s3045_s0 + $0x1b0] sm:$0xff] }
  0x1a   :  { %1707 = vmatmul.mubr.msk.f32.gmra.mxu0 %vm97_vm0, %v31_v13  ;;  %1806 = vmatprep.subr.mxu0 %v1002_v52  ;;  %v77_v11 = vld [vmem:[%s3045_s0 + $0x1b8] sm:$0xff]  ;;  %v78_v12 = vld [vmem:[%s3045_s0 + $0x1c0] sm:$0xff]  ;;  %v79_v13 = vld [vmem:[%s3045_s0 + $0x1c8] sm:$0xff] }
  0x1b   :  { %1709 = vmatprep.mubr.msk.f32.mxu0 %vm97_vm0, %v32_v15  ;;  %1807 = vmatpush3.msra.mxu0 %v1002_v52  ;;  %v80_v14 = vld [vmem:[%s3045_s0 + $0x1d0] sm:$0xff]  ;;  %v81_v15 = vld [vmem:[%s3045_s0 + $0x1d8] sm:$0xff]  ;;  %v82_v16 = vld [vmem:[%s3045_s0 + $0x1e0] sm:$0xff] }
  0x1c   :  { %1808 = vmatprep.subr.mxu0 %v1001_v54  ;;  %1924 = vmatprep.subr.mxu1 %v1004_v48  ;;  %v83_v17 = vld [vmem:[%s3045_s0 + $0x1e8] sm:$0xff] }
  0x1d   :  { %1809 = vmatpush3.msra.mxu0 %v1001_v54  ;;  %1940 = vmatpush3.msra.mxu1 %v1004_v48 }
  0x1e   :  { %1710 = vmatmul.mubr.msk.f32.gmra.mxu0 %vm97_vm0, %v33_v18  ;;  %1810 = vmatprep.subr.mxu0 %v1000_v56  ;;  %v84_v18 = vld [vmem:[%s3045_s0 + $0x1f0] sm:$0xff] }
  0x1f   :  { %1712 = vmatprep.mubr.msk.f32.mxu0 %vm97_vm0, %v34_v19  ;;  %1811 = vmatpush3.msra.mxu0 %v1000_v56  ;;  %v85_v19 = vld [vmem:[%s3045_s0 + $0x1f8] sm:$0xff] }
  0x20   :  { %1812 = vmatprep.subr.mxu0 %v999_v58  ;;  %1925 = vmatprep.subr.mxu1 %v1003_v50 }
  0x21   :  { %1813 = vmatpush3.msra.mxu0 %v999_v58  ;;  %1941 = vmatpush3.msra.mxu1 %v1003_v50 }
  0x22   :  { %1713 = vmatmul.mubr.msk.f32.gmra.mxu0 %vm97_vm0, %v35_v20  ;;  %1814 = vmatprep.subr.mxu0 %v998_v61  ;;  %v2428_v20 = vld [vmem:[%s3047_s2] ss:$0 sm:$0xff] }
  0x23   :  { %1715 = vmatprep.mubr.msk.f32.mxu0 %vm97_vm0, %v36_v21  ;;  %1926 = vmatprep.subr.mxu1 %v1002_v52 }
  0x24   :  { %1815 = vmatpush3.msra.mxu0 %v998_v61  ;;  %1942 = vmatpush3.msra.mxu1 %v1002_v52 }
  0x25   :  { %1816 = vmatprep.subr.mxu0 %v997_v62  ;;  %1927 = vmatprep.subr.mxu1 %v1001_v54 }
  0x26   :  { %1716 = vmatmul.mubr.msk.f32.gmra.mxu0 %vm97_vm0, %v37_v22  ;;  %1943 = vmatpush3.msra.mxu1 %v1001_v54 }
  0x27   :  { %1718 = vmatprep.mubr.msk.f32.mxu0 %vm97_vm0, %v38_v23  ;;  %1817 = vmatpush3.msra.mxu0 %v997_v62 }
  0x28   :  { %1818 = vmatprep.subr.mxu0 %v996_v1  ;;  %1928 = vmatprep.subr.mxu1 %v1000_v56 }
  0x29   :  { %1819 = vmatpush3.msra.mxu0 %v996_v1  ;;  %1944 = vmatpush3.msra.mxu1 %v1000_v56 }
  0x2a   :  { %1719 = vmatmul.mubr.msk.f32.gmra.mxu0 %vm97_vm0, %v39_v24  ;;  %1820 = vmatprep.subr.mxu0 %v995_v2 }
  0x2b   :  { %1721 = vmatprep.mubr.msk.f32.mxu0 %vm97_vm0, %v40_v25  ;;  %1821 = vmatpush3.msra.mxu0 %v995_v2 }
  0x2c   :  { %1929 = vmatprep.subr.mxu1 %v999_v58 }
  0x2d   :  { %1945 = vmatpush3.msra.mxu1 %v999_v58 }
  0x2e   :  { %1722 = vmatmul.mubr.msk.f32.gmra.mxu0 %vm97_vm0, %v41_v26  ;;  %1930 = vmatprep.subr.mxu1 %v998_v61 }
  0x2f   :  { %1724 = vmatprep.mubr.msk.f32.mxu0 %vm97_vm0, %v42_v27  ;;  %1946 = vmatpush3.msra.mxu1 %v998_v61 }
  0x30   :  { %1931 = vmatprep.subr.mxu1 %v997_v62 }
  0x31   :  { %1947 = vmatpush3.msra.mxu1 %v997_v62 }
  0x32   :  { %1725 = vmatmul.mubr.msk.f32.gmra.mxu0 %vm97_vm0, %v43_v28  ;;  %1932 = vmatprep.subr.mxu1 %v996_v1 }
  0x33   :  { %1727 = vmatprep.mubr.msk.f32.mxu0 %vm97_vm0, %v44_v29  ;;  %1948 = vmatpush3.msra.mxu1 %v996_v1 }
  0x34   :  { %1933 = vmatprep.subr.mxu1 %v995_v2 }
  0x35   :  { %1949 = vmatpush3.msra.mxu1 %v995_v2 }
  0x36   :  { %1728 = vmatmul.mubr.msk.f32.gmra.mxu0 %vm97_vm0, %v45_v30 }
  0x37   :  { %1730 = vmatprep.mubr.msk.f32.mxu0 %vm97_vm0, %v46_v31 }
  0x3a   :  { %1731 = vmatmul.mubr.msk.f32.gmra.mxu0 %vm97_vm0, %v47_v32 }
  0x3b   :  { %1733 = vmatprep.mubr.msk.f32.mxu0 %vm97_vm0, %v48_v33 }
  0x3e   :  { %1734 = vmatmul.mubr.msk.f32.gmra.mxu0 %vm97_vm0, %v49_v34 }
  0x3f   :  { %1736 = vmatprep.mubr.msk.f32.mxu0 %vm97_vm0, %v50_v35 }
  0x42   :  { %1737 = vmatmul.mubr.msk.f32.gmra.mxu0 %vm97_vm0, %v51_v36 }
  0x43   :  { %1739 = vmatprep.mubr.msk.f32.mxu0 %vm97_vm0, %v52_v37 }
  0x46   :  { %1740 = vmatmul.mubr.msk.f32.gmra.mxu0 %vm97_vm0, %v53_v38 }
  0x47   :  { %1742 = vmatprep.mubr.msk.f32.mxu0 %vm97_vm0, %v54_v39 }
  0x4a   :  { %1743 = vmatmul.mubr.msk.f32.gmra.mxu0 %vm97_vm0, %v55_v40 }
  0x4b   :  { %1745 = vmatprep.mubr.msk.f32.mxu0 %vm97_vm0, %v56_v41 }
  0x4e   :  { %1746 = vmatmul.mubr.msk.f32.gmra.mxu0 %vm97_vm0, %v57_v43 }
  0x4f   :  { %1748 = vmatprep.mubr.msk.f32.mxu0 %vm97_vm0, %v58_v45 }
  0x52   :  { %1749 = vmatmul.mubr.msk.f32.gmra.mxu0 %vm97_vm0, %v59_v47 }
  0x53   :  { %1751 = vmatprep.mubr.msk.f32.mxu0 %vm97_vm0, %v60_v49 }
  0x56   :  { %1752 = vmatmul.mubr.msk.f32.gmra.mxu0 %vm97_vm0, %v61_v51 }
  0x57   :  { %1754 = vmatprep.mubr.msk.f32.mxu0 %vm97_vm0, %v62_v53 }
  0x5a   :  { %1755 = vmatmul.mubr.msk.f32.gmra.mxu0 %vm97_vm0, %v63_v55 }
  0x5b   :  { %1757 = vmatprep.mubr.msk.f32.mxu0 %vm97_vm0, %v64_v57 }
  0x5e   :  { %1758 = vmatmul.mubr.msk.f32.gmra.mxu0 %vm97_vm0, %v65_v59 }
  0x5f   :  { %1760 = vmatprep.mubr.msk.f32.mxu0 %vm97_vm0, %v66_v60 }
  0x62   :  { %1761 = vmatmul.mubr.msk.f32.gmra.mxu0 %vm97_vm0, %v67_v63 }
  0x63   :  { %1763 = vmatprep.mubr.msk.f32.mxu0 %vm97_vm0, %v68_v0 }
  0x66   :  { %1764 = vmatmul.mubr.msk.f32.gmra.mxu0 %vm97_vm0, %v69_v3  ;;  %v10_v3 = vstv %s3048_s4 }
  0x67   :  { %1766 = vmatprep.mubr.msk.f32.mxu0 %vm97_vm0, %v70_v4  ;;  %11 = vst [vmem:[#allocation2] sm:$0x1] %v10_v3 }
  0x6a   :  { %1767 = vmatmul.mubr.msk.f32.gmra.mxu0 %vm97_vm0, %v71_v5 }
  0x6b   :  { %1769 = vmatprep.mubr.msk.f32.mxu0 %vm97_vm0, %v72_v6 }
  0x6e   :  { %1770 = vmatmul.mubr.msk.f32.gmra.mxu0 %vm97_vm0, %v73_v7 }
  0x6f   :  { %1772 = vmatprep.mubr.msk.f32.mxu0 %vm97_vm0, %v74_v8 }
  0x72   :  { %1773 = vmatmul.mubr.msk.f32.gmra.mxu0 %vm97_vm0, %v75_v9 }
  0x73   :  { %1775 = vmatprep.mubr.msk.f32.mxu0 %vm97_vm0, %v76_v10 }
  0x76   :  { %1776 = vmatmul.mubr.msk.f32.gmra.mxu0 %vm97_vm0, %v77_v11 }
  0x77   :  { %1778 = vmatprep.mubr.msk.f32.mxu0 %vm97_vm0, %v78_v12 }
  0x7a   :  { %1779 = vmatmul.mubr.msk.f32.gmra.mxu0 %vm97_vm0, %v79_v13 }
  0x7b   :  { %1781 = vmatprep.mubr.msk.f32.mxu0 %vm97_vm0, %v80_v14 }
  0x7e   :  { %1782 = vmatmul.mubr.msk.f32.gmra.mxu0 %vm97_vm0, %v81_v15 }
  0x7f   :  { %1784 = vmatprep.mubr.msk.f32.mxu0 %vm97_vm0, %v82_v16 }
  0x82   :  { %1785 = vmatmul.mubr.msk.f32.gmra.mxu0 %vm97_vm0, %v83_v17 }
  0x83   :  { %1787 = vmatprep.mubr.msk.f32.mxu0 %vm97_vm0, %v84_v18 }
  0x86   :  { %1788 = vmatmul.mubr.msk.f32.gmra.mxu0 %vm97_vm0, %v85_v19 }
  0xca   :  { %v1696_v21 = vpop.f32.mrf.mxu0 }
  0xcb   :  { %v362_v22 = vadd.f32 %v1696_v21, %v2428_v20 }
  0xcc   :  { %v356_v23 = vpop.f32.mrf.mxu0 }
  0xcd   :  { %v740_v24 = vmul.f32 0.70710677, %v362_v22  ;;  %v357_v25 = vadd.f32 %v2428_v20, %v356_v23  ;;  %v676_v58 = vmul.f32 0.5, %v362_v22 }
  0xce   :  { %v1699_v26 = vpop.f32.mrf.mxu0 }
  0xcf   :  { %1950 = verf.f32 %v740_v24  ;;  %v739_v27 = vmul.f32 0.70710677, %v357_v25  ;;  %v372_v28 = vadd.f32 %v1699_v26, %v2428_v20  ;;  %v675_v54 = vmul.f32 0.5, %v357_v25 }
  0xd0   :  { %v366_v29 = vpop.f32.mrf.mxu0 }
  0xd1   :  { %1952 = verf.f32 %v739_v27  ;;  %v742_v30 = vmul.f32 0.70710677, %v372_v28  ;;  %v367_v31 = vadd.f32 %v2428_v20, %v366_v29  ;;  %v678_v11 = vmul.f32 0.5, %v372_v28 }
  0xd2   :  { %v1702_v32 = vpop.f32.mrf.mxu0 }
  0xd3   :  { %1954 = verf.f32 %v742_v30  ;;  %v741_v33 = vmul.f32 0.70710677, %v367_v31  ;;  %v2435_v34 = vadd.f32 %v1702_v32, %v2428_v20  ;;  %v677_v8 = vmul.f32 0.5, %v367_v31 }
  0xd4   :  { %v376_v35 = vpop.f32.mrf.mxu0 }
  0xd5   :  { %1956 = verf.f32 %v741_v33  ;;  %v744_v36 = vmul.f32 0.70710677, %v2435_v34  ;;  %v377_v37 = vadd.f32 %v2428_v20, %v376_v35  ;;  %v680_v23 = vmul.f32 0.5, %v2435_v34 }
  0xd6   :  { %v1705_v38 = vpop.f32.mrf.mxu0 }
  0xd7   :  { %1958 = verf.f32 %v744_v36  ;;  %v743_v39 = vmul.f32 0.70710677, %v377_v37  ;;  %v2440_v40 = vadd.f32 %v1705_v38, %v2428_v20  ;;  %v679_v24 = vmul.f32 0.5, %v377_v37 }
  0xd8   :  { %v386_v41 = vpop.f32.mrf.mxu0 }
  0xd9   :  { %1960 = verf.f32 %v743_v39  ;;  %v746_v42 = vmul.f32 0.70710677, %v2440_v40  ;;  %v2444_v43 = vadd.f32 %v2428_v20, %v386_v41  ;;  %v682_v41 = vmul.f32 0.5, %v2440_v40 }
  0xda   :  { %v1708_v44 = vpop.f32.mrf.mxu0 }
  0xdb   :  { %1962 = verf.f32 %v746_v42  ;;  %v745_v45 = vmul.f32 0.70710677, %v2444_v43  ;;  %v2448_v46 = vadd.f32 %v1708_v44, %v2428_v20  ;;  %v681_v38 = vmul.f32 0.5, %v2444_v43 }
  0xdc   :  { %v1951_v47 = vpop.eup %1950  ;;  %v396_v48 = vpop.f32.mrf.mxu0 }
  0xdd   :  { %1964 = verf.f32 %v745_v45  ;;  %v748_v49 = vmul.f32 0.70710677, %v2448_v46  ;;  %v868_v51 = vadd.f32 1.0, %v1951_v47  ;;  %v2452_v52 = vadd.f32 %v2428_v20, %v396_v48 }
  0xde   :  { %v1953_v50 = vpop.eup %1952  ;;  %v1711_v53 = vpop.f32.mrf.mxu0  ;;  %v684_v40 = vmul.f32 0.5, %v2448_v46 }
  0xdf   :  { %1966 = verf.f32 %v748_v49  ;;  %v2455_v55 = vadd.f32 %v1711_v53, %v2428_v20  ;;  %v867_v56 = vadd.f32 1.0, %v1953_v50  ;;  %v747_v59 = vmul.f32 0.70710677, %v2452_v52 }
  0xe0   :  { %v1955_v57 = vpop.eup %1954  ;;  %v406_v60 = vpop.f32.mrf.mxu0  ;;  %v932_v1 = vmul.f32 %v868_v51, %v676_v58 }
  0xe1   :  { %v750_v61 = vmul.f32 0.70710677, %v2455_v55  ;;  %v2460_v62 = vadd.f32 %v2428_v20, %v406_v60  ;;  %v931_v63 = vmul.f32 %v867_v56, %v675_v54  ;;  %1968 = verf.f32 %v747_v59 }
  0xe2   :  { %v1957_v0 = vpop.eup %1956  ;;  %v1714_v2 = vpop.f32.mrf.mxu0  ;;  %v870_v6 = vadd.f32 1.0, %v1955_v57  ;;  %v683_v54 = vmul.f32 0.5, %v2452_v52 }
  0xe3   :  { %1970 = verf.f32 %v750_v61  ;;  %v749_v4 = vmul.f32 0.70710677, %v2460_v62  ;;  %v2467_v5 = vadd.f32 %v1714_v2, %v2428_v20  ;;  %1822 = vmatprep.mubr.f32.mxu0 %v931_v63  ;;  %v869_v10 = vadd.f32 1.0, %v1957_v0 }
  0xe4   :  { %v1959_v7 = vpop.eup %1958  ;;  %v416_v9 = vpop.f32.mrf.mxu0  ;;  %1823 = vmatmul.mubr.f32.vlgmr.msra.gmra.mxu0 %v932_v1  ;;  %v934_v21 = vmul.f32 %v870_v6, %v678_v11  ;;  %v685_v3 = vmul.f32 0.5, %v2460_v62 }
  0xe5   :  { %1972 = verf.f32 %v749_v4  ;;  %v752_v12 = vmul.f32 0.70710677, %v2467_v5  ;;  %v2471_v13 = vadd.f32 %v2428_v20, %v416_v9  ;;  %v933_v16 = vmul.f32 %v869_v10, %v677_v8 }
  0xe6   :  { %v1961_v14 = vpop.eup %1960  ;;  %v1717_v15 = vpop.f32.mrf.mxu0  ;;  %v872_v17 = vadd.f32 1.0, %v1959_v7  ;;  %v686_v7 = vmul.f32 0.5, %v2455_v55  ;;  %v688_v55 = vmul.f32 0.5, %v2467_v5 }
  0xe7   :  { %1974 = verf.f32 %v752_v12  ;;  %v751_v18 = vmul.f32 0.70710677, %v2471_v13  ;;  %v2475_v19 = vadd.f32 %v1717_v15, %v2428_v20  ;;  %1825 = vmatprep.mubr.f32.mxu0 %v933_v16  ;;  %v871_v26 = vadd.f32 1.0, %v1961_v14 }
  0xe8   :  { %v1963_v22 = vpop.eup %1962  ;;  %v426_v25 = vpop.f32.mrf.mxu0  ;;  %1826 = vmatmul.mubr.f32.gmra.mxu0 %v934_v21  ;;  %v936_v32 = vmul.f32 %v872_v17, %v680_v23 }
  0xe9   :  { %1976 = verf.f32 %v751_v18  ;;  %v754_v27 = vmul.f32 0.70710677, %v2475_v19  ;;  %v2480_v28 = vadd.f32 %v2428_v20, %v426_v25  ;;  %v935_v31 = vmul.f32 %v871_v26, %v679_v24 }
  0xea   :  { %v1965_v29 = vpop.eup %1964  ;;  %v1720_v30 = vpop.f32.mrf.mxu0  ;;  %v874_v35 = vadd.f32 1.0, %v1963_v22  ;;  %v687_v18 = vmul.f32 0.5, %v2471_v13 }
  0xeb   :  { %1978 = verf.f32 %v754_v27  ;;  %v753_v33 = vmul.f32 0.70710677, %v2480_v28  ;;  %v2484_v34 = vadd.f32 %v1720_v30, %v2428_v20  ;;  %1828 = vmatprep.mubr.f32.mxu0 %v935_v31  ;;  %v873_v39 = vadd.f32 1.0, %v1965_v29 }
  0xec   :  { %v1967_v36 = vpop.eup %1966  ;;  %v436_v37 = vpop.f32.mrf.mxu0  ;;  %1829 = vmatmul.mubr.f32.gmra.mxu0 %v936_v32  ;;  %v938_v43 = vmul.f32 %v874_v35, %v682_v41  ;;  %v689_v32 = vmul.f32 0.5, %v2480_v28 }
  0xed   :  { %1980 = verf.f32 %v753_v33  ;;  %v756_v42 = vmul.f32 0.70710677, %v2484_v34  ;;  %v2490_v44 = vadd.f32 %v2428_v20, %v436_v37  ;;  %v937_v47 = vmul.f32 %v873_v39, %v681_v38 }
  0xee   :  { %v1723_v45 = vpop.f32.mrf.mxu0  ;;  %v876_v48 = vadd.f32 1.0, %v1967_v36  ;;  %v1969_v49 = vpop.eup %1968  ;;  %v690_v36 = vmul.f32 0.5, %v2475_v19  ;;  %v692_v19 = vmul.f32 0.5, %v2484_v34 }
  0xef   :  { %1982 = verf.f32 %v756_v42  ;;  %v755_v50 = vmul.f32 0.70710677, %v2490_v44  ;;  %v2494_v51 = vadd.f32 %v1723_v45, %v2428_v20  ;;  %1831 = vmatprep.mubr.f32.mxu1 %v937_v47  ;;  %v875_v57 = vadd.f32 1.0, %v1969_v49 }
  0xf0   :  { %v1971_v53 = vpop.eup %1970  ;;  %v446_v56 = vpop.f32.mrf.mxu0  ;;  %1832 = vmatmul.mubr.f32.vlgmr.msra.gmra.mxu1 %v938_v43  ;;  %v940_v0 = vmul.f32 %v876_v48, %v684_v40 }
  0xf1   :  { %1984 = verf.f32 %v755_v50  ;;  %v758_v58 = vmul.f32 0.70710677, %v2494_v51  ;;  %v2500_v59 = vadd.f32 %v2428_v20, %v446_v56  ;;  %v939_v63 = vmul.f32 %v875_v57, %v683_v54 }
  0xf2   :  { %v1973_v60 = vpop.eup %1972  ;;  %v1726_v61 = vpop.f32.mrf.mxu0  ;;  %v878_v52 = vadd.f32 1.0, %v1971_v53  ;;  %v691_v50 = vmul.f32 0.5, %v2490_v44 }
  0xf3   :  { %1986 = verf.f32 %v758_v58  ;;  %v757_v1 = vmul.f32 0.70710677, %v2500_v59  ;;  %v2504_v46 = vadd.f32 %v1726_v61, %v2428_v20  ;;  %1834 = vmatprep.mubr.f32.mxu1 %v939_v63  ;;  %v877_v6 = vadd.f32 1.0, %v1973_v60 }
  0xf4   :  { %v1975_v2 = vpop.eup %1974  ;;  %v456_v4 = vpop.f32.mrf.mxu0  ;;  %1835 = vmatmul.mubr.f32.gmra.mxu1 %v940_v0  ;;  %v942_v16 = vmul.f32 %v878_v52, %v686_v7  ;;  %v693_v0 = vmul.f32 0.5, %v2500_v59 }
  0xf5   :  { %1988 = verf.f32 %v757_v1  ;;  %v760_v8 = vmul.f32 0.70710677, %v2504_v46  ;;  %v2510_v9 = vadd.f32 %v2428_v20, %v456_v4  ;;  %v941_v12 = vmul.f32 %v877_v6, %v685_v3 }
  0xf6   :  { %v1977_v10 = vpop.eup %1976  ;;  %v1729_v11 = vpop.f32.mrf.mxu0  ;;  %v880_v14 = vadd.f32 1.0, %v1975_v2  ;;  %v694_v2 = vmul.f32 0.5, %v2494_v51  ;;  %v696_v51 = vmul.f32 0.5, %v2504_v46 }
  0xf7   :  { %1990 = verf.f32 %v760_v8  ;;  %v759_v15 = vmul.f32 0.70710677, %v2510_v9  ;;  %v2514_v62 = vadd.f32 %v1729_v11, %v2428_v20  ;;  %1837 = vmatprep.mubr.f32.mxu1 %v941_v12  ;;  %v879_v22 = vadd.f32 1.0, %v1977_v10 }
  0xf8   :  { %v1979_v17 = vpop.eup %1978  ;;  %v466_v21 = vpop.f32.mrf.mxu0  ;;  %1838 = vmatmul.mubr.f32.gmra.mxu1 %v942_v16  ;;  %v944_v29 = vmul.f32 %v880_v14, %v688_v55 }
  0xf9   :  { %1992 = verf.f32 %v759_v15  ;;  %v762_v23 = vmul.f32 0.70710677, %v2514_v62  ;;  %v2520_v24 = vadd.f32 %v2428_v20, %v466_v21  ;;  %v943_v27 = vmul.f32 %v879_v22, %v687_v18 }
  0xfa   :  { %v1981_v25 = vpop.eup %1980  ;;  %v1732_v26 = vpop.f32.mrf.mxu0  ;;  %v882_v13 = vadd.f32 1.0, %v1979_v17  ;;  %v695_v15 = vmul.f32 0.5, %v2510_v9 }
  0xfb   :  { %1994 = verf.f32 %v762_v23  ;;  %v761_v30 = vmul.f32 0.70710677, %v2520_v24  ;;  %v2524_v5 = vadd.f32 %v1732_v26, %v2428_v20  ;;  %1840 = vmatprep.mubr.f32.mxu1 %v943_v27  ;;  %v881_v35 = vadd.f32 1.0, %v1981_v25 }
  0xfc   :  { %v1983_v31 = vpop.eup %1982  ;;  %v476_v33 = vpop.f32.mrf.mxu0  ;;  %1841 = vmatmul.mubr.f32.gmra.mxu1 %v944_v29  ;;  %v946_v48 = vmul.f32 %v882_v13, %v690_v36  ;;  %v697_v29 = vmul.f32 0.5, %v2520_v24 }
  0xfd   :  { %1996 = verf.f32 %v761_v30  ;;  %v764_v37 = vmul.f32 0.70710677, %v2524_v5  ;;  %v2530_v38 = vadd.f32 %v2428_v20, %v476_v33  ;;  %v945_v42 = vmul.f32 %v881_v35, %v689_v32 }
  0xfe   :  { %v1985_v39 = vpop.eup %1984  ;;  %v1735_v41 = vpop.f32.mrf.mxu0  ;;  %v884_v45 = vadd.f32 1.0, %v1983_v31  ;;  %v698_v31 = vmul.f32 0.5, %v2514_v62  ;;  %v700_v62 = vmul.f32 0.5, %v2524_v5 }
  0xff   :  { %1998 = verf.f32 %v764_v37  ;;  %v763_v47 = vmul.f32 0.70710677, %v2530_v38  ;;  %v2534_v28 = vadd.f32 %v1735_v41, %v2428_v20  ;;  %1843 = vmatprep.mubr.f32.mxu1 %v945_v42  ;;  %v883_v53 = vadd.f32 1.0, %v1985_v39 }
 0x100   :  { %v1987_v49 = vpop.eup %1986  ;;  %v486_v43 = vpop.f32.mrf.mxu0  ;;  %1844 = vmatmul.mubr.f32.gmra.mxu1 %v946_v48  ;;  %v948_v60 = vmul.f32 %v884_v45, %v692_v19 }
 0x101   :  { %2000 = verf.f32 %v763_v47  ;;  %v766_v40 = vmul.f32 0.70710677, %v2534_v28  ;;  %v2540_v54 = vadd.f32 %v2428_v20, %v486_v43  ;;  %v947_v58 = vmul.f32 %v883_v53, %v691_v50 }
 0x102   :  { %v1989_v56 = vpop.eup %1988  ;;  %v1738_v57 = vpop.f32.mrf.mxu0  ;;  %v886_v44 = vadd.f32 1.0, %v1987_v49  ;;  %v699_v47 = vmul.f32 0.5, %v2530_v38 }
 0x103   :  { %2002 = verf.f32 %v766_v40  ;;  %v765_v61 = vmul.f32 0.70710677, %v2540_v54  ;;  %v2544_v34 = vadd.f32 %v1738_v57, %v2428_v20  ;;  %1846 = vmatprep.mubr.f32.mxu1 %v947_v58  ;;  %v885_v52 = vadd.f32 1.0, %v1989_v56 }
 0x104   :  { %v1991_v63 = vpop.eup %1990  ;;  %v496_v1 = vpop.f32.mrf.mxu0  ;;  %1847 = vmatmul.mubr.f32.gmra.mxu1 %v948_v60  ;;  %v950_v12 = vmul.f32 %v886_v44, %v694_v2  ;;  %v701_v60 = vmul.f32 0.5, %v2540_v54 }
 0x105   :  { %2004 = verf.f32 %v765_v61  ;;  %v768_v3 = vmul.f32 0.70710677, %v2544_v34  ;;  %v2550_v4 = vadd.f32 %v2428_v20, %v496_v1  ;;  %v949_v8 = vmul.f32 %v885_v52, %v693_v0 }
 0x106   :  { %v1993_v6 = vpop.eup %1992  ;;  %v1741_v7 = vpop.f32.mrf.mxu0  ;;  %v888_v10 = vadd.f32 1.0, %v1991_v63  ;;  %v702_v63 = vmul.f32 0.5, %v2534_v28  ;;  %v704_v28 = vmul.f32 0.5, %v2544_v34 }
 0x107   :  { %2006 = verf.f32 %v768_v3  ;;  %v767_v11 = vmul.f32 0.70710677, %v2550_v4  ;;  %v2554_v59 = vadd.f32 %v1741_v7, %v2428_v20  ;;  %1849 = vmatprep.mubr.f32.mxu1 %v949_v8  ;;  %v887_v17 = vadd.f32 1.0, %v1993_v6 }
 0x108   :  { %v1995_v14 = vpop.eup %1994  ;;  %v506_v16 = vpop.f32.mrf.mxu0  ;;  %1850 = vmatmul.mubr.f32.gmra.mxu1 %v950_v12  ;;  %v952_v25 = vmul.f32 %v888_v10, %v696_v51 }
 0x109   :  { %2008 = verf.f32 %v767_v11  ;;  %v770_v55 = vmul.f32 0.70710677, %v2554_v59  ;;  %v2560_v18 = vadd.f32 %v2428_v20, %v506_v16  ;;  %v951_v23 = vmul.f32 %v887_v17, %v695_v15 }
 0x10a   :  { %v1997_v21 = vpop.eup %1996  ;;  %v1744_v22 = vpop.f32.mrf.mxu0  ;;  %v890_v9 = vadd.f32 1.0, %v1995_v14  ;;  %v703_v11 = vmul.f32 0.5, %v2550_v4 }
 0x10b   :  { %2010 = verf.f32 %v770_v55  ;;  %v769_v26 = vmul.f32 0.70710677, %v2560_v18  ;;  %v2564_v46 = vadd.f32 %v1744_v22, %v2428_v20  ;;  %1852 = vmatprep.mubr.f32.mxu1 %v951_v23  ;;  %v889_v13 = vadd.f32 1.0, %v1997_v21 }
 0x10c   :  { %v1999_v27 = vpop.eup %1998  ;;  %v516_v30 = vpop.f32.mrf.mxu0  ;;  %1853 = vmatmul.mubr.f32.gmra.mxu1 %v952_v25  ;;  %v954_v42 = vmul.f32 %v890_v9, %v698_v31  ;;  %v705_v25 = vmul.f32 0.5, %v2560_v18 }
 0x10d   :  { %2012 = verf.f32 %v769_v26  ;;  %v772_v32 = vmul.f32 0.70710677, %v2564_v46  ;;  %v2570_v33 = vadd.f32 %v2428_v20, %v516_v30  ;;  %v953_v37 = vmul.f32 %v889_v13, %v697_v29 }
 0x10e   :  { %v2001_v35 = vpop.eup %2000  ;;  %v1747_v36 = vpop.f32.mrf.mxu0  ;;  %v892_v39 = vadd.f32 1.0, %v1999_v27  ;;  %v706_v27 = vmul.f32 0.5, %v2554_v59  ;;  %v708_v59 = vmul.f32 0.5, %v2564_v46 }
 0x10f   :  { %2014 = verf.f32 %v772_v32  ;;  %v771_v41 = vmul.f32 0.70710677, %v2570_v33  ;;  %v2574_v24 = vadd.f32 %v1747_v36, %v2428_v20  ;;  %1855 = vmatprep.mubr.f32.mxu1 %v953_v37  ;;  %v891_v49 = vadd.f32 1.0, %v2001_v35 }
 0x110   :  { %v2003_v45 = vpop.eup %2002  ;;  %v526_v48 = vpop.f32.mrf.mxu0  ;;  %1856 = vmatmul.mubr.f32.gmra.mxu1 %v954_v42  ;;  %v956_v56 = vmul.f32 %v892_v39, %v700_v62 }
 0x111   :  { %2016 = verf.f32 %v771_v41  ;;  %v774_v19 = vmul.f32 0.70710677, %v2574_v24  ;;  %v2580_v50 = vadd.f32 %v2428_v20, %v526_v48  ;;  %v955_v40 = vmul.f32 %v891_v49, %v699_v47 }
 0x112   :  { %v2005_v43 = vpop.eup %2004  ;;  %v1750_v53 = vpop.f32.mrf.mxu0  ;;  %v894_v38 = vadd.f32 1.0, %v2003_v45  ;;  %v707_v41 = vmul.f32 0.5, %v2570_v33 }
 0x113   :  { %2018 = verf.f32 %v774_v19  ;;  %v773_v57 = vmul.f32 0.70710677, %v2580_v50  ;;  %v2584_v5 = vadd.f32 %v1750_v53, %v2428_v20  ;;  %1858 = vmatprep.mubr.f32.mxu1 %v955_v40  ;;  %v893_v44 = vadd.f32 1.0, %v2005_v43 }
 0x114   :  { %v2007_v58 = vpop.eup %2006  ;;  %v536_v61 = vpop.f32.mrf.mxu0  ;;  %1859 = vmatmul.mubr.f32.gmra.mxu1 %v956_v56  ;;  %v958_v8 = vmul.f32 %v894_v38, %v702_v63  ;;  %v709_v56 = vmul.f32 0.5, %v2580_v50 }
 0x115   :  { %2020 = verf.f32 %v773_v57  ;;  %v776_v0 = vmul.f32 0.70710677, %v2584_v5  ;;  %v2590_v1 = vadd.f32 %v2428_v20, %v536_v61  ;;  %v957_v3 = vmul.f32 %v893_v44, %v701_v60 }
 0x116   :  { %v2009_v52 = vpop.eup %2008  ;;  %v1753_v2 = vpop.f32.mrf.mxu0  ;;  %v896_v6 = vadd.f32 1.0, %v2007_v58  ;;  %v710_v58 = vmul.f32 0.5, %v2574_v24  ;;  %v712_v24 = vmul.f32 0.5, %v2584_v5 }
 0x117   :  { %2022 = verf.f32 %v776_v0  ;;  %v775_v7 = vmul.f32 0.70710677, %v2590_v1  ;;  %v2594_v54 = vadd.f32 %v1753_v2, %v2428_v20  ;;  %1861 = vmatprep.mubr.f32.mxu1 %v957_v3  ;;  %v895_v14 = vadd.f32 1.0, %v2009_v52 }
 0x118   :  { %v2011_v10 = vpop.eup %2010  ;;  %v546_v12 = vpop.f32.mrf.mxu0  ;;  %1862 = vmatmul.mubr.f32.gmra.mxu1 %v958_v8  ;;  %v960_v21 = vmul.f32 %v896_v6, %v704_v28 }
 0x119   :  { %2024 = verf.f32 %v775_v7  ;;  %v778_v51 = vmul.f32 0.70710677, %v2594_v54  ;;  %v2600_v15 = vadd.f32 %v2428_v20, %v546_v12  ;;  %v959_v55 = vmul.f32 %v895_v14, %v703_v11 }
 0x11a   :  { %v2013_v16 = vpop.eup %2012  ;;  %v1756_v17 = vpop.f32.mrf.mxu0  ;;  %v898_v4 = vadd.f32 1.0, %v2011_v10  ;;  %v711_v7 = vmul.f32 0.5, %v2590_v1 }
 0x11b   :  { %2026 = verf.f32 %v778_v51  ;;  %v777_v22 = vmul.f32 0.70710677, %v2600_v15  ;;  %v2604_v34 = vadd.f32 %v1756_v17, %v2428_v20  ;;  %1864 = vmatprep.mubr.f32.mxu1 %v959_v55  ;;  %v897_v9 = vadd.f32 1.0, %v2013_v16 }
 0x11c   :  { %v2015_v23 = vpop.eup %2014  ;;  %v556_v26 = vpop.f32.mrf.mxu0  ;;  %1865 = vmatmul.mubr.f32.gmra.mxu1 %v960_v21  ;;  %v962_v37 = vmul.f32 %v898_v4, %v706_v27  ;;  %v713_v21 = vmul.f32 0.5, %v2600_v15 }
 0x11d   :  { %2028 = verf.f32 %v777_v22  ;;  %v780_v29 = vmul.f32 0.70710677, %v2604_v34  ;;  %v2610_v30 = vadd.f32 %v2428_v20, %v556_v26  ;;  %v961_v32 = vmul.f32 %v897_v9, %v705_v25 }
 0x11e   :  { %v2017_v13 = vpop.eup %2016  ;;  %v1759_v31 = vpop.f32.mrf.mxu0  ;;  %v900_v35 = vadd.f32 1.0, %v2015_v23  ;;  %v714_v23 = vmul.f32 0.5, %v2594_v54  ;;  %v716_v54 = vmul.f32 0.5, %v2604_v34 }
 0x11f   :  { %2030 = verf.f32 %v780_v29  ;;  %v779_v36 = vmul.f32 0.70710677, %v2610_v30  ;;  %v2614_v18 = vadd.f32 %v1759_v31, %v2428_v20  ;;  %1867 = vmatprep.mubr.f32.mxu1 %v961_v32  ;;  %v899_v45 = vadd.f32 1.0, %v2017_v13 }
 0x120   :  { %v2019_v39 = vpop.eup %2018  ;;  %v566_v42 = vpop.f32.mrf.mxu0  ;;  %1868 = vmatmul.mubr.f32.gmra.mxu1 %v962_v37  ;;  %v964_v43 = vmul.f32 %v900_v35, %v708_v59 }
 0x121   :  { %2032 = verf.f32 %v779_v36  ;;  %v782_v62 = vmul.f32 0.70710677, %v2614_v18  ;;  %v2620_v47 = vadd.f32 %v2428_v20, %v566_v42  ;;  %v963_v19 = vmul.f32 %v899_v45, %v707_v41 }
 0x122   :  { %v2021_v48 = vpop.eup %2020  ;;  %v1762_v49 = vpop.f32.mrf.mxu0  ;;  %v902_v33 = vadd.f32 1.0, %v2019_v39  ;;  %v715_v36 = vmul.f32 0.5, %v2610_v30 }
 0x123   :  { %2034 = verf.f32 %v782_v62  ;;  %v781_v53 = vmul.f32 0.70710677, %v2620_v47  ;;  %v2624_v46 = vadd.f32 %v1762_v49, %v2428_v20  ;;  %1870 = vmatprep.mubr.f32.mxu1 %v963_v19  ;;  %v901_v38 = vadd.f32 1.0, %v2021_v48 }
 0x124   :  { %v2023_v40 = vpop.eup %2022  ;;  %v576_v57 = vpop.f32.mrf.mxu0  ;;  %1871 = vmatmul.mubr.f32.gmra.mxu1 %v964_v43  ;;  %v966_v3 = vmul.f32 %v902_v33, %v710_v58  ;;  %v717_v43 = vmul.f32 0.5, %v2620_v47 }
 0x125   :  { %2036 = verf.f32 %v781_v53  ;;  %v784_v60 = vmul.f32 0.70710677, %v2624_v46  ;;  %v2630_v61 = vadd.f32 %v2428_v20, %v576_v57  ;;  %v965_v0 = vmul.f32 %v901_v38, %v709_v56 }
 0x126   :  { %v2025_v44 = vpop.eup %2024  ;;  %v1765_v63 = vpop.f32.mrf.mxu0  ;;  %v904_v52 = vadd.f32 1.0, %v2023_v40  ;;  %v718_v40 = vmul.f32 0.5, %v2614_v18  ;;  %v720_v18 = vmul.f32 0.5, %v2624_v46 }
 0x127   :  { %2038 = verf.f32 %v784_v60  ;;  %v783_v2 = vmul.f32 0.70710677, %v2630_v61  ;;  %v2634_v50 = vadd.f32 %v1765_v63, %v2428_v20  ;;  %1873 = vmatprep.mubr.f32.mxu1 %v965_v0  ;;  %v903_v10 = vadd.f32 1.0, %v2025_v44 }
 0x128   :  { %v2027_v6 = vpop.eup %2026  ;;  %v586_v8 = vpop.f32.mrf.mxu0  ;;  %1874 = vmatmul.mubr.f32.gmra.mxu1 %v966_v3  ;;  %v968_v16 = vmul.f32 %v904_v52, %v712_v24 }
 0x129   :  { %2040 = verf.f32 %v783_v2  ;;  %v786_v28 = vmul.f32 0.70710677, %v2634_v50  ;;  %v2640_v11 = vadd.f32 %v2428_v20, %v586_v8  ;;  %v967_v51 = vmul.f32 %v903_v10, %v711_v7 }
 0x12a   :  { %v2029_v12 = vpop.eup %2028  ;;  %v1768_v14 = vpop.f32.mrf.mxu0  ;;  %v906_v1 = vadd.f32 1.0, %v2027_v6  ;;  %v719_v2 = vmul.f32 0.5, %v2630_v61 }
 0x12b   :  { %2042 = verf.f32 %v786_v28  ;;  %v785_v17 = vmul.f32 0.70710677, %v2640_v11  ;;  %v2644_v5 = vadd.f32 %v1768_v14, %v2428_v20  ;;  %1876 = vmatprep.mubr.f32.mxu1 %v967_v51  ;;  %v905_v4 = vadd.f32 1.0, %v2029_v12 }
 0x12c   :  { %v2031_v55 = vpop.eup %2030  ;;  %v596_v22 = vpop.f32.mrf.mxu0  ;;  %1877 = vmatmul.mubr.f32.gmra.mxu1 %v968_v16  ;;  %v970_v32 = vmul.f32 %v906_v1, %v714_v23  ;;  %v721_v16 = vmul.f32 0.5, %v2640_v11 }
 0x12d   :  { %2044 = verf.f32 %v785_v17  ;;  %v788_v25 = vmul.f32 0.70710677, %v2644_v5  ;;  %v2650_v26 = vadd.f32 %v2428_v20, %v596_v22  ;;  %v969_v29 = vmul.f32 %v905_v4, %v713_v21 }
 0x12e   :  { %v2033_v9 = vpop.eup %2032  ;;  %v1771_v27 = vpop.f32.mrf.mxu0  ;;  %v908_v13 = vadd.f32 1.0, %v2031_v55  ;;  %v722_v55 = vmul.f32 0.5, %v2634_v50  ;;  %v724_v50 = vmul.f32 0.5, %v2644_v5 }
 0x12f   :  { %2046 = verf.f32 %v788_v25  ;;  %v787_v31 = vmul.f32 0.70710677, %v2650_v26  ;;  %v2654_v15 = vadd.f32 %v1771_v27, %v2428_v20  ;;  %1879 = vmatprep.mubr.f32.mxu1 %v969_v29  ;;  %v907_v39 = vadd.f32 1.0, %v2033_v9 }
 0x130   :  { %v2035_v35 = vpop.eup %2034  ;;  %v606_v37 = vpop.f32.mrf.mxu0  ;;  %1880 = vmatmul.mubr.f32.gmra.mxu1 %v970_v32  ;;  %v972_v48 = vmul.f32 %v908_v13, %v716_v54 }
 0x131   :  { %2048 = verf.f32 %v787_v31  ;;  %v790_v59 = vmul.f32 0.70710677, %v2654_v15  ;;  %v2660_v41 = vadd.f32 %v2428_v20, %v606_v37  ;;  %v971_v62 = vmul.f32 %v907_v39, %v715_v36 }
 0x132   :  { %v2037_v42 = vpop.eup %2036  ;;  %v1774_v45 = vpop.f32.mrf.mxu0  ;;  %v910_v30 = vadd.f32 1.0, %v2035_v35  ;;  %v723_v31 = vmul.f32 0.5, %v2650_v26 }
 0x133   :  { %2050 = verf.f32 %v790_v59  ;;  %v789_v49 = vmul.f32 0.70710677, %v2660_v41  ;;  %v2664_v34 = vadd.f32 %v1774_v45, %v2428_v20  ;;  %1882 = vmatprep.mubr.f32.mxu1 %v971_v62  ;;  %v909_v33 = vadd.f32 1.0, %v2037_v42 }
 0x134   :  { %v2039_v19 = vpop.eup %2038  ;;  %v616_v53 = vpop.f32.mrf.mxu0  ;;  %1883 = vmatmul.mubr.f32.gmra.mxu1 %v972_v48  ;;  %v974_v0 = vmul.f32 %v910_v30, %v718_v40  ;;  %v725_v48 = vmul.f32 0.5, %v2660_v41  ;;  %v2078_v41 = vld [vmem:[%s3047_s2] ss:$0 sm:$0xff] }
 0x135   :  { %2052 = verf.f32 %v789_v49  ;;  %v792_v56 = vmul.f32 0.70710677, %v2664_v34  ;;  %v2670_v57 = vadd.f32 %v2428_v20, %v616_v53  ;;  %v973_v60 = vmul.f32 %v909_v33, %v717_v43 }
 0x136   :  { %v2041_v38 = vpop.eup %2040  ;;  %v1777_v58 = vpop.f32.mrf.mxu0  ;;  %v912_v44 = vadd.f32 1.0, %v2039_v19  ;;  %v726_v19 = vmul.f32 0.5, %v2654_v15  ;;  %v728_v15 = vmul.f32 0.5, %v2664_v34 }
 0x137   :  { %2054 = verf.f32 %v792_v56  ;;  %v791_v63 = vmul.f32 0.70710677, %v2670_v57  ;;  %v2674_v47 = vadd.f32 %v1777_v58, %v2428_v20  ;;  %1885 = vmatprep.mubr.f32.mxu1 %v973_v60  ;;  %v911_v6 = vadd.f32 1.0, %v2041_v38 }
 0x138   :  { %v2043_v52 = vpop.eup %2042  ;;  %v626_v3 = vpop.f32.mrf.mxu0  ;;  %1886 = vmatmul.mubr.f32.gmra.mxu1 %v974_v0  ;;  %v976_v12 = vmul.f32 %v912_v44, %v720_v18  ;;  %v727_v0 = vmul.f32 0.5, %v2670_v57 }
 0x139   :  { %2056 = verf.f32 %v791_v63  ;;  %v794_v24 = vmul.f32 0.70710677, %v2674_v47  ;;  %v2680_v7 = vadd.f32 %v2428_v20, %v626_v3  ;;  %v975_v28 = vmul.f32 %v911_v6, %v719_v2 }
 0x13a   :  { %v2045_v8 = vpop.eup %2044  ;;  %v1780_v10 = vpop.f32.mrf.mxu0  ;;  %v914_v61 = vadd.f32 1.0, %v2043_v52  ;;  %v730_v34 = vmul.f32 0.5, %v2674_v47 }
 0x13b   :  { %2058 = verf.f32 %v794_v24  ;;  %v793_v14 = vmul.f32 0.70710677, %v2680_v7  ;;  %v2684_v46 = vadd.f32 %v1780_v10, %v2428_v20  ;;  %1888 = vmatprep.mubr.f32.mxu1 %v975_v28  ;;  %v913_v1 = vadd.f32 1.0, %v2045_v8 }
 0x13c   :  { %v2047_v51 = vpop.eup %2046  ;;  %v636_v17 = vpop.f32.mrf.mxu0  ;;  %1889 = vmatmul.mubr.f32.gmra.mxu1 %v976_v12  ;;  %v978_v29 = vmul.f32 %v914_v61, %v722_v55  ;;  %v729_v6 = vmul.f32 0.5, %v2680_v7 }
 0x13d   :  { %2060 = verf.f32 %v793_v14  ;;  %v796_v21 = vmul.f32 0.70710677, %v2684_v46  ;;  %v2690_v22 = vadd.f32 %v2428_v20, %v636_v17  ;;  %v977_v25 = vmul.f32 %v913_v1, %v721_v16 }
 0x13e   :  { %v2049_v4 = vpop.eup %2048  ;;  %v1783_v23 = vpop.f32.mrf.mxu0  ;;  %v916_v9 = vadd.f32 1.0, %v2047_v51  ;;  %v732_v55 = vmul.f32 0.5, %v2684_v46 }
 0x13f   :  { %2062 = verf.f32 %v796_v21  ;;  %v795_v27 = vmul.f32 0.70710677, %v2690_v22  ;;  %v2694_v11 = vadd.f32 %v1783_v23, %v2428_v20  ;;  %1891 = vmatprep.mubr.f32.mxu1 %v977_v25  ;;  %v915_v35 = vadd.f32 1.0, %v2049_v4 }
 0x140   :  { %v2051_v13 = vpop.eup %2050  ;;  %v646_v32 = vpop.f32.mrf.mxu0  ;;  %1892 = vmatmul.mubr.f32.gmra.mxu1 %v978_v29  ;;  %v980_v42 = vmul.f32 %v916_v9, %v724_v50  ;;  %v731_v51 = vmul.f32 0.5, %v2690_v22 }
 0x141   :  { %2064 = verf.f32 %v795_v27  ;;  %v798_v54 = vmul.f32 0.70710677, %v2694_v11  ;;  %v2700_v36 = vadd.f32 %v2428_v20, %v646_v32  ;;  %v979_v59 = vmul.f32 %v915_v35, %v723_v31 }
 0x142   :  { %v2053_v37 = vpop.eup %2052  ;;  %v1786_v39 = vpop.f32.mrf.mxu0  ;;  %v918_v26 = vadd.f32 1.0, %v2051_v13  ;;  %v734_v29 = vmul.f32 0.5, %v2694_v11 }
 0x143   :  { %2066 = verf.f32 %v798_v54  ;;  %v797_v45 = vmul.f32 0.70710677, %v2700_v36  ;;  %v2704_v5 = vadd.f32 %v1786_v39, %v2428_v20  ;;  %1894 = vmatprep.mubr.f32.mxu1 %v979_v59  ;;  %v917_v30 = vadd.f32 1.0, %v2053_v37 }
 0x144   :  { %v2055_v62 = vpop.eup %2054  ;;  %v656_v49 = vpop.f32.mrf.mxu0  ;;  %1895 = vmatmul.mubr.f32.gmra.mxu1 %v980_v42  ;;  %v982_v44 = vmul.f32 %v918_v26, %v726_v19  ;;  %v733_v23 = vmul.f32 0.5, %v2700_v36 }
 0x145   :  { %2068 = verf.f32 %v797_v45  ;;  %v800_v43 = vmul.f32 0.70710677, %v2704_v5  ;;  %v657_v53 = vadd.f32 %v2428_v20, %v656_v49  ;;  %v981_v56 = vmul.f32 %v917_v30, %v725_v48  ;;  %v2722_v48 = vld [vmem:[#allocation2] ss:$0 sm:$0xff] }
 0x146   :  { %v2057_v33 = vpop.eup %2056  ;;  %v1789_v40 = vpop.f32.mrf.mxu0  ;;  %v920_v38 = vadd.f32 1.0, %v2055_v62  ;;  %v736_v54 = vmul.f32 0.5, %v2704_v5 }
 0x147   :  { %2070 = verf.f32 %v800_v43  ;;  %v799_v58 = vmul.f32 0.70710677, %v657_v53  ;;  %v672_v60 = vadd.f32 %v2078_v41, %v1789_v40  ;;  %1897 = vmatprep.mubr.f32.mxu1 %v981_v56  ;;  %v919_v52 = vadd.f32 1.0, %v2057_v33 }
 0x148   :  { %v2059_v63 = vpop.eup %2058  ;;  %v666_v20 = vpop.f32.mrf.mxu0  ;;  %1898 = vmatmul.mubr.f32.gmra.mxu1 %v982_v44  ;;  %v984_v8 = vmul.f32 %v920_v38, %v728_v15  ;;  %v735_v50 = vmul.f32 0.5, %v657_v53 }
 0x149   :  { %2072 = verf.f32 %v799_v58  ;;  %v802_v18 = vmul.f32 0.70710677, %v672_v60  ;;  %v667_v2 = vadd.f32 %v2078_v41, %v666_v20  ;;  %v983_v24 = vmul.f32 %v919_v52, %v727_v0 }
 0x14a   :  { %v2061_v3 = vpop.eup %2060  ;;  %v922_v12 = vadd.f32 1.0, %v2059_v63  ;;  %v738_v11 = vmul.f32 0.5, %v672_v60 }
 0x14b   :  { %2074 = verf.f32 %v802_v18  ;;  %v801_v10 = vmul.f32 0.70710677, %v667_v2  ;;  %v921_v28 = vadd.f32 1.0, %v2061_v3  ;;  %1900 = vmatprep.mubr.f32.mxu1 %v983_v24  ;;  %v737_v39 = vmul.f32 0.5, %v667_v2 }
 0x14c   :  { %v2063_v14 = vpop.eup %2062  ;;  %1901 = vmatmul.mubr.f32.gmra.mxu1 %v984_v8  ;;  %v986_v16 = vmul.f32 %v922_v12, %v730_v34 }
 0x14d   :  { %2076 = verf.f32 %v801_v10  ;;  %v985_v57 = vmul.f32 %v921_v28, %v729_v6  ;;  %v924_v7 = vadd.f32 1.0, %v2063_v14 }
 0x14e   :  { %v2065_v61 = vpop.eup %2064 }
 0x14f   :  { %1903 = vmatprep.mubr.f32.mxu1 %v985_v57  ;;  %v923_v17 = vadd.f32 1.0, %v2065_v61  ;;  %v988_v47 = vmul.f32 %v924_v7, %v732_v55 }
 0x150   :  { %v2067_v1 = vpop.eup %2066  ;;  %1904 = vmatmul.mubr.f32.gmra.mxu1 %v986_v16 }
 0x151   :  { %v987_v21 = vmul.f32 %v923_v17, %v731_v51  ;;  %v926_v9 = vadd.f32 1.0, %v2067_v1 }
 0x152   :  { %v2069_v4 = vpop.eup %2068 }
 0x153   :  { %1906 = vmatprep.mubr.f32.mxu1 %v987_v21  ;;  %v925_v25 = vadd.f32 1.0, %v2069_v4  ;;  %v990_v31 = vmul.f32 %v926_v9, %v734_v29 }
 0x154   :  { %v2071_v27 = vpop.eup %2070  ;;  %1907 = vmatmul.mubr.f32.gmra.mxu1 %v988_v47 }
 0x155   :  { %v989_v22 = vmul.f32 %v925_v25, %v733_v23  ;;  %v928_v46 = vadd.f32 1.0, %v2071_v27 }
 0x156   :  { %v2073_v13 = vpop.eup %2072 }
 0x157   :  { %1909 = vmatprep.mubr.f32.mxu1 %v989_v22  ;;  %v927_v32 = vadd.f32 1.0, %v2073_v13  ;;  %v992_v59 = vmul.f32 %v928_v46, %v736_v54 }
 0x158   :  { %v2075_v35 = vpop.eup %2074  ;;  %1910 = vmatmul.mubr.f32.gmra.mxu1 %v990_v31 }
 0x159   :  { %v991_v36 = vmul.f32 %v927_v32, %v735_v50  ;;  %v930_v45 = vadd.f32 1.0, %v2075_v35 }
 0x15a   :  { %v2077_v37 = vpop.eup %2076 }
 0x15b   :  { %1912 = vmatprep.mubr.f32.mxu1 %v991_v36  ;;  %v929_v42 = vadd.f32 1.0, %v2077_v37  ;;  %v994_v62 = vmul.f32 %v930_v45, %v738_v11 }
 0x15c   :  { %1913 = vmatmul.mubr.f32.gmra.mxu1 %v992_v59 }
 0x15d   :  { %v993_v26 = vmul.f32 %v929_v42, %v737_v39 }
 0x15f   :  { %1915 = vmatprep.mubr.f32.mxu1 %v993_v26 }
 0x160   :  { %1916 = vmatmul.mubr.f32.gmra.mxu1 %v994_v62 }
 0x1a4   :  { %v1824_v49 = vpop.f32.mrf.mxu0 }
 0x1a5   :  { %v1090_v5 = vadd.f32 %v1824_v49, %v2722_v48 }
 0x1a6   :  { %v1084_v30 = vpop.f32.mrf.mxu0 }
 0x1a7   :  { %1405 = vst.msk [vmem:[%s3049_s5 + $0x8] sm:$0xff] %vm1403_vm1, %v1090_v5  ;;  %v1085_v19 = vadd.f32 %v2722_v48, %v1084_v30 }
 0x1a8   :  { %v1827_v43 = vpop.f32.mrf.mxu0 }
 0x1a9   :  { %1404 = vst.msk [vmem:[%s3049_s5] sm:$0xff] %vm1403_vm1, %v1085_v19  ;;  %v1100_v53 = vadd.f32 %v1827_v43, %v2722_v48 }
 0x1aa   :  { %v1094_v33 = vpop.f32.mrf.mxu0 }
 0x1ab   :  { %1407 = vst.msk [vmem:[%s3049_s5 + $0x18] sm:$0xff] %vm1403_vm1, %v1100_v53  ;;  %v1095_v40 = vadd.f32 %v2722_v48, %v1094_v33 }
 0x1ac   :  { %v1830_v56 = vpop.f32.mrf.mxu0 }
 0x1ad   :  { %1406 = vst.msk [vmem:[%s3049_s5 + $0x10] sm:$0xff] %vm1403_vm1, %v1095_v40  ;;  %v1110_v38 = vadd.f32 %v1830_v56, %v2722_v48 }
 0x1ae   :  { %v1104_v58 = vpop.f32.mrf.mxu0 }
 0x1af   :  { %1409 = vst.msk [vmem:[%s3049_s5 + $0x28] sm:$0xff] %vm1403_vm1, %v1110_v38  ;;  %v1105_v41 = vadd.f32 %v2722_v48, %v1104_v58 }
 0x1b0   :  { %v1833_v60 = vpop.f32.mrf.mxu1 }
 0x1b1   :  { %1408 = vst.msk [vmem:[%s3049_s5 + $0x20] sm:$0xff] %vm1403_vm1, %v1105_v41  ;;  %v1120_v44 = vadd.f32 %v1833_v60, %v2722_v48 }
 0x1b2   :  { %v1114_v63 = vpop.f32.mrf.mxu1 }
 0x1b3   :  { %1411 = vst.msk [vmem:[%s3049_s5 + $0x38] sm:$0xff] %vm1403_vm1, %v1120_v44  ;;  %v1115_v15 = vadd.f32 %v2722_v48, %v1114_v63 }
 0x1b4   :  { %v1836_v0 = vpop.f32.mrf.mxu1 }
 0x1b5   :  { %1410 = vst.msk [vmem:[%s3049_s5 + $0x30] sm:$0xff] %vm1403_vm1, %v1115_v15  ;;  %v1130_v20 = vadd.f32 %v1836_v0, %v2722_v48 }
 0x1b6   :  { %v1124_v52 = vpop.f32.mrf.mxu1 }
 0x1b7   :  { %1413 = vst.msk [vmem:[%s3049_s5 + $0x48] sm:$0xff] %vm1403_vm1, %v1130_v20  ;;  %v1125_v18 = vadd.f32 %v2722_v48, %v1124_v52 }
 0x1b8   :  { %v1839_v2 = vpop.f32.mrf.mxu1 }
 0x1b9   :  { %1412 = vst.msk [vmem:[%s3049_s5 + $0x40] sm:$0xff] %vm1403_vm1, %v1125_v18  ;;  %v1140_v3 = vadd.f32 %v1839_v2, %v2722_v48 }
 0x1ba   :  { %v1134_v6 = vpop.f32.mrf.mxu1 }
 0x1bb   :  { %1415 = vst.msk [vmem:[%s3049_s5 + $0x58] sm:$0xff] %vm1403_vm1, %v1140_v3  ;;  %v1135_v24 = vadd.f32 %v2722_v48, %v1134_v6 }
 0x1bc   :  { %v1842_v8 = vpop.f32.mrf.mxu1 }
 0x1bd   :  { %1414 = vst.msk [vmem:[%s3049_s5 + $0x50] sm:$0xff] %vm1403_vm1, %v1135_v24  ;;  %v1150_v10 = vadd.f32 %v1842_v8, %v2722_v48 }
 0x1be   :  { %v1144_v28 = vpop.f32.mrf.mxu1 }
 0x1bf   :  { %1417 = vst.msk [vmem:[%s3049_s5 + $0x68] sm:$0xff] %vm1403_vm1, %v1150_v10  ;;  %v1145_v12 = vadd.f32 %v2722_v48, %v1144_v28 }
 0x1c0   :  { %v1845_v14 = vpop.f32.mrf.mxu1 }
 0x1c1   :  { %1416 = vst.msk [vmem:[%s3049_s5 + $0x60] sm:$0xff] %vm1403_vm1, %v1145_v12  ;;  %v1160_v34 = vadd.f32 %v1845_v14, %v2722_v48 }
 0x1c2   :  { %v1154_v57 = vpop.f32.mrf.mxu1 }
 0x1c3   :  { %1419 = vst.msk [vmem:[%s3049_s5 + $0x78] sm:$0xff] %vm1403_vm1, %v1160_v34  ;;  %v1155_v61 = vadd.f32 %v2722_v48, %v1154_v57 }
 0x1c4   :  { %v1848_v51 = vpop.f32.mrf.mxu1 }
 0x1c5   :  { %1418 = vst.msk [vmem:[%s3049_s5 + $0x70] sm:$0xff] %vm1403_vm1, %v1155_v61  ;;  %v1170_v16 = vadd.f32 %v1848_v51, %v2722_v48 }
 0x1c6   :  { %v1164_v17 = vpop.f32.mrf.mxu1 }
 0x1c7   :  { %1421 = vst.msk [vmem:[%s3049_s5 + $0x88] sm:$0xff] %vm1403_vm1, %v1170_v16  ;;  %v1165_v7 = vadd.f32 %v2722_v48, %v1164_v17 }
 0x1c8   :  { %v1851_v1 = vpop.f32.mrf.mxu1 }
 0x1c9   :  { %1420 = vst.msk [vmem:[%s3049_s5 + $0x80] sm:$0xff] %vm1403_vm1, %v1165_v7  ;;  %v1180_v55 = vadd.f32 %v1851_v1, %v2722_v48 }
 0x1ca   :  { %v1174_v21 = vpop.f32.mrf.mxu1 }
 0x1cb   :  { %1423 = vst.msk [vmem:[%s3049_s5 + $0x98] sm:$0xff] %vm1403_vm1, %v1180_v55  ;;  %v1175_v4 = vadd.f32 %v2722_v48, %v1174_v21 }
 0x1cc   :  { %v1854_v23 = vpop.f32.mrf.mxu1 }
 0x1cd   :  { %1422 = vst.msk [vmem:[%s3049_s5 + $0x90] sm:$0xff] %vm1403_vm1, %v1175_v4  ;;  %v1190_v47 = vadd.f32 %v1854_v23, %v2722_v48 }
 0x1ce   :  { %v1184_v25 = vpop.f32.mrf.mxu1 }
 0x1cf   :  { %1425 = vst.msk [vmem:[%s3049_s5 + $0xa8] sm:$0xff] %vm1403_vm1, %v1190_v47  ;;  %v1185_v9 = vadd.f32 %v2722_v48, %v1184_v25 }
 0x1d0   :  { %v1857_v27 = vpop.f32.mrf.mxu1 }
 0x1d1   :  { %1424 = vst.msk [vmem:[%s3049_s5 + $0xa0] sm:$0xff] %vm1403_vm1, %v1185_v9  ;;  %v1200_v29 = vadd.f32 %v1857_v27, %v2722_v48 }
 0x1d2   :  { %v1194_v22 = vpop.f32.mrf.mxu1 }
 0x1d3   :  { %1427 = vst.msk [vmem:[%s3049_s5 + $0xb8] sm:$0xff] %vm1403_vm1, %v1200_v29  ;;  %v1195_v13 = vadd.f32 %v2722_v48, %v1194_v22 }
 0x1d4   :  { %v1860_v50 = vpop.f32.mrf.mxu1 }
 0x1d5   :  { %1426 = vst.msk [vmem:[%s3049_s5 + $0xb0] sm:$0xff] %vm1403_vm1, %v1195_v13  ;;  %v1210_v31 = vadd.f32 %v1860_v50, %v2722_v48 }
 0x1d6   :  { %v1204_v32 = vpop.f32.mrf.mxu1 }
 0x1d7   :  { %1429 = vst.msk [vmem:[%s3049_s5 + $0xc8] sm:$0xff] %vm1403_vm1, %v1210_v31  ;;  %v1205_v46 = vadd.f32 %v2722_v48, %v1204_v32 }
 0x1d8   :  { %v1863_v35 = vpop.f32.mrf.mxu1 }
 0x1d9   :  { %1428 = vst.msk [vmem:[%s3049_s5 + $0xc0] sm:$0xff] %vm1403_vm1, %v1205_v46  ;;  %v1220_v54 = vadd.f32 %v1863_v35, %v2722_v48 }
 0x1da   :  { %v1214_v36 = vpop.f32.mrf.mxu1 }
 0x1db   :  { %1431 = vst.msk [vmem:[%s3049_s5 + $0xd8] sm:$0xff] %vm1403_vm1, %v1220_v54  ;;  %v1215_v37 = vadd.f32 %v2722_v48, %v1214_v36 }
 0x1dc   :  { %v1866_v39 = vpop.f32.mrf.mxu1 }
 0x1dd   :  { %1430 = vst.msk [vmem:[%s3049_s5 + $0xd0] sm:$0xff] %vm1403_vm1, %v1215_v37  ;;  %v1230_v59 = vadd.f32 %v1866_v39, %v2722_v48 }
 0x1de   :  { %v1224_v42 = vpop.f32.mrf.mxu1 }
 0x1df   :  { %1433 = vst.msk [vmem:[%s3049_s5 + $0xe8] sm:$0xff] %vm1403_vm1, %v1230_v59  ;;  %v1225_v45 = vadd.f32 %v2722_v48, %v1224_v42 }
 0x1e0   :  { %v1869_v11 = vpop.f32.mrf.mxu1 }
 0x1e1   :  { %1432 = vst.msk [vmem:[%s3049_s5 + $0xe0] sm:$0xff] %vm1403_vm1, %v1225_v45  ;;  %v1240_v26 = vadd.f32 %v1869_v11, %v2722_v48 }
 0x1e2   :  { %v1234_v62 = vpop.f32.mrf.mxu1 }
 0x1e3   :  { %1435 = vst.msk [vmem:[%s3049_s5 + $0xf8] sm:$0xff] %vm1403_vm1, %v1240_v26  ;;  %v1235_v49 = vadd.f32 %v2722_v48, %v1234_v62 }
 0x1e4   :  { %v1872_v5 = vpop.f32.mrf.mxu1 }
 0x1e5   :  { %1434 = vst.msk [vmem:[%s3049_s5 + $0xf0] sm:$0xff] %vm1403_vm1, %v1235_v49  ;;  %v1250_v30 = vadd.f32 %v1872_v5, %v2722_v48 }
 0x1e6   :  { %v1244_v19 = vpop.f32.mrf.mxu1 }
 0x1e7   :  { %1437 = vst.msk [vmem:[%s3049_s5 + $0x108] sm:$0xff] %vm1403_vm1, %v1250_v30  ;;  %v1245_v43 = vadd.f32 %v2722_v48, %v1244_v19 }
 0x1e8   :  { %v1875_v53 = vpop.f32.mrf.mxu1 }
 0x1e9   :  { %1436 = vst.msk [vmem:[%s3049_s5 + $0x100] sm:$0xff] %vm1403_vm1, %v1245_v43  ;;  %v1260_v33 = vadd.f32 %v1875_v53, %v2722_v48 }
 0x1ea   :  { %v1254_v40 = vpop.f32.mrf.mxu1 }
 0x1eb   :  { %1439 = vst.msk [vmem:[%s3049_s5 + $0x118] sm:$0xff] %vm1403_vm1, %v1260_v33  ;;  %v1255_v56 = vadd.f32 %v2722_v48, %v1254_v40 }
 0x1ec   :  { %v1878_v38 = vpop.f32.mrf.mxu1 }
 0x1ed   :  { %1438 = vst.msk [vmem:[%s3049_s5 + $0x110] sm:$0xff] %vm1403_vm1, %v1255_v56  ;;  %v1270_v58 = vadd.f32 %v1878_v38, %v2722_v48 }
 0x1ee   :  { %v1264_v41 = vpop.f32.mrf.mxu1 }
 0x1ef   :  { %1441 = vst.msk [vmem:[%s3049_s5 + $0x128] sm:$0xff] %vm1403_vm1, %v1270_v58  ;;  %v1265_v60 = vadd.f32 %v2722_v48, %v1264_v41 }
 0x1f0   :  { %v1881_v44 = vpop.f32.mrf.mxu1 }
 0x1f1   :  { %1440 = vst.msk [vmem:[%s3049_s5 + $0x120] sm:$0xff] %vm1403_vm1, %v1265_v60  ;;  %v1280_v63 = vadd.f32 %v1881_v44, %v2722_v48 }
 0x1f2   :  { %v1274_v15 = vpop.f32.mrf.mxu1 }
 0x1f3   :  { %1443 = vst.msk [vmem:[%s3049_s5 + $0x138] sm:$0xff] %vm1403_vm1, %v1280_v63  ;;  %v1275_v0 = vadd.f32 %v2722_v48, %v1274_v15 }
 0x1f4   :  { %v1884_v20 = vpop.f32.mrf.mxu1 }
 0x1f5   :  { %1442 = vst.msk [vmem:[%s3049_s5 + $0x130] sm:$0xff] %vm1403_vm1, %v1275_v0  ;;  %v1290_v52 = vadd.f32 %v1884_v20, %v2722_v48 }
 0x1f6   :  { %v1284_v18 = vpop.f32.mrf.mxu1 }
 0x1f7   :  { %1445 = vst.msk [vmem:[%s3049_s5 + $0x148] sm:$0xff] %vm1403_vm1, %v1290_v52  ;;  %v1285_v2 = vadd.f32 %v2722_v48, %v1284_v18 }
 0x1f8   :  { %v1887_v3 = vpop.f32.mrf.mxu1 }
 0x1f9   :  { %1444 = vst.msk [vmem:[%s3049_s5 + $0x140] sm:$0xff] %vm1403_vm1, %v1285_v2  ;;  %v1300_v6 = vadd.f32 %v1887_v3, %v2722_v48 }
 0x1fa   :  { %v1294_v24 = vpop.f32.mrf.mxu1 }
 0x1fb   :  { %1447 = vst.msk [vmem:[%s3049_s5 + $0x158] sm:$0xff] %vm1403_vm1, %v1300_v6  ;;  %v1295_v8 = vadd.f32 %v2722_v48, %v1294_v24 }
 0x1fc   :  { %v1890_v10 = vpop.f32.mrf.mxu1 }
 0x1fd   :  { %1446 = vst.msk [vmem:[%s3049_s5 + $0x150] sm:$0xff] %vm1403_vm1, %v1295_v8  ;;  %v1310_v28 = vadd.f32 %v1890_v10, %v2722_v48 }
 0x1fe   :  { %v1304_v12 = vpop.f32.mrf.mxu1 }
 0x1ff   :  { %1449 = vst.msk [vmem:[%s3049_s5 + $0x168] sm:$0xff] %vm1403_vm1, %v1310_v28  ;;  %v1305_v14 = vadd.f32 %v2722_v48, %v1304_v12 }
 0x200   :  { %v1893_v34 = vpop.f32.mrf.mxu1 }
 0x201   :  { %1448 = vst.msk [vmem:[%s3049_s5 + $0x160] sm:$0xff] %vm1403_vm1, %v1305_v14  ;;  %v1320_v57 = vadd.f32 %v1893_v34, %v2722_v48 }
 0x202   :  { %v1314_v61 = vpop.f32.mrf.mxu1 }
 0x203   :  { %1451 = vst.msk [vmem:[%s3049_s5 + $0x178] sm:$0xff] %vm1403_vm1, %v1320_v57  ;;  %v1315_v51 = vadd.f32 %v2722_v48, %v1314_v61 }
 0x204   :  { %v1896_v16 = vpop.f32.mrf.mxu1 }
 0x205   :  { %1450 = vst.msk [vmem:[%s3049_s5 + $0x170] sm:$0xff] %vm1403_vm1, %v1315_v51  ;;  %v1330_v17 = vadd.f32 %v1896_v16, %v2722_v48 }
 0x206   :  { %v1324_v7 = vpop.f32.mrf.mxu1 }
 0x207   :  { %1453 = vst.msk [vmem:[%s3049_s5 + $0x188] sm:$0xff] %vm1403_vm1, %v1330_v17  ;;  %v1325_v1 = vadd.f32 %v2722_v48, %v1324_v7 }
 0x208   :  { %v1899_v55 = vpop.f32.mrf.mxu1 }
 0x209   :  { %1452 = vst.msk [vmem:[%s3049_s5 + $0x180] sm:$0xff] %vm1403_vm1, %v1325_v1  ;;  %v1340_v21 = vadd.f32 %v1899_v55, %v2722_v48 }
 0x20a   :  { %v1334_v4 = vpop.f32.mrf.mxu1 }
 0x20b   :  { %1455 = vst.msk [vmem:[%s3049_s5 + $0x198] sm:$0xff] %vm1403_vm1, %v1340_v21  ;;  %v1335_v23 = vadd.f32 %v2722_v48, %v1334_v4 }
 0x20c   :  { %v1902_v47 = vpop.f32.mrf.mxu1 }
 0x20d   :  { %1454 = vst.msk [vmem:[%s3049_s5 + $0x190] sm:$0xff] %vm1403_vm1, %v1335_v23  ;;  %v1350_v25 = vadd.f32 %v1902_v47, %v2722_v48 }
 0x20e   :  { %v1344_v9 = vpop.f32.mrf.mxu1 }
 0x20f   :  { %1457 = vst.msk [vmem:[%s3049_s5 + $0x1a8] sm:$0xff] %vm1403_vm1, %v1350_v25  ;;  %v1345_v27 = vadd.f32 %v2722_v48, %v1344_v9 }
 0x210   :  { %v1905_v29 = vpop.f32.mrf.mxu1 }
 0x211   :  { %1456 = vst.msk [vmem:[%s3049_s5 + $0x1a0] sm:$0xff] %vm1403_vm1, %v1345_v27  ;;  %v1360_v22 = vadd.f32 %v1905_v29, %v2722_v48 }
 0x212   :  { %v1354_v13 = vpop.f32.mrf.mxu1 }
 0x213   :  { %1459 = vst.msk [vmem:[%s3049_s5 + $0x1b8] sm:$0xff] %vm1403_vm1, %v1360_v22  ;;  %v1355_v50 = vadd.f32 %v2722_v48, %v1354_v13 }
 0x214   :  { %v1908_v31 = vpop.f32.mrf.mxu1 }
 0x215   :  { %1458 = vst.msk [vmem:[%s3049_s5 + $0x1b0] sm:$0xff] %vm1403_vm1, %v1355_v50  ;;  %v1370_v32 = vadd.f32 %v1908_v31, %v2722_v48 }
 0x216   :  { %v1364_v46 = vpop.f32.mrf.mxu1 }
 0x217   :  { %1461 = vst.msk [vmem:[%s3049_s5 + $0x1c8] sm:$0xff] %vm1403_vm1, %v1370_v32  ;;  %v1365_v35 = vadd.f32 %v2722_v48, %v1364_v46 }
 0x218   :  { %v1911_v54 = vpop.f32.mrf.mxu1 }
 0x219   :  { %1460 = vst.msk [vmem:[%s3049_s5 + $0x1c0] sm:$0xff] %vm1403_vm1, %v1365_v35  ;;  %v1380_v36 = vadd.f32 %v1911_v54, %v2722_v48 }
 0x21a   :  { %v1374_v37 = vpop.f32.mrf.mxu1 }
 0x21b   :  { %1463 = vst.msk [vmem:[%s3049_s5 + $0x1d8] sm:$0xff] %vm1403_vm1, %v1380_v36  ;;  %v1375_v39 = vadd.f32 %v2722_v48, %v1374_v37 }
 0x21c   :  { %v1914_v59 = vpop.f32.mrf.mxu1 }
 0x21d   :  { %1462 = vst.msk [vmem:[%s3049_s5 + $0x1d0] sm:$0xff] %vm1403_vm1, %v1375_v39  ;;  %v1390_v42 = vadd.f32 %v1914_v59, %v2722_v48 }
 0x21e   :  { %v1384_v45 = vpop.f32.mrf.mxu1 }
 0x21f   :  { %1465 = vst.msk [vmem:[%s3049_s5 + $0x1e8] sm:$0xff] %vm1403_vm1, %v1390_v42  ;;  %v1385_v11 = vadd.f32 %v2722_v48, %v1384_v45 }
 0x220   :  { %v1917_v26 = vpop.f32.mrf.mxu1 }
 0x221   :  { %1464 = vst.msk [vmem:[%s3049_s5 + $0x1e0] sm:$0xff] %vm1403_vm1, %v1385_v11  ;;  %v1400_v62 = vadd.f32 %v1917_v26, %v2722_v48 }
 0x222   :  { %v1394_v49 = vpop.f32.mrf.mxu1 }
 0x223   :  { %1467 = vst.msk [vmem:[%s3049_s5 + $0x1f8] sm:$0xff] %vm1403_vm1, %v1400_v62  ;;  %v1395_v5 = vadd.f32 %v2722_v48, %v1394_v49 }
 0x225   :  { %1466 = vst.msk [vmem:[%s3049_s5 + $0x1f0] sm:$0xff] %vm1403_vm1, %v1395_v5 }

</bundles_post_ra>
